<compile_context>
chip_gen: v5e
topology: v5e:2x2
jax: 0.10.0
libtpu: 0.0.40
codegen_flags: <defaults>
</compile_context>

<pallas_src>
import math
import numpy as np
import jax
import jax.numpy as jnp
from jax import lax
from jax.experimental import pallas as pl
from jax.experimental.pallas import tpu as pltpu

# -----------------------------------------------------------------------------
# Hyper-parameters: Generator(sequence_length=16, num_tokens=50, num_inputs=80,
#                             num_layers=2, batch_size=8)
# Length math: 80 -(k=5)-> 76 -pool(2)-> 38 -(k=1)-> 38 -pool(1)-> 38 -(k=3)-> 36
# which matches Linear(36, 128).
# -----------------------------------------------------------------------------
SEQ_LEN    = 16
NUM_TOKENS = 50
NUM_INPUTS = 80
NUM_LAYERS = 2
BATCH      = 8                      # == Conv1d channel count in the module

EMB_DIM = NUM_INPUTS - 3            # 77
K1  = SEQ_LEN // 4 + 1              # 5
KP1 = SEQ_LEN // 16 + 1             # 2
K2  = 1
KP2 = SEQ_LEN // 32 + 1             # 1  -> AvgPool1d(kernel=1) == identity
K3  = 3
C1  = BATCH // 2                    # 4
C2  = BATCH // 4                    # 2
C3  = BATCH                         # 8
L1  = NUM_INPUTS - K1 + 1           # 76
L2  = (L1 - KP1) // KP1 + 1         # 38
L3  = L2                            # conv2 kernel_size = 1
L4  = (L3 - KP2) // KP2 + 1         # 38
L5  = L4 - K3 + 1                   # 36
LIN_IN, LIN_OUT = 36, 128
BN_EPS = 1e-5
ROWS = BATCH * SEQ_LEN              # 128 channel-major rows (r = b*S + s)

assert L5 == LIN_IN, "shape configuration must feed Linear(36, 128)"
assert KP2 == 1 and L4 == L3, "pooling2 must be the identity for this config"


# -----------------------------------------------------------------------------
# Fused kernel
# -----------------------------------------------------------------------------
def generator_kernel(tok_ref, emb_ref, pos_ref, gamma_ref, beta_ref,
                     w1_ref, b1_ref, p1_ref,
                     w2_ref, b2_ref,
                     w3_ref, b3_ref,
                     wl_ref, bl_ref,
                     o_ref):
    f32 = jnp.float32
    bf16 = jnp.bfloat16

    # ---- fused embedding gather (one-hot matmul) + positional add ----------
    # emb_ref is the (50, 80) table with sqrt(num_inputs) pre-folded and the
    # last 3 feature columns zero; pos_ref is (S, 80) zero-padded positional.
    tok = tok_ref[...]                                           # (ROWS, 1) i32
    vocab_iota = lax.broadcasted_iota(jnp.int32, (ROWS, NUM_TOKENS), 1)
    onehot = jnp.where(vocab_iota == tok, 1.0, 0.0).astype(bf16)  # exact in bf16
    emb = jnp.dot(onehot, emb_ref[...].astype(bf16),
                  preferred_element_type=f32)                    # (ROWS, 80)
    x = emb.reshape(BATCH, SEQ_LEN, NUM_INPUTS) + pos_ref[...][None]  # (B,S,I)

    # ---- NUM_LAYERS x BatchNorm1d(SEQ_LEN), training-mode batch stats -------
    # channel axis = S (dim 1); stats over (batch=B, feature=I) = dims (0, 2).
    inv_n = 1.0 / float(BATCH * NUM_INPUTS)
    for l in range(NUM_LAYERS):
        m = jnp.sum(jnp.sum(x, axis=2, keepdims=True),
                    axis=0, keepdims=True) * inv_n               # (1, S, 1)
        d = x - m
        v = jnp.sum(jnp.sum(d * d, axis=2, keepdims=True),
                    axis=0, keepdims=True) * inv_n
        x = d * lax.rsqrt(v + BN_EPS)
        x = x * gamma_ref[l][None] + beta_ref[l][None]           # (1, S, 1) bcast

    # channel-major 2-D activations: row r = b*SEQ_LEN + s  (free re-tiling)
    h = x.reshape(ROWS, NUM_INPUTS)                              # (128, 80)

    # ---- Conv1d on the VPU: unrolled scalar-weight FMAs over (S, L) slabs ---
    # Weights/biases live in SMEM; each tap is a scalar * (16, L_out) FMA,
    # so no MXU pushes with K<=8 contractions are issued.
    def conv_vpu(h2d, w_sref, b_sref, c_in, c_out, k, l_out):
        accs = [jnp.zeros((SEQ_LEN, l_out), f32) + b_sref[o] for o in range(c_out)]
        for c in range(c_in):
            src = h2d[c * SEQ_LEN:(c + 1) * SEQ_LEN, :]          # sublane-aligned
            for t in range(k):
                sl = src[:, t:t + l_out]                         # hoisted slice
                for o in range(c_out):
                    accs[o] = accs[o] + w_sref[(o * c_in + c) * k + t] * sl
        return jnp.concatenate(accs, axis=0)                     # (c_out*S, l_out)

    h = conv_vpu(h, w1_ref, b1_ref, BATCH, C1, K1, L1)           # (64, 76)

    # ---- AvgPool1d(2) as ONE dense 2-D matmul (64,76) x (76,38) -------------
    h = jnp.dot(h.astype(bf16), p1_ref[...].astype(bf16),
                preferred_element_type=f32)                      # (64, 38)

    h = conv_vpu(h, w2_ref, b2_ref, C1, C2, K2, L3)              # (32, 38)
    # pooling2: AvgPool1d(kernel_size=1) is the identity -> skipped.
    h = conv_vpu(h, w3_ref, b3_ref, C2, C3, K3, L5)              # (128, 36)

    # ---- Linear(36, 128) as ONE (128,36) x (36,128) matmul -------------------
    logits = jnp.dot(h.astype(bf16), wl_ref[...].astype(bf16),
                     preferred_element_type=f32) + bl_ref[...]   # (128, 128)

    # ---- per-row argmax over the last dim (first maximum wins) --------------
    mx = jnp.max(logits, axis=-1, keepdims=True)
    pos_i = lax.broadcasted_iota(jnp.int32, logits.shape, 1)
    am = jnp.min(jnp.where(logits >= mx, pos_i, LIN_OUT),
                 axis=-1, keepdims=True)                         # (ROWS, 1) i32
    o_ref[...] = am.astype(o_ref.dtype)                          # (ROWS, 1) f32


# -----------------------------------------------------------------------------
# Parameters (PyTorch-style initialization)
# -----------------------------------------------------------------------------
def init_params(key):
    ks = jax.random.split(key, 10)

    def u(k, shape, fan_in):
        bound = 1.0 / math.sqrt(fan_in)
        return jax.random.uniform(k, shape, jnp.float32, -bound, bound)

    def pool_matrix(l_in, kernel):
        l_out = (l_in - kernel) // kernel + 1
        p = np.zeros((l_in, l_out), np.float32)
        for j in range(l_out):
            p[j * kernel:(j + 1) * kernel, j] = 1.0 / kernel
        return jnp.asarray(p)

    emb_tbl  = jax.random.normal(ks[0], (NUM_TOKENS, EMB_DIM), jnp.float32)
    pos_base = jax.random.normal(ks[1], (SEQ_LEN, 3), jnp.float32)

    # Conv1d weights in PyTorch layout (C_out, C_in, K); flattened copies for SMEM.
    w1 = u(ks[2], (C1, BATCH, K1), BATCH * K1)
    b1 = u(ks[3], (C1,),           BATCH * K1)
    w2 = u(ks[4], (C2, C1, K2),    C1 * K2)
    b2 = u(ks[5], (C2,),           C1 * K2)
    w3 = u(ks[6], (C3, C2, K3),    C2 * K3)
    b3 = u(ks[7], (C3,),           C2 * K3)
    wl = u(ks[8], (LIN_IN, LIN_OUT), LIN_IN)     # Linear weight, pre-transposed
    bl = u(ks[9], (1, LIN_OUT),      LIN_IN)

    # sqrt(num_inputs) folded into the embedding; pad both tables to 80 lanes
    # so "concat" becomes a plain add inside the kernel.
    emb_pad = jnp.concatenate(
        [emb_tbl * math.sqrt(NUM_INPUTS),
         jnp.zeros((NUM_TOKENS, NUM_INPUTS - EMB_DIM), jnp.float32)], axis=1)
    pos_pad = jnp.concatenate(
        [jnp.zeros((SEQ_LEN, EMB_DIM), jnp.float32), pos_base], axis=1)

    return dict(
        # kernel operands
        emb_pad=emb_pad, pos_pad=pos_pad,
        gamma=jnp.ones((NUM_LAYERS, SEQ_LEN, 1), jnp.float32),   # BN defaults
        beta=jnp.zeros((NUM_LAYERS, SEQ_LEN, 1), jnp.float32),
        w1=w1.reshape(-1), b1=b1, p1=pool_matrix(L1, KP1),
        w2=w2.reshape(-1), b2=b2,
        w3=w3.reshape(-1), b3=b3,
        wl=wl, bl=bl,
        # full-precision copies used only by the pure-JAX reference check
        emb_tbl=emb_tbl, pos_base=pos_base,
        w1_3d=w1, w2_3d=w2, w3_3d=w3,
    )


# -----------------------------------------------------------------------------
# Forward wrapper: one pallas_call + two 512 B layout ops (token / output
# transpose), instead of the previous gather/scale/concat XLA launches.
# -----------------------------------------------------------------------------
@jax.jit
def generator_forward(tokens, params):
    # tokens: (SEQ_LEN, BATCH) int32, same interface as the PyTorch forward.
    tok_col = tokens.T.reshape(ROWS, 1).astype(jnp.int32)        # rows r = b*S+s

    vmem = pl.BlockSpec(memory_space=pltpu.MemorySpace.VMEM)
    smem = pl.BlockSpec(memory_space=pltpu.MemorySpace.SMEM)

    out = pl.pallas_call(
        generator_kernel,
        out_shape=jax.ShapeDtypeStruct((ROWS, 1), jnp.float32),
        in_specs=[vmem, vmem, vmem, vmem, vmem,    # tok, emb_pad, pos_pad, gamma, beta
                  smem, smem, vmem,                # w1, b1, p1
                  smem, smem,                      # w2, b2
                  smem, smem,                      # w3, b3
                  vmem, vmem],                     # wl, bl
        out_specs=vmem,
    )(tok_col, params['emb_pad'], params['pos_pad'],
      params['gamma'], params['beta'],
      params['w1'], params['b1'], params['p1'],
      params['w2'], params['b2'],
      params['w3'], params['b3'],
      params['wl'], params['bl'])
    return out.reshape(BATCH, SEQ_LEN).T                         # (S, B) f32 idx


# -----------------------------------------------------------------------------
# Pure-JAX float32/HIGHEST reference of getProbabilities() for self-checking.
# -----------------------------------------------------------------------------
def reference_logits(tokens, params):
    emb = params['emb_tbl'][tokens] * math.sqrt(NUM_INPUTS)      # (S, B, 77)
    pos = jnp.broadcast_to(params['pos_base'][:, None, :], (SEQ_LEN, BATCH, 3))
    x = jnp.concatenate([emb, pos], axis=2)                      # (S, B, 80)
    for l in range(NUM_LAYERS):
        m = x.mean(axis=(1, 2), keepdims=True)
        v = ((x - m) ** 2).mean(axis=(1, 2), keepdims=True)
        x = (x - m) / jnp.sqrt(v + BN_EPS)
        x = x * params['gamma'][l][:, :, None] + params['beta'][l][:, :, None]

    def conv(h, w, b, k):
        l_out = h.shape[2] - k + 1
        acc = b[None, :, None]
        for t in range(k):
            acc = acc + jnp.einsum('oc,ncl->nol', w[:, :, t], h[:, :, t:t + l_out],
                                   precision=lax.Precision.HIGHEST)
        return acc

    h = conv(x, params['w1_3d'], params['b1'], K1)               # (S, C1, 76)
    h = jnp.einsum('ncl,lj->ncj', h, params['p1'],
                   precision=lax.Precision.HIGHEST)              # (S, C1, 38)
    h = conv(h, params['w2_3d'], params['b2'], K2)               # (S, C2, 38)
    h = conv(h, params['w3_3d'], params['b3'], K3)               # pool2 == id
    logits = jnp.einsum('ncl,lf->ncf', h, params['wl'],
                        precision=lax.Precision.HIGHEST) + params['bl'][None]
    return logits                                                # (S, C3, 128)


if __name__ == "__main__":
    key = jax.random.PRNGKey(0)
    pkey, tkey = jax.random.split(key)
    params = init_params(pkey)
    tokens = jax.random.randint(tkey, (SEQ_LEN, BATCH), 0, NUM_TOKENS,
                                dtype=jnp.int32)

    notes = generator_forward(tokens, params)                    # (S, B) f32
    notes = jax.block_until_ready(notes)
    assert notes.shape == (SEQ_LEN, BATCH) and notes.dtype == jnp.float32

    notes_np = np.asarray(notes)
    idx = notes_np.astype(np.int32)
    assert np.all((idx >= 0) & (idx < LIN_OUT))
    assert np.all(notes_np == idx)                               # integral indices

    # Robust correctness check (tolerates bf16 single-pass matmuls): the index
    # chosen by the kernel must be (near-)maximal in the full-precision
    # reference logits, and mostly agree with the exact argmax.
    ref_log = np.asarray(reference_logits(tokens, params))       # (S, B, 128)
    row_max = ref_log.max(axis=-1)
    row_min = ref_log.min(axis=-1)
    chosen = np.take_along_axis(ref_log, idx[..., None], axis=-1)[..., 0]
    tol = 0.03 * (row_max - row_min) + 1e-5
    assert np.all(chosen >= row_max - tol), \
        "kernel argmax deviates from reference logits"
    exact = float(np.mean(idx == ref_log.argmax(axis=-1)))
    assert exact >= 0.75, f"kernel/reference argmax agreement too low: {exact:.3f}"

    print("KERNEL_OK")
</pallas_src>

<mosaic_0001>
module attributes {stable_mosaic.version = 11 : i64} {
  func.func @generator_kernel(%arg0: memref<128x1xi32, #tpu.memory_space<vmem>>, %arg1: memref<50x80xf32, #tpu.memory_space<vmem>>, %arg2: memref<16x80xf32, #tpu.memory_space<vmem>>, %arg3: memref<2x16x1xf32, #tpu.memory_space<vmem>>, %arg4: memref<2x16x1xf32, #tpu.memory_space<vmem>>, %arg5: memref<160xf32, #tpu.memory_space<smem>>, %arg6: memref<4xf32, #tpu.memory_space<smem>>, %arg7: memref<76x38xf32, #tpu.memory_space<vmem>>, %arg8: memref<8xf32, #tpu.memory_space<smem>>, %arg9: memref<2xf32, #tpu.memory_space<smem>>, %arg10: memref<48xf32, #tpu.memory_space<smem>>, %arg11: memref<8xf32, #tpu.memory_space<smem>>, %arg12: memref<36x128xf32, #tpu.memory_space<vmem>>, %arg13: memref<1x128xf32, #tpu.memory_space<vmem>>, %arg14: memref<128x1xf32, #tpu.memory_space<vmem>>) attributes {dimension_semantics = [], scalar_prefetch = 0 : i64, scratch_operands = 0 : i64, tpu.core_type = #tpu.core_type<tc>} {
    %c0 = arith.constant 0 : index
    %c0_0 = arith.constant 0 : index
    %0 = vector.load %arg0[%c0, %c0_0] : memref<128x1xi32, #tpu.memory_space<vmem>>, vector<128x1xi32>
    %1 = tpu.iota {dimensions = array<i32: 1>} : vector<128x50xi32>
    %2 = vector.broadcast %0 : vector<128x1xi32> to vector<128x50xi32>
    %3 = arith.cmpi eq, %1, %2 : vector<128x50xi32>
    %cst = arith.constant 1.000000e+00 : f32
    %cst_1 = arith.constant 0.000000e+00 : f32
    %4 = vector.broadcast %cst : f32 to vector<128x50xf32>
    %5 = vector.broadcast %cst_1 : f32 to vector<128x50xf32>
    %6 = arith.select %3, %4, %5 : vector<128x50xi1>, vector<128x50xf32>
    %7 = arith.truncf %6 : vector<128x50xf32> to vector<128x50xbf16>
    %c0_2 = arith.constant 0 : index
    %c0_3 = arith.constant 0 : index
    %8 = vector.load %arg1[%c0_2, %c0_3] : memref<50x80xf32, #tpu.memory_space<vmem>>, vector<50x80xf32>
    %9 = arith.truncf %8 : vector<50x80xf32> to vector<50x80xbf16>
    %cst_4 = arith.constant dense<0.000000e+00> : vector<128x80xf32>
    %10 = tpu.matmul %7, %9, %cst_4 {dimension_numbers = #tpu.dot_dimension_numbers<[1], [0], [0], [1], [0, 0, 1, 1], [], []>} : vector<128x50xbf16>, vector<50x80xbf16>, vector<128x80xf32> -> vector<128x80xf32>
    %11 = vector.shape_cast %10 : vector<128x80xf32> to vector<8x16x80xf32>
    %c0_5 = arith.constant 0 : index
    %c0_6 = arith.constant 0 : index
    %12 = vector.load %arg2[%c0_5, %c0_6] : memref<16x80xf32, #tpu.memory_space<vmem>>, vector<16x80xf32>
    %13 = vector.shape_cast %12 : vector<16x80xf32> to vector<1x16x80xf32>
    %14 = vector.broadcast %13 : vector<1x16x80xf32> to vector<8x16x80xf32>
    %15 = arith.addf %11, %14 : vector<8x16x80xf32>
    %cst_7 = arith.constant dense<0.000000e+00> : vector<8x16xf32>
    %16 = vector.multi_reduction <add>, %15, %cst_7 [2] : vector<8x16x80xf32> to vector<8x16xf32>
    %17 = vector.shape_cast %16 : vector<8x16xf32> to vector<8x16x1xf32>
    %cst_8 = arith.constant dense<0.000000e+00> : vector<16x1xf32>
    %18 = vector.multi_reduction <add>, %17, %cst_8 [0] : vector<8x16x1xf32> to vector<16x1xf32>
    %19 = vector.shape_cast %18 : vector<16x1xf32> to vector<1x16x1xf32>
    %cst_9 = arith.constant 1.562500e-03 : f32
    %20 = vector.broadcast %cst_9 : f32 to vector<1x16x1xf32>
    %21 = arith.mulf %19, %20 : vector<1x16x1xf32>
    %22 = vector.broadcast %21 : vector<1x16x1xf32> to vector<8x16x80xf32>
    %23 = arith.subf %15, %22 : vector<8x16x80xf32>
    %24 = arith.mulf %23, %23 : vector<8x16x80xf32>
    %cst_10 = arith.constant dense<0.000000e+00> : vector<8x16xf32>
    %25 = vector.multi_reduction <add>, %24, %cst_10 [2] : vector<8x16x80xf32> to vector<8x16xf32>
    %26 = vector.shape_cast %25 : vector<8x16xf32> to vector<8x16x1xf32>
    %cst_11 = arith.constant dense<0.000000e+00> : vector<16x1xf32>
    %27 = vector.multi_reduction <add>, %26, %cst_11 [0] : vector<8x16x1xf32> to vector<16x1xf32>
    %28 = vector.shape_cast %27 : vector<16x1xf32> to vector<1x16x1xf32>
    %cst_12 = arith.constant 1.562500e-03 : f32
    %29 = vector.broadcast %cst_12 : f32 to vector<1x16x1xf32>
    %30 = arith.mulf %28, %29 : vector<1x16x1xf32>
    %cst_13 = arith.constant 9.99999974E-6 : f32
    %31 = vector.broadcast %cst_13 : f32 to vector<1x16x1xf32>
    %32 = arith.addf %30, %31 : vector<1x16x1xf32>
    %33 = math.rsqrt %32 : vector<1x16x1xf32>
    %34 = vector.broadcast %33 : vector<1x16x1xf32> to vector<8x16x80xf32>
    %35 = arith.mulf %23, %34 : vector<8x16x80xf32>
    %c0_14 = arith.constant 0 : index
    %c0_15 = arith.constant 0 : index
    %c0_16 = arith.constant 0 : index
    %36 = vector.load %arg3[%c0_14, %c0_15, %c0_16] : memref<2x16x1xf32, #tpu.memory_space<vmem>>, vector<1x16x1xf32>
    %37 = vector.shape_cast %36 : vector<1x16x1xf32> to vector<16x1xf32>
    %38 = vector.shape_cast %37 : vector<16x1xf32> to vector<1x16x1xf32>
    %39 = vector.broadcast %38 : vector<1x16x1xf32> to vector<8x16x80xf32>
    %40 = arith.mulf %35, %39 : vector<8x16x80xf32>
    %c0_17 = arith.constant 0 : index
    %c0_18 = arith.constant 0 : index
    %c0_19 = arith.constant 0 : index
    %41 = vector.load %arg4[%c0_17, %c0_18, %c0_19] : memref<2x16x1xf32, #tpu.memory_space<vmem>>, vector<1x16x1xf32>
    %42 = vector.shape_cast %41 : vector<1x16x1xf32> to vector<16x1xf32>
    %43 = vector.shape_cast %42 : vector<16x1xf32> to vector<1x16x1xf32>
    %44 = vector.broadcast %43 : vector<1x16x1xf32> to vector<8x16x80xf32>
    %45 = arith.addf %40, %44 : vector<8x16x80xf32>
    %cst_20 = arith.constant dense<0.000000e+00> : vector<8x16xf32>
    %46 = vector.multi_reduction <add>, %45, %cst_20 [2] : vector<8x16x80xf32> to vector<8x16xf32>
    %47 = vector.shape_cast %46 : vector<8x16xf32> to vector<8x16x1xf32>
    %cst_21 = arith.constant dense<0.000000e+00> : vector<16x1xf32>
    %48 = vector.multi_reduction <add>, %47, %cst_21 [0] : vector<8x16x1xf32> to vector<16x1xf32>
    %49 = vector.shape_cast %48 : vector<16x1xf32> to vector<1x16x1xf32>
    %cst_22 = arith.constant 1.562500e-03 : f32
    %50 = vector.broadcast %cst_22 : f32 to vector<1x16x1xf32>
    %51 = arith.mulf %49, %50 : vector<1x16x1xf32>
    %52 = vector.broadcast %51 : vector<1x16x1xf32> to vector<8x16x80xf32>
    %53 = arith.subf %45, %52 : vector<8x16x80xf32>
    %54 = arith.mulf %53, %53 : vector<8x16x80xf32>
    %cst_23 = arith.constant dense<0.000000e+00> : vector<8x16xf32>
    %55 = vector.multi_reduction <add>, %54, %cst_23 [2] : vector<8x16x80xf32> to vector<8x16xf32>
    %56 = vector.shape_cast %55 : vector<8x16xf32> to vector<8x16x1xf32>
    %cst_24 = arith.constant dense<0.000000e+00> : vector<16x1xf32>
    %57 = vector.multi_reduction <add>, %56, %cst_24 [0] : vector<8x16x1xf32> to vector<16x1xf32>
    %58 = vector.shape_cast %57 : vector<16x1xf32> to vector<1x16x1xf32>
    %cst_25 = arith.constant 1.562500e-03 : f32
    %59 = vector.broadcast %cst_25 : f32 to vector<1x16x1xf32>
    %60 = arith.mulf %58, %59 : vector<1x16x1xf32>
    %cst_26 = arith.constant 9.99999974E-6 : f32
    %61 = vector.broadcast %cst_26 : f32 to vector<1x16x1xf32>
    %62 = arith.addf %60, %61 : vector<1x16x1xf32>
    %63 = math.rsqrt %62 : vector<1x16x1xf32>
    %64 = vector.broadcast %63 : vector<1x16x1xf32> to vector<8x16x80xf32>
    %65 = arith.mulf %53, %64 : vector<8x16x80xf32>
    %c1 = arith.constant 1 : index
    %c0_27 = arith.constant 0 : index
    %c0_28 = arith.constant 0 : index
    %66 = vector.load %arg3[%c1, %c0_27, %c0_28] : memref<2x16x1xf32, #tpu.memory_space<vmem>>, vector<1x16x1xf32>
    %67 = vector.shape_cast %66 : vector<1x16x1xf32> to vector<16x1xf32>
    %68 = vector.shape_cast %67 : vector<16x1xf32> to vector<1x16x1xf32>
    %69 = vector.broadcast %68 : vector<1x16x1xf32> to vector<8x16x80xf32>
    %70 = arith.mulf %65, %69 : vector<8x16x80xf32>
    %c1_29 = arith.constant 1 : index
    %c0_30 = arith.constant 0 : index
    %c0_31 = arith.constant 0 : index
    %71 = vector.load %arg4[%c1_29, %c0_30, %c0_31] : memref<2x16x1xf32, #tpu.memory_space<vmem>>, vector<1x16x1xf32>
    %72 = vector.shape_cast %71 : vector<1x16x1xf32> to vector<16x1xf32>
    %73 = vector.shape_cast %72 : vector<16x1xf32> to vector<1x16x1xf32>
    %74 = vector.broadcast %73 : vector<1x16x1xf32> to vector<8x16x80xf32>
    %75 = arith.addf %70, %74 : vector<8x16x80xf32>
    %76 = vector.shape_cast %75 : vector<8x16x80xf32> to vector<128x80xf32>
    %cst_32 = arith.constant 0.000000e+00 : f32
    %77 = vector.broadcast %cst_32 : f32 to vector<16x76xf32>
    %c0_33 = arith.constant 0 : index
    %78 = memref.load %arg6[%c0_33] : memref<4xf32, #tpu.memory_space<smem>>
    %79 = vector.broadcast %78 : f32 to vector<16x76xf32>
    %80 = arith.addf %77, %79 : vector<16x76xf32>
    %cst_34 = arith.constant 0.000000e+00 : f32
    %81 = vector.broadcast %cst_34 : f32 to vector<16x76xf32>
    %c1_35 = arith.constant 1 : index
    %82 = memref.load %arg6[%c1_35] : memref<4xf32, #tpu.memory_space<smem>>
    %83 = vector.broadcast %82 : f32 to vector<16x76xf32>
    %84 = arith.addf %81, %83 : vector<16x76xf32>
    %cst_36 = arith.constant 0.000000e+00 : f32
    %85 = vector.broadcast %cst_36 : f32 to vector<16x76xf32>
    %c2 = arith.constant 2 : index
    %86 = memref.load %arg6[%c2] : memref<4xf32, #tpu.memory_space<smem>>
    %87 = vector.broadcast %86 : f32 to vector<16x76xf32>
    %88 = arith.addf %85, %87 : vector<16x76xf32>
    %cst_37 = arith.constant 0.000000e+00 : f32
    %89 = vector.broadcast %cst_37 : f32 to vector<16x76xf32>
    %c3 = arith.constant 3 : index
    %90 = memref.load %arg6[%c3] : memref<4xf32, #tpu.memory_space<smem>>
    %91 = vector.broadcast %90 : f32 to vector<16x76xf32>
    %92 = arith.addf %89, %91 : vector<16x76xf32>
    %93 = vector.extract_strided_slice %76 {offsets = [0, 0], sizes = [16, 80], strides = [1, 1]} : vector<128x80xf32> to vector<16x80xf32>
    %94 = vector.extract_strided_slice %93 {offsets = [0, 0], sizes = [16, 76], strides = [1, 1]} : vector<16x80xf32> to vector<16x76xf32>
    %c0_38 = arith.constant 0 : index
    %95 = memref.load %arg5[%c0_38] : memref<160xf32, #tpu.memory_space<smem>>
    %96 = vector.broadcast %95 : f32 to vector<16x76xf32>
    %97 = arith.mulf %96, %94 : vector<16x76xf32>
    %98 = arith.addf %80, %97 : vector<16x76xf32>
    %c40 = arith.constant 40 : index
    %99 = memref.load %arg5[%c40] : memref<160xf32, #tpu.memory_space<smem>>
    %100 = vector.broadcast %99 : f32 to vector<16x76xf32>
    %101 = arith.mulf %100, %94 : vector<16x76xf32>
    %102 = arith.addf %84, %101 : vector<16x76xf32>
    %c80 = arith.constant 80 : index
    %103 = memref.load %arg5[%c80] : memref<160xf32, #tpu.memory_space<smem>>
    %104 = vector.broadcast %103 : f32 to vector<16x76xf32>
    %105 = arith.mulf %104, %94 : vector<16x76xf32>
    %106 = arith.addf %88, %105 : vector<16x76xf32>
    %c120 = arith.constant 120 : index
    %107 = memref.load %arg5[%c120] : memref<160xf32, #tpu.memory_space<smem>>
    %108 = vector.broadcast %107 : f32 to vector<16x76xf32>
    %109 = arith.mulf %108, %94 : vector<16x76xf32>
    %110 = arith.addf %92, %109 : vector<16x76xf32>
    %111 = vector.extract_strided_slice %93 {offsets = [0, 1], sizes = [16, 76], strides = [1, 1]} : vector<16x80xf32> to vector<16x76xf32>
    %c1_39 = arith.constant 1 : index
    %112 = memref.load %arg5[%c1_39] : memref<160xf32, #tpu.memory_space<smem>>
    %113 = vector.broadcast %112 : f32 to vector<16x76xf32>
    %114 = arith.mulf %113, %111 : vector<16x76xf32>
    %115 = arith.addf %98, %114 : vector<16x76xf32>
    %c41 = arith.constant 41 : index
    %116 = memref.load %arg5[%c41] : memref<160xf32, #tpu.memory_space<smem>>
    %117 = vector.broadcast %116 : f32 to vector<16x76xf32>
    %118 = arith.mulf %117, %111 : vector<16x76xf32>
    %119 = arith.addf %102, %118 : vector<16x76xf32>
    %c81 = arith.constant 81 : index
    %120 = memref.load %arg5[%c81] : memref<160xf32, #tpu.memory_space<smem>>
    %121 = vector.broadcast %120 : f32 to vector<16x76xf32>
    %122 = arith.mulf %121, %111 : vector<16x76xf32>
    %123 = arith.addf %106, %122 : vector<16x76xf32>
    %c121 = arith.constant 121 : index
    %124 = memref.load %arg5[%c121] : memref<160xf32, #tpu.memory_space<smem>>
    %125 = vector.broadcast %124 : f32 to vector<16x76xf32>
    %126 = arith.mulf %125, %111 : vector<16x76xf32>
    %127 = arith.addf %110, %126 : vector<16x76xf32>
    %128 = vector.extract_strided_slice %93 {offsets = [0, 2], sizes = [16, 76], strides = [1, 1]} : vector<16x80xf32> to vector<16x76xf32>
    %c2_40 = arith.constant 2 : index
    %129 = memref.load %arg5[%c2_40] : memref<160xf32, #tpu.memory_space<smem>>
    %130 = vector.broadcast %129 : f32 to vector<16x76xf32>
    %131 = arith.mulf %130, %128 : vector<16x76xf32>
    %132 = arith.addf %115, %131 : vector<16x76xf32>
    %c42 = arith.constant 42 : index
    %133 = memref.load %arg5[%c42] : memref<160xf32, #tpu.memory_space<smem>>
    %134 = vector.broadcast %133 : f32 to vector<16x76xf32>
    %135 = arith.mulf %134, %128 : vector<16x76xf32>
    %136 = arith.addf %119, %135 : vector<16x76xf32>
    %c82 = arith.constant 82 : index
    %137 = memref.load %arg5[%c82] : memref<160xf32, #tpu.memory_space<smem>>
    %138 = vector.broadcast %137 : f32 to vector<16x76xf32>
    %139 = arith.mulf %138, %128 : vector<16x76xf32>
    %140 = arith.addf %123, %139 : vector<16x76xf32>
    %c122 = arith.constant 122 : index
    %141 = memref.load %arg5[%c122] : memref<160xf32, #tpu.memory_space<smem>>
    %142 = vector.broadcast %141 : f32 to vector<16x76xf32>
    %143 = arith.mulf %142, %128 : vector<16x76xf32>
    %144 = arith.addf %127, %143 : vector<16x76xf32>
    %145 = vector.extract_strided_slice %93 {offsets = [0, 3], sizes = [16, 76], strides = [1, 1]} : vector<16x80xf32> to vector<16x76xf32>
    %c3_41 = arith.constant 3 : index
    %146 = memref.load %arg5[%c3_41] : memref<160xf32, #tpu.memory_space<smem>>
    %147 = vector.broadcast %146 : f32 to vector<16x76xf32>
    %148 = arith.mulf %147, %145 : vector<16x76xf32>
    %149 = arith.addf %132, %148 : vector<16x76xf32>
    %c43 = arith.constant 43 : index
    %150 = memref.load %arg5[%c43] : memref<160xf32, #tpu.memory_space<smem>>
    %151 = vector.broadcast %150 : f32 to vector<16x76xf32>
    %152 = arith.mulf %151, %145 : vector<16x76xf32>
    %153 = arith.addf %136, %152 : vector<16x76xf32>
    %c83 = arith.constant 83 : index
    %154 = memref.load %arg5[%c83] : memref<160xf32, #tpu.memory_space<smem>>
    %155 = vector.broadcast %154 : f32 to vector<16x76xf32>
    %156 = arith.mulf %155, %145 : vector<16x76xf32>
    %157 = arith.addf %140, %156 : vector<16x76xf32>
    %c123 = arith.constant 123 : index
    %158 = memref.load %arg5[%c123] : memref<160xf32, #tpu.memory_space<smem>>
    %159 = vector.broadcast %158 : f32 to vector<16x76xf32>
    %160 = arith.mulf %159, %145 : vector<16x76xf32>
    %161 = arith.addf %144, %160 : vector<16x76xf32>
    %162 = vector.extract_strided_slice %93 {offsets = [0, 4], sizes = [16, 76], strides = [1, 1]} : vector<16x80xf32> to vector<16x76xf32>
    %c4 = arith.constant 4 : index
    %163 = memref.load %arg5[%c4] : memref<160xf32, #tpu.memory_space<smem>>
    %164 = vector.broadcast %163 : f32 to vector<16x76xf32>
    %165 = arith.mulf %164, %162 : vector<16x76xf32>
    %166 = arith.addf %149, %165 : vector<16x76xf32>
    %c44 = arith.constant 44 : index
    %167 = memref.load %arg5[%c44] : memref<160xf32, #tpu.memory_space<smem>>
    %168 = vector.broadcast %167 : f32 to vector<16x76xf32>
    %169 = arith.mulf %168, %162 : vector<16x76xf32>
    %170 = arith.addf %153, %169 : vector<16x76xf32>
    %c84 = arith.constant 84 : index
    %171 = memref.load %arg5[%c84] : memref<160xf32, #tpu.memory_space<smem>>
    %172 = vector.broadcast %171 : f32 to vector<16x76xf32>
    %173 = arith.mulf %172, %162 : vector<16x76xf32>
    %174 = arith.addf %157, %173 : vector<16x76xf32>
    %c124 = arith.constant 124 : index
    %175 = memref.load %arg5[%c124] : memref<160xf32, #tpu.memory_space<smem>>
    %176 = vector.broadcast %175 : f32 to vector<16x76xf32>
    %177 = arith.mulf %176, %162 : vector<16x76xf32>
    %178 = arith.addf %161, %177 : vector<16x76xf32>
    %179 = vector.extract_strided_slice %76 {offsets = [16, 0], sizes = [16, 80], strides = [1, 1]} : vector<128x80xf32> to vector<16x80xf32>
    %180 = vector.extract_strided_slice %179 {offsets = [0, 0], sizes = [16, 76], strides = [1, 1]} : vector<16x80xf32> to vector<16x76xf32>
    %c5 = arith.constant 5 : index
    %181 = memref.load %arg5[%c5] : memref<160xf32, #tpu.memory_space<smem>>
    %182 = vector.broadcast %181 : f32 to vector<16x76xf32>
    %183 = arith.mulf %182, %180 : vector<16x76xf32>
    %184 = arith.addf %166, %183 : vector<16x76xf32>
    %c45 = arith.constant 45 : index
    %185 = memref.load %arg5[%c45] : memref<160xf32, #tpu.memory_space<smem>>
    %186 = vector.broadcast %185 : f32 to vector<16x76xf32>
    %187 = arith.mulf %186, %180 : vector<16x76xf32>
    %188 = arith.addf %170, %187 : vector<16x76xf32>
    %c85 = arith.constant 85 : index
    %189 = memref.load %arg5[%c85] : memref<160xf32, #tpu.memory_space<smem>>
    %190 = vector.broadcast %189 : f32 to vector<16x76xf32>
    %191 = arith.mulf %190, %180 : vector<16x76xf32>
    %192 = arith.addf %174, %191 : vector<16x76xf32>
    %c125 = arith.constant 125 : index
    %193 = memref.load %arg5[%c125] : memref<160xf32, #tpu.memory_space<smem>>
    %194 = vector.broadcast %193 : f32 to vector<16x76xf32>
    %195 = arith.mulf %194, %180 : vector<16x76xf32>
    %196 = arith.addf %178, %195 : vector<16x76xf32>
    %197 = vector.extract_strided_slice %179 {offsets = [0, 1], sizes = [16, 76], strides = [1, 1]} : vector<16x80xf32> to vector<16x76xf32>
    %c6 = arith.constant 6 : index
    %198 = memref.load %arg5[%c6] : memref<160xf32, #tpu.memory_space<smem>>
    %199 = vector.broadcast %198 : f32 to vector<16x76xf32>
    %200 = arith.mulf %199, %197 : vector<16x76xf32>
    %201 = arith.addf %184, %200 : vector<16x76xf32>
    %c46 = arith.constant 46 : index
    %202 = memref.load %arg5[%c46] : memref<160xf32, #tpu.memory_space<smem>>
    %203 = vector.broadcast %202 : f32 to vector<16x76xf32>
    %204 = arith.mulf %203, %197 : vector<16x76xf32>
    %205 = arith.addf %188, %204 : vector<16x76xf32>
    %c86 = arith.constant 86 : index
    %206 = memref.load %arg5[%c86] : memref<160xf32, #tpu.memory_space<smem>>
    %207 = vector.broadcast %206 : f32 to vector<16x76xf32>
    %208 = arith.mulf %207, %197 : vector<16x76xf32>
    %209 = arith.addf %192, %208 : vector<16x76xf32>
    %c126 = arith.constant 126 : index
    %210 = memref.load %arg5[%c126] : memref<160xf32, #tpu.memory_space<smem>>
    %211 = vector.broadcast %210 : f32 to vector<16x76xf32>
    %212 = arith.mulf %211, %197 : vector<16x76xf32>
    %213 = arith.addf %196, %212 : vector<16x76xf32>
    %214 = vector.extract_strided_slice %179 {offsets = [0, 2], sizes = [16, 76], strides = [1, 1]} : vector<16x80xf32> to vector<16x76xf32>
    %c7 = arith.constant 7 : index
    %215 = memref.load %arg5[%c7] : memref<160xf32, #tpu.memory_space<smem>>
    %216 = vector.broadcast %215 : f32 to vector<16x76xf32>
    %217 = arith.mulf %216, %214 : vector<16x76xf32>
    %218 = arith.addf %201, %217 : vector<16x76xf32>
    %c47 = arith.constant 47 : index
    %219 = memref.load %arg5[%c47] : memref<160xf32, #tpu.memory_space<smem>>
    %220 = vector.broadcast %219 : f32 to vector<16x76xf32>
    %221 = arith.mulf %220, %214 : vector<16x76xf32>
    %222 = arith.addf %205, %221 : vector<16x76xf32>
    %c87 = arith.constant 87 : index
    %223 = memref.load %arg5[%c87] : memref<160xf32, #tpu.memory_space<smem>>
    %224 = vector.broadcast %223 : f32 to vector<16x76xf32>
    %225 = arith.mulf %224, %214 : vector<16x76xf32>
    %226 = arith.addf %209, %225 : vector<16x76xf32>
    %c127 = arith.constant 127 : index
    %227 = memref.load %arg5[%c127] : memref<160xf32, #tpu.memory_space<smem>>
    %228 = vector.broadcast %227 : f32 to vector<16x76xf32>
    %229 = arith.mulf %228, %214 : vector<16x76xf32>
    %230 = arith.addf %213, %229 : vector<16x76xf32>
    %231 = vector.extract_strided_slice %179 {offsets = [0, 3], sizes = [16, 76], strides = [1, 1]} : vector<16x80xf32> to vector<16x76xf32>
    %c8 = arith.constant 8 : index
    %232 = memref.load %arg5[%c8] : memref<160xf32, #tpu.memory_space<smem>>
    %233 = vector.broadcast %232 : f32 to vector<16x76xf32>
    %234 = arith.mulf %233, %231 : vector<16x76xf32>
    %235 = arith.addf %218, %234 : vector<16x76xf32>
    %c48 = arith.constant 48 : index
    %236 = memref.load %arg5[%c48] : memref<160xf32, #tpu.memory_space<smem>>
    %237 = vector.broadcast %236 : f32 to vector<16x76xf32>
    %238 = arith.mulf %237, %231 : vector<16x76xf32>
    %239 = arith.addf %222, %238 : vector<16x76xf32>
    %c88 = arith.constant 88 : index
    %240 = memref.load %arg5[%c88] : memref<160xf32, #tpu.memory_space<smem>>
    %241 = vector.broadcast %240 : f32 to vector<16x76xf32>
    %242 = arith.mulf %241, %231 : vector<16x76xf32>
    %243 = arith.addf %226, %242 : vector<16x76xf32>
    %c128 = arith.constant 128 : index
    %244 = memref.load %arg5[%c128] : memref<160xf32, #tpu.memory_space<smem>>
    %245 = vector.broadcast %244 : f32 to vector<16x76xf32>
    %246 = arith.mulf %245, %231 : vector<16x76xf32>
    %247 = arith.addf %230, %246 : vector<16x76xf32>
    %248 = vector.extract_strided_slice %179 {offsets = [0, 4], sizes = [16, 76], strides = [1, 1]} : vector<16x80xf32> to vector<16x76xf32>
    %c9 = arith.constant 9 : index
    %249 = memref.load %arg5[%c9] : memref<160xf32, #tpu.memory_space<smem>>
    %250 = vector.broadcast %249 : f32 to vector<16x76xf32>
    %251 = arith.mulf %250, %248 : vector<16x76xf32>
    %252 = arith.addf %235, %251 : vector<16x76xf32>
    %c49 = arith.constant 49 : index
    %253 = memref.load %arg5[%c49] : memref<160xf32, #tpu.memory_space<smem>>
    %254 = vector.broadcast %253 : f32 to vector<16x76xf32>
    %255 = arith.mulf %254, %248 : vector<16x76xf32>
    %256 = arith.addf %239, %255 : vector<16x76xf32>
    %c89 = arith.constant 89 : index
    %257 = memref.load %arg5[%c89] : memref<160xf32, #tpu.memory_space<smem>>
    %258 = vector.broadcast %257 : f32 to vector<16x76xf32>
    %259 = arith.mulf %258, %248 : vector<16x76xf32>
    %260 = arith.addf %243, %259 : vector<16x76xf32>
    %c129 = arith.constant 129 : index
    %261 = memref.load %arg5[%c129] : memref<160xf32, #tpu.memory_space<smem>>
    %262 = vector.broadcast %261 : f32 to vector<16x76xf32>
    %263 = arith.mulf %262, %248 : vector<16x76xf32>
    %264 = arith.addf %247, %263 : vector<16x76xf32>
    %265 = vector.extract_strided_slice %76 {offsets = [32, 0], sizes = [16, 80], strides = [1, 1]} : vector<128x80xf32> to vector<16x80xf32>
    %266 = vector.extract_strided_slice %265 {offsets = [0, 0], sizes = [16, 76], strides = [1, 1]} : vector<16x80xf32> to vector<16x76xf32>
    %c10 = arith.constant 10 : index
    %267 = memref.load %arg5[%c10] : memref<160xf32, #tpu.memory_space<smem>>
    %268 = vector.broadcast %267 : f32 to vector<16x76xf32>
    %269 = arith.mulf %268, %266 : vector<16x76xf32>
    %270 = arith.addf %252, %269 : vector<16x76xf32>
    %c50 = arith.constant 50 : index
    %271 = memref.load %arg5[%c50] : memref<160xf32, #tpu.memory_space<smem>>
    %272 = vector.broadcast %271 : f32 to vector<16x76xf32>
    %273 = arith.mulf %272, %266 : vector<16x76xf32>
    %274 = arith.addf %256, %273 : vector<16x76xf32>
    %c90 = arith.constant 90 : index
    %275 = memref.load %arg5[%c90] : memref<160xf32, #tpu.memory_space<smem>>
    %276 = vector.broadcast %275 : f32 to vector<16x76xf32>
    %277 = arith.mulf %276, %266 : vector<16x76xf32>
    %278 = arith.addf %260, %277 : vector<16x76xf32>
    %c130 = arith.constant 130 : index
    %279 = memref.load %arg5[%c130] : memref<160xf32, #tpu.memory_space<smem>>
    %280 = vector.broadcast %279 : f32 to vector<16x76xf32>
    %281 = arith.mulf %280, %266 : vector<16x76xf32>
    %282 = arith.addf %264, %281 : vector<16x76xf32>
    %283 = vector.extract_strided_slice %265 {offsets = [0, 1], sizes = [16, 76], strides = [1, 1]} : vector<16x80xf32> to vector<16x76xf32>
    %c11 = arith.constant 11 : index
    %284 = memref.load %arg5[%c11] : memref<160xf32, #tpu.memory_space<smem>>
    %285 = vector.broadcast %284 : f32 to vector<16x76xf32>
    %286 = arith.mulf %285, %283 : vector<16x76xf32>
    %287 = arith.addf %270, %286 : vector<16x76xf32>
    %c51 = arith.constant 51 : index
    %288 = memref.load %arg5[%c51] : memref<160xf32, #tpu.memory_space<smem>>
    %289 = vector.broadcast %288 : f32 to vector<16x76xf32>
    %290 = arith.mulf %289, %283 : vector<16x76xf32>
    %291 = arith.addf %274, %290 : vector<16x76xf32>
    %c91 = arith.constant 91 : index
    %292 = memref.load %arg5[%c91] : memref<160xf32, #tpu.memory_space<smem>>
    %293 = vector.broadcast %292 : f32 to vector<16x76xf32>
    %294 = arith.mulf %293, %283 : vector<16x76xf32>
    %295 = arith.addf %278, %294 : vector<16x76xf32>
    %c131 = arith.constant 131 : index
    %296 = memref.load %arg5[%c131] : memref<160xf32, #tpu.memory_space<smem>>
    %297 = vector.broadcast %296 : f32 to vector<16x76xf32>
    %298 = arith.mulf %297, %283 : vector<16x76xf32>
    %299 = arith.addf %282, %298 : vector<16x76xf32>
    %300 = vector.extract_strided_slice %265 {offsets = [0, 2], sizes = [16, 76], strides = [1, 1]} : vector<16x80xf32> to vector<16x76xf32>
    %c12 = arith.constant 12 : index
    %301 = memref.load %arg5[%c12] : memref<160xf32, #tpu.memory_space<smem>>
    %302 = vector.broadcast %301 : f32 to vector<16x76xf32>
    %303 = arith.mulf %302, %300 : vector<16x76xf32>
    %304 = arith.addf %287, %303 : vector<16x76xf32>
    %c52 = arith.constant 52 : index
    %305 = memref.load %arg5[%c52] : memref<160xf32, #tpu.memory_space<smem>>
    %306 = vector.broadcast %305 : f32 to vector<16x76xf32>
    %307 = arith.mulf %306, %300 : vector<16x76xf32>
    %308 = arith.addf %291, %307 : vector<16x76xf32>
    %c92 = arith.constant 92 : index
    %309 = memref.load %arg5[%c92] : memref<160xf32, #tpu.memory_space<smem>>
    %310 = vector.broadcast %309 : f32 to vector<16x76xf32>
    %311 = arith.mulf %310, %300 : vector<16x76xf32>
    %312 = arith.addf %295, %311 : vector<16x76xf32>
    %c132 = arith.constant 132 : index
    %313 = memref.load %arg5[%c132] : memref<160xf32, #tpu.memory_space<smem>>
    %314 = vector.broadcast %313 : f32 to vector<16x76xf32>
    %315 = arith.mulf %314, %300 : vector<16x76xf32>
    %316 = arith.addf %299, %315 : vector<16x76xf32>
    %317 = vector.extract_strided_slice %265 {offsets = [0, 3], sizes = [16, 76], strides = [1, 1]} : vector<16x80xf32> to vector<16x76xf32>
    %c13 = arith.constant 13 : index
    %318 = memref.load %arg5[%c13] : memref<160xf32, #tpu.memory_space<smem>>
    %319 = vector.broadcast %318 : f32 to vector<16x76xf32>
    %320 = arith.mulf %319, %317 : vector<16x76xf32>
    %321 = arith.addf %304, %320 : vector<16x76xf32>
    %c53 = arith.constant 53 : index
    %322 = memref.load %arg5[%c53] : memref<160xf32, #tpu.memory_space<smem>>
    %323 = vector.broadcast %322 : f32 to vector<16x76xf32>
    %324 = arith.mulf %323, %317 : vector<16x76xf32>
    %325 = arith.addf %308, %324 : vector<16x76xf32>
    %c93 = arith.constant 93 : index
    %326 = memref.load %arg5[%c93] : memref<160xf32, #tpu.memory_space<smem>>
    %327 = vector.broadcast %326 : f32 to vector<16x76xf32>
    %328 = arith.mulf %327, %317 : vector<16x76xf32>
    %329 = arith.addf %312, %328 : vector<16x76xf32>
    %c133 = arith.constant 133 : index
    %330 = memref.load %arg5[%c133] : memref<160xf32, #tpu.memory_space<smem>>
    %331 = vector.broadcast %330 : f32 to vector<16x76xf32>
    %332 = arith.mulf %331, %317 : vector<16x76xf32>
    %333 = arith.addf %316, %332 : vector<16x76xf32>
    %334 = vector.extract_strided_slice %265 {offsets = [0, 4], sizes = [16, 76], strides = [1, 1]} : vector<16x80xf32> to vector<16x76xf32>
    %c14 = arith.constant 14 : index
    %335 = memref.load %arg5[%c14] : memref<160xf32, #tpu.memory_space<smem>>
    %336 = vector.broadcast %335 : f32 to vector<16x76xf32>
    %337 = arith.mulf %336, %334 : vector<16x76xf32>
    %338 = arith.addf %321, %337 : vector<16x76xf32>
    %c54 = arith.constant 54 : index
    %339 = memref.load %arg5[%c54] : memref<160xf32, #tpu.memory_space<smem>>
    %340 = vector.broadcast %339 : f32 to vector<16x76xf32>
    %341 = arith.mulf %340, %334 : vector<16x76xf32>
    %342 = arith.addf %325, %341 : vector<16x76xf32>
    %c94 = arith.constant 94 : index
    %343 = memref.load %arg5[%c94] : memref<160xf32, #tpu.memory_space<smem>>
    %344 = vector.broadcast %343 : f32 to vector<16x76xf32>
    %345 = arith.mulf %344, %334 : vector<16x76xf32>
    %346 = arith.addf %329, %345 : vector<16x76xf32>
    %c134 = arith.constant 134 : index
    %347 = memref.load %arg5[%c134] : memref<160xf32, #tpu.memory_space<smem>>
    %348 = vector.broadcast %347 : f32 to vector<16x76xf32>
    %349 = arith.mulf %348, %334 : vector<16x76xf32>
    %350 = arith.addf %333, %349 : vector<16x76xf32>
    %351 = vector.extract_strided_slice %76 {offsets = [48, 0], sizes = [16, 80], strides = [1, 1]} : vector<128x80xf32> to vector<16x80xf32>
    %352 = vector.extract_strided_slice %351 {offsets = [0, 0], sizes = [16, 76], strides = [1, 1]} : vector<16x80xf32> to vector<16x76xf32>
    %c15 = arith.constant 15 : index
    %353 = memref.load %arg5[%c15] : memref<160xf32, #tpu.memory_space<smem>>
    %354 = vector.broadcast %353 : f32 to vector<16x76xf32>
    %355 = arith.mulf %354, %352 : vector<16x76xf32>
    %356 = arith.addf %338, %355 : vector<16x76xf32>
    %c55 = arith.constant 55 : index
    %357 = memref.load %arg5[%c55] : memref<160xf32, #tpu.memory_space<smem>>
    %358 = vector.broadcast %357 : f32 to vector<16x76xf32>
    %359 = arith.mulf %358, %352 : vector<16x76xf32>
    %360 = arith.addf %342, %359 : vector<16x76xf32>
    %c95 = arith.constant 95 : index
    %361 = memref.load %arg5[%c95] : memref<160xf32, #tpu.memory_space<smem>>
    %362 = vector.broadcast %361 : f32 to vector<16x76xf32>
    %363 = arith.mulf %362, %352 : vector<16x76xf32>
    %364 = arith.addf %346, %363 : vector<16x76xf32>
    %c135 = arith.constant 135 : index
    %365 = memref.load %arg5[%c135] : memref<160xf32, #tpu.memory_space<smem>>
    %366 = vector.broadcast %365 : f32 to vector<16x76xf32>
    %367 = arith.mulf %366, %352 : vector<16x76xf32>
    %368 = arith.addf %350, %367 : vector<16x76xf32>
    %369 = vector.extract_strided_slice %351 {offsets = [0, 1], sizes = [16, 76], strides = [1, 1]} : vector<16x80xf32> to vector<16x76xf32>
    %c16 = arith.constant 16 : index
    %370 = memref.load %arg5[%c16] : memref<160xf32, #tpu.memory_space<smem>>
    %371 = vector.broadcast %370 : f32 to vector<16x76xf32>
    %372 = arith.mulf %371, %369 : vector<16x76xf32>
    %373 = arith.addf %356, %372 : vector<16x76xf32>
    %c56 = arith.constant 56 : index
    %374 = memref.load %arg5[%c56] : memref<160xf32, #tpu.memory_space<smem>>
    %375 = vector.broadcast %374 : f32 to vector<16x76xf32>
    %376 = arith.mulf %375, %369 : vector<16x76xf32>
    %377 = arith.addf %360, %376 : vector<16x76xf32>
    %c96 = arith.constant 96 : index
    %378 = memref.load %arg5[%c96] : memref<160xf32, #tpu.memory_space<smem>>
    %379 = vector.broadcast %378 : f32 to vector<16x76xf32>
    %380 = arith.mulf %379, %369 : vector<16x76xf32>
    %381 = arith.addf %364, %380 : vector<16x76xf32>
    %c136 = arith.constant 136 : index
    %382 = memref.load %arg5[%c136] : memref<160xf32, #tpu.memory_space<smem>>
    %383 = vector.broadcast %382 : f32 to vector<16x76xf32>
    %384 = arith.mulf %383, %369 : vector<16x76xf32>
    %385 = arith.addf %368, %384 : vector<16x76xf32>
    %386 = vector.extract_strided_slice %351 {offsets = [0, 2], sizes = [16, 76], strides = [1, 1]} : vector<16x80xf32> to vector<16x76xf32>
    %c17 = arith.constant 17 : index
    %387 = memref.load %arg5[%c17] : memref<160xf32, #tpu.memory_space<smem>>
    %388 = vector.broadcast %387 : f32 to vector<16x76xf32>
    %389 = arith.mulf %388, %386 : vector<16x76xf32>
    %390 = arith.addf %373, %389 : vector<16x76xf32>
    %c57 = arith.constant 57 : index
    %391 = memref.load %arg5[%c57] : memref<160xf32, #tpu.memory_space<smem>>
    %392 = vector.broadcast %391 : f32 to vector<16x76xf32>
    %393 = arith.mulf %392, %386 : vector<16x76xf32>
    %394 = arith.addf %377, %393 : vector<16x76xf32>
    %c97 = arith.constant 97 : index
    %395 = memref.load %arg5[%c97] : memref<160xf32, #tpu.memory_space<smem>>
    %396 = vector.broadcast %395 : f32 to vector<16x76xf32>
    %397 = arith.mulf %396, %386 : vector<16x76xf32>
    %398 = arith.addf %381, %397 : vector<16x76xf32>
    %c137 = arith.constant 137 : index
    %399 = memref.load %arg5[%c137] : memref<160xf32, #tpu.memory_space<smem>>
    %400 = vector.broadcast %399 : f32 to vector<16x76xf32>
    %401 = arith.mulf %400, %386 : vector<16x76xf32>
    %402 = arith.addf %385, %401 : vector<16x76xf32>
    %403 = vector.extract_strided_slice %351 {offsets = [0, 3], sizes = [16, 76], strides = [1, 1]} : vector<16x80xf32> to vector<16x76xf32>
    %c18 = arith.constant 18 : index
    %404 = memref.load %arg5[%c18] : memref<160xf32, #tpu.memory_space<smem>>
    %405 = vector.broadcast %404 : f32 to vector<16x76xf32>
    %406 = arith.mulf %405, %403 : vector<16x76xf32>
    %407 = arith.addf %390, %406 : vector<16x76xf32>
    %c58 = arith.constant 58 : index
    %408 = memref.load %arg5[%c58] : memref<160xf32, #tpu.memory_space<smem>>
    %409 = vector.broadcast %408 : f32 to vector<16x76xf32>
    %410 = arith.mulf %409, %403 : vector<16x76xf32>
    %411 = arith.addf %394, %410 : vector<16x76xf32>
    %c98 = arith.constant 98 : index
    %412 = memref.load %arg5[%c98] : memref<160xf32, #tpu.memory_space<smem>>
    %413 = vector.broadcast %412 : f32 to vector<16x76xf32>
    %414 = arith.mulf %413, %403 : vector<16x76xf32>
    %415 = arith.addf %398, %414 : vector<16x76xf32>
    %c138 = arith.constant 138 : index
    %416 = memref.load %arg5[%c138] : memref<160xf32, #tpu.memory_space<smem>>
    %417 = vector.broadcast %416 : f32 to vector<16x76xf32>
    %418 = arith.mulf %417, %403 : vector<16x76xf32>
    %419 = arith.addf %402, %418 : vector<16x76xf32>
    %420 = vector.extract_strided_slice %351 {offsets = [0, 4], sizes = [16, 76], strides = [1, 1]} : vector<16x80xf32> to vector<16x76xf32>
    %c19 = arith.constant 19 : index
    %421 = memref.load %arg5[%c19] : memref<160xf32, #tpu.memory_space<smem>>
    %422 = vector.broadcast %421 : f32 to vector<16x76xf32>
    %423 = arith.mulf %422, %420 : vector<16x76xf32>
    %424 = arith.addf %407, %423 : vector<16x76xf32>
    %c59 = arith.constant 59 : index
    %425 = memref.load %arg5[%c59] : memref<160xf32, #tpu.memory_space<smem>>
    %426 = vector.broadcast %425 : f32 to vector<16x76xf32>
    %427 = arith.mulf %426, %420 : vector<16x76xf32>
    %428 = arith.addf %411, %427 : vector<16x76xf32>
    %c99 = arith.constant 99 : index
    %429 = memref.load %arg5[%c99] : memref<160xf32, #tpu.memory_space<smem>>
    %430 = vector.broadcast %429 : f32 to vector<16x76xf32>
    %431 = arith.mulf %430, %420 : vector<16x76xf32>
    %432 = arith.addf %415, %431 : vector<16x76xf32>
    %c139 = arith.constant 139 : index
    %433 = memref.load %arg5[%c139] : memref<160xf32, #tpu.memory_space<smem>>
    %434 = vector.broadcast %433 : f32 to vector<16x76xf32>
    %435 = arith.mulf %434, %420 : vector<16x76xf32>
    %436 = arith.addf %419, %435 : vector<16x76xf32>
    %437 = vector.extract_strided_slice %76 {offsets = [64, 0], sizes = [16, 80], strides = [1, 1]} : vector<128x80xf32> to vector<16x80xf32>
    %438 = vector.extract_strided_slice %437 {offsets = [0, 0], sizes = [16, 76], strides = [1, 1]} : vector<16x80xf32> to vector<16x76xf32>
    %c20 = arith.constant 20 : index
    %439 = memref.load %arg5[%c20] : memref<160xf32, #tpu.memory_space<smem>>
    %440 = vector.broadcast %439 : f32 to vector<16x76xf32>
    %441 = arith.mulf %440, %438 : vector<16x76xf32>
    %442 = arith.addf %424, %441 : vector<16x76xf32>
    %c60 = arith.constant 60 : index
    %443 = memref.load %arg5[%c60] : memref<160xf32, #tpu.memory_space<smem>>
    %444 = vector.broadcast %443 : f32 to vector<16x76xf32>
    %445 = arith.mulf %444, %438 : vector<16x76xf32>
    %446 = arith.addf %428, %445 : vector<16x76xf32>
    %c100 = arith.constant 100 : index
    %447 = memref.load %arg5[%c100] : memref<160xf32, #tpu.memory_space<smem>>
    %448 = vector.broadcast %447 : f32 to vector<16x76xf32>
    %449 = arith.mulf %448, %438 : vector<16x76xf32>
    %450 = arith.addf %432, %449 : vector<16x76xf32>
    %c140 = arith.constant 140 : index
    %451 = memref.load %arg5[%c140] : memref<160xf32, #tpu.memory_space<smem>>
    %452 = vector.broadcast %451 : f32 to vector<16x76xf32>
    %453 = arith.mulf %452, %438 : vector<16x76xf32>
    %454 = arith.addf %436, %453 : vector<16x76xf32>
    %455 = vector.extract_strided_slice %437 {offsets = [0, 1], sizes = [16, 76], strides = [1, 1]} : vector<16x80xf32> to vector<16x76xf32>
    %c21 = arith.constant 21 : index
    %456 = memref.load %arg5[%c21] : memref<160xf32, #tpu.memory_space<smem>>
    %457 = vector.broadcast %456 : f32 to vector<16x76xf32>
    %458 = arith.mulf %457, %455 : vector<16x76xf32>
    %459 = arith.addf %442, %458 : vector<16x76xf32>
    %c61 = arith.constant 61 : index
    %460 = memref.load %arg5[%c61] : memref<160xf32, #tpu.memory_space<smem>>
    %461 = vector.broadcast %460 : f32 to vector<16x76xf32>
    %462 = arith.mulf %461, %455 : vector<16x76xf32>
    %463 = arith.addf %446, %462 : vector<16x76xf32>
    %c101 = arith.constant 101 : index
    %464 = memref.load %arg5[%c101] : memref<160xf32, #tpu.memory_space<smem>>
    %465 = vector.broadcast %464 : f32 to vector<16x76xf32>
    %466 = arith.mulf %465, %455 : vector<16x76xf32>
    %467 = arith.addf %450, %466 : vector<16x76xf32>
    %c141 = arith.constant 141 : index
    %468 = memref.load %arg5[%c141] : memref<160xf32, #tpu.memory_space<smem>>
    %469 = vector.broadcast %468 : f32 to vector<16x76xf32>
    %470 = arith.mulf %469, %455 : vector<16x76xf32>
    %471 = arith.addf %454, %470 : vector<16x76xf32>
    %472 = vector.extract_strided_slice %437 {offsets = [0, 2], sizes = [16, 76], strides = [1, 1]} : vector<16x80xf32> to vector<16x76xf32>
    %c22 = arith.constant 22 : index
    %473 = memref.load %arg5[%c22] : memref<160xf32, #tpu.memory_space<smem>>
    %474 = vector.broadcast %473 : f32 to vector<16x76xf32>
    %475 = arith.mulf %474, %472 : vector<16x76xf32>
    %476 = arith.addf %459, %475 : vector<16x76xf32>
    %c62 = arith.constant 62 : index
    %477 = memref.load %arg5[%c62] : memref<160xf32, #tpu.memory_space<smem>>
    %478 = vector.broadcast %477 : f32 to vector<16x76xf32>
    %479 = arith.mulf %478, %472 : vector<16x76xf32>
    %480 = arith.addf %463, %479 : vector<16x76xf32>
    %c102 = arith.constant 102 : index
    %481 = memref.load %arg5[%c102] : memref<160xf32, #tpu.memory_space<smem>>
    %482 = vector.broadcast %481 : f32 to vector<16x76xf32>
    %483 = arith.mulf %482, %472 : vector<16x76xf32>
    %484 = arith.addf %467, %483 : vector<16x76xf32>
    %c142 = arith.constant 142 : index
    %485 = memref.load %arg5[%c142] : memref<160xf32, #tpu.memory_space<smem>>
    %486 = vector.broadcast %485 : f32 to vector<16x76xf32>
    %487 = arith.mulf %486, %472 : vector<16x76xf32>
    %488 = arith.addf %471, %487 : vector<16x76xf32>
    %489 = vector.extract_strided_slice %437 {offsets = [0, 3], sizes = [16, 76], strides = [1, 1]} : vector<16x80xf32> to vector<16x76xf32>
    %c23 = arith.constant 23 : index
    %490 = memref.load %arg5[%c23] : memref<160xf32, #tpu.memory_space<smem>>
    %491 = vector.broadcast %490 : f32 to vector<16x76xf32>
    %492 = arith.mulf %491, %489 : vector<16x76xf32>
    %493 = arith.addf %476, %492 : vector<16x76xf32>
    %c63 = arith.constant 63 : index
    %494 = memref.load %arg5[%c63] : memref<160xf32, #tpu.memory_space<smem>>
    %495 = vector.broadcast %494 : f32 to vector<16x76xf32>
    %496 = arith.mulf %495, %489 : vector<16x76xf32>
    %497 = arith.addf %480, %496 : vector<16x76xf32>
    %c103 = arith.constant 103 : index
    %498 = memref.load %arg5[%c103] : memref<160xf32, #tpu.memory_space<smem>>
    %499 = vector.broadcast %498 : f32 to vector<16x76xf32>
    %500 = arith.mulf %499, %489 : vector<16x76xf32>
    %501 = arith.addf %484, %500 : vector<16x76xf32>
    %c143 = arith.constant 143 : index
    %502 = memref.load %arg5[%c143] : memref<160xf32, #tpu.memory_space<smem>>
    %503 = vector.broadcast %502 : f32 to vector<16x76xf32>
    %504 = arith.mulf %503, %489 : vector<16x76xf32>
    %505 = arith.addf %488, %504 : vector<16x76xf32>
    %506 = vector.extract_strided_slice %437 {offsets = [0, 4], sizes = [16, 76], strides = [1, 1]} : vector<16x80xf32> to vector<16x76xf32>
    %c24 = arith.constant 24 : index
    %507 = memref.load %arg5[%c24] : memref<160xf32, #tpu.memory_space<smem>>
    %508 = vector.broadcast %507 : f32 to vector<16x76xf32>
    %509 = arith.mulf %508, %506 : vector<16x76xf32>
    %510 = arith.addf %493, %509 : vector<16x76xf32>
    %c64 = arith.constant 64 : index
    %511 = memref.load %arg5[%c64] : memref<160xf32, #tpu.memory_space<smem>>
    %512 = vector.broadcast %511 : f32 to vector<16x76xf32>
    %513 = arith.mulf %512, %506 : vector<16x76xf32>
    %514 = arith.addf %497, %513 : vector<16x76xf32>
    %c104 = arith.constant 104 : index
    %515 = memref.load %arg5[%c104] : memref<160xf32, #tpu.memory_space<smem>>
    %516 = vector.broadcast %515 : f32 to vector<16x76xf32>
    %517 = arith.mulf %516, %506 : vector<16x76xf32>
    %518 = arith.addf %501, %517 : vector<16x76xf32>
    %c144 = arith.constant 144 : index
    %519 = memref.load %arg5[%c144] : memref<160xf32, #tpu.memory_space<smem>>
    %520 = vector.broadcast %519 : f32 to vector<16x76xf32>
    %521 = arith.mulf %520, %506 : vector<16x76xf32>
    %522 = arith.addf %505, %521 : vector<16x76xf32>
    %523 = vector.extract_strided_slice %76 {offsets = [80, 0], sizes = [16, 80], strides = [1, 1]} : vector<128x80xf32> to vector<16x80xf32>
    %524 = vector.extract_strided_slice %523 {offsets = [0, 0], sizes = [16, 76], strides = [1, 1]} : vector<16x80xf32> to vector<16x76xf32>
    %c25 = arith.constant 25 : index
    %525 = memref.load %arg5[%c25] : memref<160xf32, #tpu.memory_space<smem>>
    %526 = vector.broadcast %525 : f32 to vector<16x76xf32>
    %527 = arith.mulf %526, %524 : vector<16x76xf32>
    %528 = arith.addf %510, %527 : vector<16x76xf32>
    %c65 = arith.constant 65 : index
    %529 = memref.load %arg5[%c65] : memref<160xf32, #tpu.memory_space<smem>>
    %530 = vector.broadcast %529 : f32 to vector<16x76xf32>
    %531 = arith.mulf %530, %524 : vector<16x76xf32>
    %532 = arith.addf %514, %531 : vector<16x76xf32>
    %c105 = arith.constant 105 : index
    %533 = memref.load %arg5[%c105] : memref<160xf32, #tpu.memory_space<smem>>
    %534 = vector.broadcast %533 : f32 to vector<16x76xf32>
    %535 = arith.mulf %534, %524 : vector<16x76xf32>
    %536 = arith.addf %518, %535 : vector<16x76xf32>
    %c145 = arith.constant 145 : index
    %537 = memref.load %arg5[%c145] : memref<160xf32, #tpu.memory_space<smem>>
    %538 = vector.broadcast %537 : f32 to vector<16x76xf32>
    %539 = arith.mulf %538, %524 : vector<16x76xf32>
    %540 = arith.addf %522, %539 : vector<16x76xf32>
    %541 = vector.extract_strided_slice %523 {offsets = [0, 1], sizes = [16, 76], strides = [1, 1]} : vector<16x80xf32> to vector<16x76xf32>
    %c26 = arith.constant 26 : index
    %542 = memref.load %arg5[%c26] : memref<160xf32, #tpu.memory_space<smem>>
    %543 = vector.broadcast %542 : f32 to vector<16x76xf32>
    %544 = arith.mulf %543, %541 : vector<16x76xf32>
    %545 = arith.addf %528, %544 : vector<16x76xf32>
    %c66 = arith.constant 66 : index
    %546 = memref.load %arg5[%c66] : memref<160xf32, #tpu.memory_space<smem>>
    %547 = vector.broadcast %546 : f32 to vector<16x76xf32>
    %548 = arith.mulf %547, %541 : vector<16x76xf32>
    %549 = arith.addf %532, %548 : vector<16x76xf32>
    %c106 = arith.constant 106 : index
    %550 = memref.load %arg5[%c106] : memref<160xf32, #tpu.memory_space<smem>>
    %551 = vector.broadcast %550 : f32 to vector<16x76xf32>
    %552 = arith.mulf %551, %541 : vector<16x76xf32>
    %553 = arith.addf %536, %552 : vector<16x76xf32>
    %c146 = arith.constant 146 : index
    %554 = memref.load %arg5[%c146] : memref<160xf32, #tpu.memory_space<smem>>
    %555 = vector.broadcast %554 : f32 to vector<16x76xf32>
    %556 = arith.mulf %555, %541 : vector<16x76xf32>
    %557 = arith.addf %540, %556 : vector<16x76xf32>
    %558 = vector.extract_strided_slice %523 {offsets = [0, 2], sizes = [16, 76], strides = [1, 1]} : vector<16x80xf32> to vector<16x76xf32>
    %c27 = arith.constant 27 : index
    %559 = memref.load %arg5[%c27] : memref<160xf32, #tpu.memory_space<smem>>
    %560 = vector.broadcast %559 : f32 to vector<16x76xf32>
    %561 = arith.mulf %560, %558 : vector<16x76xf32>
    %562 = arith.addf %545, %561 : vector<16x76xf32>
    %c67 = arith.constant 67 : index
    %563 = memref.load %arg5[%c67] : memref<160xf32, #tpu.memory_space<smem>>
    %564 = vector.broadcast %563 : f32 to vector<16x76xf32>
    %565 = arith.mulf %564, %558 : vector<16x76xf32>
    %566 = arith.addf %549, %565 : vector<16x76xf32>
    %c107 = arith.constant 107 : index
    %567 = memref.load %arg5[%c107] : memref<160xf32, #tpu.memory_space<smem>>
    %568 = vector.broadcast %567 : f32 to vector<16x76xf32>
    %569 = arith.mulf %568, %558 : vector<16x76xf32>
    %570 = arith.addf %553, %569 : vector<16x76xf32>
    %c147 = arith.constant 147 : index
    %571 = memref.load %arg5[%c147] : memref<160xf32, #tpu.memory_space<smem>>
    %572 = vector.broadcast %571 : f32 to vector<16x76xf32>
    %573 = arith.mulf %572, %558 : vector<16x76xf32>
    %574 = arith.addf %557, %573 : vector<16x76xf32>
    %575 = vector.extract_strided_slice %523 {offsets = [0, 3], sizes = [16, 76], strides = [1, 1]} : vector<16x80xf32> to vector<16x76xf32>
    %c28 = arith.constant 28 : index
    %576 = memref.load %arg5[%c28] : memref<160xf32, #tpu.memory_space<smem>>
    %577 = vector.broadcast %576 : f32 to vector<16x76xf32>
    %578 = arith.mulf %577, %575 : vector<16x76xf32>
    %579 = arith.addf %562, %578 : vector<16x76xf32>
    %c68 = arith.constant 68 : index
    %580 = memref.load %arg5[%c68] : memref<160xf32, #tpu.memory_space<smem>>
    %581 = vector.broadcast %580 : f32 to vector<16x76xf32>
    %582 = arith.mulf %581, %575 : vector<16x76xf32>
    %583 = arith.addf %566, %582 : vector<16x76xf32>
    %c108 = arith.constant 108 : index
    %584 = memref.load %arg5[%c108] : memref<160xf32, #tpu.memory_space<smem>>
    %585 = vector.broadcast %584 : f32 to vector<16x76xf32>
    %586 = arith.mulf %585, %575 : vector<16x76xf32>
    %587 = arith.addf %570, %586 : vector<16x76xf32>
    %c148 = arith.constant 148 : index
    %588 = memref.load %arg5[%c148] : memref<160xf32, #tpu.memory_space<smem>>
    %589 = vector.broadcast %588 : f32 to vector<16x76xf32>
    %590 = arith.mulf %589, %575 : vector<16x76xf32>
    %591 = arith.addf %574, %590 : vector<16x76xf32>
    %592 = vector.extract_strided_slice %523 {offsets = [0, 4], sizes = [16, 76], strides = [1, 1]} : vector<16x80xf32> to vector<16x76xf32>
    %c29 = arith.constant 29 : index
    %593 = memref.load %arg5[%c29] : memref<160xf32, #tpu.memory_space<smem>>
    %594 = vector.broadcast %593 : f32 to vector<16x76xf32>
    %595 = arith.mulf %594, %592 : vector<16x76xf32>
    %596 = arith.addf %579, %595 : vector<16x76xf32>
    %c69 = arith.constant 69 : index
    %597 = memref.load %arg5[%c69] : memref<160xf32, #tpu.memory_space<smem>>
    %598 = vector.broadcast %597 : f32 to vector<16x76xf32>
    %599 = arith.mulf %598, %592 : vector<16x76xf32>
    %600 = arith.addf %583, %599 : vector<16x76xf32>
    %c109 = arith.constant 109 : index
    %601 = memref.load %arg5[%c109] : memref<160xf32, #tpu.memory_space<smem>>
    %602 = vector.broadcast %601 : f32 to vector<16x76xf32>
    %603 = arith.mulf %602, %592 : vector<16x76xf32>
    %604 = arith.addf %587, %603 : vector<16x76xf32>
    %c149 = arith.constant 149 : index
    %605 = memref.load %arg5[%c149] : memref<160xf32, #tpu.memory_space<smem>>
    %606 = vector.broadcast %605 : f32 to vector<16x76xf32>
    %607 = arith.mulf %606, %592 : vector<16x76xf32>
    %608 = arith.addf %591, %607 : vector<16x76xf32>
    %609 = vector.extract_strided_slice %76 {offsets = [96, 0], sizes = [16, 80], strides = [1, 1]} : vector<128x80xf32> to vector<16x80xf32>
    %610 = vector.extract_strided_slice %609 {offsets = [0, 0], sizes = [16, 76], strides = [1, 1]} : vector<16x80xf32> to vector<16x76xf32>
    %c30 = arith.constant 30 : index
    %611 = memref.load %arg5[%c30] : memref<160xf32, #tpu.memory_space<smem>>
    %612 = vector.broadcast %611 : f32 to vector<16x76xf32>
    %613 = arith.mulf %612, %610 : vector<16x76xf32>
    %614 = arith.addf %596, %613 : vector<16x76xf32>
    %c70 = arith.constant 70 : index
    %615 = memref.load %arg5[%c70] : memref<160xf32, #tpu.memory_space<smem>>
    %616 = vector.broadcast %615 : f32 to vector<16x76xf32>
    %617 = arith.mulf %616, %610 : vector<16x76xf32>
    %618 = arith.addf %600, %617 : vector<16x76xf32>
    %c110 = arith.constant 110 : index
    %619 = memref.load %arg5[%c110] : memref<160xf32, #tpu.memory_space<smem>>
    %620 = vector.broadcast %619 : f32 to vector<16x76xf32>
    %621 = arith.mulf %620, %610 : vector<16x76xf32>
    %622 = arith.addf %604, %621 : vector<16x76xf32>
    %c150 = arith.constant 150 : index
    %623 = memref.load %arg5[%c150] : memref<160xf32, #tpu.memory_space<smem>>
    %624 = vector.broadcast %623 : f32 to vector<16x76xf32>
    %625 = arith.mulf %624, %610 : vector<16x76xf32>
    %626 = arith.addf %608, %625 : vector<16x76xf32>
    %627 = vector.extract_strided_slice %609 {offsets = [0, 1], sizes = [16, 76], strides = [1, 1]} : vector<16x80xf32> to vector<16x76xf32>
    %c31 = arith.constant 31 : index
    %628 = memref.load %arg5[%c31] : memref<160xf32, #tpu.memory_space<smem>>
    %629 = vector.broadcast %628 : f32 to vector<16x76xf32>
    %630 = arith.mulf %629, %627 : vector<16x76xf32>
    %631 = arith.addf %614, %630 : vector<16x76xf32>
    %c71 = arith.constant 71 : index
    %632 = memref.load %arg5[%c71] : memref<160xf32, #tpu.memory_space<smem>>
    %633 = vector.broadcast %632 : f32 to vector<16x76xf32>
    %634 = arith.mulf %633, %627 : vector<16x76xf32>
    %635 = arith.addf %618, %634 : vector<16x76xf32>
    %c111 = arith.constant 111 : index
    %636 = memref.load %arg5[%c111] : memref<160xf32, #tpu.memory_space<smem>>
    %637 = vector.broadcast %636 : f32 to vector<16x76xf32>
    %638 = arith.mulf %637, %627 : vector<16x76xf32>
    %639 = arith.addf %622, %638 : vector<16x76xf32>
    %c151 = arith.constant 151 : index
    %640 = memref.load %arg5[%c151] : memref<160xf32, #tpu.memory_space<smem>>
    %641 = vector.broadcast %640 : f32 to vector<16x76xf32>
    %642 = arith.mulf %641, %627 : vector<16x76xf32>
    %643 = arith.addf %626, %642 : vector<16x76xf32>
    %644 = vector.extract_strided_slice %609 {offsets = [0, 2], sizes = [16, 76], strides = [1, 1]} : vector<16x80xf32> to vector<16x76xf32>
    %c32 = arith.constant 32 : index
    %645 = memref.load %arg5[%c32] : memref<160xf32, #tpu.memory_space<smem>>
    %646 = vector.broadcast %645 : f32 to vector<16x76xf32>
    %647 = arith.mulf %646, %644 : vector<16x76xf32>
    %648 = arith.addf %631, %647 : vector<16x76xf32>
    %c72 = arith.constant 72 : index
    %649 = memref.load %arg5[%c72] : memref<160xf32, #tpu.memory_space<smem>>
    %650 = vector.broadcast %649 : f32 to vector<16x76xf32>
    %651 = arith.mulf %650, %644 : vector<16x76xf32>
    %652 = arith.addf %635, %651 : vector<16x76xf32>
    %c112 = arith.constant 112 : index
    %653 = memref.load %arg5[%c112] : memref<160xf32, #tpu.memory_space<smem>>
    %654 = vector.broadcast %653 : f32 to vector<16x76xf32>
    %655 = arith.mulf %654, %644 : vector<16x76xf32>
    %656 = arith.addf %639, %655 : vector<16x76xf32>
    %c152 = arith.constant 152 : index
    %657 = memref.load %arg5[%c152] : memref<160xf32, #tpu.memory_space<smem>>
    %658 = vector.broadcast %657 : f32 to vector<16x76xf32>
    %659 = arith.mulf %658, %644 : vector<16x76xf32>
    %660 = arith.addf %643, %659 : vector<16x76xf32>
    %661 = vector.extract_strided_slice %609 {offsets = [0, 3], sizes = [16, 76], strides = [1, 1]} : vector<16x80xf32> to vector<16x76xf32>
    %c33 = arith.constant 33 : index
    %662 = memref.load %arg5[%c33] : memref<160xf32, #tpu.memory_space<smem>>
    %663 = vector.broadcast %662 : f32 to vector<16x76xf32>
    %664 = arith.mulf %663, %661 : vector<16x76xf32>
    %665 = arith.addf %648, %664 : vector<16x76xf32>
    %c73 = arith.constant 73 : index
    %666 = memref.load %arg5[%c73] : memref<160xf32, #tpu.memory_space<smem>>
    %667 = vector.broadcast %666 : f32 to vector<16x76xf32>
    %668 = arith.mulf %667, %661 : vector<16x76xf32>
    %669 = arith.addf %652, %668 : vector<16x76xf32>
    %c113 = arith.constant 113 : index
    %670 = memref.load %arg5[%c113] : memref<160xf32, #tpu.memory_space<smem>>
    %671 = vector.broadcast %670 : f32 to vector<16x76xf32>
    %672 = arith.mulf %671, %661 : vector<16x76xf32>
    %673 = arith.addf %656, %672 : vector<16x76xf32>
    %c153 = arith.constant 153 : index
    %674 = memref.load %arg5[%c153] : memref<160xf32, #tpu.memory_space<smem>>
    %675 = vector.broadcast %674 : f32 to vector<16x76xf32>
    %676 = arith.mulf %675, %661 : vector<16x76xf32>
    %677 = arith.addf %660, %676 : vector<16x76xf32>
    %678 = vector.extract_strided_slice %609 {offsets = [0, 4], sizes = [16, 76], strides = [1, 1]} : vector<16x80xf32> to vector<16x76xf32>
    %c34 = arith.constant 34 : index
    %679 = memref.load %arg5[%c34] : memref<160xf32, #tpu.memory_space<smem>>
    %680 = vector.broadcast %679 : f32 to vector<16x76xf32>
    %681 = arith.mulf %680, %678 : vector<16x76xf32>
    %682 = arith.addf %665, %681 : vector<16x76xf32>
    %c74 = arith.constant 74 : index
    %683 = memref.load %arg5[%c74] : memref<160xf32, #tpu.memory_space<smem>>
    %684 = vector.broadcast %683 : f32 to vector<16x76xf32>
    %685 = arith.mulf %684, %678 : vector<16x76xf32>
    %686 = arith.addf %669, %685 : vector<16x76xf32>
    %c114 = arith.constant 114 : index
    %687 = memref.load %arg5[%c114] : memref<160xf32, #tpu.memory_space<smem>>
    %688 = vector.broadcast %687 : f32 to vector<16x76xf32>
    %689 = arith.mulf %688, %678 : vector<16x76xf32>
    %690 = arith.addf %673, %689 : vector<16x76xf32>
    %c154 = arith.constant 154 : index
    %691 = memref.load %arg5[%c154] : memref<160xf32, #tpu.memory_space<smem>>
    %692 = vector.broadcast %691 : f32 to vector<16x76xf32>
    %693 = arith.mulf %692, %678 : vector<16x76xf32>
    %694 = arith.addf %677, %693 : vector<16x76xf32>
    %695 = vector.extract_strided_slice %76 {offsets = [112, 0], sizes = [16, 80], strides = [1, 1]} : vector<128x80xf32> to vector<16x80xf32>
    %696 = vector.extract_strided_slice %695 {offsets = [0, 0], sizes = [16, 76], strides = [1, 1]} : vector<16x80xf32> to vector<16x76xf32>
    %c35 = arith.constant 35 : index
    %697 = memref.load %arg5[%c35] : memref<160xf32, #tpu.memory_space<smem>>
    %698 = vector.broadcast %697 : f32 to vector<16x76xf32>
    %699 = arith.mulf %698, %696 : vector<16x76xf32>
    %700 = arith.addf %682, %699 : vector<16x76xf32>
    %c75 = arith.constant 75 : index
    %701 = memref.load %arg5[%c75] : memref<160xf32, #tpu.memory_space<smem>>
    %702 = vector.broadcast %701 : f32 to vector<16x76xf32>
    %703 = arith.mulf %702, %696 : vector<16x76xf32>
    %704 = arith.addf %686, %703 : vector<16x76xf32>
    %c115 = arith.constant 115 : index
    %705 = memref.load %arg5[%c115] : memref<160xf32, #tpu.memory_space<smem>>
    %706 = vector.broadcast %705 : f32 to vector<16x76xf32>
    %707 = arith.mulf %706, %696 : vector<16x76xf32>
    %708 = arith.addf %690, %707 : vector<16x76xf32>
    %c155 = arith.constant 155 : index
    %709 = memref.load %arg5[%c155] : memref<160xf32, #tpu.memory_space<smem>>
    %710 = vector.broadcast %709 : f32 to vector<16x76xf32>
    %711 = arith.mulf %710, %696 : vector<16x76xf32>
    %712 = arith.addf %694, %711 : vector<16x76xf32>
    %713 = vector.extract_strided_slice %695 {offsets = [0, 1], sizes = [16, 76], strides = [1, 1]} : vector<16x80xf32> to vector<16x76xf32>
    %c36 = arith.constant 36 : index
    %714 = memref.load %arg5[%c36] : memref<160xf32, #tpu.memory_space<smem>>
    %715 = vector.broadcast %714 : f32 to vector<16x76xf32>
    %716 = arith.mulf %715, %713 : vector<16x76xf32>
    %717 = arith.addf %700, %716 : vector<16x76xf32>
    %c76 = arith.constant 76 : index
    %718 = memref.load %arg5[%c76] : memref<160xf32, #tpu.memory_space<smem>>
    %719 = vector.broadcast %718 : f32 to vector<16x76xf32>
    %720 = arith.mulf %719, %713 : vector<16x76xf32>
    %721 = arith.addf %704, %720 : vector<16x76xf32>
    %c116 = arith.constant 116 : index
    %722 = memref.load %arg5[%c116] : memref<160xf32, #tpu.memory_space<smem>>
    %723 = vector.broadcast %722 : f32 to vector<16x76xf32>
    %724 = arith.mulf %723, %713 : vector<16x76xf32>
    %725 = arith.addf %708, %724 : vector<16x76xf32>
    %c156 = arith.constant 156 : index
    %726 = memref.load %arg5[%c156] : memref<160xf32, #tpu.memory_space<smem>>
    %727 = vector.broadcast %726 : f32 to vector<16x76xf32>
    %728 = arith.mulf %727, %713 : vector<16x76xf32>
    %729 = arith.addf %712, %728 : vector<16x76xf32>
    %730 = vector.extract_strided_slice %695 {offsets = [0, 2], sizes = [16, 76], strides = [1, 1]} : vector<16x80xf32> to vector<16x76xf32>
    %c37 = arith.constant 37 : index
    %731 = memref.load %arg5[%c37] : memref<160xf32, #tpu.memory_space<smem>>
    %732 = vector.broadcast %731 : f32 to vector<16x76xf32>
    %733 = arith.mulf %732, %730 : vector<16x76xf32>
    %734 = arith.addf %717, %733 : vector<16x76xf32>
    %c77 = arith.constant 77 : index
    %735 = memref.load %arg5[%c77] : memref<160xf32, #tpu.memory_space<smem>>
    %736 = vector.broadcast %735 : f32 to vector<16x76xf32>
    %737 = arith.mulf %736, %730 : vector<16x76xf32>
    %738 = arith.addf %721, %737 : vector<16x76xf32>
    %c117 = arith.constant 117 : index
    %739 = memref.load %arg5[%c117] : memref<160xf32, #tpu.memory_space<smem>>
    %740 = vector.broadcast %739 : f32 to vector<16x76xf32>
    %741 = arith.mulf %740, %730 : vector<16x76xf32>
    %742 = arith.addf %725, %741 : vector<16x76xf32>
    %c157 = arith.constant 157 : index
    %743 = memref.load %arg5[%c157] : memref<160xf32, #tpu.memory_space<smem>>
    %744 = vector.broadcast %743 : f32 to vector<16x76xf32>
    %745 = arith.mulf %744, %730 : vector<16x76xf32>
    %746 = arith.addf %729, %745 : vector<16x76xf32>
    %747 = vector.extract_strided_slice %695 {offsets = [0, 3], sizes = [16, 76], strides = [1, 1]} : vector<16x80xf32> to vector<16x76xf32>
    %c38 = arith.constant 38 : index
    %748 = memref.load %arg5[%c38] : memref<160xf32, #tpu.memory_space<smem>>
    %749 = vector.broadcast %748 : f32 to vector<16x76xf32>
    %750 = arith.mulf %749, %747 : vector<16x76xf32>
    %751 = arith.addf %734, %750 : vector<16x76xf32>
    %c78 = arith.constant 78 : index
    %752 = memref.load %arg5[%c78] : memref<160xf32, #tpu.memory_space<smem>>
    %753 = vector.broadcast %752 : f32 to vector<16x76xf32>
    %754 = arith.mulf %753, %747 : vector<16x76xf32>
    %755 = arith.addf %738, %754 : vector<16x76xf32>
    %c118 = arith.constant 118 : index
    %756 = memref.load %arg5[%c118] : memref<160xf32, #tpu.memory_space<smem>>
    %757 = vector.broadcast %756 : f32 to vector<16x76xf32>
    %758 = arith.mulf %757, %747 : vector<16x76xf32>
    %759 = arith.addf %742, %758 : vector<16x76xf32>
    %c158 = arith.constant 158 : index
    %760 = memref.load %arg5[%c158] : memref<160xf32, #tpu.memory_space<smem>>
    %761 = vector.broadcast %760 : f32 to vector<16x76xf32>
    %762 = arith.mulf %761, %747 : vector<16x76xf32>
    %763 = arith.addf %746, %762 : vector<16x76xf32>
    %764 = vector.extract_strided_slice %695 {offsets = [0, 4], sizes = [16, 76], strides = [1, 1]} : vector<16x80xf32> to vector<16x76xf32>
    %c39 = arith.constant 39 : index
    %765 = memref.load %arg5[%c39] : memref<160xf32, #tpu.memory_space<smem>>
    %766 = vector.broadcast %765 : f32 to vector<16x76xf32>
    %767 = arith.mulf %766, %764 : vector<16x76xf32>
    %768 = arith.addf %751, %767 : vector<16x76xf32>
    %c79 = arith.constant 79 : index
    %769 = memref.load %arg5[%c79] : memref<160xf32, #tpu.memory_space<smem>>
    %770 = vector.broadcast %769 : f32 to vector<16x76xf32>
    %771 = arith.mulf %770, %764 : vector<16x76xf32>
    %772 = arith.addf %755, %771 : vector<16x76xf32>
    %c119 = arith.constant 119 : index
    %773 = memref.load %arg5[%c119] : memref<160xf32, #tpu.memory_space<smem>>
    %774 = vector.broadcast %773 : f32 to vector<16x76xf32>
    %775 = arith.mulf %774, %764 : vector<16x76xf32>
    %776 = arith.addf %759, %775 : vector<16x76xf32>
    %c159 = arith.constant 159 : index
    %777 = memref.load %arg5[%c159] : memref<160xf32, #tpu.memory_space<smem>>
    %778 = vector.broadcast %777 : f32 to vector<16x76xf32>
    %779 = arith.mulf %778, %764 : vector<16x76xf32>
    %780 = arith.addf %763, %779 : vector<16x76xf32>
    %781 = tpu.concatenate %768, %772, %776, %780 in 0 : vector<16x76xf32>, vector<16x76xf32>, vector<16x76xf32>, vector<16x76xf32> -> vector<64x76xf32>
    %782 = arith.truncf %781 : vector<64x76xf32> to vector<64x76xbf16>
    %c0_42 = arith.constant 0 : index
    %c0_43 = arith.constant 0 : index
    %783 = vector.load %arg7[%c0_42, %c0_43] : memref<76x38xf32, #tpu.memory_space<vmem>>, vector<76x38xf32>
    %784 = arith.truncf %783 : vector<76x38xf32> to vector<76x38xbf16>
    %cst_44 = arith.constant dense<0.000000e+00> : vector<64x38xf32>
    %785 = tpu.matmul %782, %784, %cst_44 {dimension_numbers = #tpu.dot_dimension_numbers<[1], [0], [0], [1], [0, 0, 1, 1], [], []>} : vector<64x76xbf16>, vector<76x38xbf16>, vector<64x38xf32> -> vector<64x38xf32>
    %cst_45 = arith.constant 0.000000e+00 : f32
    %786 = vector.broadcast %cst_45 : f32 to vector<16x38xf32>
    %c0_46 = arith.constant 0 : index
    %787 = memref.load %arg9[%c0_46] : memref<2xf32, #tpu.memory_space<smem>>
    %788 = vector.broadcast %787 : f32 to vector<16x38xf32>
    %789 = arith.addf %786, %788 : vector<16x38xf32>
    %cst_47 = arith.constant 0.000000e+00 : f32
    %790 = vector.broadcast %cst_47 : f32 to vector<16x38xf32>
    %c1_48 = arith.constant 1 : index
    %791 = memref.load %arg9[%c1_48] : memref<2xf32, #tpu.memory_space<smem>>
    %792 = vector.broadcast %791 : f32 to vector<16x38xf32>
    %793 = arith.addf %790, %792 : vector<16x38xf32>
    %794 = vector.extract_strided_slice %785 {offsets = [0, 0], sizes = [16, 38], strides = [1, 1]} : vector<64x38xf32> to vector<16x38xf32>
    %c0_49 = arith.constant 0 : index
    %795 = memref.load %arg8[%c0_49] : memref<8xf32, #tpu.memory_space<smem>>
    %796 = vector.broadcast %795 : f32 to vector<16x38xf32>
    %797 = arith.mulf %796, %794 : vector<16x38xf32>
    %798 = arith.addf %789, %797 : vector<16x38xf32>
    %c4_50 = arith.constant 4 : index
    %799 = memref.load %arg8[%c4_50] : memref<8xf32, #tpu.memory_space<smem>>
    %800 = vector.broadcast %799 : f32 to vector<16x38xf32>
    %801 = arith.mulf %800, %794 : vector<16x38xf32>
    %802 = arith.addf %793, %801 : vector<16x38xf32>
    %803 = vector.extract_strided_slice %785 {offsets = [16, 0], sizes = [16, 38], strides = [1, 1]} : vector<64x38xf32> to vector<16x38xf32>
    %c1_51 = arith.constant 1 : index
    %804 = memref.load %arg8[%c1_51] : memref<8xf32, #tpu.memory_space<smem>>
    %805 = vector.broadcast %804 : f32 to vector<16x38xf32>
    %806 = arith.mulf %805, %803 : vector<16x38xf32>
    %807 = arith.addf %798, %806 : vector<16x38xf32>
    %c5_52 = arith.constant 5 : index
    %808 = memref.load %arg8[%c5_52] : memref<8xf32, #tpu.memory_space<smem>>
    %809 = vector.broadcast %808 : f32 to vector<16x38xf32>
    %810 = arith.mulf %809, %803 : vector<16x38xf32>
    %811 = arith.addf %802, %810 : vector<16x38xf32>
    %812 = vector.extract_strided_slice %785 {offsets = [32, 0], sizes = [16, 38], strides = [1, 1]} : vector<64x38xf32> to vector<16x38xf32>
    %c2_53 = arith.constant 2 : index
    %813 = memref.load %arg8[%c2_53] : memref<8xf32, #tpu.memory_space<smem>>
    %814 = vector.broadcast %813 : f32 to vector<16x38xf32>
    %815 = arith.mulf %814, %812 : vector<16x38xf32>
    %816 = arith.addf %807, %815 : vector<16x38xf32>
    %c6_54 = arith.constant 6 : index
    %817 = memref.load %arg8[%c6_54] : memref<8xf32, #tpu.memory_space<smem>>
    %818 = vector.broadcast %817 : f32 to vector<16x38xf32>
    %819 = arith.mulf %818, %812 : vector<16x38xf32>
    %820 = arith.addf %811, %819 : vector<16x38xf32>
    %821 = vector.extract_strided_slice %785 {offsets = [48, 0], sizes = [16, 38], strides = [1, 1]} : vector<64x38xf32> to vector<16x38xf32>
    %c3_55 = arith.constant 3 : index
    %822 = memref.load %arg8[%c3_55] : memref<8xf32, #tpu.memory_space<smem>>
    %823 = vector.broadcast %822 : f32 to vector<16x38xf32>
    %824 = arith.mulf %823, %821 : vector<16x38xf32>
    %825 = arith.addf %816, %824 : vector<16x38xf32>
    %c7_56 = arith.constant 7 : index
    %826 = memref.load %arg8[%c7_56] : memref<8xf32, #tpu.memory_space<smem>>
    %827 = vector.broadcast %826 : f32 to vector<16x38xf32>
    %828 = arith.mulf %827, %821 : vector<16x38xf32>
    %829 = arith.addf %820, %828 : vector<16x38xf32>
    %830 = tpu.concatenate %825, %829 in 0 : vector<16x38xf32>, vector<16x38xf32> -> vector<32x38xf32>
    %cst_57 = arith.constant 0.000000e+00 : f32
    %831 = vector.broadcast %cst_57 : f32 to vector<16x36xf32>
    %c0_58 = arith.constant 0 : index
    %832 = memref.load %arg11[%c0_58] : memref<8xf32, #tpu.memory_space<smem>>
    %833 = vector.broadcast %832 : f32 to vector<16x36xf32>
    %834 = arith.addf %831, %833 : vector<16x36xf32>
    %cst_59 = arith.constant 0.000000e+00 : f32
    %835 = vector.broadcast %cst_59 : f32 to vector<16x36xf32>
    %c1_60 = arith.constant 1 : index
    %836 = memref.load %arg11[%c1_60] : memref<8xf32, #tpu.memory_space<smem>>
    %837 = vector.broadcast %836 : f32 to vector<16x36xf32>
    %838 = arith.addf %835, %837 : vector<16x36xf32>
    %cst_61 = arith.constant 0.000000e+00 : f32
    %839 = vector.broadcast %cst_61 : f32 to vector<16x36xf32>
    %c2_62 = arith.constant 2 : index
    %840 = memref.load %arg11[%c2_62] : memref<8xf32, #tpu.memory_space<smem>>
    %841 = vector.broadcast %840 : f32 to vector<16x36xf32>
    %842 = arith.addf %839, %841 : vector<16x36xf32>
    %cst_63 = arith.constant 0.000000e+00 : f32
    %843 = vector.broadcast %cst_63 : f32 to vector<16x36xf32>
    %c3_64 = arith.constant 3 : index
    %844 = memref.load %arg11[%c3_64] : memref<8xf32, #tpu.memory_space<smem>>
    %845 = vector.broadcast %844 : f32 to vector<16x36xf32>
    %846 = arith.addf %843, %845 : vector<16x36xf32>
    %cst_65 = arith.constant 0.000000e+00 : f32
    %847 = vector.broadcast %cst_65 : f32 to vector<16x36xf32>
    %c4_66 = arith.constant 4 : index
    %848 = memref.load %arg11[%c4_66] : memref<8xf32, #tpu.memory_space<smem>>
    %849 = vector.broadcast %848 : f32 to vector<16x36xf32>
    %850 = arith.addf %847, %849 : vector<16x36xf32>
    %cst_67 = arith.constant 0.000000e+00 : f32
    %851 = vector.broadcast %cst_67 : f32 to vector<16x36xf32>
    %c5_68 = arith.constant 5 : index
    %852 = memref.load %arg11[%c5_68] : memref<8xf32, #tpu.memory_space<smem>>
    %853 = vector.broadcast %852 : f32 to vector<16x36xf32>
    %854 = arith.addf %851, %853 : vector<16x36xf32>
    %cst_69 = arith.constant 0.000000e+00 : f32
    %855 = vector.broadcast %cst_69 : f32 to vector<16x36xf32>
    %c6_70 = arith.constant 6 : index
    %856 = memref.load %arg11[%c6_70] : memref<8xf32, #tpu.memory_space<smem>>
    %857 = vector.broadcast %856 : f32 to vector<16x36xf32>
    %858 = arith.addf %855, %857 : vector<16x36xf32>
    %cst_71 = arith.constant 0.000000e+00 : f32
    %859 = vector.broadcast %cst_71 : f32 to vector<16x36xf32>
    %c7_72 = arith.constant 7 : index
    %860 = memref.load %arg11[%c7_72] : memref<8xf32, #tpu.memory_space<smem>>
    %861 = vector.broadcast %860 : f32 to vector<16x36xf32>
    %862 = arith.addf %859, %861 : vector<16x36xf32>
    %863 = vector.extract_strided_slice %830 {offsets = [0, 0], sizes = [16, 38], strides = [1, 1]} : vector<32x38xf32> to vector<16x38xf32>
    %864 = vector.extract_strided_slice %863 {offsets = [0, 0], sizes = [16, 36], strides = [1, 1]} : vector<16x38xf32> to vector<16x36xf32>
    %c0_73 = arith.constant 0 : index
    %865 = memref.load %arg10[%c0_73] : memref<48xf32, #tpu.memory_space<smem>>
    %866 = vector.broadcast %865 : f32 to vector<16x36xf32>
    %867 = arith.mulf %866, %864 : vector<16x36xf32>
    %868 = arith.addf %834, %867 : vector<16x36xf32>
    %c6_74 = arith.constant 6 : index
    %869 = memref.load %arg10[%c6_74] : memref<48xf32, #tpu.memory_space<smem>>
    %870 = vector.broadcast %869 : f32 to vector<16x36xf32>
    %871 = arith.mulf %870, %864 : vector<16x36xf32>
    %872 = arith.addf %838, %871 : vector<16x36xf32>
    %c12_75 = arith.constant 12 : index
    %873 = memref.load %arg10[%c12_75] : memref<48xf32, #tpu.memory_space<smem>>
    %874 = vector.broadcast %873 : f32 to vector<16x36xf32>
    %875 = arith.mulf %874, %864 : vector<16x36xf32>
    %876 = arith.addf %842, %875 : vector<16x36xf32>
    %c18_76 = arith.constant 18 : index
    %877 = memref.load %arg10[%c18_76] : memref<48xf32, #tpu.memory_space<smem>>
    %878 = vector.broadcast %877 : f32 to vector<16x36xf32>
    %879 = arith.mulf %878, %864 : vector<16x36xf32>
    %880 = arith.addf %846, %879 : vector<16x36xf32>
    %c24_77 = arith.constant 24 : index
    %881 = memref.load %arg10[%c24_77] : memref<48xf32, #tpu.memory_space<smem>>
    %882 = vector.broadcast %881 : f32 to vector<16x36xf32>
    %883 = arith.mulf %882, %864 : vector<16x36xf32>
    %884 = arith.addf %850, %883 : vector<16x36xf32>
    %c30_78 = arith.constant 30 : index
    %885 = memref.load %arg10[%c30_78] : memref<48xf32, #tpu.memory_space<smem>>
    %886 = vector.broadcast %885 : f32 to vector<16x36xf32>
    %887 = arith.mulf %886, %864 : vector<16x36xf32>
    %888 = arith.addf %854, %887 : vector<16x36xf32>
    %c36_79 = arith.constant 36 : index
    %889 = memref.load %arg10[%c36_79] : memref<48xf32, #tpu.memory_space<smem>>
    %890 = vector.broadcast %889 : f32 to vector<16x36xf32>
    %891 = arith.mulf %890, %864 : vector<16x36xf32>
    %892 = arith.addf %858, %891 : vector<16x36xf32>
    %c42_80 = arith.constant 42 : index
    %893 = memref.load %arg10[%c42_80] : memref<48xf32, #tpu.memory_space<smem>>
    %894 = vector.broadcast %893 : f32 to vector<16x36xf32>
    %895 = arith.mulf %894, %864 : vector<16x36xf32>
    %896 = arith.addf %862, %895 : vector<16x36xf32>
    %897 = vector.extract_strided_slice %863 {offsets = [0, 1], sizes = [16, 36], strides = [1, 1]} : vector<16x38xf32> to vector<16x36xf32>
    %c1_81 = arith.constant 1 : index
    %898 = memref.load %arg10[%c1_81] : memref<48xf32, #tpu.memory_space<smem>>
    %899 = vector.broadcast %898 : f32 to vector<16x36xf32>
    %900 = arith.mulf %899, %897 : vector<16x36xf32>
    %901 = arith.addf %868, %900 : vector<16x36xf32>
    %c7_82 = arith.constant 7 : index
    %902 = memref.load %arg10[%c7_82] : memref<48xf32, #tpu.memory_space<smem>>
    %903 = vector.broadcast %902 : f32 to vector<16x36xf32>
    %904 = arith.mulf %903, %897 : vector<16x36xf32>
    %905 = arith.addf %872, %904 : vector<16x36xf32>
    %c13_83 = arith.constant 13 : index
    %906 = memref.load %arg10[%c13_83] : memref<48xf32, #tpu.memory_space<smem>>
    %907 = vector.broadcast %906 : f32 to vector<16x36xf32>
    %908 = arith.mulf %907, %897 : vector<16x36xf32>
    %909 = arith.addf %876, %908 : vector<16x36xf32>
    %c19_84 = arith.constant 19 : index
    %910 = memref.load %arg10[%c19_84] : memref<48xf32, #tpu.memory_space<smem>>
    %911 = vector.broadcast %910 : f32 to vector<16x36xf32>
    %912 = arith.mulf %911, %897 : vector<16x36xf32>
    %913 = arith.addf %880, %912 : vector<16x36xf32>
    %c25_85 = arith.constant 25 : index
    %914 = memref.load %arg10[%c25_85] : memref<48xf32, #tpu.memory_space<smem>>
    %915 = vector.broadcast %914 : f32 to vector<16x36xf32>
    %916 = arith.mulf %915, %897 : vector<16x36xf32>
    %917 = arith.addf %884, %916 : vector<16x36xf32>
    %c31_86 = arith.constant 31 : index
    %918 = memref.load %arg10[%c31_86] : memref<48xf32, #tpu.memory_space<smem>>
    %919 = vector.broadcast %918 : f32 to vector<16x36xf32>
    %920 = arith.mulf %919, %897 : vector<16x36xf32>
    %921 = arith.addf %888, %920 : vector<16x36xf32>
    %c37_87 = arith.constant 37 : index
    %922 = memref.load %arg10[%c37_87] : memref<48xf32, #tpu.memory_space<smem>>
    %923 = vector.broadcast %922 : f32 to vector<16x36xf32>
    %924 = arith.mulf %923, %897 : vector<16x36xf32>
    %925 = arith.addf %892, %924 : vector<16x36xf32>
    %c43_88 = arith.constant 43 : index
    %926 = memref.load %arg10[%c43_88] : memref<48xf32, #tpu.memory_space<smem>>
    %927 = vector.broadcast %926 : f32 to vector<16x36xf32>
    %928 = arith.mulf %927, %897 : vector<16x36xf32>
    %929 = arith.addf %896, %928 : vector<16x36xf32>
    %930 = vector.extract_strided_slice %863 {offsets = [0, 2], sizes = [16, 36], strides = [1, 1]} : vector<16x38xf32> to vector<16x36xf32>
    %c2_89 = arith.constant 2 : index
    %931 = memref.load %arg10[%c2_89] : memref<48xf32, #tpu.memory_space<smem>>
    %932 = vector.broadcast %931 : f32 to vector<16x36xf32>
    %933 = arith.mulf %932, %930 : vector<16x36xf32>
    %934 = arith.addf %901, %933 : vector<16x36xf32>
    %c8_90 = arith.constant 8 : index
    %935 = memref.load %arg10[%c8_90] : memref<48xf32, #tpu.memory_space<smem>>
    %936 = vector.broadcast %935 : f32 to vector<16x36xf32>
    %937 = arith.mulf %936, %930 : vector<16x36xf32>
    %938 = arith.addf %905, %937 : vector<16x36xf32>
    %c14_91 = arith.constant 14 : index
    %939 = memref.load %arg10[%c14_91] : memref<48xf32, #tpu.memory_space<smem>>
    %940 = vector.broadcast %939 : f32 to vector<16x36xf32>
    %941 = arith.mulf %940, %930 : vector<16x36xf32>
    %942 = arith.addf %909, %941 : vector<16x36xf32>
    %c20_92 = arith.constant 20 : index
    %943 = memref.load %arg10[%c20_92] : memref<48xf32, #tpu.memory_space<smem>>
    %944 = vector.broadcast %943 : f32 to vector<16x36xf32>
    %945 = arith.mulf %944, %930 : vector<16x36xf32>
    %946 = arith.addf %913, %945 : vector<16x36xf32>
    %c26_93 = arith.constant 26 : index
    %947 = memref.load %arg10[%c26_93] : memref<48xf32, #tpu.memory_space<smem>>
    %948 = vector.broadcast %947 : f32 to vector<16x36xf32>
    %949 = arith.mulf %948, %930 : vector<16x36xf32>
    %950 = arith.addf %917, %949 : vector<16x36xf32>
    %c32_94 = arith.constant 32 : index
    %951 = memref.load %arg10[%c32_94] : memref<48xf32, #tpu.memory_space<smem>>
    %952 = vector.broadcast %951 : f32 to vector<16x36xf32>
    %953 = arith.mulf %952, %930 : vector<16x36xf32>
    %954 = arith.addf %921, %953 : vector<16x36xf32>
    %c38_95 = arith.constant 38 : index
    %955 = memref.load %arg10[%c38_95] : memref<48xf32, #tpu.memory_space<smem>>
    %956 = vector.broadcast %955 : f32 to vector<16x36xf32>
    %957 = arith.mulf %956, %930 : vector<16x36xf32>
    %958 = arith.addf %925, %957 : vector<16x36xf32>
    %c44_96 = arith.constant 44 : index
    %959 = memref.load %arg10[%c44_96] : memref<48xf32, #tpu.memory_space<smem>>
    %960 = vector.broadcast %959 : f32 to vector<16x36xf32>
    %961 = arith.mulf %960, %930 : vector<16x36xf32>
    %962 = arith.addf %929, %961 : vector<16x36xf32>
    %963 = vector.extract_strided_slice %830 {offsets = [16, 0], sizes = [16, 38], strides = [1, 1]} : vector<32x38xf32> to vector<16x38xf32>
    %964 = vector.extract_strided_slice %963 {offsets = [0, 0], sizes = [16, 36], strides = [1, 1]} : vector<16x38xf32> to vector<16x36xf32>
    %c3_97 = arith.constant 3 : index
    %965 = memref.load %arg10[%c3_97] : memref<48xf32, #tpu.memory_space<smem>>
    %966 = vector.broadcast %965 : f32 to vector<16x36xf32>
    %967 = arith.mulf %966, %964 : vector<16x36xf32>
    %968 = arith.addf %934, %967 : vector<16x36xf32>
    %c9_98 = arith.constant 9 : index
    %969 = memref.load %arg10[%c9_98] : memref<48xf32, #tpu.memory_space<smem>>
    %970 = vector.broadcast %969 : f32 to vector<16x36xf32>
    %971 = arith.mulf %970, %964 : vector<16x36xf32>
    %972 = arith.addf %938, %971 : vector<16x36xf32>
    %c15_99 = arith.constant 15 : index
    %973 = memref.load %arg10[%c15_99] : memref<48xf32, #tpu.memory_space<smem>>
    %974 = vector.broadcast %973 : f32 to vector<16x36xf32>
    %975 = arith.mulf %974, %964 : vector<16x36xf32>
    %976 = arith.addf %942, %975 : vector<16x36xf32>
    %c21_100 = arith.constant 21 : index
    %977 = memref.load %arg10[%c21_100] : memref<48xf32, #tpu.memory_space<smem>>
    %978 = vector.broadcast %977 : f32 to vector<16x36xf32>
    %979 = arith.mulf %978, %964 : vector<16x36xf32>
    %980 = arith.addf %946, %979 : vector<16x36xf32>
    %c27_101 = arith.constant 27 : index
    %981 = memref.load %arg10[%c27_101] : memref<48xf32, #tpu.memory_space<smem>>
    %982 = vector.broadcast %981 : f32 to vector<16x36xf32>
    %983 = arith.mulf %982, %964 : vector<16x36xf32>
    %984 = arith.addf %950, %983 : vector<16x36xf32>
    %c33_102 = arith.constant 33 : index
    %985 = memref.load %arg10[%c33_102] : memref<48xf32, #tpu.memory_space<smem>>
    %986 = vector.broadcast %985 : f32 to vector<16x36xf32>
    %987 = arith.mulf %986, %964 : vector<16x36xf32>
    %988 = arith.addf %954, %987 : vector<16x36xf32>
    %c39_103 = arith.constant 39 : index
    %989 = memref.load %arg10[%c39_103] : memref<48xf32, #tpu.memory_space<smem>>
    %990 = vector.broadcast %989 : f32 to vector<16x36xf32>
    %991 = arith.mulf %990, %964 : vector<16x36xf32>
    %992 = arith.addf %958, %991 : vector<16x36xf32>
    %c45_104 = arith.constant 45 : index
    %993 = memref.load %arg10[%c45_104] : memref<48xf32, #tpu.memory_space<smem>>
    %994 = vector.broadcast %993 : f32 to vector<16x36xf32>
    %995 = arith.mulf %994, %964 : vector<16x36xf32>
    %996 = arith.addf %962, %995 : vector<16x36xf32>
    %997 = vector.extract_strided_slice %963 {offsets = [0, 1], sizes = [16, 36], strides = [1, 1]} : vector<16x38xf32> to vector<16x36xf32>
    %c4_105 = arith.constant 4 : index
    %998 = memref.load %arg10[%c4_105] : memref<48xf32, #tpu.memory_space<smem>>
    %999 = vector.broadcast %998 : f32 to vector<16x36xf32>
    %1000 = arith.mulf %999, %997 : vector<16x36xf32>
    %1001 = arith.addf %968, %1000 : vector<16x36xf32>
    %c10_106 = arith.constant 10 : index
    %1002 = memref.load %arg10[%c10_106] : memref<48xf32, #tpu.memory_space<smem>>
    %1003 = vector.broadcast %1002 : f32 to vector<16x36xf32>
    %1004 = arith.mulf %1003, %997 : vector<16x36xf32>
    %1005 = arith.addf %972, %1004 : vector<16x36xf32>
    %c16_107 = arith.constant 16 : index
    %1006 = memref.load %arg10[%c16_107] : memref<48xf32, #tpu.memory_space<smem>>
    %1007 = vector.broadcast %1006 : f32 to vector<16x36xf32>
    %1008 = arith.mulf %1007, %997 : vector<16x36xf32>
    %1009 = arith.addf %976, %1008 : vector<16x36xf32>
    %c22_108 = arith.constant 22 : index
    %1010 = memref.load %arg10[%c22_108] : memref<48xf32, #tpu.memory_space<smem>>
    %1011 = vector.broadcast %1010 : f32 to vector<16x36xf32>
    %1012 = arith.mulf %1011, %997 : vector<16x36xf32>
    %1013 = arith.addf %980, %1012 : vector<16x36xf32>
    %c28_109 = arith.constant 28 : index
    %1014 = memref.load %arg10[%c28_109] : memref<48xf32, #tpu.memory_space<smem>>
    %1015 = vector.broadcast %1014 : f32 to vector<16x36xf32>
    %1016 = arith.mulf %1015, %997 : vector<16x36xf32>
    %1017 = arith.addf %984, %1016 : vector<16x36xf32>
    %c34_110 = arith.constant 34 : index
    %1018 = memref.load %arg10[%c34_110] : memref<48xf32, #tpu.memory_space<smem>>
    %1019 = vector.broadcast %1018 : f32 to vector<16x36xf32>
    %1020 = arith.mulf %1019, %997 : vector<16x36xf32>
    %1021 = arith.addf %988, %1020 : vector<16x36xf32>
    %c40_111 = arith.constant 40 : index
    %1022 = memref.load %arg10[%c40_111] : memref<48xf32, #tpu.memory_space<smem>>
    %1023 = vector.broadcast %1022 : f32 to vector<16x36xf32>
    %1024 = arith.mulf %1023, %997 : vector<16x36xf32>
    %1025 = arith.addf %992, %1024 : vector<16x36xf32>
    %c46_112 = arith.constant 46 : index
    %1026 = memref.load %arg10[%c46_112] : memref<48xf32, #tpu.memory_space<smem>>
    %1027 = vector.broadcast %1026 : f32 to vector<16x36xf32>
    %1028 = arith.mulf %1027, %997 : vector<16x36xf32>
    %1029 = arith.addf %996, %1028 : vector<16x36xf32>
    %1030 = vector.extract_strided_slice %963 {offsets = [0, 2], sizes = [16, 36], strides = [1, 1]} : vector<16x38xf32> to vector<16x36xf32>
    %c5_113 = arith.constant 5 : index
    %1031 = memref.load %arg10[%c5_113] : memref<48xf32, #tpu.memory_space<smem>>
    %1032 = vector.broadcast %1031 : f32 to vector<16x36xf32>
    %1033 = arith.mulf %1032, %1030 : vector<16x36xf32>
    %1034 = arith.addf %1001, %1033 : vector<16x36xf32>
    %c11_114 = arith.constant 11 : index
    %1035 = memref.load %arg10[%c11_114] : memref<48xf32, #tpu.memory_space<smem>>
    %1036 = vector.broadcast %1035 : f32 to vector<16x36xf32>
    %1037 = arith.mulf %1036, %1030 : vector<16x36xf32>
    %1038 = arith.addf %1005, %1037 : vector<16x36xf32>
    %c17_115 = arith.constant 17 : index
    %1039 = memref.load %arg10[%c17_115] : memref<48xf32, #tpu.memory_space<smem>>
    %1040 = vector.broadcast %1039 : f32 to vector<16x36xf32>
    %1041 = arith.mulf %1040, %1030 : vector<16x36xf32>
    %1042 = arith.addf %1009, %1041 : vector<16x36xf32>
    %c23_116 = arith.constant 23 : index
    %1043 = memref.load %arg10[%c23_116] : memref<48xf32, #tpu.memory_space<smem>>
    %1044 = vector.broadcast %1043 : f32 to vector<16x36xf32>
    %1045 = arith.mulf %1044, %1030 : vector<16x36xf32>
    %1046 = arith.addf %1013, %1045 : vector<16x36xf32>
    %c29_117 = arith.constant 29 : index
    %1047 = memref.load %arg10[%c29_117] : memref<48xf32, #tpu.memory_space<smem>>
    %1048 = vector.broadcast %1047 : f32 to vector<16x36xf32>
    %1049 = arith.mulf %1048, %1030 : vector<16x36xf32>
    %1050 = arith.addf %1017, %1049 : vector<16x36xf32>
    %c35_118 = arith.constant 35 : index
    %1051 = memref.load %arg10[%c35_118] : memref<48xf32, #tpu.memory_space<smem>>
    %1052 = vector.broadcast %1051 : f32 to vector<16x36xf32>
    %1053 = arith.mulf %1052, %1030 : vector<16x36xf32>
    %1054 = arith.addf %1021, %1053 : vector<16x36xf32>
    %c41_119 = arith.constant 41 : index
    %1055 = memref.load %arg10[%c41_119] : memref<48xf32, #tpu.memory_space<smem>>
    %1056 = vector.broadcast %1055 : f32 to vector<16x36xf32>
    %1057 = arith.mulf %1056, %1030 : vector<16x36xf32>
    %1058 = arith.addf %1025, %1057 : vector<16x36xf32>
    %c47_120 = arith.constant 47 : index
    %1059 = memref.load %arg10[%c47_120] : memref<48xf32, #tpu.memory_space<smem>>
    %1060 = vector.broadcast %1059 : f32 to vector<16x36xf32>
    %1061 = arith.mulf %1060, %1030 : vector<16x36xf32>
    %1062 = arith.addf %1029, %1061 : vector<16x36xf32>
    %1063 = tpu.concatenate %1034, %1038, %1042, %1046, %1050, %1054, %1058, %1062 in 0 : vector<16x36xf32>, vector<16x36xf32>, vector<16x36xf32>, vector<16x36xf32>, vector<16x36xf32>, vector<16x36xf32>, vector<16x36xf32>, vector<16x36xf32> -> vector<128x36xf32>
    %1064 = arith.truncf %1063 : vector<128x36xf32> to vector<128x36xbf16>
    %c0_121 = arith.constant 0 : index
    %c0_122 = arith.constant 0 : index
    %1065 = vector.load %arg12[%c0_121, %c0_122] : memref<36x128xf32, #tpu.memory_space<vmem>>, vector<36x128xf32>
    %1066 = arith.truncf %1065 : vector<36x128xf32> to vector<36x128xbf16>
    %cst_123 = arith.constant dense<0.000000e+00> : vector<128x128xf32>
    %1067 = tpu.matmul %1064, %1066, %cst_123 {dimension_numbers = #tpu.dot_dimension_numbers<[1], [0], [0], [1], [0, 0, 1, 1], [], []>} : vector<128x36xbf16>, vector<36x128xbf16>, vector<128x128xf32> -> vector<128x128xf32>
    %c0_124 = arith.constant 0 : index
    %c0_125 = arith.constant 0 : index
    %1068 = vector.load %arg13[%c0_124, %c0_125] : memref<1x128xf32, #tpu.memory_space<vmem>>, vector<1x128xf32>
    %1069 = vector.broadcast %1068 : vector<1x128xf32> to vector<128x128xf32>
    %1070 = arith.addf %1067, %1069 : vector<128x128xf32>
    %cst_126 = arith.constant dense<0xFF800000> : vector<128xf32>
    %1071 = vector.multi_reduction <maximumf>, %1070, %cst_126 [1] : vector<128x128xf32> to vector<128xf32>
    %1072 = vector.shape_cast %1071 : vector<128xf32> to vector<128x1xf32>
    %1073 = tpu.iota {dimensions = array<i32: 1>} : vector<128x128xi32>
    %1074 = vector.broadcast %1072 : vector<128x1xf32> to vector<128x128xf32>
    %1075 = arith.cmpf oge, %1070, %1074 : vector<128x128xf32>
    %c128_i32 = arith.constant 128 : i32
    %1076 = vector.broadcast %c128_i32 : i32 to vector<128x128xi32>
    %1077 = arith.select %1075, %1073, %1076 : vector<128x128xi1>, vector<128x128xi32>
    %cst_127 = arith.constant dense<2147483647> : vector<128xi32>
    %1078 = vector.multi_reduction <minsi>, %1077, %cst_127 [1] : vector<128x128xi32> to vector<128xi32>
    %1079 = vector.shape_cast %1078 : vector<128xi32> to vector<128x1xi32>
    %1080 = arith.sitofp %1079 : vector<128x1xi32> to vector<128x1xf32>
    %c0_128 = arith.constant 0 : index
    %c0_129 = arith.constant 0 : index
    %1081 = vector.load %arg14[%c0_128, %c0_129] : memref<128x1xf32, #tpu.memory_space<vmem>>, vector<128x1xf32>
    tpu.vector_store %arg14[%c0_128, %c0_129], %1080 {strides = array<i32>} : memref<128x1xf32, #tpu.memory_space<vmem>>, vector<128x1xf32>,
    return
  }
}

</mosaic_0001>

<bundles_post_ra>
// kernel: generator_forward.1
= control target key start
LH: loop header
LB: loop body
LE: loop exit
PB: predicated region body
PF: predicated region fallthrough
CT: control target
= control target key end

     0   :  { %s8024_s0 = inlined_call_operand.vmem [shape: s32[128,1], index: 0, kind: input, shape index: {}]   ;;  %s8025_s1 = inlined_call_operand.vmem [shape: f32[50,80], index: 1, kind: input, shape index: {}]   ;;  %s8026_s2 = inlined_call_operand.vmem [shape: f32[16,80], index: 2, kind: input, shape index: {}]   ;;  %s8027_s3 = inlined_call_operand.vmem [shape: f32[2,16,1], index: 3, kind: input, shape index: {}]   ;;  %s8028_s4 = inlined_call_operand.vmem [shape: f32[2,16,1], index: 4, kind: input, shape index: {}]   ;;  %s8029_s5 = inlined_call_operand.vmem [shape: f32[160], index: 5, kind: input, shape index: {}]   ;;  %s8030_s6 = inlined_call_operand.vmem [shape: f32[4], index: 6, kind: input, shape index: {}]   ;;  %s8031_s7 = inlined_call_operand.vmem [shape: f32[76,38], index: 7, kind: input, shape index: {}]   ;;  %s8032_s8 = inlined_call_operand.vmem [shape: f32[8], index: 8, kind: input, shape index: {}]   ;;  %s8033_s9 = inlined_call_operand.vmem [shape: f32[2], index: 9, kind: input, shape index: {}]   ;;  %s8034_s10 = inlined_call_operand.vmem [shape: f32[48], index: 10, kind: input, shape index: {}]   ;;  %s8035_s11 = inlined_call_operand.vmem [shape: f32[8], index: 11, kind: input, shape index: {}]   ;;  %s8036_s12 = inlined_call_operand.vmem [shape: f32[36,128], index: 12, kind: input, shape index: {}]   ;;  %s8037_s13 = inlined_call_operand.vmem [shape: f32[1,128], index: 13, kind: input, shape index: {}]   ;;  %s8038_s14 = inlined_call_operand.vmem [shape: f32[128,1], index: 14, kind: output, shape index: {}]  }
   0x1   :  { %8304 = sst [smem:[#allocation174_spill]] %s8031_s7 }
   0x2   :  { %8305 = sst [smem:[#allocation175_spill]] %s8036_s12 }
   0x3   :  { %8306 = sst [smem:[#allocation176_spill]] %s8037_s13 }
   0x4   :  { %8307 = sst [smem:[#allocation177_spill]] %s8038_s14 }
   0x5   :  { %19 = vsyncpa [#allocation3], 0 }
   0x6   :  { %20 = vsyncpa [#allocation5], 0 }
   0x7   :  { %21 = vsyncpa [#allocation8], 0  ;;  %s47_s15 = sshll.u32 %s8030_s6, 4  ;;  %s48_s15 = int_to_ptr.vmem [resolvable:$true] %s47_s15 }
   0x8   :  { %22 = vsyncpa [#allocation11], 0  ;;  %s67_s18 = sshll.u32 %s8033_s9, 4  ;;  %s4312_s19 = smov [#allocation4]   ;;  %s68_s18 = int_to_ptr.vmem [resolvable:$true] %s67_s18 }
   0x9   :  { %50 = dma.vmem_to_smem %s48_s15, 16, %s4312_s19, [#allocation5]  }
   0xa   :  { %s4313_s20 = smov [#allocation7]   ;;  %s38_s23 = sshll.u32 %s8029_s5, 4  ;;  %s39_s23 = int_to_ptr.vmem [resolvable:$true] %s38_s23 }
   0xb   :  { %70 = dma.vmem_to_smem %s68_s18, 16, %s4313_s20, [#allocation8]  }
   0xc   :  { %s58_s6 = sshll.u32 %s8032_s8, 4  ;;  %s4314_s26 = smov [#allocation2]   ;;  %s59_s6 = int_to_ptr.vmem [resolvable:$true] %s58_s6 }
   0xd   :  { %41 = dma.vmem_to_smem %s39_s23, 32, %s4314_s26, [#allocation3]  }
   0xe   :  { %s4315_s27 = smov [#allocation6]   ;;  %s76_s29 = sshll.u32 %s8034_s10, 4  ;;  %s77_s29 = int_to_ptr.vmem [resolvable:$true] %s76_s29 }
   0xf   :  { %61 = dma.vmem_to_smem %s59_s6, 16, %s4315_s27, [#allocation5]  }
  0x10   :  { %s85_s16 = sshll.u32 %s8035_s11, 4  ;;  %s4316_s5 = smov [#allocation9]   ;;  %s86_s16 = int_to_ptr.vmem [resolvable:$true] %s85_s16 }
  0x11   :  { %79 = dma.vmem_to_smem %s77_s29, 16, %s4316_s5, [#allocation8]  }
  0x12   :  { %s4317_s17 = smov [#allocation10]  }
  0x13   :  { %88 = dma.vmem_to_smem %s86_s16, 16, %s4317_s17, [#allocation11]  }
  0x14   :  { %4304 = dma.done.wait [#allocation3], 32  }
  0x15   :  { %4305 = vsyncadd [#allocation3], 4294967264 }
  0x16   :  { %4306 = dma.done.wait [#allocation5], 32  }
  0x17   :  { %4307 = vsyncadd [#allocation5], 4294967264 }
  0x18   :  { %4308 = dma.done.wait [#allocation8], 32  }
  0x19   :  { %4309 = vsyncadd [#allocation8], 4294967264 }
  0x1a   :  { %4310 = dma.done.wait [#allocation11], 16  }
  0x1b   :  { %4311 = vsyncadd [#allocation11], 4294967280 }
  0x1c   :  { %117 = sfence }
  0x1d   :  { %v123_v0 = vld [vmem:[%s8024_s0 + $0x20] sm:$0xff]  ;;  %v121_v1 = vld [vmem:[%s8024_s0 + $0x10] sm:$0xff]  ;;  %v4318_v3 = vmov 0   ;;  %v124_v4 = vld [vmem:[%s8024_s0 + $0x28] sm:$0xff]  ;;  %vm261_vm0 = vcmask 1040384   ;;  %v135_v38 = vlaneseq  ;;  %v4319_v43 = vmov 0.0  }
  0x1e   :  { %v119_v2 = vld [vmem:[%s8024_s0] sm:$0xff]  ;;  %4222 = vset.pattern.permute.xlu2 %v4318_v3  ;;  %4221 = vset.pattern.permute.xlu1 %v4318_v3  ;;  %v122_v5 = vld [vmem:[%s8024_s0 + $0x18] sm:$0xff]  ;;  %v120_v6 = vld [vmem:[%s8024_s0 + $0x8] sm:$0xff]  ;;  %vm236_vm3 = vcmask 408576   ;;  %s4920_s15 = sld [smem:[#allocation2 + $0x29]]  ;;  %s8043_s29 = smov 127  }
  0x1f   :  { %4220 = vset.pattern.permute.xlu0 %v4318_v3  ;;  %150 = vperm.xlu2 %4222, %v123_v0   ;;  %v127_v7 = vld [vmem:[%s8024_s0 + $0x40] sm:$0xff]  ;;  %v126_v8 = vld [vmem:[%s8024_s0 + $0x38] sm:$0xff]  ;;  %v125_v9 = vld [vmem:[%s8024_s0 + $0x30] sm:$0xff]  ;;  %v4510_v42 = vand.u32 127, %v135_v38  ;;  %s4922_s16 = sld [smem:[#allocation2 + $0x1]] }
  0x20   :  { %144 = vperm.xlu1 %4221, %v121_v1   ;;  %138 = vperm.xlu0 %4220, %v119_v2   ;;  %v130_v10 = vld [vmem:[%s8024_s0 + $0x58] sm:$0xff]  ;;  %v129_v11 = vld [vmem:[%s8024_s0 + $0x50] sm:$0xff]  ;;  %v128_v12 = vld [vmem:[%s8024_s0 + $0x48] sm:$0xff]  ;;  %s4924_s5 = sld [smem:[#allocation2 + $0x2a]] }
  0x21   :  { %v133_v13 = vld [vmem:[%s8024_s0 + $0x70] sm:$0xff]  ;;  %v132_v14 = vld [vmem:[%s8024_s0 + $0x68] sm:$0xff]  ;;  %v131_v15 = vld [vmem:[%s8024_s0 + $0x60] sm:$0xff]  ;;  %8308 = vst [vmem:[#allocation16_spill] sm:$0xff] %v4510_v42  ;;  %s4928_s17 = sld [smem:[#allocation2 + $0x79]] }
  0x22   :  { %v531_v16 = vld [vmem:[%s8027_s3] sm:$0xff]  ;;  %v134_v18 = vld [vmem:[%s8024_s0 + $0x78] sm:$0xff]  ;;  %v3963_v20 = vld [vmem:[%s8028_s4 + $0x10] sm:$0xff]  ;;  %s4926_s0 = sld [smem:[#allocation2 + $0x2]] }
  0x23   :  { %v559_v17 = vld [vmem:[%s8028_s4] sm:$0xff]  ;;  %v3962_v19 = vld [vmem:[%s8027_s3 + $0x18] sm:$0xff]  ;;  %v532_v21 = vld [vmem:[%s8027_s3 + $0x8] sm:$0xff]  ;;  %s4930_s8 = sld [smem:[#allocation2 + $0x3]] }
  0x24   :  { %v560_v22 = vld [vmem:[%s8028_s4 + $0x8] sm:$0xff]  ;;  %v3961_v23 = vld [vmem:[%s8027_s3 + $0x10] sm:$0xff]  ;;  %v3964_v24 = vld [vmem:[%s8028_s4 + $0x18] sm:$0xff]  ;;  %8310 = sst [smem:[#allocation18_spill]] %s4920_s15 }
  0x25   :  { %v231_v25 = vld [vmem:[%s8025_s1 + $0x30] sm:$0x3]  ;;  %v229_v28 = vld [vmem:[%s8025_s1 + $0x20] sm:$0xff]  ;;  %v230_v29 = vld [vmem:[%s8025_s1 + $0x28] sm:$0xff]  ;;  %8311 = sst [smem:[#allocation19_spill]] %s4922_s16 }
  0x26   :  { %v235_v26 = vpack.c.bf16 %v231_v25, %v231_v25  ;;  %v234_v30 = vpack.c.bf16 %v230_v29, %v229_v28  ;;  %v227_v31 = vld [vmem:[%s8025_s1 + $0x10] sm:$0xff]  ;;  %v228_v32 = vld [vmem:[%s8025_s1 + $0x18] sm:$0xff]  ;;  %v225_v34 = vld [vmem:[%s8025_s1] sm:$0xff]  ;;  %8312 = sst [smem:[#allocation20_spill]] %s4924_s5 }
  0x27   :  { %153 = vperm.xlu2 %4222, %v124_v4   ;;  %v233_v33 = vpack.c.bf16 %v228_v32, %v227_v31  ;;  %v226_v35 = vld [vmem:[%s8025_s1 + $0x8] sm:$0xff]  ;;  %8314 = sst [smem:[#allocation22_spill]] %s4928_s17 }
  0x28   :  { %147 = vperm.xlu1 %4221, %v122_v5   ;;  %141 = vperm.xlu0 %4220, %v120_v6   ;;  %v263_v27 = vsel %vm261_vm0, %v235_v26, 0  ;;  %v232_v36 = vpack.c.bf16 %v226_v35, %v225_v34  ;;  %8313 = sst [smem:[#allocation21_spill]] %s4926_s0 }
  0x29   :  { %269 = vmatpush.bf16.msra.mxu0 %v263_v27  ;;  %4201 = vmatpush.bf16.msra.mxu3 %v263_v27  ;;  %8315 = sst [smem:[#allocation23_spill]] %s4930_s8 }
  0x2a   :  { %s4932_s10 = sld [smem:[#allocation2 + $0x7a]] }
  0x2b   :  { %s4934_s18 = sld [smem:[#allocation2 + $0x52]] }
  0x2c   :  { %s4936_s11 = sld [smem:[#allocation2 + $0x7b]] }
  0x2d   :  { %270 = vmatpush.bf16.msra.mxu0 %v234_v30  ;;  %4202 = vmatpush.bf16.msra.mxu3 %v234_v30  ;;  %s4938_s19 = sld [smem:[#allocation2 + $0x53]] }
  0x2e   :  { %s4940_s20 = sld [smem:[#allocation2 + $0x2b]] }
  0x2f   :  { %162 = vperm.xlu2 %4222, %v127_v7   ;;  %s4942_s21 = sld [smem:[#allocation2 + $0x54]] }
  0x30   :  { %159 = vperm.xlu1 %4221, %v126_v8   ;;  %156 = vperm.xlu0 %4220, %v125_v9   ;;  %8316 = sst [smem:[#allocation24_spill]] %s4932_s10 }
  0x31   :  { %271 = vmatpush.bf16.msra.mxu0 %v233_v33  ;;  %4203 = vmatpush.bf16.msra.mxu3 %v233_v33  ;;  %8317 = sst [smem:[#allocation25_spill]] %s4934_s18 }
  0x32   :  { %8318 = sst [smem:[#allocation26_spill]] %s4936_s11 }
  0x33   :  { %8319 = sst [smem:[#allocation27_spill]] %s4938_s19 }
  0x34   :  { %8320 = sst [smem:[#allocation28_spill]] %s4940_s20 }
  0x35   :  { %272 = vmatpush.bf16.msra.mxu0 %v232_v36  ;;  %4204 = vmatpush.bf16.msra.mxu3 %v232_v36  ;;  %8321 = sst [smem:[#allocation29_spill]] %s4942_s21 }
  0x36   :  { %s4944_s3 = sld [smem:[#allocation2 + $0x2c]] }
  0x37   :  { %171 = vperm.xlu2 %4222, %v130_v10   ;;  %s4946_s22 = sld [smem:[#allocation2 + $0x4]] }
  0x38   :  { %168 = vperm.xlu1 %4221, %v129_v11   ;;  %165 = vperm.xlu0 %4220, %v128_v12   ;;  %s4948_s4 = sld [smem:[#allocation2 + $0x2e]] }
  0x39   :  { %s4952_s23 = sld [smem:[#allocation2 + $0x6]] }
  0x3a   :  { %s4956_s24 = sld [smem:[#allocation2 + $0x7c]] }
  0x3b   :  { %s4958_s25 = sld [smem:[#allocation2 + $0x7]] }
  0x3c   :  { %8322 = sst [smem:[#allocation30_spill]] %s4944_s3 }
  0x3d   :  { %8323 = sst [smem:[#allocation31_spill]] %s4946_s22 }
  0x3e   :  { %8324 = sst [smem:[#allocation32_spill]] %s4948_s4 }
  0x3f   :  { %180 = vperm.xlu2 %4222, %v133_v13   ;;  %8325 = sst [smem:[#allocation33_spill]] %s4952_s23 }
  0x40   :  { %177 = vperm.xlu1 %4221, %v132_v14   ;;  %174 = vperm.xlu0 %4220, %v131_v15   ;;  %8326 = sst [smem:[#allocation34_spill]] %s4956_s24 }
  0x41   :  { %8327 = sst [smem:[#allocation35_spill]] %s4958_s25  ;;  %s8348_s25 = smov 126  }
  0x42   :  { %s4961_s6 = sld [smem:[#allocation2 + $0x7e]] }
  0x43   :  { %s4966_s26 = sld [smem:[#allocation2 + $0x56]] }
  0x44   :  { %s4971_s27 = sld [smem:[#allocation2 + $0x7f]] }
  0x45   :  { %s4973_s9 = sld [smem:[#allocation2 + $0x57]] }
  0x46   :  { %s4984_s1 = sld [smem:[#allocation2 + $0x2f]] }
  0x47   :  { %535 = vperm.xlu2 %4222, %v531_v16   ;;  %v314_v16 = vld [vmem:[%s8026_s2] sm:$0xff]  ;;  %s4986_s28 = sld [smem:[#allocation2 + $0xb]] }
  0x48   :  { %563 = vperm.xlu1 %4221, %v559_v17   ;;  %183 = vperm.xlu0 %4220, %v134_v18   ;;  %8328 = sst [smem:[#allocation36_spill]] %s4961_s6  ;;  %s8061_s6 = smov 125  }
  0x49   :  { %8329 = sst [smem:[#allocation37_spill]] %s4966_s26 }
  0x4a   :  { %8330 = sst [smem:[#allocation38_spill]] %s4971_s27 }
  0x4b   :  { %8331 = sst [smem:[#allocation39_spill]] %s4973_s9 }
  0x4c   :  { %8332 = sst [smem:[#allocation40_spill]] %s4984_s1 }
  0x4d   :  { %s4990_s30 = sld [smem:[#allocation2 + $0x83]] }
  0x4e   :  { %s4993_s14 = sld [smem:[#allocation2 + $0x5b]] }
  0x4f   :  { %795 = vperm.xlu2 %4222, %v3962_v19   ;;  %s4995_s13 = sld [smem:[#allocation2 + $0x33]] }
  0x50   :  { %819 = vperm.xlu1 %4221, %v3963_v20   ;;  %540 = vperm.xlu0 %4220, %v532_v21   ;;  %v315_v20 = vld [vmem:[%s8026_s2 + $0x8] sm:$0xff]  ;;  %s4918_s2 = sld [smem:[#allocation2 + $0x51]] }
  0x51   :  { %s4999_s12 = sld [smem:[#allocation2 + $0x5c]] }
  0x52   :  { %s5002_s7 = sld [smem:[#allocation2 + $0x34]] }
  0x53   :  { %s5024_s1 = sld [smem:[#allocation2 + $0xe]] }
  0x54   :  { %s5030_s9 = sld [smem:[#allocation2 + $0x5d]] }
  0x55   :  { %8333 = sst [smem:[#allocation41_spill]] %s4995_s13 }
  0x56   :  { %8309 = sst [smem:[#allocation17_spill]] %s4918_s2 }
  0x57   :  { %8334 = sst [smem:[#allocation42_spill]] %s4999_s12 }
  0x58   :  { %568 = vperm.xlu0 %4220, %v560_v22   ;;  %8335 = sst [smem:[#allocation43_spill]] %s5002_s7 }
  0x59   :  { %8341 = sst [smem:[#allocation48_spill]] %s5024_s1 }
  0x5a   :  { %8343 = sst [smem:[#allocation50_spill]] %s5030_s9 }
  0x5b   :  { %s5033_s27 = sld [smem:[#allocation2 + $0x86]] }
  0x5c   :  { %s5048_s26 = sld [smem:[#allocation2 + $0x60]] }
  0x60   :  { %790 = vperm.xlu0 %4220, %v3961_v23  }
  0x61   :  { %8344 = sst [smem:[#allocation51_spill]] %s5033_s27 }
  0x62   :  { %8347 = sst [smem:[#allocation54_spill]] %s5048_s26 }
  0x68   :  { %824 = vperm.xlu0 %4220, %v3964_v24  }
  0x79   :  { %v151_v37 = vpop.permute.xlu2 %150 }
  0x7a   :  { %vm189_vm8 = vcmp.eq.s32.totalorder %v4510_v42, %v151_v37 }
  0x7b   :  { %v205_v63 = vsel %vm189_vm8, 1.0, %v4319_v43 }
  0x81   :  { %v154_v39 = vpop.permute.xlu2 %153 }
  0x82   :  { %vm190_vm9 = vcmp.eq.s32.totalorder %v4510_v42, %v154_v39 }
  0x83   :  { %v206_v0 = vsel %vm190_vm9, 1.0, %v4319_v43 }
  0x84   :  { %v219_v3 = vpack.c.bf16 %v206_v0, %v205_v63 }
  0x89   :  { %v163_v47 = vpop.permute.xlu2 %162 }
  0x91   :  { %v172_v52 = vpop.permute.xlu2 %171 }
  0x92   :  { %v145_v40 = vpop.permute.xlu1 %144  ;;  %v139_v41 = vpop.permute.xlu0 %138  ;;  %vm196_vm5 = vcmp.eq.s32.totalorder %v4510_v42, %v172_v52 }
  0x93   :  { %vm185_vm1 = vcmp.eq.s32.totalorder %v4510_v42, %v139_v41  ;;  %vm187_vm6 = vcmp.eq.s32.totalorder %v4510_v42, %v145_v40  ;;  %v212_v56 = vsel %vm196_vm5, 1.0, %v4319_v43 }
  0x94   :  { %v201_v44 = vsel %vm185_vm1, 1.0, %v4319_v43  ;;  %v203_v57 = vsel %vm187_vm6, 1.0, %v4319_v43  ;;  %vm193_vm1 = vcmp.eq.s32.totalorder %v4510_v42, %v163_v47 }
  0x95   :  { %v209_v14 = vsel %vm193_vm1, 1.0, %v4319_v43  ;;  %vm3571_vm1 = vcmask 1041408  }
  0x99   :  { %v181_v6 = vpop.permute.xlu2 %180 }
  0x9a   :  { %v148_v45 = vpop.permute.xlu1 %147  ;;  %v142_v46 = vpop.permute.xlu0 %141  ;;  %vm199_vm15 = vcmp.eq.s32.totalorder %v4510_v42, %v181_v6 }
  0x9b   :  { %vm186_vm2 = vcmp.eq.s32.totalorder %v4510_v42, %v142_v46  ;;  %vm188_vm4 = vcmp.eq.s32.totalorder %v4510_v42, %v148_v45  ;;  %v215_v10 = vsel %vm199_vm15, 1.0, %v4319_v43  ;;  %vm2871_vm15 = vcmask 1045504  }
  0x9c   :  { %v202_v48 = vsel %vm186_vm2, 1.0, %v4319_v43  ;;  %v204_v53 = vsel %vm188_vm4, 1.0, %v4319_v43  ;;  %vm332_vm2 = vcmask 654336  }
  0x9d   :  { %v217_v49 = vpack.c.bf16 %v202_v48, %v201_v44  ;;  %v218_v59 = vpack.c.bf16 %v204_v53, %v203_v57 }
  0x9f   :  { %3953 = vmatmul.msk.bf16.vlgmr.msra.gmra.mxu0 %vm236_vm3, %v217_v49 }
  0xa2   :  { %v160_v50 = vpop.permute.xlu1 %159  ;;  %v157_v51 = vpop.permute.xlu0 %156 }
  0xa3   :  { %vm192_vm12 = vcmp.eq.s32.totalorder %v4510_v42, %v160_v50  ;;  %vm191_vm13 = vcmp.eq.s32.totalorder %v4510_v42, %v157_v51 }
  0xa4   :  { %v208_v7 = vsel %vm192_vm12, 1.0, %v4319_v43  ;;  %v207_v8 = vsel %vm191_vm13, 1.0, %v4319_v43 }
  0xa5   :  { %v220_v11 = vpack.c.bf16 %v208_v7, %v207_v8 }
  0xaa   :  { %v169_v54 = vpop.permute.xlu1 %168  ;;  %v166_v55 = vpop.permute.xlu0 %165 }
  0xab   :  { %vm195_vm7 = vcmp.eq.s32.totalorder %v4510_v42, %v169_v54  ;;  %vm194_vm0 = vcmp.eq.s32.totalorder %v4510_v42, %v166_v55 }
  0xac   :  { %v211_v58 = vsel %vm195_vm7, 1.0, %v4319_v43  ;;  %v210_v13 = vsel %vm194_vm0, 1.0, %v4319_v43  ;;  %vm2858_vm0 = vcmask 621568  }
  0xad   :  { %v222_v60 = vpack.c.bf16 %v212_v56, %v211_v58  ;;  %v221_v15 = vpack.c.bf16 %v210_v13, %v209_v14 }
  0xaf   :  { %3954 = vmatmul.msk.bf16.gmra.mxu0 %vm236_vm3, %v218_v59  ;;  %3958 = vmatmul.msk.bf16.vlgmr.msra.gmra.mxu3 %vm236_vm3, %v222_v60 }
  0xb2   :  { %v178_v61 = vpop.permute.xlu1 %177  ;;  %v175_v62 = vpop.permute.xlu0 %174 }
  0xb3   :  { %vm198_vm10 = vcmp.eq.s32.totalorder %v4510_v42, %v178_v61  ;;  %vm197_vm11 = vcmp.eq.s32.totalorder %v4510_v42, %v175_v62 }
  0xb4   :  { %v214_v1 = vsel %vm198_vm10, 1.0, %v4319_v43  ;;  %v213_v2 = vsel %vm197_vm11, 1.0, %v4319_v43 }
  0xb5   :  { %v223_v4 = vpack.c.bf16 %v214_v1, %v213_v2 }
  0xba   :  { %v184_v5 = vpop.permute.xlu0 %183  ;;  %v4608_v7 = vpop.permute.xlu1 %563 }
  0xbb   :  { %vm200_vm14 = vcmp.eq.s32.totalorder %v4510_v42, %v184_v5 }
  0xbc   :  { %v216_v9 = vsel %vm200_vm14, 1.0, %v4319_v43 }
  0xbd   :  { %v224_v12 = vpack.c.bf16 %v216_v9, %v215_v10 }
  0xbf   :  { %3955 = vmatmul.msk.bf16.gmra.mxu0 %vm236_vm3, %v219_v3  ;;  %3959 = vmatmul.msk.bf16.gmra.mxu3 %vm236_vm3, %v223_v4  ;;  %v4602_v4 = vpop.permute.xlu2 %535 }
  0xc2   :  { %v4600_v3 = vpop.permute.xlu0 %540  ;;  %v4612_v10 = vpop.permute.xlu1 %819 }
  0xc7   :  { %v4606_v6 = vpop.permute.xlu2 %795 }
  0xca   :  { %v4604_v5 = vpop.permute.xlu0 %568 }
  0xcf   :  { %3956 = vmatmul.msk.bf16.gmra.mxu0 %vm236_vm3, %v220_v11  ;;  %3960 = vmatmul.msk.bf16.gmra.mxu3 %vm236_vm3, %v224_v12 }
  0xd2   :  { %v4610_v9 = vpop.permute.xlu0 %790 }
  0xda   :  { %v4614_v12 = vpop.permute.xlu0 %824 }
  0xdf   :  { %3957 = vmatmul.msk.bf16.gmra.mxu0 %vm236_vm3, %v221_v15 }
 0x11c   :  { %v274_v17 = vpop.f32.mrf.mxu0 }
 0x11d   :  { %v4539_v18 = vadd.f32 %v314_v16, %v274_v17 }
 0x11f   :  { %v333_v19 = vsel %vm332_vm2, %v4539_v18, 0.0 }
 0x120   :  { %334 = vadd.xlane.f32.xlu1 %v333_v19 }
 0x124   :  { %v276_v21 = vpop.f32.mrf.mxu0 }
 0x125   :  { %v4546_v22 = vadd.f32 %v315_v20, %v276_v21 }
 0x127   :  { %v336_v23 = vsel %vm332_vm2, %v4546_v22, 0.0 }
 0x128   :  { %337 = vadd.xlane.f32.xlu2 %v336_v23 }
 0x12c   :  { %v279_v24 = vpop.f32.mrf.mxu0 }
 0x12d   :  { %v4550_v25 = vadd.f32 %v314_v16, %v279_v24 }
 0x12f   :  { %v339_v26 = vsel %vm332_vm2, %v4550_v25, 0.0 }
 0x130   :  { %340 = vadd.xlane.f32.xlu0 %v339_v26 }
 0x132   :  { %v299_v27 = vpop.f32.mrf.mxu3 }
 0x133   :  { %v4554_v28 = vadd.f32 %v314_v16, %v299_v27 }
 0x134   :  { %v281_v29 = vpop.f32.mrf.mxu0 }
 0x135   :  { %v363_v30 = vsel %vm332_vm2, %v4554_v28, 0.0  ;;  %v4562_v35 = vadd.f32 %v315_v20, %v281_v29 }
 0x136   :  { %364 = vadd.xlane.f32.xlu1 %v363_v30 }
 0x137   :  { %v342_v39 = vsel %vm332_vm2, %v4562_v35, 0.0 }
 0x13a   :  { %v301_v31 = vpop.f32.mrf.mxu3 }
 0x13b   :  { %v4558_v32 = vadd.f32 %v315_v20, %v301_v31 }
 0x13c   :  { %v284_v33 = vpop.f32.mrf.mxu0 }
 0x13d   :  { %v366_v34 = vsel %vm332_vm2, %v4558_v32, 0.0  ;;  %v4574_v46 = vadd.f32 %v314_v16, %v284_v33 }
 0x13e   :  { %367 = vadd.xlane.f32.xlu2 %v366_v34 }
 0x13f   :  { %v345_v50 = vsel %vm332_vm2, %v4574_v46, 0.0 }
 0x142   :  { %v304_v36 = vpop.f32.mrf.mxu3 }
 0x143   :  { %v4564_v37 = vadd.f32 %v314_v16, %v304_v36 }
 0x144   :  { %v286_v38 = vpop.f32.mrf.mxu0 }
 0x145   :  { %v369_v40 = vsel %vm332_vm2, %v4564_v37, 0.0  ;;  %v4582_v52 = vadd.f32 %v315_v20, %v286_v38 }
 0x146   :  { %343 = vadd.xlane.f32.xlu2 %v342_v39  ;;  %370 = vadd.xlane.f32.xlu0 %v369_v40 }
 0x147   :  { %v348_v58 = vsel %vm332_vm2, %v4582_v52, 0.0 }
 0x14a   :  { %v306_v41 = vpop.f32.mrf.mxu3 }
 0x14b   :  { %v4570_v43 = vadd.f32 %v315_v20, %v306_v41 }
 0x14c   :  { %v289_v44 = vpop.f32.mrf.mxu0 }
 0x14d   :  { %v372_v45 = vsel %vm332_vm2, %v4570_v43, 0.0  ;;  %v322_v61 = vadd.f32 %v314_v16, %v289_v44 }
 0x14e   :  { %373 = vadd.xlane.f32.xlu1 %v372_v45 }
 0x14f   :  { %v351_v63 = vsel %vm332_vm2, %v322_v61, 0.0 }
 0x152   :  { %v309_v47 = vpop.f32.mrf.mxu3 }
 0x153   :  { %v4576_v48 = vadd.f32 %v314_v16, %v309_v47 }
 0x154   :  { %v291_v49 = vpop.f32.mrf.mxu0 }
 0x155   :  { %v375_v51 = vsel %vm332_vm2, %v4576_v48, 0.0  ;;  %v4584_v53 = vadd.f32 %v315_v20, %v291_v49 }
 0x156   :  { %346 = vadd.xlane.f32.xlu1 %v345_v50  ;;  %376 = vadd.xlane.f32.xlu2 %v375_v51 }
 0x157   :  { %v354_v57 = vsel %vm332_vm2, %v4584_v53, 0.0 }
 0x15a   :  { %v311_v54 = vpop.f32.mrf.mxu3 }
 0x15b   :  { %v4586_v55 = vadd.f32 %v315_v20, %v311_v54 }
 0x15c   :  { %v294_v56 = vpop.f32.mrf.mxu0 }
 0x15d   :  { %v378_v59 = vsel %vm332_vm2, %v4586_v55, 0.0  ;;  %v324_v60 = vadd.f32 %v314_v16, %v294_v56 }
 0x15e   :  { %355 = vadd.xlane.f32.xlu1 %v354_v57  ;;  %349 = vadd.xlane.f32.xlu2 %v348_v58 }
 0x15f   :  { %379 = vadd.xlane.f32.xlu0 %v378_v59  ;;  %v357_v62 = vsel %vm332_vm2, %v324_v60, 0.0 }
 0x164   :  { %v296_v0 = vpop.f32.mrf.mxu0 }
 0x165   :  { %v4596_v1 = vadd.f32 %v315_v20, %v296_v0 }
 0x166   :  { %358 = vadd.xlane.f32.xlu2 %v357_v62 }
 0x167   :  { %352 = vadd.xlane.f32.xlu0 %v351_v63  ;;  %v360_v2 = vsel %vm332_vm2, %v4596_v1, 0.0 }
 0x16f   :  { %361 = vadd.xlane.f32.xlu0 %v360_v2 }
 0x193   :  { %v335_v13 = vpop.xlane.xlu1 %334 }
 0x19b   :  { %v338_v8 = vpop.xlane.xlu2 %337 }
 0x1a3   :  { %v341_v15 = vpop.xlane.xlu0 %340 }
 0x1a4   :  { %v381_v26 = vadd.f32 %v341_v15, %v335_v13 }
 0x1a9   :  { %v365_v16 = vpop.xlane.xlu1 %364 }
 0x1b1   :  { %v368_v11 = vpop.xlane.xlu2 %367 }
 0x1b9   :  { %v344_v14 = vpop.xlane.xlu2 %343  ;;  %v371_v19 = vpop.xlane.xlu0 %370 }
 0x1ba   :  { %v388_v30 = vadd.f32 %v344_v14, %v338_v8 }
 0x1c1   :  { %v374_v20 = vpop.xlane.xlu1 %373 }
 0x1c9   :  { %v377_v17 = vpop.xlane.xlu2 %376  ;;  %v347_v24 = vpop.xlane.xlu1 %346 }
 0x1ca   :  { %v382_v27 = vadd.f32 %v381_v26, %v347_v24 }
 0x1d1   :  { %v350_v21 = vpop.xlane.xlu2 %349  ;;  %v356_v39 = vpop.xlane.xlu1 %355 }
 0x1d2   :  { %v380_v23 = vpop.xlane.xlu0 %379  ;;  %v389_v34 = vadd.f32 %v388_v30, %v350_v21 }
 0x1d4   :  { %v390_v41 = vadd.f32 %v389_v34, %v356_v39 }
 0x1d9   :  { %v359_v33 = vpop.xlane.xlu2 %358 }
 0x1da   :  { %v353_v29 = vpop.xlane.xlu0 %352 }
 0x1db   :  { %v383_v31 = vadd.f32 %v382_v27, %v353_v29 }
 0x1dd   :  { %v384_v36 = vadd.f32 %v383_v31, %v359_v33 }
 0x1df   :  { %v385_v38 = vadd.f32 %v384_v36, %v365_v16 }
 0x1e1   :  { %v386_v40 = vadd.f32 %v385_v38, %v371_v19 }
 0x1e2   :  { %v362_v44 = vpop.xlane.xlu0 %361 }
 0x1e3   :  { %v387_v45 = vadd.f32 %v386_v40, %v377_v17  ;;  %v391_v47 = vadd.f32 %v390_v41, %v362_v44 }
 0x1e5   :  { %v395_v49 = vmul.f32 0.0015625, %v387_v45  ;;  %v392_v50 = vadd.f32 %v391_v47, %v368_v11 }
 0x1e7   :  { %v393_v51 = vadd.f32 %v392_v50, %v374_v20  ;;  %v4617_v54 = vsub.f32 %v4574_v46, %v395_v49  ;;  %v4620_v56 = vsub.f32 %v4550_v25, %v395_v49  ;;  %v4623_v57 = vsub.f32 %v4539_v18, %v395_v49 }
 0x1e8   :  { %v4632_v63 = vsub.f32 %v4554_v28, %v395_v49  ;;  %v4634_v46 = vsub.f32 %v324_v60, %v395_v49  ;;  %v4639_v8 = vsub.f32 %v322_v61, %v395_v49  ;;  %v4650_v16 = vsub.f32 %v4576_v48, %v395_v49 }
 0x1e9   :  { %v417_v58 = vmul.f32 %v4617_v54, %v4617_v54  ;;  %v415_v59 = vmul.f32 %v4620_v56, %v4620_v56  ;;  %v413_v62 = vmul.f32 %v4623_v57, %v4623_v57  ;;  %v394_v0 = vadd.f32 %v393_v51, %v380_v23 }
 0x1ea   :  { %v423_v13 = vmul.f32 %v4632_v63, %v4632_v63  ;;  %v421_v28 = vmul.f32 %v4634_v46, %v4634_v46  ;;  %v419_v60 = vmul.f32 %v4639_v8, %v4639_v8  ;;  %v4657_v19 = vsub.f32 %v4564_v37, %v395_v49 }
 0x1eb   :  { %v441_v25 = vsel %vm332_vm2, %v417_v58, 0.0  ;;  %v435_v18 = vsel %vm332_vm2, %v415_v59, 0.0  ;;  %v429_v2 = vsel %vm332_vm2, %v413_v62, 0.0  ;;  %v396_v11 = vmul.f32 0.0015625, %v394_v0 }
 0x1ec   :  { %442 = vadd.xlane.f32.xlu2 %v441_v25  ;;  %436 = vadd.xlane.f32.xlu0 %v435_v18  ;;  %v459_v14 = vsel %vm332_vm2, %v423_v13, 0.0  ;;  %v453_v15 = vsel %vm332_vm2, %v421_v28, 0.0  ;;  %v447_v17 = vsel %vm332_vm2, %v419_v60, 0.0  ;;  %v427_v20 = vmul.f32 %v4650_v16, %v4650_v16 }
 0x1ed   :  { %430 = vadd.xlane.f32.xlu1 %v429_v2  ;;  %v4653_v61 = vsub.f32 %v4546_v22, %v396_v11  ;;  %v425_v48 = vmul.f32 %v4657_v19, %v4657_v19  ;;  %v4668_v24 = vsub.f32 %v4582_v52, %v396_v11  ;;  %v4671_v37 = vsub.f32 %v4584_v53, %v396_v11 }
 0x1ee   :  { %v471_v22 = vsel %vm332_vm2, %v427_v20, 0.0  ;;  %v4675_v27 = vsub.f32 %v4562_v35, %v396_v11  ;;  %v4686_v33 = vsub.f32 %v4558_v32, %v396_v11  ;;  %v4689_v35 = vsub.f32 %v4570_v43, %v396_v11 }
 0x1ef   :  { %v414_v21 = vmul.f32 %v4653_v61, %v4653_v61  ;;  %v465_v26 = vsel %vm332_vm2, %v425_v48, 0.0  ;;  %v418_v29 = vmul.f32 %v4668_v24, %v4668_v24  ;;  %v420_v30 = vmul.f32 %v4671_v37, %v4671_v37 }
 0x1f0   :  { %v416_v52 = vmul.f32 %v4675_v27, %v4675_v27  ;;  %v4693_v36 = vsub.f32 %v4596_v1, %v396_v11  ;;  %v424_v38 = vmul.f32 %v4686_v33, %v4686_v33  ;;  %v426_v39 = vmul.f32 %v4689_v35, %v4689_v35 }
 0x1f1   :  { %v432_v23 = vsel %vm332_vm2, %v414_v21, 0.0  ;;  %v444_v53 = vsel %vm332_vm2, %v418_v29, 0.0  ;;  %v450_v31 = vsel %vm332_vm2, %v420_v30, 0.0  ;;  %v4705_v1 = vsub.f32 %v4586_v55, %v396_v11 }
 0x1f2   :  { %v438_v34 = vsel %vm332_vm2, %v416_v52, 0.0  ;;  %v422_v32 = vmul.f32 %v4693_v36, %v4693_v36  ;;  %v462_v43 = vsel %vm332_vm2, %v424_v38, 0.0  ;;  %v468_v40 = vsel %vm332_vm2, %v426_v39, 0.0 }
 0x1f3   :  { %v428_v44 = vmul.f32 %v4705_v1, %v4705_v1 }
 0x1f4   :  { %460 = vadd.xlane.f32.xlu2 %v459_v14  ;;  %454 = vadd.xlane.f32.xlu0 %v453_v15  ;;  %v456_v41 = vsel %vm332_vm2, %v422_v32, 0.0 }
 0x1f5   :  { %448 = vadd.xlane.f32.xlu1 %v447_v17  ;;  %v474_v45 = vsel %vm332_vm2, %v428_v44, 0.0 }
 0x1fc   :  { %472 = vadd.xlane.f32.xlu0 %v471_v22  ;;  %433 = vadd.xlane.f32.xlu2 %v432_v23 }
 0x1fd   :  { %466 = vadd.xlane.f32.xlu1 %v465_v26 }
 0x204   :  { %445 = vadd.xlane.f32.xlu0 %v444_v53  ;;  %451 = vadd.xlane.f32.xlu2 %v450_v31 }
 0x205   :  { %439 = vadd.xlane.f32.xlu1 %v438_v34 }
 0x20c   :  { %463 = vadd.xlane.f32.xlu0 %v462_v43  ;;  %469 = vadd.xlane.f32.xlu2 %v468_v40 }
 0x20d   :  { %457 = vadd.xlane.f32.xlu1 %v456_v41 }
 0x215   :  { %475 = vadd.xlane.f32.xlu1 %v474_v45 }
 0x25f   :  { %v443_v47 = vpop.xlane.xlu2 %442  ;;  %v437_v49 = vpop.xlane.xlu0 %436 }
 0x260   :  { %v431_v50 = vpop.xlane.xlu1 %430 }
 0x261   :  { %v477_v51 = vadd.f32 %v437_v49, %v431_v50 }
 0x263   :  { %v478_v58 = vadd.f32 %v477_v51, %v443_v47 }
 0x267   :  { %v455_v59 = vpop.xlane.xlu0 %454  ;;  %v461_v62 = vpop.xlane.xlu2 %460 }
 0x268   :  { %v449_v0 = vpop.xlane.xlu1 %448 }
 0x269   :  { %v479_v25 = vadd.f32 %v478_v58, %v449_v0 }
 0x26b   :  { %v480_v18 = vadd.f32 %v479_v25, %v455_v59 }
 0x26d   :  { %v481_v2 = vadd.f32 %v480_v18, %v461_v62 }
 0x26f   :  { %v473_v55 = vpop.xlane.xlu0 %472  ;;  %v434_v28 = vpop.xlane.xlu2 %433 }
 0x270   :  { %v467_v11 = vpop.xlane.xlu1 %466 }
 0x271   :  { %v482_v13 = vadd.f32 %v481_v2, %v467_v11 }
 0x273   :  { %v483_v60 = vadd.f32 %v482_v13, %v473_v55 }
 0x275   :  { %v491_v14 = vmul.f32 0.0015625, %v483_v60 }
 0x277   :  { %v493_v15 = vadd.f32 1e-05, %v491_v14  ;;  %v446_v20 = vpop.xlane.xlu0 %445  ;;  %v452_v22 = vpop.xlane.xlu2 %451 }
 0x278   :  { %v440_v17 = vpop.xlane.xlu1 %439 }
 0x279   :  { %4224 = vrsqrt.f32 %v493_v15  ;;  %v484_v21 = vadd.f32 %v440_v17, %v434_v28  ;;  %vm501_vm4 = vweird.f32 %v493_v15 }
 0x27b   :  { %v485_v48 = vadd.f32 %v484_v21, %v446_v20 }
 0x27d   :  { %v486_v26 = vadd.f32 %v485_v48, %v452_v22 }
 0x27f   :  { %v4225_v23 = vpop.eup %4224  ;;  %v464_v31 = vpop.xlane.xlu0 %463 }
 0x280   :  { %v496_v29 = vmul.f32 %v4225_v23, %v493_v15  ;;  %v458_v30 = vpop.xlane.xlu1 %457  ;;  %vm502_vm3 = vweird.f32 %v4225_v23  ;;  %v470_v32 = vpop.xlane.xlu2 %469 }
 0x281   :  { %v487_v52 = vadd.f32 %v486_v26, %v458_v30  ;;  %vm503_vm5 = vmor %vm501_vm4, %vm502_vm3 }
 0x282   :  { %v497_v53 = vmul.f32 %v4225_v23, %v496_v29 }
 0x283   :  { %v488_v34 = vadd.f32 %v487_v52, %v464_v31 }
 0x284   :  { %v498_v38 = vmul.f32 0.5, %v497_v53 }
 0x285   :  { %v489_v43 = vadd.f32 %v488_v34, %v470_v32 }
 0x286   :  { %v499_v39 = vsub.f32 1.5, %v498_v38 }
 0x288   :  { %v500_v40 = vmul.f32 %v4225_v23, %v499_v39  ;;  %v476_v41 = vpop.xlane.xlu1 %475 }
 0x289   :  { %v490_v44 = vadd.f32 %v489_v43, %v476_v41 }
 0x28a   :  { %v504_v45 = vsel %vm503_vm5, %v4225_v23, %v500_v40 }
 0x28b   :  { %v492_v47 = vmul.f32 0.0015625, %v490_v44  ;;  %v519_v49 = vmul.f32 %v504_v45, %v4617_v54  ;;  %v517_v50 = vmul.f32 %v504_v45, %v4620_v56  ;;  %v515_v51 = vmul.f32 %v504_v45, %v4623_v57 }
 0x28c   :  { %v525_v58 = vmul.f32 %v504_v45, %v4632_v63  ;;  %v523_v59 = vmul.f32 %v504_v45, %v4634_v46  ;;  %v521_v2 = vmul.f32 %v504_v45, %v4639_v8  ;;  %v529_v15 = vmul.f32 %v504_v45, %v4650_v16 }
 0x28d   :  { %v494_v62 = vadd.f32 1e-05, %v492_v47  ;;  %v547_v0 = vmul.f32 %v4602_v4, %v519_v49  ;;  %v545_v25 = vmul.f32 %v4602_v4, %v517_v50  ;;  %v543_v18 = vmul.f32 %v4602_v4, %v515_v51 }
 0x28e   :  { %v553_v55 = vmul.f32 %v4602_v4, %v525_v58  ;;  %v551_v8 = vmul.f32 %v4602_v4, %v523_v59  ;;  %v549_v13 = vmul.f32 %v4602_v4, %v521_v2  ;;  %v527_v21 = vmul.f32 %v504_v45, %v4657_v19 }
 0x28f   :  { %4226 = vrsqrt.f32 %v494_v62  ;;  %v4720_v54 = vadd.f32 %v4608_v7, %v547_v0  ;;  %v4723_v56 = vadd.f32 %v4608_v7, %v545_v25  ;;  %v4726_v57 = vadd.f32 %v4608_v7, %v543_v18 }
 0x290   :  { %v4738_v60 = vadd.f32 %v4608_v7, %v553_v55  ;;  %v4741_v14 = vadd.f32 %v4608_v7, %v551_v8  ;;  %v4745_v20 = vadd.f32 %v4608_v7, %v549_v13  ;;  %v557_v26 = vmul.f32 %v4602_v4, %v529_v15 }
 0x291   :  { %v599_v63 = vsel %vm332_vm2, %v4720_v54, 0.0  ;;  %v593_v46 = vsel %vm332_vm2, %v4723_v56, 0.0  ;;  %v587_v11 = vsel %vm332_vm2, %v4726_v57, 0.0  ;;  %v555_v30 = vmul.f32 %v4602_v4, %v527_v21 }
 0x292   :  { %600 = vadd.xlane.f32.xlu1 %v599_v63  ;;  %594 = vadd.xlane.f32.xlu0 %v593_v46  ;;  %v617_v22 = vsel %vm332_vm2, %v4738_v60, 0.0  ;;  %v611_v23 = vsel %vm332_vm2, %v4741_v14, 0.0  ;;  %v605_v16 = vsel %vm332_vm2, %v4745_v20, 0.0  ;;  %v4757_v19 = vadd.f32 %v4608_v7, %v557_v26 }
 0x293   :  { %588 = vadd.xlane.f32.xlu2 %v587_v11  ;;  %vm511_vm7 = vweird.f32 %v494_v62  ;;  %v4760_v31 = vadd.f32 %v4608_v7, %v555_v30 }
 0x294   :  { %v629_v38 = vsel %vm332_vm2, %v4757_v19, 0.0 }
 0x295   :  { %v4227_v28 = vpop.eup %4226  ;;  %v623_v43 = vsel %vm332_vm2, %v4760_v31, 0.0 }
 0x296   :  { %v506_v17 = vmul.f32 %v4227_v28, %v494_v62  ;;  %vm512_vm6 = vweird.f32 %v4227_v28 }
 0x297   :  { %vm513_vm8 = vmor %vm511_vm7, %vm512_vm6 }
 0x298   :  { %v507_v48 = vmul.f32 %v4227_v28, %v506_v17 }
 0x29a   :  { %v508_v29 = vmul.f32 0.5, %v507_v48  ;;  %618 = vadd.xlane.f32.xlu1 %v617_v22  ;;  %612 = vadd.xlane.f32.xlu0 %v611_v23 }
 0x29b   :  { %606 = vadd.xlane.f32.xlu2 %v605_v16 }
 0x29c   :  { %v509_v52 = vsub.f32 1.5, %v508_v29 }
 0x29e   :  { %v510_v53 = vmul.f32 %v4227_v28, %v509_v52 }
 0x2a0   :  { %v514_v34 = vsel %vm513_vm8, %v4227_v28, %v510_v53 }
 0x2a1   :  { %v516_v39 = vmul.f32 %v514_v34, %v4653_v61  ;;  %v520_v4 = vmul.f32 %v514_v34, %v4668_v24  ;;  %v518_v32 = vmul.f32 %v514_v34, %v4675_v27  ;;  %v522_v44 = vmul.f32 %v514_v34, %v4671_v37 }
 0x2a2   :  { %630 = vadd.xlane.f32.xlu0 %v629_v38  ;;  %v526_v24 = vmul.f32 %v514_v34, %v4686_v33  ;;  %v524_v47 = vmul.f32 %v514_v34, %v4693_v36  ;;  %v528_v59 = vmul.f32 %v514_v34, %v4689_v35  ;;  %v530_v25 = vmul.f32 %v514_v34, %v4705_v1 }
 0x2a3   :  { %624 = vadd.xlane.f32.xlu2 %v623_v43  ;;  %v544_v40 = vmul.f32 %v4600_v3, %v516_v39  ;;  %v548_v7 = vmul.f32 %v4600_v3, %v520_v4  ;;  %v546_v41 = vmul.f32 %v4600_v3, %v518_v32  ;;  %v550_v50 = vmul.f32 %v4600_v3, %v522_v44 }
 0x2a4   :  { %v554_v51 = vmul.f32 %v4600_v3, %v526_v24  ;;  %v552_v58 = vmul.f32 %v4600_v3, %v524_v47  ;;  %v556_v2 = vmul.f32 %v4600_v3, %v528_v59  ;;  %v558_v46 = vmul.f32 %v4600_v3, %v530_v25 }
 0x2a5   :  { %v4774_v45 = vadd.f32 %v4604_v5, %v544_v40  ;;  %v4777_v61 = vadd.f32 %v4604_v5, %v548_v7  ;;  %v4781_v27 = vadd.f32 %v4604_v5, %v546_v41  ;;  %v4794_v36 = vadd.f32 %v4604_v5, %v550_v50 }
 0x2a6   :  { %v4798_v62 = vadd.f32 %v4604_v5, %v554_v51  ;;  %v4801_v0 = vadd.f32 %v4604_v5, %v552_v58  ;;  %v4813_v55 = vadd.f32 %v4604_v5, %v556_v2  ;;  %v4816_v1 = vadd.f32 %v4604_v5, %v558_v46 }
 0x2a7   :  { %v590_v49 = vsel %vm332_vm2, %v4774_v45, 0.0  ;;  %v602_v37 = vsel %vm332_vm2, %v4777_v61, 0.0  ;;  %v596_v33 = vsel %vm332_vm2, %v4781_v27, 0.0  ;;  %v608_v18 = vsel %vm332_vm2, %v4794_v36, 0.0 }
 0x2a8   :  { %591 = vadd.xlane.f32.xlu1 %v590_v49  ;;  %v620_v63 = vsel %vm332_vm2, %v4798_v62, 0.0  ;;  %v614_v35 = vsel %vm332_vm2, %v4801_v0, 0.0  ;;  %v626_v8 = vsel %vm332_vm2, %v4813_v55, 0.0  ;;  %v632_v11 = vsel %vm332_vm2, %v4816_v1, 0.0 }
 0x2aa   :  { %603 = vadd.xlane.f32.xlu0 %v602_v37 }
 0x2ab   :  { %597 = vadd.xlane.f32.xlu2 %v596_v33 }
 0x2b0   :  { %609 = vadd.xlane.f32.xlu1 %v608_v18 }
 0x2b2   :  { %621 = vadd.xlane.f32.xlu0 %v620_v63 }
 0x2b3   :  { %615 = vadd.xlane.f32.xlu2 %v614_v35 }
 0x2b8   :  { %627 = vadd.xlane.f32.xlu1 %v626_v8 }
 0x2bb   :  { %633 = vadd.xlane.f32.xlu2 %v632_v11 }
 0x305   :  { %v595_v13 = vpop.xlane.xlu0 %594  ;;  %v601_v15 = vpop.xlane.xlu1 %600 }
 0x306   :  { %v589_v28 = vpop.xlane.xlu2 %588 }
 0x307   :  { %v635_v17 = vadd.f32 %v595_v13, %v589_v28 }
 0x309   :  { %v636_v3 = vadd.f32 %v635_v17, %v601_v15 }
 0x30d   :  { %v613_v21 = vpop.xlane.xlu0 %612  ;;  %v619_v26 = vpop.xlane.xlu1 %618 }
 0x30e   :  { %v607_v48 = vpop.xlane.xlu2 %606 }
 0x30f   :  { %v637_v22 = vadd.f32 %v636_v3, %v607_v48 }
 0x311   :  { %v638_v23 = vadd.f32 %v637_v22, %v613_v21 }
 0x313   :  { %v639_v5 = vadd.f32 %v638_v23, %v619_v26 }
 0x315   :  { %v631_v29 = vpop.xlane.xlu0 %630 }
 0x316   :  { %v625_v16 = vpop.xlane.xlu2 %624 }
 0x317   :  { %v640_v30 = vadd.f32 %v639_v5, %v625_v16 }
 0x319   :  { %v641_v52 = vadd.f32 %v640_v30, %v631_v29 }
 0x31b   :  { %v649_v53 = vmul.f32 0.0015625, %v641_v52  ;;  %v592_v34 = vpop.xlane.xlu1 %591 }
 0x31d   :  { %v4823_v38 = vsub.f32 %v4720_v54, %v649_v53  ;;  %v4826_v39 = vsub.f32 %v4723_v56, %v649_v53  ;;  %v4829_v4 = vsub.f32 %v4726_v57, %v649_v53  ;;  %v604_v40 = vpop.xlane.xlu0 %603  ;;  %v4838_v54 = vsub.f32 %v4738_v60, %v649_v53 }
 0x31e   :  { %v598_v32 = vpop.xlane.xlu2 %597  ;;  %v4844_v47 = vsub.f32 %v4741_v14, %v649_v53  ;;  %v4847_v50 = vsub.f32 %v4745_v20, %v649_v53  ;;  %v4858_v2 = vsub.f32 %v4757_v19, %v649_v53  ;;  %v4862_v46 = vsub.f32 %v4760_v31, %v649_v53 }
 0x31f   :  { %v642_v43 = vadd.f32 %v598_v32, %v592_v34  ;;  %v671_v7 = vmul.f32 %v4823_v38, %v4823_v38  ;;  %v669_v41 = vmul.f32 %v4826_v39, %v4826_v39  ;;  %v667_v44 = vmul.f32 %v4829_v4, %v4829_v4 }
 0x320   :  { %v677_v60 = vmul.f32 %v4838_v54, %v4838_v54  ;;  %v675_v33 = vmul.f32 %v4844_v47, %v4844_v47  ;;  %v673_v14 = vmul.f32 %v4847_v50, %v4847_v50  ;;  %v681_v13 = vmul.f32 %v4858_v2, %v4858_v2 }
 0x321   :  { %v695_v56 = vsel %vm332_vm2, %v671_v7, 0.0  ;;  %v689_v57 = vsel %vm332_vm2, %v669_v41, 0.0  ;;  %v683_v24 = vsel %vm332_vm2, %v667_v44, 0.0  ;;  %v643_v49 = vadd.f32 %v642_v43, %v604_v40 }
 0x322   :  { %696 = vadd.xlane.f32.xlu0 %v695_v56  ;;  %690 = vadd.xlane.f32.xlu2 %v689_v57  ;;  %v713_v18 = vsel %vm332_vm2, %v677_v60, 0.0  ;;  %v707_v20 = vsel %vm332_vm2, %v675_v33, 0.0  ;;  %v701_v35 = vsel %vm332_vm2, %v673_v14, 0.0  ;;  %v679_v15 = vmul.f32 %v4862_v46, %v4862_v46 }
 0x323   :  { %684 = vadd.xlane.f32.xlu1 %v683_v24  ;;  %v610_v37 = vpop.xlane.xlu1 %609  ;;  %v725_v3 = vsel %vm332_vm2, %v681_v13, 0.0 }
 0x324   :  { %v644_v51 = vadd.f32 %v643_v49, %v610_v37  ;;  %v719_v21 = vsel %vm332_vm2, %v679_v15, 0.0 }
 0x325   :  { %v622_v25 = vpop.xlane.xlu0 %621 }
 0x326   :  { %v616_v58 = vpop.xlane.xlu2 %615 }
 0x327   :  { %v645_v59 = vadd.f32 %v644_v51, %v616_v58 }
 0x329   :  { %v646_v63 = vadd.f32 %v645_v59, %v622_v25 }
 0x32a   :  { %714 = vadd.xlane.f32.xlu0 %v713_v18  ;;  %708 = vadd.xlane.f32.xlu2 %v707_v20 }
 0x32b   :  { %702 = vadd.xlane.f32.xlu1 %v701_v35  ;;  %v628_v8 = vpop.xlane.xlu1 %627 }
 0x32c   :  { %v647_v11 = vadd.f32 %v646_v63, %v628_v8 }
 0x32e   :  { %v634_v28 = vpop.xlane.xlu2 %633 }
 0x32f   :  { %v648_v19 = vadd.f32 %v647_v11, %v634_v28 }
 0x331   :  { %v650_v17 = vmul.f32 0.0015625, %v648_v19 }
 0x332   :  { %726 = vadd.xlane.f32.xlu2 %v725_v3 }
 0x333   :  { %720 = vadd.xlane.f32.xlu1 %v719_v21  ;;  %v4871_v31 = vsub.f32 %v4774_v45, %v650_v17  ;;  %v4874_v48 = vsub.f32 %v4777_v61, %v650_v17  ;;  %v4877_v22 = vsub.f32 %v4781_v27, %v650_v17  ;;  %v4887_v45 = vsub.f32 %v4794_v36, %v650_v17 }
 0x334   :  { %v4891_v27 = vsub.f32 %v4798_v62, %v650_v17  ;;  %v4895_v30 = vsub.f32 %v4801_v0, %v650_v17  ;;  %v4905_v62 = vsub.f32 %v4813_v55, %v650_v17  ;;  %v4910_v43 = vsub.f32 %v4816_v1, %v650_v17 }
 0x335   :  { %v668_v23 = vmul.f32 %v4871_v31, %v4871_v31  ;;  %v672_v26 = vmul.f32 %v4874_v48, %v4874_v48  ;;  %v670_v5 = vmul.f32 %v4877_v22, %v4877_v22  ;;  %v674_v52 = vmul.f32 %v4887_v45, %v4887_v45 }
 0x336   :  { %v678_v36 = vmul.f32 %v4891_v27, %v4891_v27  ;;  %v676_v53 = vmul.f32 %v4895_v30, %v4895_v30  ;;  %v680_v40 = vmul.f32 %v4905_v62, %v4905_v62  ;;  %v682_v7 = vmul.f32 %v4910_v43, %v4910_v43 }
 0x337   :  { %v686_v29 = vsel %vm332_vm2, %v668_v23, 0.0  ;;  %v698_v61 = vsel %vm332_vm2, %v672_v26, 0.0  ;;  %v692_v16 = vsel %vm332_vm2, %v670_v5, 0.0  ;;  %v704_v34 = vsel %vm332_vm2, %v674_v52, 0.0 }
 0x338   :  { %687 = vadd.xlane.f32.xlu0 %v686_v29  ;;  %v716_v32 = vsel %vm332_vm2, %v678_v36, 0.0  ;;  %v710_v0 = vsel %vm332_vm2, %v676_v53, 0.0  ;;  %v722_v41 = vsel %vm332_vm2, %v680_v40, 0.0  ;;  %v728_v55 = vsel %vm332_vm2, %v682_v7, 0.0 }
 0x339   :  { %vm3546_vm2 = vcmask 293888  }
 0x33a   :  { %699 = vadd.xlane.f32.xlu2 %v698_v61 }
 0x33b   :  { %693 = vadd.xlane.f32.xlu1 %v692_v16 }
 0x340   :  { %705 = vadd.xlane.f32.xlu0 %v704_v34 }
 0x342   :  { %717 = vadd.xlane.f32.xlu2 %v716_v32 }
 0x343   :  { %711 = vadd.xlane.f32.xlu1 %v710_v0 }
 0x348   :  { %723 = vadd.xlane.f32.xlu0 %v722_v41  ;;  %v8110_v41 = vstv %s4918_s2  ;;  %s8053_s2 = smov 126  }
 0x34b   :  { %729 = vadd.xlane.f32.xlu1 %v728_v55  ;;  %v8108_v55 = vstv %s4920_s15  ;;  %s5017_s15 = sld [smem:[#allocation2 + $0xd]] }
 0x351   :  { %8338 = sst [smem:[#allocation46_spill]] %s5017_s15 }
 0x395   :  { %v691_v44 = vpop.xlane.xlu2 %690  ;;  %v697_v24 = vpop.xlane.xlu0 %696 }
 0x396   :  { %v685_v56 = vpop.xlane.xlu1 %684 }
 0x397   :  { %v731_v57 = vadd.f32 %v691_v44, %v685_v56  ;;  %v8107_v44 = vstv %s4922_s16  ;;  %s5004_s16 = sld [smem:[#allocation2 + $0xc]] }
 0x399   :  { %v732_v49 = vadd.f32 %v731_v57, %v697_v24 }
 0x39d   :  { %v709_v1 = vpop.xlane.xlu2 %708  ;;  %v715_v33 = vpop.xlane.xlu0 %714  ;;  %8336 = sst [smem:[#allocation44_spill]] %s5004_s16 }
 0x39e   :  { %v703_v37 = vpop.xlane.xlu1 %702 }
 0x39f   :  { %v733_v51 = vadd.f32 %v732_v49, %v703_v37  ;;  %v8104_v37 = vstv %s4924_s5  ;;  %s5021_s5 = sld [smem:[#allocation2 + $0x84]] }
 0x3a1   :  { %v734_v60 = vadd.f32 %v733_v51, %v709_v1  ;;  %v8103_v51 = vstv %s4926_s0  ;;  %s8340_s0 = smov 127  }
 0x3a3   :  { %v735_v58 = vadd.f32 %v734_v60, %v715_v33  ;;  %v8101_v60 = vstv %s4928_s17  ;;  %s5026_s17 = sld [smem:[#allocation2 + $0x85]] }
 0x3a5   :  { %v727_v25 = vpop.xlane.xlu2 %726  ;;  %8339 = sst [smem:[#allocation47_spill]] %s5021_s5 }
 0x3a6   :  { %v721_v14 = vpop.xlane.xlu1 %720 }
 0x3a7   :  { %v736_v59 = vadd.f32 %v735_v58, %v721_v14 }
 0x3a9   :  { %v737_v18 = vadd.f32 %v736_v59, %v727_v25  ;;  %8342 = sst [smem:[#allocation49_spill]] %s5026_s17 }
 0x3ab   :  { %v745_v20 = vmul.f32 0.0015625, %v737_v18  ;;  %v688_v63 = vpop.xlane.xlu0 %687 }
 0x3ad   :  { %v747_v35 = vadd.f32 1e-05, %v745_v20  ;;  %v700_v13 = vpop.xlane.xlu2 %699  ;;  %v8100_v20 = vstv %s4930_s8  ;;  %s5052_s8 = sld [smem:[#allocation2 + $0x38]] }
 0x3ae   :  { %v694_v8 = vpop.xlane.xlu1 %693 }
 0x3af   :  { %4228 = vrsqrt.f32 %v747_v35  ;;  %v738_v11 = vadd.f32 %v694_v8, %v688_v63  ;;  %vm755_vm10 = vweird.f32 %v747_v35  ;;  %v8099_v63 = vstv %s4932_s10  ;;  %s5057_s10 = sld [smem:[#allocation2 + $0x39]] }
 0x3b1   :  { %v739_v28 = vadd.f32 %v738_v11, %v700_v13 }
 0x3b3   :  { %v706_v15 = vpop.xlane.xlu0 %705  ;;  %8349 = sst [smem:[#allocation55_spill]] %s5052_s8 }
 0x3b4   :  { %v740_v17 = vadd.f32 %v739_v28, %v706_v15 }
 0x3b5   :  { %v4229_v19 = vpop.eup %4228  ;;  %v718_v61 = vpop.xlane.xlu2 %717  ;;  %8351 = sst [smem:[#allocation57_spill]] %s5057_s10 }
 0x3b6   :  { %v750_v3 = vmul.f32 %v4229_v19, %v747_v35  ;;  %v712_v21 = vpop.xlane.xlu1 %711  ;;  %vm756_vm9 = vweird.f32 %v4229_v19  ;;  %v8094_v35 = vstv %s4934_s18  ;;  %s5055_s18 = sld [smem:[#allocation2 + $0x10]] }
 0x3b7   :  { %v741_v26 = vadd.f32 %v740_v17, %v712_v21  ;;  %vm757_vm11 = vmor %vm755_vm10, %vm756_vm9  ;;  %s5072_s10 = sld [smem:[#allocation2 + $0x12]] }
 0x3b8   :  { %v751_v23 = vmul.f32 %v4229_v19, %v750_v3  ;;  %v8088_v3 = vstv %s4936_s11  ;;  %s8357_s11 = smov 125  }
 0x3b9   :  { %v742_v52 = vadd.f32 %v741_v26, %v718_v61  ;;  %v8087_v61 = vstv %s4942_s21  ;;  %s8105_s21 = smov 124  }
 0x3ba   :  { %v752_v5 = vmul.f32 0.5, %v751_v23  ;;  %v8084_v23 = vstv %s4938_s19  ;;  %s5097_s19 = sld [smem:[#allocation2 + $0x62]] }
 0x3bb   :  { %v724_v16 = vpop.xlane.xlu0 %723 }
 0x3bc   :  { %v753_v29 = vsub.f32 1.5, %v752_v5  ;;  %v743_v53 = vadd.f32 %v742_v52, %v724_v16  ;;  %8350 = sst [smem:[#allocation56_spill]] %s5055_s18  ;;  %v8083_v5 = vstv %s4940_s20  ;;  %v8090_v16 = vstv %s4944_s3 }
 0x3bd   :  { %8354 = sst [smem:[#allocation60_spill]] %s5072_s10  ;;  %v8097_v52 = vstv %s4946_s22 }
 0x3be   :  { %v754_v36 = vmul.f32 %v4229_v19, %v753_v29  ;;  %v730_v32 = vpop.xlane.xlu1 %729  ;;  %s5104_s20 = sld [smem:[#allocation2 + $0x3a]] }
 0x3bf   :  { %v744_v7 = vadd.f32 %v743_v53, %v730_v32  ;;  %v8141_v53 = vstv %s4956_s24  ;;  %s5109_s24 = sld [smem:[#allocation2 + $0x58]] }
 0x3c0   :  { %v4950_v34 = vsel %vm757_vm11, %v4229_v19, %v754_v36  ;;  %v8098_v36 = vstv %s4952_s23  ;;  %8358 = sst [smem:[#allocation63_spill]] %s5097_s19 }
 0x3c1   :  { %v769_v0 = vmul.f32 %v4950_v34, %v4829_v4  ;;  %v746_v4 = vmul.f32 0.0015625, %v744_v7  ;;  %v771_v21 = vmul.f32 %v4950_v34, %v4826_v39  ;;  %v1418_v7 = vstv %s4990_s30  ;;  %s5171_s22 = sld [smem:[#allocation2 + $0x59]] }
 0x3c2   :  { %s5195_s23 = sld [smem:[#allocation2 + $0x8a]] }
 0x3c3   :  { %v798_v40 = vmul.f32 %v4610_v9, %v769_v0  ;;  %v748_v1 = vadd.f32 1e-05, %v746_v4  ;;  %v800_v32 = vmul.f32 %v4610_v9, %v771_v21  ;;  %v8126_v21 = vstv %s5048_s26  ;;  %s5338_s26 = sld [smem:[#allocation2 + $0x8e]] }
 0x3c4   :  { %8359 = sst [smem:[#allocation64_spill]] %s5104_s20 }
 0x3c5   :  { %v4969_v56 = vadd.f32 %v4612_v10, %v798_v40  ;;  %4230 = vrsqrt.f32 %v748_v1  ;;  %vm765_vm13 = vweird.f32 %v748_v1  ;;  %v1376_v40 = vstv %s4986_s28  ;;  %8360 = sst [smem:[#allocation65_spill]] %s5109_s24 }
 0x3c6   :  { %s5366_s3 = sld [smem:[#allocation2 + $0x18]] }
 0x3c7   :  { %v909_v57 = vmul.f32 %v8110_v41, %v4969_v56  ;;  %v895_v24 = vmul.f32 %v8108_v55, %v4969_v56  ;;  %v881_v49 = vmul.f32 %v8107_v44, %v4969_v56  ;;  %v951_v33 = vmul.f32 %v8104_v37, %v4969_v56  ;;  %8374 = sst [smem:[#allocation72_spill]] %s5171_s22 }
 0x3c8   :  { %v937_v58 = vmul.f32 %v8103_v51, %v4969_v56  ;;  %v923_v14 = vmul.f32 %v8101_v60, %v4969_v56  ;;  %v993_v11 = vmul.f32 %v8100_v20, %v4969_v56  ;;  %v979_v13 = vmul.f32 %v8099_v63, %v4969_v56  ;;  %8376 = sst [smem:[#allocation74_spill]] %s5195_s23 }
 0x3c9   :  { %913 = vrot.lane.b32.xlu0 %v909_v57, %s8043_s29  ;;  %899 = vrot.lane.b32.xlu1 %v895_v24, %s8043_s29  ;;  %v965_v15 = vmul.f32 %v8094_v35, %v4969_v56  ;;  %v1035_v29 = vmul.f32 %v8088_v3, %v4969_v56  ;;  %v1021_v39 = vmul.f32 %v8084_v23, %v4969_v56  ;;  %v8182_v57 = vstv %s4993_s14  ;;  %8398 = sst [smem:[#allocation88_spill]] %s5338_s26 }
 0x3ca   :  { %885 = vrot.lane.b32.xlu2 %v881_v49, %s8043_s29  ;;  %s5012_s29 = sld [smem:[#allocation2 + $0x35]]  ;;  %v1007_v0 = vmul.f32 %v8083_v5, %v4969_v56  ;;  %v8179_v24 = vstv %s4995_s13  ;;  %v8178_v49 = vstv %s4999_s12 }
 0x3cb   :  { %v4231_v59 = vpop.eup %4230  ;;  %s5114_s13 = sld [smem:[#allocation2 + $0x30]] }
 0x3cc   :  { %v760_v25 = vmul.f32 %v4231_v59, %v748_v1  ;;  %vm766_vm12 = vweird.f32 %v4231_v59  ;;  %s8362_s12 = sld [smem:[#allocation57_spill]] }
 0x3cd   :  { %vm767_vm14 = vmor %vm765_vm13, %vm766_vm12  ;;  %8408 = sst [smem:[#allocation95_spill]] %s5366_s3 }
 0x3ce   :  { %v761_v18 = vmul.f32 %v4231_v59, %v760_v25  ;;  %v8115_v25 = vstv %s5021_s5  ;;  %s5329_s5 = sld [smem:[#allocation2 + $0x16]] }
 0x3cf   :  { %s5487_s28 = sld [smem:[#allocation2 + $0x27]] }
 0x3d0   :  { %8337 = sst [smem:[#allocation45_spill]] %s5012_s29  ;;  %v762_v8 = vmul.f32 0.5, %v761_v18  ;;  %v8116_v18 = vstv %s5024_s1 }
 0x3d1   :  { %955 = vrot.lane.b32.xlu0 %v951_v33, %s8053_s2  ;;  %941 = vrot.lane.b32.xlu1 %v937_v58, %s8053_s2  ;;  %s5035_s2 = sld [smem:[#allocation2 + $0x5e]]  ;;  %v8176_v33 = vstv %s5002_s7  ;;  %v8122_v58 = vstv %s5004_s16 }
 0x3d2   :  { %927 = vrot.lane.b32.xlu2 %v923_v14, %s8340_s0  ;;  %s5043_s0 = sld [smem:[#allocation2 + $0x36]]  ;;  %v763_v28 = vsub.f32 1.5, %v762_v8  ;;  %v8111_v14 = vstv %s5012_s29  ;;  %v8117_v8 = vstv %s5026_s17 }
 0x3d3   :  { %8361 = sst [smem:[#allocation66_spill]] %s5114_s13 }
 0x3d4   :  { %v764_v19 = vmul.f32 %v4231_v59, %v763_v28  ;;  %s5131_s13 = sld [smem:[#allocation2 + $0x31]] }
 0x3d5   :  { %s5239_s29 = sld [smem:[#allocation2 + $0x3b]] }
 0x3d6   :  { %v5059_v17 = vsel %vm767_vm14, %v4231_v59, %v764_v19  ;;  %v8113_v59 = vstv %s5017_s15  ;;  %s5261_s17 = sld [smem:[#allocation2 + $0x13]] }
 0x3d7   :  { %8345 = sst [smem:[#allocation52_spill]] %s5035_s2  ;;  %v774_v26 = vmul.f32 %v5059_v17, %v4874_v48  ;;  %v8096_v48 = vstv %s4948_s4  ;;  %v776_v1 = vmul.f32 %v5059_v17, %v4887_v45  ;;  %v5121_v45 = vadd.f32 %v4612_v10, %v800_v32  ;;  %s8394_s4 = smov 124  }
 0x3d8   :  { %8346 = sst [smem:[#allocation53_spill]] %s5043_s0  ;;  %v8121_v28 = vstv %s5035_s2  ;;  %v8125_v19 = vstv %s5043_s0  ;;  %v8128_v32 = vstv %s5055_s18 }
 0x3d9   :  { %997 = vrot.lane.b32.xlu0 %v993_v11, %s8061_s6  ;;  %983 = vrot.lane.b32.xlu1 %v979_v13, %s8348_s25  ;;  %s5062_s6 = sld [smem:[#allocation2 + $0x11]]  ;;  %v803_v4 = vmul.f32 %v4606_v6, %v774_v26  ;;  %v8119_v11 = vstv %s5030_s9  ;;  %v8120_v13 = vstv %s5033_s27  ;;  %v1143_v3 = vmul.f32 %v8096_v48, %v5121_v45 }
 0x3da   :  { %969 = vrot.lane.b32.xlu2 %v965_v15, %s8348_s25  ;;  %s5067_s25 = sld [smem:[#allocation2 + $0x88]]  ;;  %v8175_v26 = vstv %s5052_s8 }
 0x3db   :  { %v5129_v15 = vadd.f32 %v4614_v12, %v803_v4  ;;  %8367 = sst [smem:[#allocation69_spill]] %s5131_s13  ;;  %v1063_v4 = vmul.f32 %v8090_v16, %v4969_v56  ;;  %v1129_v16 = vmul.f32 %v8098_v36, %v5121_v45  ;;  %v8144_v36 = vstv %s5104_s20 }
 0x3dc   :  { %s5147_s13 = sld [smem:[#allocation2 + $0x80]] }
 0x3dd   :  { %8366 = vst [vmem:[#allocation68_spill] sm:$0xff] %v5129_v15  ;;  %v5188_v20 = vmul.f32 %v8182_v57, %v5129_v15  ;;  %v5193_v60 = vmul.f32 %v8179_v24, %v5129_v15  ;;  %v5210_v51 = vmul.f32 %v8122_v58, %v5129_v15  ;;  %v5215_v37 = vmul.f32 %v8111_v14, %v5129_v15  ;;  %8379 = sst [smem:[#allocation76_spill]] %s5239_s29 }
 0x3de   :  { %v5222_v44 = vmul.f32 %v8113_v59, %v5129_v15  ;;  %v5227_v55 = vmul.f32 %v8115_v25, %v5129_v15  ;;  %v5232_v41 = vmul.f32 %v8116_v18, %v5129_v15  ;;  %v5237_v14 = vmul.f32 %v8117_v8, %v5129_v15  ;;  %8381 = sst [smem:[#allocation77_spill]] %s5261_s17 }
 0x3df   :  { %8352 = sst [smem:[#allocation58_spill]] %s5062_s6  ;;  %v5244_v59 = vmul.f32 %v8119_v11, %v5129_v15  ;;  %v5249_v25 = vmul.f32 %v8120_v13, %v5129_v15  ;;  %v5254_v18 = vmul.f32 %v8121_v28, %v5129_v15  ;;  %v5259_v8 = vmul.f32 %v8125_v19, %v5129_v15 }
 0x3e0   :  { %8353 = sst [smem:[#allocation59_spill]] %s5067_s25  ;;  %v782_v57 = vmul.f32 %v5059_v17, %v4905_v62 }
 0x3e1   :  { %s5080_s6 = sld [smem:[#allocation2 + $0x89]]  ;;  %1039 = vrot.lane.b32.xlu0 %v1035_v29, %s8357_s11  ;;  %1025 = vrot.lane.b32.xlu1 %v1021_v39, %s8357_s11  ;;  %v805_v29 = vmul.f32 %v4606_v6, %v776_v1  ;;  %v1077_v39 = vmul.f32 %v8087_v61, %v4969_v56  ;;  %v8135_v1 = vstv %s5072_s10  ;;  %v1049_v61 = vmul.f32 %v8097_v52, %v4969_v56  ;;  %s8404_s10 = smov 126  }
 0x3e2   :  { %s5088_s25 = sld [smem:[#allocation2 + $0x61]]  ;;  %1011 = vrot.lane.b32.xlu2 %v1007_v0, %s8357_s11  ;;  %v8129_v0 = vstv %s8362_s12  ;;  %v8149_v52 = vstv %s5097_s19 }
 0x3e3   :  { %s5123_s11 = sld [smem:[#allocation2 + $0x8]]  ;;  %v5177_v63 = vadd.f32 %v4614_v12, %v805_v29  ;;  %v5205_v29 = vmul.f32 %v8176_v33, %v5129_v15 }
 0x3e4   :  { %s8364_s24 = sld [smem:[#allocation58_spill]] }
 0x3e5   :  { %s8365_s16 = sld [smem:[#allocation59_spill]]  ;;  %8375 = vst [vmem:[#allocation73_spill] sm:$0xff] %v5177_v63  ;;  %v5266_v11 = vmul.f32 %v8126_v21, %v5177_v63  ;;  %v5271_v13 = vmul.f32 %v8175_v26, %v5177_v63  ;;  %v5276_v28 = vmul.f32 %v8128_v32, %v5177_v63  ;;  %v5281_v58 = vmul.f32 %v8129_v0, %v5177_v63 }
 0x3e6   :  { %8369 = sst [smem:[#allocation71_spill]] %s5147_s13  ;;  %v5298_v32 = vmul.f32 %v8135_v1, %v5177_v63  ;;  %v5319_v1 = vmul.f32 %v8149_v52, %v5177_v63 }
 0x3e7   :  { %8355 = sst [smem:[#allocation61_spill]] %s5080_s6  ;;  %v8136_v35 = vstv %s5080_s6 }
 0x3e8   :  { %8356 = sst [smem:[#allocation62_spill]] %s5088_s25  ;;  %v8163_v48 = vstv %s5088_s25  ;;  %v5303_v0 = vmul.f32 %v8136_v35, %v5177_v63  ;;  %8390 = vst [vmem:[#allocation82_spill] sm:$0xff] %v5319_v1  ;;  %v5324_v35 = vmul.f32 %v8144_v36, %v5177_v63 }
 0x3e9   :  { %8363 = sst [smem:[#allocation67_spill]] %s5123_s11  ;;  %1081 = vrot.lane.b32.xlu0 %v1077_v39, %s8105_s21  ;;  %1067 = vrot.lane.b32.xlu1 %v1063_v4, %s8105_s21  ;;  %v5169_v39 = vmul.f32 %v1376_v40, %v5129_v15  ;;  %v5183_v4 = vmul.f32 %v1418_v7, %v5129_v15 }
 0x3ea   :  { %s5140_s11 = sld [smem:[#allocation2 + $0x9]]  ;;  %v8133_v5 = vstv %s8364_s24  ;;  %1053 = vrot.lane.b32.xlu2 %v1049_v61, %s8105_s21  ;;  %v5200_v61 = vmul.f32 %v8178_v49, %v5129_v15  ;;  %8385 = vst [vmem:[#allocation79_spill] sm:$0xff] %v5303_v0  ;;  %s8388_s24 = smov 127  }
 0x3eb   :  { %v8134_v23 = vstv %s8365_s16  ;;  %s5162_s13 = sld [smem:[#allocation2 + $0x81]]  ;;  %v5288_v19 = vmul.f32 %v8133_v5, %v5177_v63  ;;  %v1091_v5 = vmul.f32 %v8141_v53, %v4969_v56  ;;  %8391 = vst [vmem:[#allocation83_spill] sm:$0xff] %v5324_v35 }
 0x3ec   :  { %s5217_s21 = sld [smem:[#allocation2 + $0x63]]  ;;  %v5293_v21 = vmul.f32 %v8134_v23, %v5177_v63  ;;  %v5314_v23 = vmul.f32 %v8163_v48, %v5177_v63 }
 0x3ed   :  { %s5283_s0 = sld [smem:[#allocation2 + $0x3d]] }
 0x3ee   :  { %s8383_s2 = sld [smem:[#allocation35_spill]]  ;;  %8389 = vst [vmem:[#allocation81_spill] sm:$0xff] %v5314_v23 }
 0x3ef   :  { %s8384_s18 = sld [smem:[#allocation36_spill]] }
 0x3f0   :  { %8368 = sst [smem:[#allocation70_spill]] %s5140_s11 }
 0x3f1   :  { %s8370_s11 = sld [smem:[#allocation41_spill]]  ;;  %1147 = vrot.lane.b32.xlu0 %v1143_v3, %s8388_s24  ;;  %1133 = vrot.lane.b32.xlu1 %v1129_v16, %s8388_s24  ;;  %v8190_v24 = vstv %s5162_s13 }
 0x3f2   :  { %8372 = sst [smem:[#allocation41_spill]] %s5162_s13  ;;  %1095 = vrot.lane.b32.xlu2 %v1091_v5, %s8394_s4 }
 0x3f3   :  { %8377 = sst [smem:[#allocation75_spill]] %s5217_s21  ;;  %v8235_v35 = vstv %s5283_s0 }
 0x3f4   :  { %8382 = sst [smem:[#allocation78_spill]] %s5283_s0  ;;  %v8154_v3 = vstv %s8383_s2  ;;  %s8483_s0 = smov 124  }
 0x3f5   :  { %s8386_s12 = sld [smem:[#allocation37_spill]]  ;;  %v8153_v53 = vstv %s8384_s18  ;;  %v1185_v16 = vmul.f32 %v8154_v3, %v5121_v45 }
 0x3f6   :  { %s5305_s8 = sld [smem:[#allocation2 + $0x15]]  ;;  %v1171_v5 = vmul.f32 %v8153_v53, %v5121_v45 }
 0x3f7   :  { %s5326_s6 = sld [smem:[#allocation2 + $0x8b]] }
 0x3f8   :  { %8393 = sst [smem:[#allocation85_spill]] %s5329_s5 }
 0x3f9   :  { %s5332_s25 = sld [smem:[#allocation2 + $0x8d]]  ;;  %1189 = vrot.lane.b32.xlu0 %v1185_v16, %s8404_s10  ;;  %1175 = vrot.lane.b32.xlu1 %v1171_v5, %s8388_s24  ;;  %v773_v5 = vmul.f32 %v4950_v34, %v4823_v38 }
 0x3fa   :  { %s5335_s19 = sld [smem:[#allocation2 + $0x65]] }
 0x3fb   :  { %s8397_s16 = sld [smem:[#allocation38_spill]]  ;;  %v8158_v36 = vstv %s8386_s12  ;;  %v802_v38 = vmul.f32 %v4610_v9, %v773_v5 }
 0x3fc   :  { %8387 = sst [smem:[#allocation80_spill]] %s5305_s8  ;;  %v1157_v52 = vmul.f32 %v8158_v36, %v5121_v45 }
 0x3fd   :  { %8392 = sst [smem:[#allocation84_spill]] %s5326_s6  ;;  %s8447_s6 = smov 124  }
 0x3fe   :  { %s8399_s20 = sld [smem:[#allocation39_spill]]  ;;  %1161 = vrot.lane.b32.xlu2 %v1157_v52, %s8388_s24 }
 0x3ff   :  { %8395 = sst [smem:[#allocation86_spill]] %s5332_s25 }
 0x400   :  { %8396 = sst [smem:[#allocation87_spill]] %s5335_s19 }
 0x401   :  { %s5341_s27 = sld [smem:[#allocation2 + $0x66]]  ;;  %v8173_v53 = vstv %s8397_s16 }
 0x402   :  { %s8401_s9 = sld [smem:[#allocation40_spill]]  ;;  %v1227_v36 = vmul.f32 %v8173_v53, %v5121_v45 }
 0x403   :  { %s5346_s1 = sld [smem:[#allocation2 + $0x3e]] }
 0x404   :  { %s5351_s15 = sld [smem:[#allocation2 + $0x67]]  ;;  %v8171_v3 = vstv %s8399_s20  ;;  %1231 = vrot.lane.b32.xlu0 %v1227_v36, %s8404_s10 }
 0x405   :  { %s5357_s7 = sld [smem:[#allocation2 + $0x3f]]  ;;  %v1213_v52 = vmul.f32 %v8171_v3, %v5121_v45 }
 0x406   :  { %s5360_s2 = sld [smem:[#allocation2 + $0x17]] }
 0x407   :  { %8400 = sst [smem:[#allocation89_spill]] %s5341_s27  ;;  %1217 = vrot.lane.b32.xlu1 %v1213_v52, %s8404_s10 }
 0x408   :  { %s5363_s18 = sld [smem:[#allocation2 + $0x1a]]  ;;  %v8170_v16 = vstv %s8401_s9 }
 0x409   :  { %8402 = sst [smem:[#allocation90_spill]] %s5346_s1  ;;  %v1199_v48 = vmul.f32 %v8170_v16, %v5121_v45  ;;  %v778_v16 = vmul.f32 %v5059_v17, %v4895_v30 }
 0x40a   :  { %8403 = sst [smem:[#allocation91_spill]] %s5351_s15 }
 0x40b   :  { %8405 = sst [smem:[#allocation92_spill]] %s5357_s7  ;;  %1203 = vrot.lane.b32.xlu2 %v1199_v48, %s8404_s10  ;;  %v5412_v48 = vadd.f32 %v4612_v10, %v802_v38  ;;  %v8192_v38 = vstv %s5171_s22 }
 0x40c   :  { %8406 = sst [smem:[#allocation93_spill]] %s5360_s2 }
 0x40d   :  { %s5369_s4 = sld [smem:[#allocation2 + $0x1b]] }
 0x40e   :  { %8407 = sst [smem:[#allocation94_spill]] %s5363_s18 }
 0x40f   :  { %s8410_s12 = sld [smem:[#allocation65_spill]] }
 0x410   :  { %s5372_s15 = sld [smem:[#allocation2 + $0x1d]] }
 0x411   :  { %s8412_s2 = sld [smem:[#allocation66_spill]] }
 0x412   :  { %s8413_s24 = sld [smem:[#allocation67_spill]] }
 0x413   :  { %8409 = sst [smem:[#allocation96_spill]] %s5369_s4 }
 0x414   :  { %s5379_s7 = sld [smem:[#allocation2 + $0x1c]] }
 0x415   :  { %s8414_s3 = sld [smem:[#allocation69_spill]]  ;;  %v8181_v36 = vstv %s8410_s12 }
 0x416   :  { %8411 = sst [smem:[#allocation97_spill]] %s5372_s15  ;;  %v1269_v5 = vmul.f32 %v8181_v36, %v5121_v45  ;;  %v780_v36 = vmul.f32 %v5059_v17, %v4891_v27 }
 0x417   :  { %s5384_s18 = sld [smem:[#allocation2 + $0x1f]]  ;;  %v8183_v52 = vstv %s8412_s2 }
 0x418   :  { %s5390_s15 = sld [smem:[#allocation2 + $0x20]]  ;;  %v8184_v3 = vstv %s8413_s24  ;;  %v1255_v30 = vmul.f32 %v8183_v52, %v5121_v45  ;;  %v784_v52 = vmul.f32 %v5059_v17, %v4910_v43  ;;  %s8426_s24 = smov 125  }
 0x419   :  { %s8417_s16 = sld [smem:[#allocation70_spill]]  ;;  %v1241_v49 = vmul.f32 %v8184_v3, %v5121_v45  ;;  %v807_v3 = vmul.f32 %v4606_v6, %v778_v16  ;;  %1273 = vrot.lane.b32.xlu0 %v1269_v5, %s8426_s24  ;;  %v5457_v16 = vmul.f32 %v1376_v40, %v5412_v48  ;;  %v5462_v5 = vmul.f32 %v8190_v24, %v5121_v45 }
 0x41a   :  { %s8418_s4 = sld [smem:[#allocation71_spill]]  ;;  %1259 = vrot.lane.b32.xlu1 %v1255_v30, %s8426_s24  ;;  %v5467_v30 = vmul.f32 %v8192_v38, %v5121_v45  ;;  %v8430_v40 = vstv %s4993_s14  ;;  %v8431_v24 = vstv %s8370_s11  ;;  %v813_v42 = vmul.f32 %v4606_v6, %v784_v52 }
 0x41b   :  { %s5393_s1 = sld [smem:[#allocation2 + $0x40]]  ;;  %v8193_v53 = vstv %s8414_s3  ;;  %1245 = vrot.lane.b32.xlu2 %v1241_v49, %s8426_s24  ;;  %v5474_v49 = vmul.f32 %v1418_v7, %v5412_v48  ;;  %v811_v7 = vmul.f32 %v4606_v6, %v782_v57  ;;  %v8466_v52 = vstv %s5217_s21 }
 0x41c   :  { %s5397_s20 = sld [smem:[#allocation2 + $0x21]]  ;;  %v1311_v27 = vmul.f32 %v8193_v53, %v5121_v45  ;;  %v809_v53 = vmul.f32 %v4606_v6, %v780_v36  ;;  %v8239_v36 = vstv %s5305_s8  ;;  %v5532_v57 = vadd.f32 %v4614_v12, %v813_v42 }
 0x41d   :  { %8415 = sst [smem:[#allocation98_spill]] %s5384_s18  ;;  %v5525_v15 = vadd.f32 %v4614_v12, %v811_v7 }
 0x41e   :  { %8416 = sst [smem:[#allocation99_spill]] %s5390_s15  ;;  %v5516_v38 = vadd.f32 %v4614_v12, %v809_v53  ;;  %8453 = vst [vmem:[#allocation119_spill] sm:$0xff] %v5532_v57 }
 0x41f   :  { %s5400_s9 = sld [smem:[#allocation2 + $0x22]]  ;;  %v8191_v26 = vstv %s8417_s16  ;;  %8451 = vst [vmem:[#allocation118_spill] sm:$0xff] %v5525_v15 }
 0x420   :  { %s5406_s15 = sld [smem:[#allocation2 + $0x42]]  ;;  %v8189_v33 = vstv %s8418_s4  ;;  %v1297_v62 = vmul.f32 %v8191_v26, %v5121_v45  ;;  %v5484_v26 = vmul.f32 %v8431_v24, %v5412_v48  ;;  %8446 = vst [vmem:[#allocation116_spill] sm:$0xff] %v5516_v38  ;;  %v5568_v24 = vmul.f32 %v8466_v52, %v5177_v63 }
 0x421   :  { %8419 = sst [smem:[#allocation100_spill]] %s5393_s1  ;;  %v1283_v43 = vmul.f32 %v8189_v33, %v5121_v45  ;;  %v5479_v33 = vmul.f32 %v8430_v40, %v5412_v48  ;;  %v5493_v40 = vadd.f32 %v4614_v12, %v807_v3  ;;  %1315 = vrot.lane.b32.xlu0 %v1311_v27, %s8447_s6 }
 0x422   :  { %8420 = sst [smem:[#allocation101_spill]] %s5397_s20  ;;  %1301 = vrot.lane.b32.xlu1 %v1297_v62, %s8447_s6  ;;  %8468 = vst [vmem:[#allocation122_spill] sm:$0xff] %v5568_v24 }
 0x423   :  { %s5409_s1 = sld [smem:[#allocation2 + $0x43]]  ;;  %8434 = vst [vmem:[#allocation111_spill] sm:$0xff] %v5493_v40  ;;  %1287 = vrot.lane.b32.xlu2 %v1283_v43, %s8426_s24  ;;  %v5592_v62 = vmul.f32 %v8239_v36, %v5493_v40  ;;  %v8492_v43 = vstv %s5341_s27 }
 0x424   :  { %s5419_s10 = sld [smem:[#allocation2 + $0x24]] }
 0x425   :  { %8421 = sst [smem:[#allocation102_spill]] %s5400_s9  ;;  %8478 = vst [vmem:[#allocation127_spill] sm:$0xff] %v5592_v62 }
 0x426   :  { %8422 = sst [smem:[#allocation103_spill]] %s5406_s15 }
 0x427   :  { %s5429_s12 = sld [smem:[#allocation2 + $0x44]] }
 0x428   :  { %s5439_s2 = sld [smem:[#allocation2 + $0x45]] }
 0x429   :  { %8423 = sst [smem:[#allocation104_spill]] %s5409_s1 }
 0x42a   :  { %8424 = sst [smem:[#allocation105_spill]] %s5419_s10  ;;  %1343 = vrot.lane.b32.xlu1 %v5462_v5, %s8483_s0  ;;  %v5626_v5 = vmul.f32 %v8492_v43, %v5493_v40 }
 0x42b   :  { %s5469_s16 = sld [smem:[#allocation2 + $0x25]]  ;;  %1329 = vrot.lane.b32.xlu2 %v5467_v30, %s8483_s0 }
 0x42c   :  { %8432 = sst [smem:[#allocation110_spill]] %s5487_s28  ;;  %8493 = vst [vmem:[#allocation133_spill] sm:$0xff] %v5626_v5 }
 0x42d   :  { %8425 = sst [smem:[#allocation106_spill]] %s5429_s12 }
 0x42e   :  { %8427 = sst [smem:[#allocation107_spill]] %s5439_s2 }
 0x42f   :  { %s5448_s12 = sld [smem:[#allocation2 + $0x26]] }
 0x430   :  { %s5495_s11 = sld [smem:[#allocation2 + $0x47]] }
 0x431   :  { %8429 = sst [smem:[#allocation109_spill]] %s5469_s16 }
 0x432   :  { %s5501_s4 = sld [smem:[#allocation2 + $0x68]] }
 0x433   :  { %s8440_s3 = sld [smem:[#allocation94_spill]] }
 0x434   :  { %s8441_s28 = sld [smem:[#allocation95_spill]] }
 0x435   :  { %8428 = sst [smem:[#allocation108_spill]] %s5448_s12 }
 0x436   :  { %8435 = sst [smem:[#allocation112_spill]] %s5495_s11 }
 0x437   :  { %s5507_s23 = sld [smem:[#allocation2 + $0x49]] }
 0x438   :  { %8439 = sst [smem:[#allocation113_spill]] %s5501_s4  ;;  %s8474_s4 = smov 127  }
 0x439   :  { %s8444_s29 = sld [smem:[#allocation97_spill]]  ;;  %1381 = vrot.lane.b32.xlu0 %v5457_v16, %s8474_s4  ;;  %1409 = vrot.lane.b32.xlu1 %v5479_v33, %s8474_s4 }
 0x43a   :  { %s5513_s17 = sld [smem:[#allocation2 + $0x48]]  ;;  %1395 = vrot.lane.b32.xlu2 %v5484_v26, %s8474_s4 }
 0x43b   :  { %s8448_s5 = sld [smem:[#allocation99_spill]] }
 0x43c   :  { %s5522_s19 = sld [smem:[#allocation2 + $0x6a]] }
 0x43d   :  { %8442 = sst [smem:[#allocation114_spill]] %s5507_s23 }
 0x43e   :  { %s8454_s30 = sld [smem:[#allocation109_spill]] }
 0x43f   :  { %s8455_s13 = sld [smem:[#allocation74_spill]] }
 0x440   :  { %8445 = sst [smem:[#allocation115_spill]] %s5513_s17 }
 0x441   :  { %s5538_s22 = sld [smem:[#allocation2 + $0x6b]]  ;;  %1423 = vrot.lane.b32.xlu0 %v5474_v49, %s8474_s4 }
 0x442   :  { %8450 = sst [smem:[#allocation117_spill]] %s5522_s19 }
 0x443   :  { %s5544_s16 = sld [smem:[#allocation2 + $0x4a]] }
 0x444   :  { %s8459_s24 = sld [smem:[#allocation76_spill]] }
 0x445   :  { %s5550_s18 = sld [smem:[#allocation2 + $0x6c]]  ;;  %v8462_v27 = vstv %s8455_s13 }
 0x446   :  { %s8460_s20 = sld [smem:[#allocation77_spill]]  ;;  %v5560_v42 = vmul.f32 %v8462_v27, %v5177_v63  ;;  %v5582_v27 = vmul.f32 %v8235_v35, %v5493_v40 }
 0x447   :  { %8456 = sst [smem:[#allocation109_spill]] %s5538_s22 }
 0x448   :  { %s5555_s25 = sld [smem:[#allocation2 + $0x6d]]  ;;  %8464 = vst [vmem:[#allocation121_spill] sm:$0xff] %v5560_v42 }
 0x449   :  { %8458 = sst [smem:[#allocation120_spill]] %s5544_s16  ;;  %8473 = vst [vmem:[#allocation125_spill] sm:$0xff] %v5582_v27  ;;  %v8561_v49 = vstv %s5544_s16 }
 0x44a   :  { %s8463_s9 = sld [smem:[#allocation85_spill]]  ;;  %v8470_v53 = vstv %s8459_s24 }
 0x44b   :  { %s8465_s1 = sld [smem:[#allocation86_spill]]  ;;  %v5577_v23 = vmul.f32 %v8470_v53, %v5177_v63 }
 0x44c   :  { %s8467_s14 = sld [smem:[#allocation84_spill]]  ;;  %v8479_v53 = vstv %s8460_s20 }
 0x44d   :  { %s5572_s2 = sld [smem:[#allocation2 + $0x4c]]  ;;  %8471 = vst [vmem:[#allocation124_spill] sm:$0xff] %v5577_v23  ;;  %v5597_v7 = vmul.f32 %v8479_v53, %v5177_v63 }
 0x44e   :  { %8461 = sst [smem:[#allocation77_spill]] %s5555_s25 }
 0x44f   :  { %s8472_s13 = sld [smem:[#allocation87_spill]]  ;;  %8480 = vst [vmem:[#allocation128_spill] sm:$0xff] %v5597_v7 }
 0x450   :  { %s8475_s21 = sld [smem:[#allocation92_spill]]  ;;  %v8481_v35 = vstv %s8463_s9 }
 0x451   :  { %s8476_s23 = sld [smem:[#allocation90_spill]]  ;;  %v5602_v1 = vmul.f32 %v8481_v35, %v5493_v40  ;;  %v8486_v16 = vstv %s8465_s1  ;;  %v8490_v35 = vstv %s5338_s26 }
 0x452   :  { %s5587_s6 = sld [smem:[#allocation2 + $0x4d]]  ;;  %v5611_v36 = vmul.f32 %v8486_v16, %v5493_v40  ;;  %v8488_v53 = vstv %s8467_s14  ;;  %v5621_v3 = vmul.f32 %v8490_v35, %v5493_v40 }
 0x453   :  { %8469 = sst [smem:[#allocation123_spill]] %s5572_s2  ;;  %8482 = vst [vmem:[#allocation129_spill] sm:$0xff] %v5602_v1  ;;  %v5616_v52 = vmul.f32 %v8488_v53, %v5177_v63  ;;  %v8497_v63 = vstv %s8440_s3  ;;  %v8568_v26 = vstv %s5572_s2 }
 0x454   :  { %s8484_s24 = sld [smem:[#allocation93_spill]]  ;;  %8487 = vst [vmem:[#allocation130_spill] sm:$0xff] %v5611_v36  ;;  %v5640_v35 = vmul.f32 %v8497_v63, %v5516_v38  ;;  %v5797_v33 = vmul.f32 %v8568_v26, %v5532_v57  ;;  %v8580_v26 = vstv %s5555_s25 }
 0x455   :  { %s5606_s19 = sld [smem:[#allocation2 + $0x4e]]  ;;  %8489 = vst [vmem:[#allocation131_spill] sm:$0xff] %v5616_v52  ;;  %v8495_v16 = vstv %s8472_s13 }
 0x456   :  { %8491 = vst [vmem:[#allocation132_spill] sm:$0xff] %v5621_v3  ;;  %s5630_s1 = sld [smem:[#allocation2 + $0x4f]]  ;;  %v5635_v53 = vmul.f32 %v8495_v16, %v5493_v40  ;;  %v8500_v3 = vstv %s8475_s21  ;;  %v8508_v16 = vstv %s8444_s29 }
 0x457   :  { %s8498_s26 = sld [smem:[#allocation96_spill]]  ;;  %8499 = vst [vmem:[#allocation136_spill] sm:$0xff] %v5640_v35  ;;  %v5645_v43 = vmul.f32 %v8500_v3, %v5493_v40  ;;  %v8503_v5 = vstv %s8476_s23  ;;  %v5658_v63 = vmul.f32 %v8508_v16, %v5516_v38  ;;  %v8510_v35 = vstv %s8441_s28 }
 0x458   :  { %8477 = sst [smem:[#allocation126_spill]] %s5587_s6  ;;  %8496 = vst [vmem:[#allocation135_spill] sm:$0xff] %v5635_v53  ;;  %v5650_v30 = vmul.f32 %v8503_v5, %v5493_v40  ;;  %v5663_v3 = vmul.f32 %v8510_v35, %v5493_v40  ;;  %v8518_v16 = vstv %s8448_s5  ;;  %v8520_v53 = vstv %s5379_s7 }
 0x459   :  { %s8501_s27 = sld [smem:[#allocation102_spill]]  ;;  %8502 = vst [vmem:[#allocation137_spill] sm:$0xff] %v5645_v43  ;;  %v5682_v35 = vmul.f32 %v8520_v53, %v5516_v38 }
 0x45a   :  { %s8504_s9 = sld [smem:[#allocation100_spill]]  ;;  %8505 = vst [vmem:[#allocation138_spill] sm:$0xff] %v5650_v30  ;;  %v8513_v43 = vstv %s8484_s24 }
 0x45b   :  { %8485 = sst [smem:[#allocation93_spill]] %s5606_s19  ;;  %8509 = vst [vmem:[#allocation139_spill] sm:$0xff] %v5658_v63  ;;  %v5668_v5 = vmul.f32 %v8513_v43, %v5493_v40  ;;  %v5677_v63 = vmul.f32 %v8518_v16, %v5525_v15 }
 0x45c   :  { %8494 = sst [smem:[#allocation134_spill]] %s5630_s1  ;;  %8512 = vst [vmem:[#allocation140_spill] sm:$0xff] %v5663_v3 }
 0x45d   :  { %s8506_s14 = sld [smem:[#allocation98_spill]]  ;;  %8514 = vst [vmem:[#allocation141_spill] sm:$0xff] %v5668_v5  ;;  %v8523_v43 = vstv %s8498_s26 }
 0x45e   :  { %s5653_s13 = sld [smem:[#allocation2 + $0x8f]]  ;;  %8519 = vst [vmem:[#allocation142_spill] sm:$0xff] %v5677_v63  ;;  %v5690_v30 = vmul.f32 %v8523_v43, %v5516_v38  ;;  %v8535_v43 = vstv %s5406_s15 }
 0x45f   :  { %s8511_s3 = sld [smem:[#allocation101_spill]]  ;;  %8521 = vst [vmem:[#allocation143_spill] sm:$0xff] %v5682_v35  ;;  %v8526_v36 = vstv %s8501_s27  ;;  %v8532_v35 = vstv %s5419_s10 }
 0x460   :  { %s8515_s21 = sld [smem:[#allocation106_spill]]  ;;  %8525 = vst [vmem:[#allocation144_spill] sm:$0xff] %v5690_v30  ;;  %v5695_v5 = vmul.f32 %v8526_v36, %v5525_v15  ;;  %v8528_v16 = vstv %s8504_s9  ;;  %v5710_v1 = vmul.f32 %v8532_v35, %v5532_v57  ;;  %v5715_v36 = vmul.f32 %v8535_v43, %v5516_v38 }
 0x461   :  { %s8516_s23 = sld [smem:[#allocation104_spill]]  ;;  %v5700_v63 = vmul.f32 %v8528_v16, %v5493_v40  ;;  %v8540_v16 = vstv %s5448_s12  ;;  %v8547_v43 = vstv %s5495_s11  ;;  %8570 = vst [vmem:[#allocation163_spill] sm:$0xff] %v5797_v33  ;;  %v5823_v33 = vmul.f32 %v8580_v26, %v5516_v38 }
 0x462   :  { %s5672_s8 = sld [smem:[#allocation2 + $0x6f]]  ;;  %8527 = vst [vmem:[#allocation145_spill] sm:$0xff] %v5695_v5 }
 0x463   :  { %s5685_s29 = sld [smem:[#allocation2 + $0x90]]  ;;  %8529 = vst [vmem:[#allocation146_spill] sm:$0xff] %v5700_v63  ;;  %v8530_v53 = vstv %s8506_s14  ;;  %v5725_v63 = vmul.f32 %v8540_v16, %v5532_v57 }
 0x464   :  { %8507 = sst [smem:[#allocation96_spill]] %s5653_s13  ;;  %v5705_v3 = vmul.f32 %v8530_v53, %v5525_v15  ;;  %8534 = vst [vmem:[#allocation148_spill] sm:$0xff] %v5710_v1 }
 0x465   :  { %s8524_s28 = sld [smem:[#allocation107_spill]]  ;;  %8537 = vst [vmem:[#allocation149_spill] sm:$0xff] %v5715_v36  ;;  %v8538_v5 = vstv %s8511_s3 }
 0x466   :  { %8531 = vst [vmem:[#allocation147_spill] sm:$0xff] %v5705_v3  ;;  %s8533_s5 = sld [smem:[#allocation91_spill]]  ;;  %v5720_v30 = vmul.f32 %v8538_v5, %v5525_v15  ;;  %v8542_v53 = vstv %s8515_s21  ;;  %v5740_v5 = vmul.f32 %v8547_v43, %v5525_v15  ;;  %v8555_v43 = vstv %s5513_s17 }
 0x467   :  { %s8536_s27 = sld [smem:[#allocation110_spill]]  ;;  %8541 = vst [vmem:[#allocation151_spill] sm:$0xff] %v5725_v63  ;;  %v5730_v3 = vmul.f32 %v8542_v53, %v5516_v38  ;;  %v8544_v35 = vstv %s8516_s23  ;;  %v8551_v53 = vstv %s8454_s30  ;;  %v5762_v63 = vmul.f32 %v8555_v43, %v5525_v15 }
 0x468   :  { %8517 = sst [smem:[#allocation100_spill]] %s5672_s8  ;;  %8539 = vst [vmem:[#allocation150_spill] sm:$0xff] %v5720_v30  ;;  %v5735_v1 = vmul.f32 %v8544_v35, %v5516_v38  ;;  %v5780_v43 = vmul.f32 %v8561_v49, %v5525_v15 }
 0x469   :  { %8522 = sst [smem:[#allocation98_spill]] %s5685_s29  ;;  %8543 = vst [vmem:[#allocation152_spill] sm:$0xff] %v5730_v3  ;;  %v5749_v3 = vmul.f32 %v8551_v53, %v5532_v57 }
 0x46a   :  { %s8545_s10 = sld [smem:[#allocation113_spill]]  ;;  %8546 = vst [vmem:[#allocation153_spill] sm:$0xff] %v5735_v1 }
 0x46b   :  { %s8548_s15 = sld [smem:[#allocation114_spill]]  ;;  %8549 = vst [vmem:[#allocation154_spill] sm:$0xff] %v5740_v5  ;;  %v8553_v35 = vstv %s8524_s28 }
 0x46c   :  { %s8550_s12 = sld [smem:[#allocation117_spill]]  ;;  %8552 = vst [vmem:[#allocation155_spill] sm:$0xff] %v5749_v3  ;;  %v5754_v1 = vmul.f32 %v8553_v35, %v5516_v38  ;;  %v8557_v16 = vstv %s8533_s5 }
 0x46d   :  { %8556 = vst [vmem:[#allocation157_spill] sm:$0xff] %v5762_v63  ;;  %v5767_v53 = vmul.f32 %v8557_v16, %v5493_v40  ;;  %v8559_v3 = vstv %s8536_s27  ;;  %s8564_s17 = sld [smem:[#allocation42_spill]] }
 0x46e   :  { %8554 = vst [vmem:[#allocation156_spill] sm:$0xff] %v5754_v1  ;;  %v5772_v35 = vmul.f32 %v8559_v3, %v5532_v57  ;;  %s8569_s11 = sld [smem:[#allocation43_spill]]  ;;  %v8578_v1 = vstv %s5550_s18 }
 0x46f   :  { %8558 = vst [vmem:[#allocation158_spill] sm:$0xff] %v5767_v53  ;;  %s8574_s16 = sld [smem:[#allocation44_spill]]  ;;  %v5818_v36 = vmul.f32 %v8578_v1, %v5516_v38  ;;  %v8589_v1 = vstv %s5653_s13 }
 0x470   :  { %8560 = vst [vmem:[#allocation159_spill] sm:$0xff] %v5772_v35  ;;  %v8563_v63 = vstv %s8545_s10  ;;  %v5792_v35 = vpop.permute.xlu2 %885  ;;  %s8581_s2 = sld [smem:[#allocation45_spill]] }
 0x471   :  { %8562 = vst [vmem:[#allocation160_spill] sm:$0xff] %v5780_v43  ;;  %v5785_v16 = vmul.f32 %v8563_v63, %v5493_v40  ;;  %v8566_v53 = vstv %s8548_s15  ;;  %v8573_v63 = vstv %s5538_s22  ;;  %s8584_s22 = sld [smem:[#allocation46_spill]] }
 0x472   :  { %v5790_v3 = vmul.f32 %v8566_v53, %v5525_v15  ;;  %v8571_v49 = vstv %s8550_s12  ;;  %v8576_v53 = vstv %s5606_s19  ;;  %8579 = vst [vmem:[#allocation167_spill] sm:$0xff] %v5818_v36  ;;  %s8586_s12 = sld [smem:[#allocation47_spill]]  ;;  %v5840_v36 = vmul.f32 %v8589_v1, %v5493_v40 }
 0x473   :  { %8565 = vst [vmem:[#allocation161_spill] sm:$0xff] %v5785_v16  ;;  %v5802_v43 = vmul.f32 %v8571_v49, %v5516_v38  ;;  %v5807_v16 = vmul.f32 %v8573_v63, %v5516_v38  ;;  %v8583_v49 = vstv %s5630_s1  ;;  %v8265_v63 = vstv %s5672_s8  ;;  %s8593_s1 = sld [smem:[#allocation48_spill]] }
 0x474   :  { %8567 = vst [vmem:[#allocation162_spill] sm:$0xff] %v5790_v3  ;;  %v5812_v3 = vmul.f32 %v8576_v53, %v5532_v57  ;;  %v8587_v53 = vstv %s5587_s6  ;;  %v5848_v38 = vmul.f32 %v8265_v63, %v5525_v15  ;;  %s8596_s19 = sld [smem:[#allocation49_spill]]  ;;  %s8597_s6 = smov 126  }
 0x475   :  { %8572 = vst [vmem:[#allocation164_spill] sm:$0xff] %v5802_v43  ;;  %v5828_v43 = vmul.f32 %v8583_v49, %v5532_v57  ;;  %v5835_v5 = vmul.f32 %v8587_v53, %v5532_v57  ;;  %v8598_v1 = vstv %s8574_s16  ;;  %s8599_s13 = sld [smem:[#allocation50_spill]] }
 0x476   :  { %8575 = vst [vmem:[#allocation165_spill] sm:$0xff] %v5807_v16  ;;  %v8266_v16 = vstv %s5685_s29  ;;  %v1433_v57 = vmul.f32 %v8598_v1, %v5412_v48  ;;  %v8600_v63 = vstv %s8581_s2  ;;  %s8604_s16 = sld [smem:[#allocation51_spill]] }
 0x477   :  { %8577 = vst [vmem:[#allocation166_spill] sm:$0xff] %v5812_v3  ;;  %v8591_v3 = vstv %s8564_s17  ;;  %v5853_v49 = vmul.f32 %v8266_v16, %v5493_v40  ;;  %v1503_v16 = vmul.f32 %v8600_v63, %v5412_v48  ;;  %v8601_v15 = vstv %s8584_s22  ;;  %s8602_s17 = smov 125   ;;  %s8607_s2 = sld [smem:[#allocation52_spill]] }
 0x478   :  { %8582 = vst [vmem:[#allocation168_spill] sm:$0xff] %v5823_v33  ;;  %v1461_v26 = vmul.f32 %v8591_v3, %v5412_v48  ;;  %1437 = vrot.lane.b32.xlu2 %v1433_v57, %s8597_s6  ;;  %v5864_v3 = vpop.permute.xlu2 %927  ;;  %s5895_s22 = sld [smem:[#allocation4]] }
 0x479   :  { %8585 = vst [vmem:[#allocation169_spill] sm:$0xff] %v5828_v43  ;;  %v8595_v43 = vstv %s8569_s11  ;;  %s5880_s11 = sld [smem:[#allocation2]]  ;;  %v8606_v57 = vstv %s8593_s1 }
 0x47a   :  { %8588 = vst [vmem:[#allocation170_spill] sm:$0xff] %v5835_v5  ;;  %v1447_v53 = vmul.f32 %v8595_v43, %v5412_v48  ;;  %1465 = vrot.lane.b32.xlu0 %v1461_v26, %s8597_s6  ;;  %v8603_v43 = vstv %s8586_s12  ;;  %v1545_v63 = vmul.f32 %v8606_v57, %v5412_v48  ;;  %s8610_s12 = sld [smem:[#allocation53_spill]]  ;;  %v5900_v57 = vpop.permute.xlu0 %913 }
 0x47b   :  { %8590 = vst [vmem:[#allocation171_spill] sm:$0xff] %v5840_v36  ;;  %v1475_v26 = vmul.f32 %v8603_v43, %v5412_v48  ;;  %v8609_v1 = vstv %s8599_s13  ;;  %v775_v43 = vmul.f32 %v4950_v34, %v4847_v50  ;;  %s5906_s13 = sld [smem:[#allocation2 + $0x78]] }
 0x47c   :  { %8592 = vst [vmem:[#allocation172_spill] sm:$0xff] %v5848_v38  ;;  %1451 = vrot.lane.b32.xlu1 %v1447_v53, %s8597_s6  ;;  %v1489_v38 = vmul.f32 %v8601_v15, %v5412_v48  ;;  %v8608_v15 = vstv %s8596_s19  ;;  %s5914_s19 = sld [smem:[#allocation4 + $0x3]] }
 0x47d   :  { %8594 = vst [vmem:[#allocation173_spill] sm:$0xff] %v5853_v49  ;;  %v8614_v50 = vstv %s8607_s2  ;;  %s8617_s1 = sld [smem:[#allocation54_spill]] }
 0x47e   :  { %8611 = sst [smem:[#allocation106_spill]] %s5895_s22  ;;  %v1573_v5 = vmul.f32 %v8614_v50, %v5412_v48  ;;  %v8276_v50 = vstv %s5895_s22 }
 0x47f   :  { %8605 = sst [smem:[#allocation101_spill]] %s5880_s11 }
 0x480   :  { %1479 = vrot.lane.b32.xlu2 %v1475_v26, %s8597_s6  ;;  %v5878_v53 = vpop.permute.xlu2 %969  ;;  %v5898_v26 = vpop.permute.xlu1 %899  ;;  %s5923_s29 = sld [smem:[#allocation2 + $0x50]] }
 0x481   :  { %8612 = sst [smem:[#allocation104_spill]] %s5906_s13 }
 0x482   :  { %1507 = vrot.lane.b32.xlu0 %v1503_v16, %s8602_s17  ;;  %v1531_v16 = vmul.f32 %v8608_v15, %v5412_v48  ;;  %v804_v15 = vmul.f32 %v4610_v9, %v775_v43  ;;  %8615 = sst [smem:[#allocation107_spill]] %s5914_s19  ;;  %v956_v40 = vpop.permute.xlu0 %955 }
 0x483   :  { %s8619_s2 = sld [smem:[#allocation56_spill]] }
 0x484   :  { %1493 = vrot.lane.b32.xlu1 %v1489_v38, %s8602_s17  ;;  %v1517_v38 = vmul.f32 %v8609_v1, %v5412_v48  ;;  %v8273_v1 = vstv %s5880_s11  ;;  %s5933_s11 = sld [smem:[#allocation2 + $0x28]] }
 0x485   :  { %v857_v43 = vmul.f32 %v8273_v1, %v4969_v56  ;;  %s5938_s8 = sld [smem:[#allocation4 + $0x2]] }
 0x486   :  { %s5944_s25 = sld [smem:[#allocation4 + $0x1]] }
 0x487   :  { %v859_v1 = vadd.f32 %v857_v43, %v8276_v50  ;;  %s5995_s22 = sld [smem:[#allocation2 + $0x2d]] }
 0x488   :  { %1521 = vrot.lane.b32.xlu2 %v1517_v38, %s8602_s17  ;;  %v8616_v38 = vstv %s8610_s12  ;;  %s5931_s12 = sld [smem:[#allocation2 + $0x5]] }
 0x489   :  { %v1559_v36 = vmul.f32 %v8616_v38, %v5412_v48  ;;  %v8623_v43 = vstv %s8619_s2  ;;  %s5961_s2 = sld [smem:[#allocation2 + $0x7d]] }
 0x48a   :  { %1549 = vrot.lane.b32.xlu0 %v1545_v63, %s8483_s0  ;;  %v5902_v63 = vpop.permute.xlu2 %1011 }
 0x48b   :  { %v8292_v24 = vstv %s5938_s8 }
 0x48c   :  { %1535 = vrot.lane.b32.xlu1 %v1531_v16, %s8602_s17  ;;  %v8613_v16 = vstv %s8604_s16  ;;  %s8618_s16 = sld [smem:[#allocation55_spill]]  ;;  %v8285_v0 = vstv %s5944_s25 }
 0x48d   :  { %v1587_v49 = vmul.f32 %v8613_v16, %v5412_v48  ;;  %v5927_v16 = vadd.f32 %v4612_v10, %v804_v15  ;;  %v8621_v15 = vstv %s8617_s1  ;;  %s8624_s1 = sld [smem:[#allocation57_spill]] }
 0x48e   :  { %8620 = sst [smem:[#allocation91_spill]] %s5931_s12  ;;  %v8284_v27 = vstv %s5931_s12 }
 0x48f   :  { %v1653_v33 = vmul.f32 %v8621_v15, %v5927_v16  ;;  %v1625_v50 = vmul.f32 %v8623_v43, %v5927_v16  ;;  %8626 = sst [smem:[#allocation110_spill]] %s5961_s2  ;;  %v8293_v43 = vstv %s5933_s11 }
 0x490   :  { %1563 = vrot.lane.b32.xlu2 %v1559_v36, %s8483_s0  ;;  %v891_v36 = vadd.f32 %v5792_v35, %v859_v1  ;;  %v8279_v35 = vstv %s5914_s19  ;;  %v8280_v1 = vstv %s5923_s29  ;;  %v863_v23 = vmul.f32 %v8293_v43, %v4969_v56  ;;  %s5990_s12 = sld [smem:[#allocation2 + $0x55]] }
 0x491   :  { %s8633_s19 = sld [smem:[#allocation61_spill]] }
 0x492   :  { %1591 = vrot.lane.b32.xlu0 %v1587_v49, %s8483_s0  ;;  %v942_v49 = vpop.permute.xlu1 %941  ;;  %v1054_v38 = vpop.permute.xlu2 %1053  ;;  %v8622_v30 = vstv %s8618_s16  ;;  %s8625_s16 = sld [smem:[#allocation58_spill]] }
 0x493   :  { %v1639_v52 = vmul.f32 %v8622_v30, %v5927_v16  ;;  %v947_v15 = vadd.f32 %v942_v49, %v891_v36  ;;  %v869_v36 = vmul.f32 %v8280_v1, %v4969_v56  ;;  %v8628_v42 = vstv %s8624_s1  ;;  %s8632_s1 = sld [smem:[#allocation60_spill]] }
 0x494   :  { %1577 = vrot.lane.b32.xlu1 %v1573_v5, %s8483_s0  ;;  %v8278_v5 = vstv %s5906_s13  ;;  %s8627_s13 = sld [smem:[#allocation59_spill]] }
 0x495   :  { %v875_v62 = vmul.f32 %v8278_v5, %v4969_v56  ;;  %v871_v56 = vadd.f32 %v869_v36, %v8292_v24  ;;  %8634 = sst [smem:[#allocation114_spill]] %s5995_s22 }
 0x496   :  { %8631 = sst [smem:[#allocation113_spill]] %s5990_s12 }
 0x498   :  { %1629 = vrot.lane.b32.xlu2 %v1625_v50, %s8474_s4  ;;  %v1105_v50 = vmul.f32 %v8284_v27, %v5121_v45 }
 0x49a   :  { %1657 = vrot.lane.b32.xlu0 %v1653_v33, %s8474_s4  ;;  %v984_v30 = vpop.permute.xlu1 %983  ;;  %v998_v33 = vpop.permute.xlu0 %997 }
 0x49b   :  { %v1003_v5 = vadd.f32 %v998_v33, %v947_v15  ;;  %v1096_v49 = vpop.permute.xlu2 %1095  ;;  %v1695_v15 = vmul.f32 %v8628_v42, %v5927_v16 }
 0x49c   :  { %1643 = vrot.lane.b32.xlu1 %v1639_v52, %s8474_s4  ;;  %v877_v52 = vadd.f32 %v875_v62, %v8279_v35  ;;  %v8629_v62 = vstv %s8625_s16  ;;  %s8635_s16 = sld [smem:[#allocation62_spill]] }
 0x49d   :  { %v1059_v7 = vadd.f32 %v1054_v38, %v1003_v5  ;;  %v1681_v35 = vmul.f32 %v8629_v62, %v5927_v16  ;;  %v8630_v38 = vstv %s8627_s13  ;;  %s8639_s13 = sld [smem:[#allocation74_spill]] }
 0x49e   :  { %v933_v33 = vadd.f32 %v5864_v3, %v877_v52  ;;  %v1667_v5 = vmul.f32 %v8630_v38, %v5927_v16  ;;  %v8289_v52 = vstv %s5961_s2  ;;  %v8636_v38 = vstv %s8632_s1  ;;  %s8640_s2 = sld [smem:[#allocation63_spill]] }
 0x49f   :  { %v5984_v1 = vadd.f32 %v1105_v50, %v1059_v7  ;;  %v865_v7 = vadd.f32 %v863_v23, %v8285_v0  ;;  %v919_v50 = vadd.f32 %v5900_v57, %v871_v56  ;;  %v1123_v62 = vmul.f32 %v8289_v52, %v5121_v45  ;;  %s8641_s1 = sld [smem:[#allocation64_spill]] }
 0x4a0   :  { %v989_v42 = vadd.f32 %v984_v30, %v933_v33  ;;  %1671 = vrot.lane.b32.xlu2 %v1667_v5, %s8474_s4  ;;  %v1737_v5 = vmul.f32 %v8636_v38, %v5927_v16  ;;  %v8637_v0 = vstv %s8633_s19  ;;  %s8642_s19 = sld [smem:[#allocation75_spill]] }
 0x4a1   :  { %v905_v30 = vadd.f32 %v5898_v26, %v865_v7  ;;  %v975_v27 = vadd.f32 %v5878_v53, %v919_v50  ;;  %v1723_v57 = vmul.f32 %v8637_v0, %v5927_v16  ;;  %v8290_v7 = vstv %s5995_s22  ;;  %s8647_s22 = sld [smem:[#allocation78_spill]] }
 0x4a2   :  { %1699 = vrot.lane.b32.xlu0 %v1695_v15, %s8597_s6  ;;  %v1040_v3 = vpop.permute.xlu0 %1039  ;;  %v1026_v15 = vpop.permute.xlu1 %1025  ;;  %v8638_v26 = vstv %s8635_s16  ;;  %s8643_s16 = sld [smem:[#allocation76_spill]] }
 0x4a3   :  { %v1045_v36 = vadd.f32 %v1040_v3, %v989_v42  ;;  %v1162_v33 = vpop.permute.xlu2 %1161  ;;  %v961_v23 = vadd.f32 %v956_v40, %v905_v30  ;;  %v8291_v42 = vstv %s5990_s12  ;;  %v1031_v40 = vadd.f32 %v1026_v15, %v975_v27  ;;  %s8649_s12 = sld [smem:[#allocation84_spill]] }
 0x4a4   :  { %1685 = vrot.lane.b32.xlu1 %v1681_v35, %s8597_s6  ;;  %v1117_v50 = vmul.f32 %v8291_v42, %v5121_v45  ;;  %v1111_v27 = vmul.f32 %v8290_v7, %v5121_v45 }
 0x4a5   :  { %v1101_v35 = vadd.f32 %v1096_v49, %v1045_v36  ;;  %v1709_v49 = vmul.f32 %v8638_v26, %v5927_v16  ;;  %v1017_v0 = vadd.f32 %v5902_v63, %v961_v23  ;;  %v8645_v63 = vstv %s8640_s2  ;;  %s8653_s2 = sld [smem:[#allocation85_spill]] }
 0x4a6   :  { %v1765_v23 = vmul.f32 %v8645_v63, %v5927_v16 }
 0x4a7   :  { %v6013_v56 = vadd.f32 %v1123_v62, %v1101_v35  ;;  %v8644_v62 = vstv %s8639_s13  ;;  %s8648_s13 = sld [smem:[#allocation80_spill]] }
 0x4a8   :  { %1713 = vrot.lane.b32.xlu2 %v1709_v49, %s8597_s6  ;;  %v1779_v38 = vmul.f32 %v8644_v62, %v5927_v16  ;;  %v777_v49 = vmul.f32 %v4950_v34, %v4844_v47  ;;  %v8652_v47 = vstv %s8460_s20  ;;  %s6074_s20 = sld [smem:[#allocation2 + $0x5a]] }
 0x4aa   :  { %1741 = vrot.lane.b32.xlu0 %v1737_v5, %s8602_s17  ;;  %v1082_v53 = vpop.permute.xlu0 %1081  ;;  %v1068_v3 = vpop.permute.xlu1 %1067 }
 0x4ab   :  { %v1087_v36 = vadd.f32 %v1082_v53, %v1031_v40  ;;  %v1073_v30 = vadd.f32 %v1068_v3, %v1017_v0  ;;  %v1204_v35 = vpop.permute.xlu2 %1203  ;;  %v806_v53 = vmul.f32 %v4610_v9, %v777_v49  ;;  %v8650_v3 = vstv %s8642_s19  ;;  %s8655_s19 = sld [smem:[#allocation87_spill]] }
 0x4ac   :  { %1727 = vrot.lane.b32.xlu1 %v1723_v57, %s8597_s6  ;;  %v8646_v57 = vstv %s8641_s1  ;;  %s8654_s1 = sld [smem:[#allocation86_spill]] }
 0x4ad   :  { %v1119_v15 = vadd.f32 %v1117_v50, %v1087_v36  ;;  %v1113_v5 = vadd.f32 %v1111_v27, %v1073_v30  ;;  %v1751_v26 = vmul.f32 %v8646_v57, %v5927_v16  ;;  %v1821_v50 = vmul.f32 %v8650_v3, %v5927_v16 }
 0x4ae   :  { %v8651_v36 = vstv %s8643_s16  ;;  %v1793_v27 = vmul.f32 %v8652_v47, %v5927_v16  ;;  %v6057_v62 = vadd.f32 %v4612_v10, %v806_v53  ;;  %v8656_v57 = vstv %s8647_s22  ;;  %s8662_s22 = sld [smem:[#allocation88_spill]] }
 0x4af   :  { %v1807_v30 = vmul.f32 %v8651_v36, %v5927_v16  ;;  %v8657_v49 = vstv %s8648_s13  ;;  %v1167_v52 = vadd.f32 %v1162_v33, %v1119_v15  ;;  %s8663_s16 = sld [smem:[#allocation89_spill]]  ;;  %v8294_v15 = vstv %s6074_s20 }
 0x4b0   :  { %1755 = vrot.lane.b32.xlu2 %v1751_v26, %s8602_s17  ;;  %v1887_v26 = vmul.f32 %v8656_v57, %v6057_v62  ;;  %v1873_v3 = vmul.f32 %v8657_v49, %v6057_v62  ;;  %s6089_s13 = sld [smem:[#allocation2 + $0xa]] }
 0x4b2   :  { %1783 = vrot.lane.b32.xlu0 %v1779_v38, %s8602_s17  ;;  %v1148_v45 = vpop.permute.xlu0 %1147  ;;  %v1134_v40 = vpop.permute.xlu1 %1133  ;;  %v8660_v49 = vstv %s8654_s1  ;;  %s6114_s1 = sld [smem:[#allocation2 + $0x82]] }
 0x4b3   :  { %v1246_v0 = vpop.permute.xlu2 %1245 }
 0x4b4   :  { %1769 = vrot.lane.b32.xlu1 %v1765_v23, %s8602_s17  ;;  %v8665_v42 = vstv %s8662_s22  ;;  %s8670_s22 = sld [smem:[#allocation94_spill]] }
 0x4b5   :  { %v8666_v43 = vstv %s8663_s16  ;;  %s8672_s16 = sld [smem:[#allocation95_spill]] }
 0x4b8   :  { %1797 = vrot.lane.b32.xlu2 %v1793_v27, %s8483_s0  ;;  %v8659_v27 = vstv %s8653_s2  ;;  %s8664_s2 = sld [smem:[#allocation90_spill]] }
 0x4b9   :  { %v1929_v57 = vmul.f32 %v8659_v27, %v6057_v62  ;;  %v1153_v27 = vadd.f32 %v1148_v45, %v1113_v5  ;;  %v1957_v5 = vmul.f32 %v8666_v43, %v6057_v62 }
 0x4ba   :  { %1825 = vrot.lane.b32.xlu0 %v1821_v50, %s8483_s0  ;;  %v1190_v38 = vpop.permute.xlu0 %1189  ;;  %v1176_v63 = vpop.permute.xlu1 %1175  ;;  %v8658_v50 = vstv %s8649_s12  ;;  %s6086_s12 = sld [smem:[#allocation2 + $0x32]] }
 0x4bb   :  { %v6060_v23 = vpop.permute.xlu2 %1287  ;;  %v1835_v53 = vmul.f32 %v8658_v50, %v5927_v16  ;;  %v1209_v24 = vadd.f32 %v1204_v35, %v1153_v27 }
 0x4bc   :  { %1811 = vrot.lane.b32.xlu1 %v1807_v30, %s8483_s0 }
 0x4c0   :  { %1839 = vrot.lane.b32.xlu2 %v1835_v53, %s8483_s0 }
 0x4c2   :  { %1891 = vrot.lane.b32.xlu0 %v1887_v26, %s8474_s4  ;;  %v1232_v36 = vpop.permute.xlu0 %1231  ;;  %v1218_v30 = vpop.permute.xlu1 %1217  ;;  %v1915_v26 = vmul.f32 %v8660_v49, %v6057_v62 }
 0x4c3   :  { %v1330_v47 = vpop.permute.xlu2 %1329  ;;  %v1223_v53 = vadd.f32 %v1218_v30, %v1167_v52  ;;  %v1365_v30 = vmul.f32 %v8294_v15, %v5412_v48 }
 0x4c4   :  { %1877 = vrot.lane.b32.xlu1 %v1873_v3, %s8474_s4  ;;  %v8661_v3 = vstv %s8655_s19  ;;  %s8668_s19 = sld [smem:[#allocation92_spill]] }
 0x4c5   :  { %v1901_v50 = vmul.f32 %v8661_v3, %v6057_v62  ;;  %v1139_v3 = vadd.f32 %v1134_v40, %v5984_v1  ;;  %v8667_v1 = vstv %s8664_s2  ;;  %s8686_s2 = sld [smem:[#allocation103_spill]] }
 0x4c6   :  { %v1943_v40 = vmul.f32 %v8667_v1, %v6057_v62 }
 0x4c8   :  { %1905 = vrot.lane.b32.xlu2 %v1901_v50, %s8474_s4  ;;  %v1971_v50 = vmul.f32 %v8665_v42, %v6057_v62  ;;  %v779_v42 = vmul.f32 %v4950_v34, %v4838_v54 }
 0x4ca   :  { %1933 = vrot.lane.b32.xlu0 %v1929_v57, %s8597_s6  ;;  %v1274_v33 = vpop.permute.xlu0 %1273  ;;  %v1260_v57 = vpop.permute.xlu1 %1259  ;;  %v8671_v1 = vstv %s8668_s19  ;;  %s6224_s19 = sld [smem:[#allocation2 + $0x5f]] }
 0x4cb   :  { %v1279_v49 = vadd.f32 %v1274_v33, %v1223_v53  ;;  %v6094_v7 = vpop.permute.xlu2 %1395  ;;  %v1265_v53 = vadd.f32 %v1260_v57, %v1209_v24  ;;  %v1181_v57 = vadd.f32 %v1176_v63, %v6013_v56  ;;  %v8673_v56 = vstv %s8484_s24  ;;  %s8678_s24 = sld [smem:[#allocation99_spill]] }
 0x4cc   :  { %1919 = vrot.lane.b32.xlu1 %v1915_v26, %s8474_s4  ;;  %v1195_v26 = vadd.f32 %v1190_v38, %v1139_v3  ;;  %v1352_v38 = vstv %s6089_s13  ;;  %v1985_v63 = vmul.f32 %v8673_v56, %v6057_v62  ;;  %s6881_s13 = sld [smem:[#allocation2 + $0x72]] }
 0x4cd   :  { %v1335_v52 = vadd.f32 %v1330_v47, %v1279_v49  ;;  %v1358_v47 = vstv %s6086_s12  ;;  %v1353_v54 = vmul.f32 %v1352_v38, %v5412_v48  ;;  %s4101_s12 = sld [smem:[#allocation2 + $0x71]] }
 0x4ce   :  { %v1251_v43 = vadd.f32 %v1246_v0, %v1195_v26  ;;  %v1359_v24 = vmul.f32 %v1358_v47, %v5412_v48  ;;  %v1237_v0 = vadd.f32 %v1232_v36, %v1181_v57  ;;  %v8669_v26 = vstv %s8533_s5  ;;  %s8674_s5 = sld [smem:[#allocation97_spill]] }
 0x4cf   :  { %v6105_v45 = vadd.f32 %v1365_v30, %v1335_v52  ;;  %v808_v30 = vmul.f32 %v4610_v9, %v779_v42 }
 0x4d0   :  { %1947 = vrot.lane.b32.xlu2 %v1943_v40, %s8597_s6  ;;  %v1999_v40 = vmul.f32 %v8671_v1, %v6057_v62  ;;  %v1293_v42 = vadd.f32 %v6060_v23, %v1237_v0  ;;  %v8676_v23 = vstv %s8672_s16  ;;  %s8701_s16 = sld [smem:[#allocation109_spill]] }
 0x4d1   :  { %v6142_v36 = vadd.f32 %v4612_v10, %v808_v30  ;;  %v2041_v0 = vmul.f32 %v8676_v23, %v6057_v62 }
 0x4d2   :  { %1975 = vrot.lane.b32.xlu0 %v1971_v50, %s8597_s6  ;;  %v1316_v35 = vpop.permute.xlu0 %1315  ;;  %v1302_v33 = vpop.permute.xlu1 %1301  ;;  %v2013_v50 = vmul.f32 %v8669_v26, %v6057_v62 }
 0x4d3   :  { %v1321_v27 = vadd.f32 %v1316_v35, %v1265_v53  ;;  %v1307_v49 = vadd.f32 %v1302_v33, %v1251_v43  ;;  %v6123_v3 = vpop.permute.xlu2 %1437  ;;  %v1370_v53 = vstv %s6114_s1  ;;  %v781_v33 = vmul.f32 %v4950_v34, %v4862_v46  ;;  %s4074_s1 = sld [smem:[#allocation2 + $0x92]] }
 0x4d4   :  { %1961 = vrot.lane.b32.xlu1 %v1957_v5, %s8597_s6  ;;  %v1371_v57 = vmul.f32 %v1370_v53, %v5412_v48  ;;  %v8677_v46 = vstv %s8498_s26  ;;  %s6181_s26 = sld [smem:[#allocation2 + $0x37]] }
 0x4d5   :  { %v1361_v52 = vadd.f32 %v1359_v24, %v1321_v27  ;;  %v1355_v5 = vadd.f32 %v1353_v54, %v1307_v49  ;;  %v8675_v49 = vstv %s8670_s22  ;;  %v810_v26 = vmul.f32 %v4610_v9, %v781_v33  ;;  %s8700_s22 = sld [smem:[#allocation117_spill]] }
 0x4d6   :  { %v2121_v54 = vmul.f32 %v8675_v49, %v6142_v36 }
 0x4d8   :  { %1989 = vrot.lane.b32.xlu2 %v1985_v63, %s8602_s17  ;;  %v8679_v63 = vstv %s8674_s5  ;;  %s8713_s5 = sld [smem:[#allocation123_spill]] }
 0x4da   :  { %2017 = vrot.lane.b32.xlu0 %v2013_v50, %s8602_s17  ;;  %v1382_v43 = vpop.permute.xlu0 %1381  ;;  %v1344_v35 = vpop.permute.xlu1 %1343  ;;  %v2177_v50 = vmul.f32 %v8677_v46, %v6142_v36  ;;  %v1401_v46 = vadd.f32 %v6094_v7, %v1361_v52  ;;  %v8299_v52 = vstv %s6181_s26 }
 0x4db   :  { %v1349_v24 = vadd.f32 %v1344_v35, %v1293_v42  ;;  %v6148_v27 = vpop.permute.xlu2 %1479  ;;  %v2289_v42 = vmul.f32 %v8679_v63, %v6142_v36  ;;  %v8680_v35 = vstv %s5379_s7  ;;  %s8685_s7 = sld [smem:[#allocation102_spill]] }
 0x4dc   :  { %2003 = vrot.lane.b32.xlu1 %v1999_v40, %s8602_s17  ;;  %v6167_v40 = vadd.f32 %v4612_v10, %v810_v26  ;;  %v2233_v33 = vmul.f32 %v8680_v35, %v6142_v36 }
 0x4dd   :  { %v1373_v30 = vadd.f32 %v1371_v57, %v1349_v24  ;;  %v8681_v24 = vstv %s8506_s14  ;;  %s6194_s14 = sld [smem:[#allocation2 + $0xf]] }
 0x4de   :  { %v2369_v57 = vmul.f32 %v8681_v24, %v6167_v40  ;;  %v783_v24 = vmul.f32 %v4950_v34, %v4858_v2 }
 0x4e0   :  { %2181 = vrot.lane.b32.xlu2 %v2177_v50, %s8597_s6  ;;  %v8683_v50 = vstv %s8504_s9  ;;  %s6221_s9 = sld [smem:[#allocation2 + $0x87]] }
 0x4e1   :  { %v2055_v63 = vmul.f32 %v8683_v50, %v6057_v62 }
 0x4e2   :  { %2125 = vrot.lane.b32.xlu0 %v2121_v54, %s8474_s4  ;;  %v1424_v48 = vpop.permute.xlu0 %1423  ;;  %v1410_v1 = vpop.permute.xlu1 %1409 }
 0x4e3   :  { %v1522_v56 = vpop.permute.xlu2 %1521 }
 0x4e4   :  { %2045 = vrot.lane.b32.xlu1 %v2041_v0, %s8483_s0  ;;  %v8682_v0 = vstv %s8678_s24  ;;  %s6312_s24 = sld [smem:[#allocation2 + $0x64]] }
 0x4e5   :  { %v2425_v26 = vmul.f32 %v8682_v0, %v6167_v40 }
 0x4e8   :  { %2373 = vrot.lane.b32.xlu2 %v2369_v57, %s8474_s4  ;;  %v1387_v57 = vadd.f32 %v1382_v43, %v1355_v5  ;;  %v8689_v43 = vstv %s8516_s23  ;;  %s8694_s23 = sld [smem:[#allocation108_spill]] }
 0x4ea   :  { %2293 = vrot.lane.b32.xlu0 %v2289_v42, %s8483_s0  ;;  %v8684_v42 = vstv %s8511_s3  ;;  %v1443_v34 = vadd.f32 %v6123_v3, %v1387_v57  ;;  %s8690_s3 = sld [smem:[#allocation105_spill]] }
 0x4eb   :  { %v1564_v23 = vpop.permute.xlu2 %1563  ;;  %v2481_v35 = vmul.f32 %v8684_v42, %v6167_v40 }
 0x4ec   :  { %2237 = vrot.lane.b32.xlu1 %v2233_v33, %s8602_s17  ;;  %v1466_v49 = vpop.permute.xlu0 %1465 }
 0x4ee   :  { %v1452_v54 = vpop.permute.xlu1 %1451 }
 0x4ef   :  { %v1457_v33 = vadd.f32 %v1452_v54, %v1401_v46  ;;  %v1607_v54 = vmul.f32 %v8299_v52, %v5927_v16  ;;  %v812_v46 = vmul.f32 %v4610_v9, %v783_v24 }
 0x4f0   :  { %2485 = vrot.lane.b32.xlu2 %v2481_v35, %s8602_s17  ;;  %v8688_v35 = vstv %s8686_s2  ;;  %s6315_s2 = sld [smem:[#allocation2 + $0x3c]] }
 0x4f1   :  { %v2135_v15 = vmul.f32 %v8688_v35, %v6142_v36  ;;  %v6227_v3 = vadd.f32 %v4612_v10, %v812_v46  ;;  %v8691_v10 = vstv %s8690_s3  ;;  %s8719_s3 = sld [smem:[#allocation93_spill]] }
 0x4f2   :  { %2429 = vrot.lane.b32.xlu0 %v2425_v26, %s8597_s6 }
 0x4f3   :  { %v6201_v50 = vpop.permute.xlu2 %1629  ;;  %v2617_v46 = vmul.f32 %v8691_v10, %v6227_v3 }
 0x4f4   :  { %2059 = vrot.lane.b32.xlu1 %v2055_v63, %s8483_s0  ;;  %v1508_v7 = vpop.permute.xlu0 %1507  ;;  %v8687_v63 = vstv %s8685_s7  ;;  %s8714_s7 = sld [smem:[#allocation126_spill]] }
 0x4f5   :  { %v1513_v26 = vadd.f32 %v1508_v7, %v1457_v33  ;;  %v2537_v2 = vmul.f32 %v8687_v63, %v6167_v40  ;;  %v1600_v33 = vstv %s6194_s14  ;;  %v1429_v7 = vadd.f32 %v1424_v48, %v1373_v30  ;;  %s6902_s14 = sld [smem:[#allocation2 + $0x74]] }
 0x4f6   :  { %v1494_v0 = vpop.permute.xlu1 %1493  ;;  %v8693_v48 = vstv %s8524_s28  ;;  %s8699_s28 = sld [smem:[#allocation115_spill]] }
 0x4f7   :  { %v1569_v42 = vadd.f32 %v1564_v23, %v1513_v26  ;;  %v2191_v23 = vmul.f32 %v8689_v43, %v6142_v36  ;;  %v1499_v9 = vadd.f32 %v1494_v0, %v1443_v34  ;;  %v1601_v26 = vmul.f32 %v1600_v33, %v5927_v16 }
 0x4f8   :  { %v8692_v34 = vstv %s8515_s21  ;;  %v2303_v35 = vmul.f32 %v8693_v48, %v6142_v36  ;;  %s8695_s21 = sld [smem:[#allocation112_spill]] }
 0x4f9   :  { %v6214_v5 = vadd.f32 %v1607_v54, %v1569_v42  ;;  %2195 = vrot.lane.b32.xlu2 %v2191_v23, %s8597_s6  ;;  %v1415_v42 = vadd.f32 %v1410_v1, %v6105_v45  ;;  %v2247_v30 = vmul.f32 %v8692_v34, %v6142_v36  ;;  %v1618_v45 = vstv %s6221_s9  ;;  %s4082_s9 = sld [smem:[#allocation2 + $0x94]] }
 0x4fa   :  { %2541 = vrot.lane.b32.xlu0 %v2537_v2, %s8483_s0  ;;  %v1485_v2 = vadd.f32 %v6148_v27, %v1429_v7 }
 0x4fb   :  { %v1471_v63 = vadd.f32 %v1466_v49, %v1415_v42  ;;  %v8300_v49 = vstv %s6224_s19  ;;  %v8696_v42 = vstv %s8694_s23  ;;  %s8720_s23 = sld [smem:[#allocation100_spill]] }
 0x4fc   :  { %2139 = vrot.lane.b32.xlu1 %v2135_v15, %s8474_s4  ;;  %v1550_v24 = vpop.permute.xlu0 %1549  ;;  %v1672_v15 = vpop.permute.xlu2 %1671  ;;  %v2729_v10 = vmul.f32 %v8696_v42, %v6227_v3  ;;  %v8705_v42 = vstv %s8699_s28  ;;  %s8722_s28 = sld [smem:[#allocation134_spill]] }
 0x4fd   :  { %v1555_v0 = vadd.f32 %v1550_v24, %v1499_v9  ;;  %v1527_v27 = vadd.f32 %v1522_v56, %v1471_v63  ;;  %v1619_v9 = vmul.f32 %v1618_v45, %v5927_v16  ;;  %v8697_v56 = vstv %s8454_s30  ;;  %s6295_s30 = sld [smem:[#allocation2 + $0x8c]] }
 0x4fe   :  { %v1536_v57 = vpop.permute.xlu1 %1535  ;;  %v2673_v63 = vmul.f32 %v8697_v56, %v6227_v3 }
 0x4ff   :  { %v1603_v54 = vadd.f32 %v1601_v26, %v1555_v0  ;;  %v1541_v1 = vadd.f32 %v1536_v57, %v1485_v2  ;;  %v1613_v57 = vmul.f32 %v8300_v49, %v5927_v16  ;;  %v8698_v2 = vstv %s8536_s27  ;;  %s6279_s27 = sld [smem:[#allocation2 + $0x14]] }
 0x500   :  { %v2785_v34 = vmul.f32 %v8698_v2, %v6227_v3 }
 0x501   :  { %2307 = vrot.lane.b32.xlu2 %v2303_v35, %s8483_s0  ;;  %v8702_v35 = vstv %s8695_s21  ;;  %v1635_v56 = vadd.f32 %v6201_v50, %v1603_v54  ;;  %s8721_s21 = sld [smem:[#allocation98_spill]] }
 0x502   :  { %2621 = vrot.lane.b32.xlu0 %v2617_v46, %s8474_s4 }
 0x504   :  { %2251 = vrot.lane.b32.xlu1 %v2247_v30, %s8602_s17  ;;  %v1592_v43 = vpop.permute.xlu0 %1591  ;;  %v1714_v26 = vpop.permute.xlu2 %1713 }
 0x505   :  { %v1597_v24 = vadd.f32 %v1592_v43, %v1541_v1  ;;  %v2383_v1 = vmul.f32 %v8702_v35, %v6167_v40 }
 0x506   :  { %v1578_v23 = vpop.permute.xlu1 %1577 }
 0x507   :  { %v1583_v7 = vadd.f32 %v1578_v23, %v1527_v27  ;;  %v1621_v0 = vadd.f32 %v1619_v9, %v1597_v24  ;;  %v8703_v27 = vstv %s8545_s10  ;;  %v8704_v23 = vstv %s8548_s15  ;;  %s8706_s10 = sld [smem:[#allocation120_spill]] }
 0x508   :  { %v2069_v43 = vmul.f32 %v8703_v27, %v6057_v62  ;;  %v2495_v9 = vmul.f32 %v8704_v23, %v6167_v40  ;;  %s8709_s15 = sld [smem:[#allocation77_spill]] }
 0x509   :  { %v1615_v46 = vadd.f32 %v1613_v57, %v1583_v7  ;;  %2789 = vrot.lane.b32.xlu2 %v2785_v34, %s8483_s0  ;;  %v8708_v34 = vstv %s8701_s16  ;;  %s8724_s16 = sld [smem:[#allocation18_spill]] }
 0x50a   :  { %2733 = vrot.lane.b32.xlu0 %v2729_v10, %s8602_s17  ;;  %v2439_v10 = vmul.f32 %v8705_v42, %v6167_v40  ;;  %v2205_v35 = vmul.f32 %v8708_v34, %v6142_v36 }
 0x50c   :  { %2677 = vrot.lane.b32.xlu1 %v2673_v63, %s8597_s6  ;;  %v1658_v16 = vpop.permute.xlu0 %1657  ;;  %v1756_v48 = vpop.permute.xlu2 %1755  ;;  %v8707_v63 = vstv %s8700_s22  ;;  %s8723_s22 = sld [smem:[#allocation17_spill]] }
 0x50d   :  { %v2149_v2 = vmul.f32 %v8707_v63, %v6142_v36  ;;  %v8711_v63 = vstv %s5550_s18  ;;  %s8715_s18 = sld [smem:[#allocation96_spill]] }
 0x50e   :  { %v1644_v30 = vpop.permute.xlu1 %1643 }
 0x511   :  { %2499 = vrot.lane.b32.xlu2 %v2495_v9, %s8602_s17 }
 0x512   :  { %2387 = vrot.lane.b32.xlu0 %v2383_v1, %s8474_s4 }
 0x514   :  { %2073 = vrot.lane.b32.xlu1 %v2069_v43, %s8483_s0  ;;  %v1700_v24 = vpop.permute.xlu0 %1699  ;;  %v1798_v57 = vpop.permute.xlu2 %1797  ;;  %v8296_v43 = vstv %s6279_s27 }
 0x515   :  { %v1849_v42 = vmul.f32 %v8296_v43, %v6057_v62 }
 0x516   :  { %v1686_v7 = vpop.permute.xlu1 %1685 }
 0x517   :  { %v1691_v1 = vadd.f32 %v1686_v7, %v1635_v56  ;;  %v1677_v56 = vadd.f32 %v1672_v15, %v1621_v0  ;;  %v8295_v0 = vstv %s6295_s30 }
 0x519   :  { %2209 = vrot.lane.b32.xlu2 %v2205_v35, %s8597_s6  ;;  %v8712_v35 = vstv %s8709_s15  ;;  %s8729_s15 = sld [smem:[#allocation20_spill]] }
 0x51a   :  { %2443 = vrot.lane.b32.xlu0 %v2439_v10, %s8597_s6  ;;  %v8710_v10 = vstv %s8706_s10  ;;  %s8728_s10 = sld [smem:[#allocation19_spill]] }
 0x51b   :  { %v2551_v7 = vmul.f32 %v8710_v10, %v6167_v40 }
 0x51c   :  { %2153 = vrot.lane.b32.xlu1 %v2149_v2, %s8474_s4  ;;  %v1742_v27 = vpop.permute.xlu0 %1741  ;;  %v1840_v23 = vpop.permute.xlu2 %1839  ;;  %v2261_v2 = vmul.f32 %v8711_v63, %v6142_v36  ;;  %v8716_v63 = vstv %s8713_s5  ;;  %s8730_s5 = sld [smem:[#allocation21_spill]] }
 0x51d   :  { %v1747_v54 = vadd.f32 %v1742_v27, %v1691_v1  ;;  %v2317_v1 = vmul.f32 %v8712_v35, %v6142_v36  ;;  %v1663_v27 = vadd.f32 %v1658_v16, %v1615_v46 }
 0x51e   :  { %v1728_v50 = vpop.permute.xlu1 %1727 }
 0x51f   :  { %v1803_v9 = vadd.f32 %v1798_v57, %v1747_v54  ;;  %v1733_v57 = vadd.f32 %v1728_v50, %v1677_v56  ;;  %v1719_v35 = vadd.f32 %v1714_v26, %v1663_v27  ;;  %v770_v27 = vmul.f32 %v5059_v17, %v4871_v31 }
 0x521   :  { %v6306_v34 = vadd.f32 %v1849_v42, %v1803_v9  ;;  %2321 = vrot.lane.b32.xlu2 %v2317_v1, %s8483_s0  ;;  %v1649_v42 = vadd.f32 %v1644_v30, %v6214_v5  ;;  %v8717_v1 = vstv %s8714_s7  ;;  %v8718_v5 = vstv %s8715_s18  ;;  %s8734_s7 = sld [smem:[#allocation22_spill]] }
 0x522   :  { %2555 = vrot.lane.b32.xlu0 %v2551_v7, %s8483_s0  ;;  %v1867_v7 = vmul.f32 %v8295_v0, %v6057_v62  ;;  %v2687_v46 = vmul.f32 %v8717_v1, %v6227_v3  ;;  %v2027_v30 = vmul.f32 %v8718_v5, %v6057_v62  ;;  %v8726_v1 = vstv %s8720_s23  ;;  %s8735_s18 = sld [smem:[#allocation23_spill]] }
 0x523   :  { %v1705_v56 = vadd.f32 %v1700_v24, %v1649_v42  ;;  %v8297_v24 = vstv %s6315_s2  ;;  %v8727_v5 = vstv %s8721_s21  ;;  %s8740_s23 = sld [smem:[#allocation25_spill]] }
 0x524   :  { %2265 = vrot.lane.b32.xlu1 %v2261_v2, %s8602_s17  ;;  %v1784_v15 = vpop.permute.xlu0 %1783  ;;  %v6320_v10 = vpop.permute.xlu2 %1905  ;;  %v2631_v2 = vmul.f32 %v8716_v63, %v6227_v3  ;;  %v1855_v63 = vmul.f32 %v8297_v24, %v6057_v62  ;;  %s8741_s21 = sld [smem:[#allocation26_spill]] }
 0x525   :  { %v1789_v9 = vadd.f32 %v1784_v15, %v1733_v57  ;;  %v1761_v26 = vadd.f32 %v1756_v48, %v1705_v56  ;;  %v8725_v48 = vstv %s8719_s3  ;;  %s8736_s3 = sld [smem:[#allocation24_spill]] }
 0x526   :  { %v1770_v54 = vpop.permute.xlu1 %1769  ;;  %v2743_v56 = vmul.f32 %v8725_v48, %v6227_v3 }
 0x527   :  { %v1845_v50 = vadd.f32 %v1840_v23, %v1789_v9  ;;  %v8298_v23 = vstv %s6312_s24  ;;  %v1775_v57 = vadd.f32 %v1770_v54, %v1719_v35  ;;  %v799_v35 = vmul.f32 %v4606_v6, %v770_v27 }
 0x528   :  { %v1861_v42 = vmul.f32 %v8298_v23, %v6057_v62 }
 0x529   :  { %v6331_v16 = vadd.f32 %v1867_v7, %v1845_v50  ;;  %2031 = vrot.lane.b32.xlu2 %v2027_v30, %s8602_s17  ;;  %v2083_v30 = vmul.f32 %v8727_v5, %v6057_v62  ;;  %v8738_v5 = vstv %s8729_s15  ;;  %s8751_s15 = sld [smem:[#allocation30_spill]] }
 0x52a   :  { %2635 = vrot.lane.b32.xlu0 %v2631_v2, %s8474_s4 }
 0x52c   :  { %2691 = vrot.lane.b32.xlu1 %v2687_v46, %s8597_s6  ;;  %v1826_v15 = vpop.permute.xlu0 %1825  ;;  %v6346_v54 = vpop.permute.xlu2 %1947  ;;  %v2397_v46 = vmul.f32 %v8726_v1, %v6167_v40  ;;  %v8737_v1 = vstv %s8728_s10  ;;  %s8750_s10 = sld [smem:[#allocation29_spill]] }
 0x52d   :  { %v1831_v50 = vadd.f32 %v1826_v15, %v1775_v57 }
 0x52e   :  { %v1812_v9 = vpop.permute.xlu1 %1811 }
 0x52f   :  { %v1817_v7 = vadd.f32 %v1812_v9, %v1761_v26  ;;  %v6351_v2 = vadd.f32 %v1861_v42, %v1831_v50  ;;  %v6371_v26 = vadd.f32 %v4614_v12, %v799_v35  ;;  %v8731_v9 = vstv %s8722_s28  ;;  %s8742_s28 = sld [smem:[#allocation27_spill]] }
 0x530   :  { %v2799_v42 = vmul.f32 %v8731_v9, %v6227_v3  ;;  %v8732_v50 = vstv %s8723_s22  ;;  %v8739_v9 = vstv %s8730_s5  ;;  %s6414_s22 = sld [smem:[#allocation2 + $0x19]] }
 0x531   :  { %v6356_v31 = vadd.f32 %v1855_v63, %v1817_v7  ;;  %2087 = vrot.lane.b32.xlu2 %v2083_v30, %s8483_s0  ;;  %v910_v62 = vmul.f32 %v8732_v50, %v6371_v26  ;;  %v8733_v7 = vstv %s8724_s16  ;;  %v952_v30 = vmul.f32 %v8738_v5, %v6371_v26  ;;  %s8747_s16 = sld [smem:[#allocation28_spill]] }
 0x532   :  { %2747 = vrot.lane.b32.xlu0 %v2743_v56, %s8602_s17  ;;  %v896_v63 = vmul.f32 %v8733_v7, %v6371_v26  ;;  %v938_v50 = vmul.f32 %v8739_v9, %v6371_v26  ;;  %v8744_v5 = vstv %s8735_s18  ;;  %s6435_s5 = sld [smem:[#allocation2 + $0x1e]] }
 0x533   :  { %v994_v9 = vmul.f32 %v8744_v5, %v6371_v26  ;;  %v8746_v5 = vstv %s8740_s23  ;;  %s8756_s18 = sld [smem:[#allocation32_spill]] }
 0x534   :  { %2401 = vrot.lane.b32.xlu1 %v2397_v46, %s8474_s4  ;;  %v6368_v57 = vpop.permute.xlu0 %1891  ;;  %v1990_v27 = vpop.permute.xlu2 %1989  ;;  %v882_v46 = vmul.f32 %v8737_v1, %v6371_v26  ;;  %v966_v24 = vmul.f32 %v8746_v5, %v6371_v26  ;;  %s6454_s23 = sld [smem:[#allocation2 + $0x41]] }
 0x535   :  { %v8749_v23 = vstv %s8742_s28  ;;  %s8762_s28 = sld [smem:[#allocation35_spill]] }
 0x536   :  { %v1878_v15 = vpop.permute.xlu1 %1877  ;;  %v1022_v52 = vmul.f32 %v8749_v23, %v6371_v26 }
 0x539   :  { %901 = vrot.lane.b32.xlu2 %v896_v63, %s8474_s4  ;;  %v8743_v63 = vstv %s8734_s7  ;;  %s8754_s7 = sld [smem:[#allocation31_spill]] }
 0x53a   :  { %2803 = vrot.lane.b32.xlu0 %v2799_v42, %s8483_s0  ;;  %v924_v1 = vmul.f32 %v8743_v63, %v6371_v26  ;;  %v1883_v63 = vadd.f32 %v1878_v15, %v6306_v34  ;;  %v2096_v34 = vstv %s6414_s22  ;;  %s4122_s22 = sld [smem:[#allocation2 + $0x9e]] }
 0x53b   :  { %v2097_v23 = vmul.f32 %v2096_v34, %v6142_v36 }
 0x53c   :  { %915 = vrot.lane.b32.xlu1 %v910_v62, %s8474_s4  ;;  %v1934_v48 = vpop.permute.xlu0 %1933  ;;  %v2182_v35 = vpop.permute.xlu2 %2181 }
 0x53e   :  { %v6385_v56 = vpop.permute.xlu1 %1919 }
 0x541   :  { %943 = vrot.lane.b32.xlu2 %v938_v50, %s8597_s6 }
 0x542   :  { %887 = vrot.lane.b32.xlu0 %v882_v46, %s8474_s4  ;;  %v8745_v46 = vstv %s8736_s3  ;;  %s8757_s3 = sld [smem:[#allocation33_spill]] }
 0x543   :  { %v980_v0 = vmul.f32 %v8745_v46, %v6371_v26  ;;  %v1939_v46 = vadd.f32 %v1934_v48, %v1883_v63  ;;  %v772_v48 = vmul.f32 %v5059_v17, %v4877_v22  ;;  %v8755_v17 = vstv %s8751_s15  ;;  %s8766_s15 = sld [smem:[#allocation37_spill]] }
 0x544   :  { %957 = vrot.lane.b32.xlu1 %v952_v30, %s8597_s6  ;;  %v6399_v42 = vpop.permute.xlu0 %1975  ;;  %v2374_v7 = vpop.permute.xlu2 %2373 }
 0x546   :  { %v6401_v62 = vpop.permute.xlu1 %1961 }
 0x549   :  { %985 = vrot.lane.b32.xlu2 %v980_v0, %s8597_s6  ;;  %v1995_v0 = vadd.f32 %v1990_v27, %v1939_v46  ;;  %v8753_v27 = vstv %s8750_s10  ;;  %v1064_v46 = vmul.f32 %v8755_v17, %v6371_v26  ;;  %s6477_s10 = sld [smem:[#allocation2 + $0x23]] }
 0x54a   :  { %929 = vrot.lane.b32.xlu0 %v924_v1, %s8474_s4  ;;  %v8748_v1 = vstv %s8741_s21  ;;  %v1078_v22 = vmul.f32 %v8753_v27, %v6371_v26  ;;  %s8761_s21 = sld [smem:[#allocation34_spill]] }
 0x54c   :  { %999 = vrot.lane.b32.xlu1 %v994_v9, %s8602_s17  ;;  %v6417_v30 = vpop.permute.xlu0 %2017  ;;  %v2486_v43 = vpop.permute.xlu2 %2485  ;;  %v1036_v9 = vmul.f32 %v8748_v1, %v6371_v26 }
 0x54e   :  { %v2004_v50 = vpop.permute.xlu1 %2003 }
 0x54f   :  { %8764 = sst [smem:[#allocation42_spill]] %s6477_s10 }
 0x551   :  { %1027 = vrot.lane.b32.xlu2 %v1022_v52, %s8602_s17  ;;  %v801_v52 = vmul.f32 %v4606_v6, %v772_v48 }
 0x552   :  { %971 = vrot.lane.b32.xlu0 %v966_v24, %s8597_s6  ;;  %v8752_v24 = vstv %s8747_s16  ;;  %s8763_s16 = sld [smem:[#allocation36_spill]] }
 0x554   :  { %1041 = vrot.lane.b32.xlu1 %v1036_v9, %s8602_s17  ;;  %v2126_v15 = vpop.permute.xlu0 %2125  ;;  %v6437_v1 = vpop.permute.xlu2 %2195  ;;  %v1008_v9 = vmul.f32 %v8752_v24, %v6371_v26 }
 0x556   :  { %v2046_v63 = vpop.permute.xlu1 %2045 }
 0x557   :  { %v2051_v5 = vadd.f32 %v2046_v63, %v1995_v0  ;;  %v6458_v63 = vadd.f32 %v4614_v12, %v801_v52  ;;  %v8760_v52 = vstv %s8757_s3  ;;  %s6503_s3 = sld [smem:[#allocation2 + $0x46]] }
 0x559   :  { %v2099_v49 = vadd.f32 %v2097_v23, %v2051_v5  ;;  %1069 = vrot.lane.b32.xlu2 %v1064_v46, %s8483_s0  ;;  %v2344_v23 = vstv %s6435_s5  ;;  %v1130_v46 = vmul.f32 %v8760_v52, %v6458_v63  ;;  %s7111_s5 = sld [smem:[#allocation9 + $0x8]] }
 0x55a   :  { %1013 = vrot.lane.b32.xlu0 %v1008_v9, %s8602_s17  ;;  %v8758_v9 = vstv %s8754_s7  ;;  %s8769_s7 = sld [smem:[#allocation38_spill]] }
 0x55b   :  { %v2131_v0 = vadd.f32 %v2126_v15, %v2099_v49  ;;  %v1897_v49 = vadd.f32 %v6368_v57, %v6356_v31  ;;  %v1050_v27 = vmul.f32 %v8758_v9, %v6371_v26  ;;  %v2102_v57 = vstv %s6454_s23  ;;  %s4125_s23 = sld [smem:[#allocation2 + $0x77]] }
 0x55c   :  { %1083 = vrot.lane.b32.xlu1 %v1078_v22, %s8483_s0  ;;  %v2294_v48 = vpop.permute.xlu0 %2293  ;;  %v2308_v24 = vpop.permute.xlu2 %2307  ;;  %v2345_v22 = vmul.f32 %v2344_v23, %v6167_v40 }
 0x55d   :  { %v2187_v6 = vadd.f32 %v2182_v35, %v2131_v0  ;;  %v8759_v35 = vstv %s8756_s18  ;;  %v1953_v0 = vadd.f32 %v6346_v54, %v1897_v49  ;;  %v2103_v49 = vmul.f32 %v2102_v57, %v6142_v36  ;;  %s8770_s18 = sld [smem:[#allocation39_spill]] }
 0x55e   :  { %v2238_v5 = vpop.permute.xlu1 %2237  ;;  %v1144_v12 = vmul.f32 %v8759_v35, %v6458_v63 }
 0x55f   :  { %v2243_v15 = vadd.f32 %v2238_v5, %v2187_v6  ;;  %v2009_v6 = vadd.f32 %v2004_v50, %v1953_v0  ;;  %v8767_v50 = vstv %s8762_s28  ;;  %s8773_s28 = sld [smem:[#allocation65_spill]] }
 0x561   :  { %v2299_v17 = vadd.f32 %v2294_v48, %v2243_v15  ;;  %1135 = vrot.lane.b32.xlu2 %v1130_v46, %s8474_s4  ;;  %v2592_v46 = vstv %s6477_s10  ;;  %s6537_s10 = sld [smem:[#allocation2 + $0x69]] }
 0x562   :  { %1055 = vrot.lane.b32.xlu0 %v1050_v27, %s8483_s0 }
 0x563   :  { %v2347_v31 = vadd.f32 %v2345_v22, %v2299_v17  ;;  %v8765_v22 = vstv %s8761_s21  ;;  %s8771_s21 = sld [smem:[#allocation40_spill]] }
 0x564   :  { %1149 = vrot.lane.b32.xlu1 %v1144_v12, %s8474_s4  ;;  %v2430_v5 = vpop.permute.xlu0 %2429  ;;  %v6482_v54 = vpop.permute.xlu2 %2789  ;;  %v1092_v17 = vmul.f32 %v8765_v22, %v6371_v26  ;;  %v1186_v12 = vmul.f32 %v8767_v50, %v6458_v63  ;;  %v8776_v50 = vstv %s8770_s18  ;;  %s8780_s18 = sld [smem:[#allocation70_spill]] }
 0x565   :  { %v2379_v48 = vadd.f32 %v2374_v7, %v2347_v31  ;;  %v8768_v7 = vstv %s8763_s16  ;;  %s8775_s16 = sld [smem:[#allocation66_spill]] }
 0x566   :  { %v2060_v15 = vpop.permute.xlu1 %2059  ;;  %v1172_v52 = vmul.f32 %v8768_v7, %v6458_v63 }
 0x567   :  { %v2065_v9 = vadd.f32 %v2060_v15, %v2009_v6  ;;  %v2435_v27 = vadd.f32 %v2430_v5, %v2379_v48  ;;  %v2593_v5 = vmul.f32 %v2592_v46, %v6227_v3 }
 0x569   :  { %v2105_v35 = vadd.f32 %v2103_v49, %v2065_v9  ;;  %v2491_v0 = vadd.f32 %v2486_v43, %v2435_v27  ;;  %1177 = vrot.lane.b32.xlu2 %v1172_v52, %s8474_s4  ;;  %v8772_v49 = vstv %s8766_s15  ;;  %v8774_v27 = vstv %s8769_s7  ;;  %s8777_s15 = sld [smem:[#allocation67_spill]] }
 0x56a   :  { %1097 = vrot.lane.b32.xlu0 %v1092_v17, %s8483_s0  ;;  %v1158_v22 = vmul.f32 %v8772_v49, %v6458_v63  ;;  %v1228_v17 = vmul.f32 %v8774_v27, %v6458_v63  ;;  %s8779_s7 = sld [smem:[#allocation69_spill]]  ;;  %v8781_v27 = vstv %s8773_s28 }
 0x56b   :  { %s8786_s28 = sld [smem:[#allocation41_spill]] }
 0x56c   :  { %1191 = vrot.lane.b32.xlu1 %v1186_v12, %s8597_s6  ;;  %v2542_v31 = vpop.permute.xlu0 %2541  ;;  %v2500_v15 = vpop.permute.xlu2 %2499  ;;  %v1214_v12 = vmul.f32 %v8776_v50, %v6458_v63 }
 0x56d   :  { %v2547_v48 = vadd.f32 %v2542_v31, %v2491_v0  ;;  %v8302_v31 = vstv %s6503_s3 }
 0x56e   :  { %v2140_v6 = vpop.permute.xlu1 %2139 }
 0x56f   :  { %v6505_v9 = vadd.f32 %v2593_v5, %v2547_v48  ;;  %v2145_v43 = vadd.f32 %v2140_v6, %v2105_v35  ;;  %v8778_v48 = vstv %s8771_s21  ;;  %s8784_s21 = sld [smem:[#allocation71_spill]] }
 0x570   :  { %v1200_v5 = vmul.f32 %v8778_v48, %v6458_v63  ;;  %v1911_v48 = vadd.f32 %v6320_v10, %v6351_v2 }
 0x571   :  { %1219 = vrot.lane.b32.xlu2 %v1214_v12, %s8597_s6  ;;  %v2201_v7 = vadd.f32 %v6437_v1, %v2145_v43  ;;  %v8782_v1 = vstv %s8775_s16  ;;  %s8788_s16 = sld [smem:[#allocation72_spill]] }
 0x572   :  { %1163 = vrot.lane.b32.xlu0 %v1158_v22, %s8474_s4  ;;  %v2351_v22 = vmul.f32 %v8302_v31, %v6167_v40  ;;  %v1256_v43 = vmul.f32 %v8782_v1, %v6458_v63  ;;  %v2108_v1 = vstv %s6537_s10  ;;  %s7021_s10 = sld [smem:[#allocation2 + $0x9c]] }
 0x574   :  { %1233 = vrot.lane.b32.xlu1 %v1228_v17, %s8597_s6  ;;  %v6520_v52 = vpop.permute.xlu0 %2621  ;;  %v2210_v6 = vpop.permute.xlu2 %2209  ;;  %v1270_v17 = vmul.f32 %v8781_v27, %v6458_v63 }
 0x576   :  { %v2252_v0 = vpop.permute.xlu1 %2251 }
 0x577   :  { %v2257_v35 = vadd.f32 %v2252_v0, %v2201_v7  ;;  %v8783_v0 = vstv %s8777_s15  ;;  %s6573_s15 = sld [smem:[#allocation2 + $0x4b]] }
 0x579   :  { %v2313_v49 = vadd.f32 %v2308_v24, %v2257_v35  ;;  %1261 = vrot.lane.b32.xlu2 %v1256_v43, %s8602_s17  ;;  %v1242_v35 = vmul.f32 %v8783_v0, %v6458_v63 }
 0x57a   :  { %1205 = vrot.lane.b32.xlu0 %v1200_v5, %s8597_s6  ;;  %v8785_v5 = vstv %s8779_s7  ;;  %s6578_s7 = sld [smem:[#allocation2 + $0x6e]] }
 0x57b   :  { %v2353_v50 = vadd.f32 %v2351_v22, %v2313_v49  ;;  %v1312_v49 = vmul.f32 %v8785_v5, %v6458_v63  ;;  %v8787_v22 = vstv %s8780_s18  ;;  %v2109_v5 = vmul.f32 %v2108_v1, %v6142_v36  ;;  %s8792_s18 = sld [smem:[#allocation101_spill]] }
 0x57c   :  { %1275 = vrot.lane.b32.xlu1 %v1270_v17, %s8602_s17  ;;  %v6540_v24 = vpop.permute.xlu0 %2733  ;;  %v2322_v7 = vpop.permute.xlu2 %2321  ;;  %v1298_v27 = vmul.f32 %v8787_v22, %v6458_v63  ;;  %v1967_v17 = vadd.f32 %v6401_v62, %v1911_v48  ;;  %v8789_v62 = vstv %s8784_s21  ;;  %s8794_s21 = sld [smem:[#allocation106_spill]] }
 0x57d   :  { %v1284_v48 = vmul.f32 %v8789_v62, %v6458_v63 }
 0x57e   :  { %v6542_v12 = vpop.permute.xlu1 %2677  ;;  %v2023_v43 = vadd.f32 %v6417_v30, %v1967_v17 }
 0x581   :  { %1303 = vrot.lane.b32.xlu2 %v1298_v27, %s8483_s0 }
 0x582   :  { %1247 = vrot.lane.b32.xlu0 %v1242_v35, %s8602_s17 }
 0x584   :  { %1317 = vrot.lane.b32.xlu1 %v1312_v49, %s8483_s0  ;;  %v2388_v0 = vpop.permute.xlu0 %2387  ;;  %v6561_v31 = vpop.permute.xlu2 %2031  ;;  %v8790_v49 = vstv %s8786_s28  ;;  %s8807_s28 = sld [smem:[#allocation91_spill]] }
 0x585   :  { %v1340_v22 = vmul.f32 %v8790_v49, %v6458_v63  ;;  %v2393_v27 = vadd.f32 %v2388_v0, %v2353_v50 }
 0x586   :  { %v2074_v10 = vpop.permute.xlu1 %2073 }
 0x587   :  { %v2079_v2 = vadd.f32 %v2074_v10, %v2023_v43 }
 0x589   :  { %v2111_v35 = vadd.f32 %v2109_v5, %v2079_v2  ;;  %1345 = vrot.lane.b32.xlu2 %v1340_v22, %s8483_s0  ;;  %v8791_v2 = vstv %s8788_s16  ;;  %s6696_s16 = sld [smem:[#allocation2 + $0x91]] }
 0x58a   :  { %1289 = vrot.lane.b32.xlu0 %v1284_v48, %s8602_s17  ;;  %v1326_v5 = vmul.f32 %v8791_v2, %v6458_v63 }
 0x58c   :  { %1383 = vrot.lane.b32.xlu1 %v5169_v39, %s8474_s4  ;;  %v2444_v30 = vpop.permute.xlu0 %2443  ;;  %v6580_v43 = vpop.permute.xlu2 %2087  ;;  %v2598_v39 = vstv %s6573_s15  ;;  %s4110_s15 = sld [smem:[#allocation2 + $0x9b]] }
 0x58d   :  { %v2449_v10 = vadd.f32 %v2444_v30, %v2393_v27  ;;  %v2599_v30 = vmul.f32 %v2598_v39, %v6227_v3  ;;  %v2356_v27 = vstv %s6578_s7  ;;  %s7086_s7 = sld [smem:[#allocation6]] }
 0x58e   :  { %v2154_v17 = vpop.permute.xlu1 %2153 }
 0x58f   :  { %v2159_v62 = vadd.f32 %v2154_v17, %v2111_v35  ;;  %v2505_v50 = vadd.f32 %v2500_v15, %v2449_v10 }
 0x591   :  { %1411 = vrot.lane.b32.xlu2 %v5188_v20, %s8474_s4  ;;  %v2215_v0 = vadd.f32 %v2210_v6, %v2159_v62 }
 0x592   :  { %1331 = vrot.lane.b32.xlu0 %v1326_v5, %s8483_s0 }
 0x594   :  { %1425 = vrot.lane.b32.xlu1 %v5183_v4, %s8474_s4  ;;  %v2556_v48 = vpop.permute.xlu0 %2555  ;;  %v902_v17 = vpop.permute.xlu2 %901  ;;  %v2357_v4 = vmul.f32 %v2356_v27, %v6167_v40 }
 0x595   :  { %v2561_v22 = vadd.f32 %v2556_v48, %v2505_v50 }
 0x596   :  { %v2266_v49 = vpop.permute.xlu1 %2265 }
 0x597   :  { %v2271_v35 = vadd.f32 %v2266_v49, %v2215_v0  ;;  %v6595_v2 = vadd.f32 %v2599_v30, %v2561_v22  ;;  %v8797_v30 = vstv %s5944_s25  ;;  %s8804_s25 = sld [smem:[#allocation107_spill]] }
 0x599   :  { %v2327_v5 = vadd.f32 %v2322_v7, %v2271_v35  ;;  %1453 = vrot.lane.b32.xlu2 %v5205_v29, %s8597_s6 }
 0x59a   :  { %1397 = vrot.lane.b32.xlu0 %v5193_v60, %s8474_s4 }
 0x59b   :  { %v6602_v20 = vadd.f32 %v2357_v4, %v2327_v5 }
 0x59c   :  { %1467 = vrot.lane.b32.xlu1 %v5200_v61, %s8597_s6  ;;  %v6608_v15 = vpop.permute.xlu0 %2635  ;;  %v944_v10 = vpop.permute.xlu2 %943 }
 0x59e   :  { %v6610_v6 = vpop.permute.xlu1 %2691 }
 0x5a1   :  { %1495 = vrot.lane.b32.xlu2 %v5222_v44, %s8602_s17 }
 0x5a2   :  { %1439 = vrot.lane.b32.xlu0 %v5210_v51, %s8597_s6 }
 0x5a4   :  { %1509 = vrot.lane.b32.xlu1 %v5215_v37, %s8602_s17  ;;  %v6618_v60 = vpop.permute.xlu0 %2747  ;;  %v6622_v7 = vpop.permute.xlu2 %985 }
 0x5a6   :  { %v6620_v61 = vpop.permute.xlu1 %2401 }
 0x5a9   :  { %1537 = vrot.lane.b32.xlu2 %v5237_v14, %s8602_s17 }
 0x5aa   :  { %1481 = vrot.lane.b32.xlu0 %v5227_v55, %s8597_s6 }
 0x5ac   :  { %1551 = vrot.lane.b32.xlu1 %v5232_v41, %s8483_s0  ;;  %v6630_v37 = vpop.permute.xlu0 %2803  ;;  %v1028_v44 = vpop.permute.xlu2 %1027 }
 0x5ae   :  { %v916_v51 = vpop.permute.xlu1 %915 }
 0x5b1   :  { %1579 = vrot.lane.b32.xlu2 %v5254_v18, %s8483_s0  ;;  %v8793_v18 = vstv %s5923_s29  ;;  %s8799_s29 = sld [smem:[#allocation113_spill]] }
 0x5b2   :  { %1523 = vrot.lane.b32.xlu0 %v5244_v59, %s8602_s17  ;;  %v870_v62 = vmul.f32 %v8793_v18, %v6371_v26 }
 0x5b4   :  { %1593 = vrot.lane.b32.xlu1 %v5249_v25, %s8483_s0  ;;  %v888_v41 = vpop.permute.xlu0 %887  ;;  %v1070_v29 = vpop.permute.xlu2 %1069 }
 0x5b6   :  { %v958_v55 = vpop.permute.xlu1 %957 }
 0x5b9   :  { %1645 = vrot.lane.b32.xlu2 %v5271_v13, %s8474_s4 }
 0x5ba   :  { %1565 = vrot.lane.b32.xlu0 %v5259_v8, %s8483_s0  ;;  %v8795_v8 = vstv %s5933_s11  ;;  %s8800_s11 = sld [smem:[#allocation104_spill]] }
 0x5bb   :  { %v864_v50 = vmul.f32 %v8795_v8, %v6371_v26 }
 0x5bc   :  { %1659 = vrot.lane.b32.xlu1 %v5266_v11, %s8474_s4  ;;  %v930_v14 = vpop.permute.xlu0 %929  ;;  %v6644_v25 = vpop.permute.xlu2 %1135  ;;  %v8796_v11 = vstv %s5938_s8  ;;  %s8801_s8 = sld [smem:[#allocation114_spill]] }
 0x5bd   :  { %v872_v0 = vadd.f32 %v870_v62, %v8796_v11  ;;  %v866_v35 = vadd.f32 %v864_v50, %v8797_v30 }
 0x5be   :  { %v1000_v59 = vpop.permute.xlu1 %999 }
 0x5bf   :  { %v920_v49 = vadd.f32 %v916_v51, %v872_v0  ;;  %v906_v18 = vadd.f32 %v902_v17, %v866_v35  ;;  %v8803_v51 = vld [vmem:[#allocation79_spill] sm:$0xff] }
 0x5c0   :  { %v8806_v30 = vstv %s8800_s11  ;;  %s7040_s11 = sld [smem:[#allocation2 + $0x9f]] }
 0x5c1   :  { %1687 = vrot.lane.b32.xlu2 %v5288_v19, %s8597_s6  ;;  %v8802_v19 = vstv %s8794_s21  ;;  %v876_v35 = vmul.f32 %v8806_v30, %v6371_v26  ;;  %v8815_v30 = vld [vmem:[#allocation83_spill] sm:$0xff]  ;;  %s4102_s21 = sld [smem:[#allocation2 + $0x99]] }
 0x5c2   :  { %1631 = vrot.lane.b32.xlu0 %v5276_v28, %s8474_s4  ;;  %v8798_v28 = vstv %s8792_s18  ;;  %s8814_s18 = sld [smem:[#allocation110_spill]] }
 0x5c3   :  { %v858_v5 = vmul.f32 %v8798_v28, %v6371_v26  ;;  %v8808_v28 = vstv %s8801_s8  ;;  %s6945_s8 = sld [smem:[#allocation2 + $0x76]] }
 0x5c4   :  { %1701 = vrot.lane.b32.xlu1 %v5281_v58, %s8597_s6  ;;  %v972_v13 = vpop.permute.xlu0 %971  ;;  %v6660_v22 = vpop.permute.xlu2 %1177  ;;  %v962_v58 = vadd.f32 %v958_v55, %v906_v18  ;;  %v8809_v18 = vld [vmem:[#allocation81_spill] sm:$0xff] }
 0x5c5   :  { %v976_v4 = vadd.f32 %v972_v13, %v920_v49  ;;  %v860_v62 = vadd.f32 %v858_v5, %v8802_v19  ;;  %v1112_v5 = vmul.f32 %v8808_v28, %v6458_v63  ;;  %v8810_v19 = vstv %s8804_s25  ;;  %v8817_v28 = vld [vmem:[#allocation124_spill] sm:$0xff]  ;;  %s6947_s25 = sld [smem:[#allocation2 + $0x75]] }
 0x5c6   :  { %v1042_v48 = vpop.permute.xlu1 %1041 }
 0x5c7   :  { %v1032_v8 = vadd.f32 %v1028_v44, %v976_v4  ;;  %v892_v11 = vadd.f32 %v888_v41, %v860_v62  ;;  %v878_v62 = vadd.f32 %v876_v35, %v8810_v19 }
 0x5c9   :  { %1729 = vrot.lane.b32.xlu2 %v8803_v51, %s8597_s6  ;;  %v948_v4 = vadd.f32 %v944_v10, %v892_v11  ;;  %v8811_v51 = vld [vmem:[#allocation121_spill] sm:$0xff]  ;;  %v8813_v10 = vstv %s8807_s28  ;;  %s4133_s28 = sld [smem:[#allocation6 + $0x1]] }
 0x5ca   :  { %1673 = vrot.lane.b32.xlu0 %v5293_v21, %s8474_s4  ;;  %v8805_v21 = vstv %s8799_s29  ;;  %v1106_v11 = vmul.f32 %v8813_v10, %v6458_v63  ;;  %v8823_v10 = vld [vmem:[#allocation129_spill] sm:$0xff]  ;;  %s4106_s29 = sld [smem:[#allocation2 + $0x9a]] }
 0x5cb   :  { %v1118_v55 = vmul.f32 %v8805_v21, %v6458_v63 }
 0x5cc   :  { %1743 = vrot.lane.b32.xlu1 %v5298_v32, %s8602_s17  ;;  %v1014_v50 = vpop.permute.xlu0 %1013  ;;  %v6675_v49 = vpop.permute.xlu2 %1219 }
 0x5cd   :  { %v1018_v13 = vadd.f32 %v1014_v50, %v962_v58  ;;  %v1004_v58 = vadd.f32 %v1000_v59, %v948_v4 }
 0x5ce   :  { %v1084_v0 = vpop.permute.xlu1 %1083 }
 0x5cf   :  { %v1088_v17 = vadd.f32 %v1084_v0, %v1032_v8  ;;  %v1074_v32 = vadd.f32 %v1070_v29, %v1018_v13  ;;  %v8812_v8 = vld [vmem:[#allocation82_spill] sm:$0xff]  ;;  %v934_v29 = vadd.f32 %v930_v14, %v878_v62  ;;  %v1925_v13 = vadd.f32 %v6385_v56, %v6331_v16  ;;  %v8819_v62 = vld [vmem:[#allocation128_spill] sm:$0xff] }
 0x5d0   :  { %v2114_v16 = vstv %s6696_s16  ;;  %s7088_s16 = sld [smem:[#allocation6 + $0x4]] }
 0x5d1   :  { %v6686_v44 = vadd.f32 %v1118_v55, %v1088_v17  ;;  %v1114_v41 = vadd.f32 %v1112_v5, %v1074_v32  ;;  %1771 = vrot.lane.b32.xlu2 %v8812_v8, %s8602_s17  ;;  %v1981_v21 = vadd.f32 %v6399_v42, %v1925_v13  ;;  %v990_v55 = vadd.f32 %v6622_v7, %v934_v29  ;;  %v8816_v32 = vld [vmem:[#allocation122_spill] sm:$0xff]  ;;  %v8822_v29 = vld [vmem:[#allocation131_spill] sm:$0xff] }
 0x5d2   :  { %1715 = vrot.lane.b32.xlu0 %v8809_v18, %s8597_s6  ;;  %v8818_v42 = vstv %s8814_s18  ;;  %s4134_s18 = sld [smem:[#allocation6 + $0x5]] }
 0x5d3   :  { %v2037_v14 = vadd.f32 %v6561_v31, %v1981_v21  ;;  %v1046_v35 = vadd.f32 %v1042_v48, %v990_v55  ;;  %v1124_v7 = vmul.f32 %v8818_v42, %v6458_v63  ;;  %v2115_v31 = vmul.f32 %v2114_v16, %v6142_v36 }
 0x5d4   :  { %1785 = vrot.lane.b32.xlu1 %v8811_v51, %s8602_s17  ;;  %v1056_v26 = vpop.permute.xlu0 %1055  ;;  %v1262_v59 = vpop.permute.xlu2 %1261  ;;  %v8820_v51 = vld [vmem:[#allocation125_spill] sm:$0xff] }
 0x5d5   :  { %v1060_v0 = vadd.f32 %v1056_v26, %v1004_v58  ;;  %v2093_v56 = vadd.f32 %v6580_v43, %v2037_v14  ;;  %v8821_v43 = vld [vmem:[#allocation127_spill] sm:$0xff] }
 0x5d6   :  { %v1150_v50 = vpop.permute.xlu1 %1149 }
 0x5d7   :  { %v1108_v17 = vadd.f32 %v1106_v11, %v1060_v0  ;;  %v6720_v48 = vadd.f32 %v2115_v31, %v2093_v56  ;;  %v8824_v11 = vld [vmem:[#allocation130_spill] sm:$0xff]  ;;  %v1154_v21 = vadd.f32 %v1150_v50, %v1114_v41  ;;  %v8828_v31 = vld [vmem:[#allocation68_spill] sm:$0xff] }
 0x5d9   :  { %1813 = vrot.lane.b32.xlu2 %v8817_v28, %s8483_s0  ;;  %v1140_v14 = vadd.f32 %v6644_v25, %v1108_v17  ;;  %v8826_v28 = vld [vmem:[#allocation132_spill] sm:$0xff]  ;;  %v1360_v25 = vmul.f32 %v1358_v47, %v8828_v31 }
 0x5da   :  { %1757 = vrot.lane.b32.xlu0 %v8815_v30, %s8602_s17 }
 0x5dc   :  { %1827 = vrot.lane.b32.xlu1 %v8816_v32, %s8483_s0  ;;  %v1098_v5 = vpop.permute.xlu0 %1097  ;;  %v1304_v58 = vpop.permute.xlu2 %1303 }
 0x5dd   :  { %v1102_v18 = vadd.f32 %v1098_v5, %v1046_v35  ;;  %v8825_v35 = vld [vmem:[#allocation135_spill] sm:$0xff]  ;;  %v8827_v5 = vld [vmem:[#allocation133_spill] sm:$0xff] }
 0x5de   :  { %v1192_v4 = vpop.permute.xlu1 %1191 }
 0x5df   :  { %v1126_v19 = vadd.f32 %v1124_v7, %v1102_v18  ;;  %v1196_v32 = vadd.f32 %v1192_v4, %v1140_v14  ;;  %v1354_v4 = vmul.f32 %v1352_v38, %v8828_v31  ;;  %v8832_v14 = vld [vmem:[#allocation141_spill] sm:$0xff] }
 0x5e1   :  { %1879 = vrot.lane.b32.xlu2 %v8821_v43, %s8474_s4 }
 0x5e2   :  { %1799 = vrot.lane.b32.xlu0 %v8819_v62, %s8483_s0 }
 0x5e4   :  { %1893 = vrot.lane.b32.xlu1 %v8820_v51, %s8474_s4  ;;  %v1164_v8 = vpop.permute.xlu0 %1163  ;;  %v1346_v63 = vpop.permute.xlu2 %1345  ;;  %v1182_v51 = vadd.f32 %v6660_v22, %v1126_v19  ;;  %v1372_v22 = vmul.f32 %v1370_v53, %v8828_v31 }
 0x5e6   :  { %v1234_v26 = vpop.permute.xlu1 %1233 }
 0x5e9   :  { %1921 = vrot.lane.b32.xlu2 %v8824_v11, %s8474_s4  ;;  %v8831_v11 = vld [vmem:[#allocation137_spill] sm:$0xff] }
 0x5ea   :  { %1841 = vrot.lane.b32.xlu0 %v8822_v29, %s8483_s0  ;;  %v1238_v29 = vadd.f32 %v1234_v26, %v1182_v51 }
 0x5ec   :  { %1935 = vrot.lane.b32.xlu1 %v8823_v10, %s8597_s6  ;;  %v1206_v0 = vpop.permute.xlu0 %1205  ;;  %v6734_v55 = vpop.permute.xlu2 %1411  ;;  %v8830_v10 = vld [vmem:[#allocation136_spill] sm:$0xff] }
 0x5ed   :  { %v1210_v30 = vadd.f32 %v1206_v0, %v1154_v21 }
 0x5ee   :  { %v1276_v13 = vpop.permute.xlu1 %1275 }
 0x5ef   :  { %v1266_v56 = vadd.f32 %v1262_v59, %v1210_v30  ;;  %v8829_v59 = vld [vmem:[#allocation138_spill] sm:$0xff] }
 0x5f1   :  { %1963 = vrot.lane.b32.xlu2 %v8827_v5, %s8597_s6 }
 0x5f2   :  { %1907 = vrot.lane.b32.xlu0 %v8825_v35, %s8474_s4 }
 0x5f4   :  { %1977 = vrot.lane.b32.xlu1 %v8826_v28, %s8597_s6  ;;  %v1248_v42 = vpop.permute.xlu0 %1247  ;;  %v6743_v18 = vpop.permute.xlu2 %1453  ;;  %v8834_v28 = vld [vmem:[#allocation140_spill] sm:$0xff] }
 0x5f5   :  { %v1252_v41 = vadd.f32 %v1248_v42, %v1196_v32  ;;  %v8833_v32 = vld [vmem:[#allocation139_spill] sm:$0xff] }
 0x5f6   :  { %v1318_v7 = vpop.permute.xlu1 %1317 }
 0x5f7   :  { %v1322_v50 = vadd.f32 %v1318_v7, %v1266_v56  ;;  %v1308_v17 = vadd.f32 %v1304_v58, %v1252_v41  ;;  %v1168_v58 = vadd.f32 %v1164_v8, %v6686_v44  ;;  %v8837_v7 = vld [vmem:[#allocation142_spill] sm:$0xff] }
 0x5f9   :  { %v1362_v62 = vadd.f32 %v1360_v25, %v1322_v50  ;;  %v1356_v43 = vadd.f32 %v1354_v4, %v1308_v17  ;;  %2005 = vrot.lane.b32.xlu2 %v8831_v11, %s8602_s17  ;;  %v1224_v19 = vadd.f32 %v6675_v49, %v1168_v58  ;;  %v8836_v49 = vld [vmem:[#allocation144_spill] sm:$0xff]  ;;  %v8839_v17 = vld [vmem:[#allocation147_spill] sm:$0xff]  ;;  %v8841_v4 = vld [vmem:[#allocation146_spill] sm:$0xff] }
 0x5fa   :  { %1949 = vrot.lane.b32.xlu0 %v8829_v59, %s8597_s6  ;;  %v8843_v58 = vld [vmem:[#allocation148_spill] sm:$0xff] }
 0x5fb   :  { %v1280_v35 = vadd.f32 %v1276_v13, %v1224_v19  ;;  %v8838_v13 = vld [vmem:[#allocation143_spill] sm:$0xff] }
 0x5fc   :  { %2127 = vrot.lane.b32.xlu1 %v8830_v10, %s8474_s4  ;;  %v1290_v47 = vpop.permute.xlu0 %1289  ;;  %v1496_v21 = vpop.permute.xlu2 %1495 }
 0x5fd   :  { %v1294_v38 = vadd.f32 %v1290_v47, %v1238_v29  ;;  %v8842_v47 = vld [vmem:[#allocation150_spill] sm:$0xff] }
 0x5fe   :  { %v1384_v0 = vpop.permute.xlu1 %1383 }
 0x5ff   :  { %v1350_v30 = vadd.f32 %v1346_v63, %v1294_v38  ;;  %v8835_v63 = vstv %s6074_s20  ;;  %v1388_v29 = vadd.f32 %v1384_v0, %v1356_v43  ;;  %v8844_v38 = vld [vmem:[#allocation149_spill] sm:$0xff]  ;;  %s6850_s20 = sld [smem:[#allocation2 + $0x70]] }
 0x600   :  { %v1366_v5 = vmul.f32 %v8835_v63, %v8828_v31  ;;  %v8840_v31 = vld [vmem:[#allocation145_spill] sm:$0xff] }
 0x601   :  { %v1374_v26 = vadd.f32 %v1372_v22, %v1350_v30  ;;  %2047 = vrot.lane.b32.xlu2 %v8834_v28, %s8483_s0  ;;  %v8845_v28 = vld [vmem:[#allocation73_spill] sm:$0xff] }
 0x602   :  { %1991 = vrot.lane.b32.xlu0 %v8832_v14, %s8602_s17  ;;  %v1602_v43 = vmul.f32 %v1600_v33, %v8845_v28 }
 0x604   :  { %2295 = vrot.lane.b32.xlu1 %v8833_v32, %s8483_s0  ;;  %v1332_v44 = vpop.permute.xlu0 %1331  ;;  %v1538_v53 = vpop.permute.xlu2 %1537 }
 0x605   :  { %v1336_v56 = vadd.f32 %v1332_v44, %v1280_v35 }
 0x606   :  { %v1426_v8 = vpop.permute.xlu1 %1425 }
 0x607   :  { %v1368_v42 = vadd.f32 %v1366_v5, %v1336_v56  ;;  %v1430_v14 = vadd.f32 %v1426_v8, %v1374_v26  ;;  %v8846_v5 = vld [vmem:[#allocation153_spill] sm:$0xff]  ;;  %v8848_v26 = vld [vmem:[#allocation152_spill] sm:$0xff] }
 0x609   :  { %2239 = vrot.lane.b32.xlu2 %v8838_v13, %s8602_s17  ;;  %v1416_v63 = vadd.f32 %v6734_v55, %v1368_v42  ;;  %v1620_v55 = vmul.f32 %v1618_v45, %v8845_v28 }
 0x60a   :  { %2183 = vrot.lane.b32.xlu0 %v8836_v49, %s8597_s6 }
 0x60c   :  { %2431 = vrot.lane.b32.xlu1 %v8837_v7, %s8597_s6  ;;  %v1398_v41 = vpop.permute.xlu0 %1397  ;;  %v1580_v25 = vpop.permute.xlu2 %1579 }
 0x60d   :  { %v1402_v7 = vadd.f32 %v1398_v41, %v1362_v62  ;;  %v8851_v41 = vld [vmem:[#allocation154_spill] sm:$0xff] }
 0x60e   :  { %v1468_v50 = vpop.permute.xlu1 %1467 }
 0x60f   :  { %v1472_v56 = vadd.f32 %v1468_v50, %v1416_v63  ;;  %v8849_v50 = vstv %s6224_s19  ;;  %v8857_v63 = vld [vmem:[#allocation162_spill] sm:$0xff]  ;;  %s6916_s19 = sld [smem:[#allocation2 + $0x95]] }
 0x611   :  { %2061 = vrot.lane.b32.xlu2 %v8841_v4, %s8483_s0  ;;  %v1614_v4 = vmul.f32 %v8849_v50, %v8845_v28 }
 0x612   :  { %2375 = vrot.lane.b32.xlu0 %v8839_v17, %s8474_s4 }
 0x614   :  { %2543 = vrot.lane.b32.xlu1 %v8840_v31, %s8483_s0  ;;  %v1440_v51 = vpop.permute.xlu0 %1439  ;;  %v1646_v10 = vpop.permute.xlu2 %1645 }
 0x615   :  { %v1444_v11 = vadd.f32 %v1440_v51, %v1388_v29  ;;  %v1458_v29 = vadd.f32 %v6743_v18, %v1402_v7  ;;  %v8854_v18 = vld [vmem:[#allocation159_spill] sm:$0xff]  ;;  %v8862_v7 = vld [vmem:[#allocation164_spill] sm:$0xff] }
 0x616   :  { %v1510_v59 = vpop.permute.xlu1 %1509 }
 0x617   :  { %v1500_v30 = vadd.f32 %v1496_v21, %v1444_v11  ;;  %v8847_v21 = vld [vmem:[#allocation151_spill] sm:$0xff]  ;;  %v1514_v62 = vadd.f32 %v1510_v59, %v1458_v29  ;;  %v8856_v59 = vld [vmem:[#allocation158_spill] sm:$0xff] }
 0x619   :  { %2141 = vrot.lane.b32.xlu2 %v8844_v38, %s8474_s4 }
 0x61a   :  { %2487 = vrot.lane.b32.xlu0 %v8842_v47, %s8602_s17  ;;  %v8852_v47 = vld [vmem:[#allocation155_spill] sm:$0xff] }
 0x61c   :  { %2623 = vrot.lane.b32.xlu1 %v8843_v58, %s8474_s4  ;;  %v1482_v22 = vpop.permute.xlu0 %1481  ;;  %v6790_v32 = vpop.permute.xlu2 %1687 }
 0x61d   :  { %v1486_v0 = vadd.f32 %v1482_v22, %v1430_v14  ;;  %v8855_v14 = vld [vmem:[#allocation157_spill] sm:$0xff] }
 0x61e   :  { %v1552_v19 = vpop.permute.xlu1 %1551 }
 0x61f   :  { %v1556_v35 = vadd.f32 %v1552_v19, %v1500_v30  ;;  %v1542_v8 = vadd.f32 %v1538_v53, %v1486_v0  ;;  %v8850_v53 = vld [vmem:[#allocation156_spill] sm:$0xff] }
 0x621   :  { %v1604_v44 = vadd.f32 %v1602_v43, %v1556_v35  ;;  %2253 = vrot.lane.b32.xlu2 %v8848_v26, %s8602_s17 }
 0x622   :  { %2197 = vrot.lane.b32.xlu0 %v8846_v5, %s8597_s6  ;;  %v8859_v5 = vld [vmem:[#allocation161_spill] sm:$0xff] }
 0x624   :  { %2735 = vrot.lane.b32.xlu1 %v8847_v21, %s8602_s17  ;;  %v1524_v49 = vpop.permute.xlu0 %1523  ;;  %v6802_v31 = vpop.permute.xlu2 %1729 }
 0x625   :  { %v1528_v33 = vadd.f32 %v1524_v49, %v1472_v56  ;;  %v8861_v49 = vld [vmem:[#allocation163_spill] sm:$0xff] }
 0x626   :  { %v1594_v13 = vpop.permute.xlu1 %1593 }
 0x627   :  { %v1598_v17 = vadd.f32 %v1594_v13, %v1542_v8  ;;  %v1584_v42 = vadd.f32 %v1580_v25, %v1528_v33  ;;  %v8853_v25 = vstv %s6181_s26  ;;  %v8860_v8 = vld [vmem:[#allocation165_spill] sm:$0xff]  ;;  %s4078_s26 = sld [smem:[#allocation2 + $0x93]] }
 0x628   :  { %v1608_v38 = vmul.f32 %v8853_v25, %v8845_v28  ;;  %v8858_v28 = vld [vmem:[#allocation160_spill] sm:$0xff] }
 0x629   :  { %v1622_v51 = vadd.f32 %v1620_v55, %v1598_v17  ;;  %v1616_v11 = vadd.f32 %v1614_v4, %v1584_v42  ;;  %2679 = vrot.lane.b32.xlu2 %v8852_v47, %s8597_s6  ;;  %v8863_v4 = vld [vmem:[#allocation168_spill] sm:$0xff] }
 0x62a   :  { %2309 = vrot.lane.b32.xlu0 %v8850_v53, %s8483_s0  ;;  %v8864_v53 = vld [vmem:[#allocation166_spill] sm:$0xff] }
 0x62c   :  { %2389 = vrot.lane.b32.xlu1 %v8851_v41, %s8474_s4  ;;  %v1566_v58 = vpop.permute.xlu0 %1565  ;;  %v1772_v22 = vpop.permute.xlu2 %1771 }
 0x62d   :  { %v1570_v30 = vadd.f32 %v1566_v58, %v1514_v62  ;;  %v8865_v62 = vld [vmem:[#allocation167_spill] sm:$0xff] }
 0x62e   :  { %v1660_v45 = vpop.permute.xlu1 %1659 }
 0x62f   :  { %v1610_v19 = vadd.f32 %v1608_v38, %v1570_v30  ;;  %v1664_v17 = vadd.f32 %v1660_v45, %v1616_v11  ;;  %v8867_v30 = vstv %s6312_s24  ;;  %s8878_s24 = sld [smem:[#allocation174_spill]] }
 0x631   :  { %2019 = vrot.lane.b32.xlu2 %v8856_v59, %s8602_s17  ;;  %v1650_v50 = vadd.f32 %v1646_v10, %v1610_v19  ;;  %v8866_v10 = vld [vmem:[#allocation111_spill] sm:$0xff] }
 0x632   :  { %2791 = vrot.lane.b32.xlu0 %v8854_v18, %s8483_s0  ;;  %v1862_v19 = vmul.f32 %v8867_v30, %v8866_v10 }
 0x634   :  { %2445 = vrot.lane.b32.xlu1 %v8855_v14, %s8597_s6  ;;  %v1632_v35 = vpop.permute.xlu0 %1631  ;;  %v1814_v0 = vpop.permute.xlu2 %1813  ;;  %v8868_v14 = vstv %s6315_s2  ;;  %s7140_s2 = sld [smem:[#allocation9 + $0xb]] }
 0x635   :  { %v1636_v58 = vadd.f32 %v1632_v35, %v1604_v44  ;;  %v1856_v59 = vmul.f32 %v8868_v14, %v8866_v10  ;;  %v8869_v35 = vld [vmem:[#allocation171_spill] sm:$0xff] }
 0x636   :  { %v1702_v43 = vpop.permute.xlu1 %1701 }
 0x637   :  { %v1706_v29 = vadd.f32 %v1702_v43, %v1650_v50  ;;  %v1692_v44 = vadd.f32 %v6790_v32, %v1636_v58 }
 0x639   :  { %2075 = vrot.lane.b32.xlu2 %v8859_v5, %s8483_s0  ;;  %v8871_v5 = vld [vmem:[#allocation170_spill] sm:$0xff] }
 0x63a   :  { %2501 = vrot.lane.b32.xlu0 %v8857_v63, %s8602_s17 }
 0x63c   :  { %2557 = vrot.lane.b32.xlu1 %v8858_v28, %s8483_s0  ;;  %v1674_v56 = vpop.permute.xlu0 %1673  ;;  %v6832_v26 = vpop.permute.xlu2 %1879  ;;  %v8870_v28 = vld [vmem:[#allocation169_spill] sm:$0xff] }
 0x63e   :  { %v1744_v21 = vpop.permute.xlu1 %1743 }
 0x63f   :  { %v1748_v63 = vadd.f32 %v1744_v21, %v1692_v44  ;;  %v2162_v44 = vstv %s4074_s1  ;;  %s7101_s1 = sld [smem:[#allocation6 + $0x7]] }
 0x641   :  { %2155 = vrot.lane.b32.xlu2 %v8862_v7, %s8474_s4  ;;  %v8872_v7 = vstv %s6279_s27  ;;  %s7122_s27 = sld [smem:[#allocation9 + $0x5]] }
 0x642   :  { %2211 = vrot.lane.b32.xlu0 %v8860_v8, %s8597_s6  ;;  %v1678_v8 = vadd.f32 %v1674_v56, %v1622_v51  ;;  %v8874_v51 = vld [vmem:[#allocation172_spill] sm:$0xff] }
 0x644   :  { %2637 = vrot.lane.b32.xlu1 %v8861_v49, %s8474_s4  ;;  %v1716_v13 = vpop.permute.xlu0 %1715  ;;  %v6840_v55 = vpop.permute.xlu2 %1921  ;;  %v1734_v21 = vadd.f32 %v6802_v31, %v1678_v8 }
 0x645   :  { %v1720_v42 = vadd.f32 %v1716_v13, %v1664_v17  ;;  %v1850_v13 = vmul.f32 %v8872_v7, %v8866_v10 }
 0x646   :  { %v1786_v33 = vpop.permute.xlu1 %1785 }
 0x647   :  { %v1776_v41 = vadd.f32 %v1772_v22, %v1720_v42  ;;  %v2452_v42 = vstv %s6850_s20  ;;  %s4135_s20 = sld [smem:[#allocation6 + $0x2]] }
 0x649   :  { %2267 = vrot.lane.b32.xlu2 %v8865_v62, %s8602_s17 }
 0x64a   :  { %2323 = vrot.lane.b32.xlu0 %v8863_v4, %s8483_s0  ;;  %v2453_v4 = vmul.f32 %v2452_v42, %v6167_v40 }
 0x64c   :  { %2749 = vrot.lane.b32.xlu1 %v8864_v53, %s8602_s17  ;;  %v1758_v47 = vpop.permute.xlu0 %1757  ;;  %v6848_v38 = vpop.permute.xlu2 %1963  ;;  %v1790_v53 = vadd.f32 %v1786_v33, %v1734_v21 }
 0x64d   :  { %v1762_v45 = vadd.f32 %v1758_v47, %v1706_v29  ;;  %v8873_v29 = vld [vmem:[#allocation173_spill] sm:$0xff] }
 0x64e   :  { %v1828_v11 = vpop.permute.xlu1 %1827 }
 0x64f   :  { %v1832_v25 = vadd.f32 %v1828_v11, %v1776_v41  ;;  %v1818_v18 = vadd.f32 %v1814_v0, %v1762_v45  ;;  %v8875_v41 = vstv %s6295_s30  ;;  %v2508_v11 = vstv %s4101_s12  ;;  %s4136_s12 = sld [smem:[#allocation6 + $0x6]] }
 0x650   :  { %v1868_v47 = vmul.f32 %v8875_v41, %v8866_v10  ;;  %v2509_v33 = vmul.f32 %v2508_v11, %v6167_v40  ;;  %s7136_s30 = sld [smem:[#allocation9 + $0xd]] }
 0x651   :  { %v6858_v43 = vadd.f32 %v1862_v19, %v1832_v25  ;;  %v1858_v22 = vadd.f32 %v1856_v59, %v1818_v18  ;;  %2693 = vrot.lane.b32.xlu2 %v8871_v5, %s8597_s6  ;;  %v8876_v25 = vld [vmem:[#allocation118_spill] sm:$0xff]  ;;  %v2564_v59 = vstv %s6881_s13  ;;  %v2163_v5 = vmul.f32 %v2162_v44, %v6142_v36  ;;  %s7099_s13 = sld [smem:[#allocation6 + $0x3]] }
 0x652   :  { %2033 = vrot.lane.b32.xlu0 %v8869_v35, %s8602_s17  ;;  %v2510_v30 = vmul.f32 %v2508_v11, %v8876_v25  ;;  %v2454_v19 = vmul.f32 %v2452_v42, %v8876_v25  ;;  %v8877_v35 = vld [vmem:[#allocation116_spill] sm:$0xff]  ;;  %v2274_v11 = vstv %s4082_s9  ;;  %s4094_s9 = sld [smem:[#allocation2 + $0x97]] }
 0x654   :  { %2805 = vrot.lane.b32.xlu1 %v8870_v28, %s8483_s0  ;;  %v1800_v0 = vpop.permute.xlu0 %1799  ;;  %v2006_v32 = vpop.permute.xlu2 %2005  ;;  %v2565_v28 = vmul.f32 %v2564_v59, %v6167_v40 }
 0x655   :  { %v1804_v17 = vadd.f32 %v1800_v0, %v1748_v63  ;;  %v2164_v63 = vmul.f32 %v2162_v44, %v8877_v35 }
 0x656   :  { %v1894_v49 = vpop.permute.xlu1 %1893 }
 0x657   :  { %v1852_v50 = vadd.f32 %v1850_v13, %v1804_v17  ;;  %v1898_v0 = vadd.f32 %v1894_v49, %v1858_v22  ;;  %v2218_v17 = vstv %s4078_s26  ;;  %v2104_v49 = vmul.f32 %v2102_v57, %v8877_v35  ;;  %s7103_s26 = sld [smem:[#allocation9 + $0x4]] }
 0x658   :  { %v2220_v22 = vmul.f32 %v2218_v17, %v8877_v35  ;;  %v2644_v57 = vstv %s6902_s14  ;;  %s7105_s14 = sld [smem:[#allocation9 + $0x2]] }
 0x659   :  { %2403 = vrot.lane.b32.xlu2 %v8874_v51, %s8474_s4  ;;  %v2566_v51 = vmul.f32 %v2564_v59, %v8876_v25  ;;  %v2645_v44 = vmul.f32 %v2644_v57, %v6227_v3 }
 0x65a   :  { %2089 = vrot.lane.b32.xlu0 %v8873_v29, %s8483_s0  ;;  %v1884_v29 = vadd.f32 %v6832_v26, %v1852_v50 }
 0x65c   :  { %2457 = vrot.lane.b32.xlu1 %v2453_v4, %s8597_s6  ;;  %v1842_v56 = vpop.permute.xlu0 %1841  ;;  %v2048_v45 = vpop.permute.xlu2 %2047  ;;  %v2219_v4 = vmul.f32 %v2218_v17, %v6142_v36 }
 0x65d   :  { %v1846_v58 = vadd.f32 %v1842_v56, %v1790_v53 }
 0x65e   :  { %v1936_v62 = vpop.permute.xlu1 %1935 }
 0x65f   :  { %v6883_v31 = vadd.f32 %v1868_v47, %v1846_v58  ;;  %v1940_v56 = vadd.f32 %v1936_v62, %v1884_v29  ;;  %v2851_v62 = vld [vmem:[%s8878_s24 + $0x40] sm:$0xff] }
 0x661   :  { %2459 = vrot.lane.b32.xlu2 %v2454_v19, %s8597_s6  ;;  %v2276_v19 = vmul.f32 %v2274_v11, %v8877_v35 }
 0x662   :  { %2513 = vrot.lane.b32.xlu0 %v2509_v33, %s8602_s17  ;;  %v2098_v33 = vmul.f32 %v2096_v34, %v8877_v35  ;;  %v2850_v34 = vld [vmem:[%s8878_s24 + $0x38] sm:$0xff] }
 0x664   :  { %2515 = vrot.lane.b32.xlu1 %v2510_v30, %s8602_s17  ;;  %v6891_v10 = vpop.permute.xlu0 %1907  ;;  %v2240_v14 = vpop.permute.xlu2 %2239  ;;  %v2852_v30 = vld [vmem:[%s8878_s24 + $0x48] sm:$0xf] }
 0x665   :  { %v2857_v59 = vpack.c.bf16 %v2852_v30, %v2851_v62 }
 0x666   :  { %v6893_v18 = vpop.permute.xlu1 %1977 }
 0x669   :  { %2167 = vrot.lane.b32.xlu2 %v2163_v5, %s8474_s4  ;;  %v2873_v5 = vsel %vm2871_vm15, %v2857_v59, 0 }
 0x66a   :  { %2169 = vrot.lane.b32.xlu0 %v2164_v63, %s8474_s4  ;;  %2878 = vmatpush.bf16.msra.mxu1 %v2873_v5 }
 0x66c   :  { %2569 = vrot.lane.b32.xlu1 %v2565_v28, %s8483_s0  ;;  %v1950_v8 = vpop.permute.xlu0 %1949  ;;  %v2062_v42 = vpop.permute.xlu2 %2061  ;;  %v2275_v28 = vmul.f32 %v2274_v11, %v6142_v36 }
 0x66d   :  { %v1954_v13 = vadd.f32 %v1950_v8, %v1898_v0 }
 0x66e   :  { %v2128_v7 = vpop.permute.xlu1 %2127 }
 0x66f   :  { %v2010_v21 = vadd.f32 %v2006_v32, %v1954_v13 }
 0x671   :  { %v2066_v53 = vadd.f32 %v2062_v42, %v2010_v21  ;;  %2571 = vrot.lane.b32.xlu2 %v2566_v51, %s8483_s0  ;;  %v2330_v21 = vstv %s6916_s19  ;;  %v2845_v51 = vld [vmem:[%s8878_s24 + $0x10] sm:$0xff]  ;;  %s7116_s19 = sld [smem:[#allocation9 + $0x7]] }
 0x672   :  { %2223 = vrot.lane.b32.xlu0 %v2219_v4, %s8597_s6 }
 0x673   :  { %v6913_v32 = vadd.f32 %v2104_v49, %v2066_v53  ;;  %v2331_v49 = vmul.f32 %v2330_v21, %v6142_v36 }
 0x674   :  { %2225 = vrot.lane.b32.xlu1 %v2220_v22, %s8597_s6  ;;  %v1992_v41 = vpop.permute.xlu0 %1991  ;;  %v6918_v47 = vpop.permute.xlu2 %2141  ;;  %v2848_v22 = vld [vmem:[%s8878_s24 + $0x28] sm:$0xff] }
 0x675   :  { %v1996_v50 = vadd.f32 %v1992_v41, %v1940_v56  ;;  %v2332_v56 = vmul.f32 %v2330_v21, %v8877_v35 }
 0x676   :  { %v2296_v26 = vpop.permute.xlu1 %2295 }
 0x677   :  { %v2052_v58 = vadd.f32 %v2048_v45, %v1996_v50  ;;  %v2849_v45 = vld [vmem:[%s8878_s24 + $0x30] sm:$0xff]  ;;  %v2346_v50 = vmul.f32 %v2344_v23, %v8876_v25  ;;  %v2843_v23 = vld [vmem:[%s8878_s24] sm:$0xff] }
 0x678   :  { %v2856_v8 = vpack.c.bf16 %v2850_v34, %v2849_v45  ;;  %v2700_v45 = vstv %s6947_s25  ;;  %s7092_s25 = sld [smem:[#allocation7 + $0x1]] }
 0x679   :  { %v2100_v63 = vadd.f32 %v2098_v33, %v2052_v58  ;;  %2279 = vrot.lane.b32.xlu2 %v2275_v28, %s8602_s17  ;;  %v8879_v58 = vld [vmem:[#allocation119_spill] sm:$0xff]  ;;  %v2701_v28 = vmul.f32 %v2700_v45, %v6227_v3 }
 0x67a   :  { %2281 = vrot.lane.b32.xlu0 %v2276_v19, %s8602_s17  ;;  %2879 = vmatpush.bf16.msra.mxu1 %v2856_v8  ;;  %v2646_v11 = vmul.f32 %v2644_v57, %v8879_v58  ;;  %v2844_v57 = vld [vmem:[%s8878_s24 + $0x8] sm:$0xff]  ;;  %v2702_v34 = vmul.f32 %v2700_v45, %v8879_v58 }
 0x67b   :  { %v2132_v0 = vadd.f32 %v2128_v7, %v2100_v63  ;;  %v2847_v7 = vld [vmem:[%s8878_s24 + $0x20] sm:$0xff] }
 0x67c   :  { %2649 = vrot.lane.b32.xlu1 %v2645_v44, %s8474_s4  ;;  %v2184_v13 = vpop.permute.xlu0 %2183  ;;  %v6943_v4 = vpop.permute.xlu2 %2253  ;;  %v2855_v53 = vpack.c.bf16 %v2848_v22, %v2847_v7  ;;  %v2853_v44 = vpack.c.bf16 %v2844_v57, %v2843_v23  ;;  %v2594_v7 = vmul.f32 %v2592_v46, %v8879_v58 }
 0x67d   :  { %v2188_v42 = vadd.f32 %v2184_v13, %v2132_v0 }
 0x67e   :  { %v2432_v17 = vpop.permute.xlu1 %2431  ;;  %2880 = vmatpush.bf16.msra.mxu1 %v2855_v53 }
 0x67f   :  { %v2244_v29 = vadd.f32 %v2240_v14, %v2188_v42  ;;  %v2846_v14 = vld [vmem:[%s8878_s24 + $0x18] sm:$0xff]  ;;  %v2410_v42 = vstv %s4094_s9  ;;  %s6986_s24 = sld [smem:[#allocation2 + $0x98]] }
 0x680   :  { %v2854_v33 = vpack.c.bf16 %v2846_v14, %v2845_v51  ;;  %v2412_v53 = vmul.f32 %v2410_v42, %v8876_v25  ;;  %s7107_s9 = sld [smem:[#allocation9 + $0x1]] }
 0x681   :  { %v2300_v41 = vadd.f32 %v2296_v26, %v2244_v29  ;;  %2651 = vrot.lane.b32.xlu2 %v2646_v11, %s8474_s4  ;;  %v2756_v26 = vstv %s6945_s8  ;;  %v1912_v29 = vadd.f32 %v6891_v10, %v6858_v43  ;;  %v2146_v43 = vadd.f32 %v6918_v47, %v6913_v32  ;;  %s7090_s8 = sld [smem:[#allocation7]] }
 0x682   :  { %2335 = vrot.lane.b32.xlu0 %v2331_v49, %s8483_s0  ;;  %2881 = vmatpush.bf16.msra.mxu1 %v2854_v33  ;;  %v2757_v63 = vmul.f32 %v2756_v26, %v6227_v3  ;;  %v2758_v51 = vmul.f32 %v2756_v26, %v8879_v58  ;;  %v2812_v33 = vstv %s4125_s23  ;;  %v2627_v47 = vadd.f32 %v6520_v52, %v6505_v9  ;;  %s7161_s23 = sld [smem:[#allocation9 + $0x11]] }
 0x683   :  { %v2348_v36 = vadd.f32 %v2346_v50, %v2300_v41  ;;  %v1968_v14 = vadd.f32 %v6848_v38, %v1912_v29  ;;  %v2110_v38 = vmul.f32 %v2108_v1, %v8877_v35  ;;  %v2813_v32 = vmul.f32 %v2812_v33, %v6227_v3 }
 0x684   :  { %2337 = vrot.lane.b32.xlu1 %v2332_v56, %s8483_s0  ;;  %v2376_v62 = vpop.permute.xlu0 %2375  ;;  %v6970_v19 = vpop.permute.xlu2 %2679  ;;  %v2683_v23 = vadd.f32 %v6542_v12, %v2627_v47 }
 0x685   :  { %v2380_v59 = vadd.f32 %v2376_v62, %v2348_v36  ;;  %v2466_v50 = vstv %s6986_s24  ;;  %v2814_v62 = vmul.f32 %v2812_v33, %v8879_v58  ;;  %s7147_s24 = sld [smem:[#allocation9 + $0xa]] }
 0x686   :  { %v2544_v30 = vpop.permute.xlu1 %2543  ;;  %2882 = vmatpush.bf16.msra.mxu1 %v2853_v44 }
 0x687   :  { %v2436_v5 = vadd.f32 %v2432_v17, %v2380_v59  ;;  %v2411_v17 = vmul.f32 %v2410_v42, %v6167_v40 }
 0x689   :  { %2705 = vrot.lane.b32.xlu2 %v2701_v28, %s8597_s6  ;;  %v2522_v28 = vstv %s4102_s21  ;;  %s7165_s21 = sld [smem:[#allocation9 + $0x10]] }
 0x68a   :  { %2707 = vrot.lane.b32.xlu0 %v2702_v34, %s8597_s6  ;;  %v8881_v34 = vstv %s6503_s3  ;;  %v2524_v12 = vmul.f32 %v2522_v28, %v8876_v25  ;;  %s4118_s3 = sld [smem:[#allocation2 + $0x9d]] }
 0x68b   :  { %v2352_v44 = vmul.f32 %v8881_v34, %v8876_v25 }
 0x68c   :  { %2761 = vrot.lane.b32.xlu1 %v2757_v63, %s8602_s17  ;;  %v2488_v0 = vpop.permute.xlu0 %2487  ;;  %v2020_v21 = vpop.permute.xlu2 %2019 }
 0x68d   :  { %v2492_v13 = vadd.f32 %v2488_v0, %v2436_v5  ;;  %v2024_v10 = vadd.f32 %v2020_v21, %v1968_v14  ;;  %v2739_v0 = vadd.f32 %v6540_v24, %v2683_v23  ;;  %v2658_v24 = vstv %s7021_s10  ;;  %s7168_s10 = sld [smem:[#allocation9 + $0xe]] }
 0x68e   :  { %v2624_v8 = vpop.permute.xlu1 %2623 }
 0x68f   :  { %v2548_v22 = vadd.f32 %v2544_v30, %v2492_v13  ;;  %v2467_v30 = vmul.f32 %v2466_v50, %v6167_v40 }
 0x691   :  { %v2596_v49 = vadd.f32 %v2594_v7, %v2548_v22  ;;  %2763 = vrot.lane.b32.xlu2 %v2758_v51, %s8602_s17  ;;  %v2659_v51 = vmul.f32 %v2658_v24, %v6227_v3 }
 0x692   :  { %2415 = vrot.lane.b32.xlu0 %v2411_v17, %s8474_s4  ;;  %v2578_v17 = vstv %s4106_s29  ;;  %s7182_s29 = sld [smem:[#allocation9 + $0x16]] }
 0x693   :  { %v2628_v59 = vadd.f32 %v2624_v8, %v2596_v49  ;;  %v2468_v8 = vmul.f32 %v2466_v50, %v8876_v25  ;;  %v2580_v49 = vmul.f32 %v2578_v17, %v8876_v25  ;;  %v2579_v14 = vmul.f32 %v2578_v17, %v6167_v40 }
 0x694   :  { %2417 = vrot.lane.b32.xlu1 %v2412_v53, %s8474_s4  ;;  %v2198_v46 = vpop.permute.xlu0 %2197  ;;  %v2076_v41 = vpop.permute.xlu2 %2075 }
 0x695   :  { %v2080_v11 = vadd.f32 %v2076_v41, %v2024_v10  ;;  %v2202_v36 = vadd.f32 %v2198_v46, %v2146_v43  ;;  %v2684_v9 = vadd.f32 %v6970_v19, %v2628_v59  ;;  %v2795_v19 = vadd.f32 %v6482_v54, %v2739_v0 }
 0x696   :  { %v2736_v56 = vpop.permute.xlu1 %2735  ;;  %v2826_v59 = vstv %s7040_s11  ;;  %s7189_s11 = sld [smem:[#allocation9 + $0x13]] }
 0x697   :  { %v7008_v26 = vadd.f32 %v2110_v38, %v2080_v11  ;;  %v2258_v45 = vadd.f32 %v6943_v4, %v2202_v36  ;;  %v2523_v4 = vmul.f32 %v2522_v28, %v6167_v40  ;;  %v2740_v13 = vadd.f32 %v2736_v56, %v2684_v9 }
 0x698   :  { %v2714_v56 = vstv %s4118_s3  ;;  %v2600_v11 = vmul.f32 %v2598_v39, %v8879_v58  ;;  %v2358_v28 = vmul.f32 %v2356_v27, %v8876_v25  ;;  %v2641_v9 = vadd.f32 %v6608_v15, %v6595_v2  ;;  %s7186_s3 = sld [smem:[#allocation9 + $0x14]] }
 0x699   :  { %2817 = vrot.lane.b32.xlu2 %v2813_v32, %s8483_s0  ;;  %v2715_v36 = vmul.f32 %v2714_v56, %v6227_v3  ;;  %v2716_v33 = vmul.f32 %v2714_v56, %v8879_v58  ;;  %v1926_v15 = vadd.f32 %v6840_v55, %v6883_v31 }
 0x69a   :  { %2819 = vrot.lane.b32.xlu0 %v2814_v62, %s8483_s0  ;;  %v2660_v62 = vmul.f32 %v2658_v24, %v8879_v58 }
 0x69c   :  { %2471 = vrot.lane.b32.xlu1 %v2467_v30, %s8597_s6  ;;  %v2310_v1 = vpop.permute.xlu0 %2309  ;;  %v2156_v5 = vpop.permute.xlu2 %2155 }
 0x69d   :  { %v2314_v63 = vadd.f32 %v2310_v1, %v2258_v45  ;;  %v2160_v32 = vadd.f32 %v2156_v5, %v7008_v26  ;;  %v2770_v1 = vstv %s4122_s22  ;;  %s7203_s22 = sld [smem:[#allocation9 + $0x25]] }
 0x69e   :  { %v2390_v57 = vpop.permute.xlu1 %2389  ;;  %v2772_v23 = vmul.f32 %v2770_v1, %v8879_v58  ;;  %v2771_v34 = vmul.f32 %v2770_v1, %v6227_v3 }
 0x69f   :  { %v2354_v52 = vadd.f32 %v2352_v44, %v2314_v63 }
 0x6a1   :  { %2473 = vrot.lane.b32.xlu2 %v2468_v8, %s8597_s6  ;;  %v2394_v53 = vadd.f32 %v2390_v57, %v2354_v52  ;;  %v2827_v57 = vmul.f32 %v2826_v59, %v6227_v3 }
 0x6a2   :  { %2527 = vrot.lane.b32.xlu0 %v2523_v4, %s8602_s17 }
 0x6a4   :  { %2529 = vrot.lane.b32.xlu1 %v2524_v12, %s8602_s17  ;;  %v2792_v42 = vpop.permute.xlu0 %2791  ;;  %v2268_v7 = vpop.permute.xlu2 %2267  ;;  %v2697_v12 = vadd.f32 %v6610_v6, %v2641_v9  ;;  %v1982_v6 = vadd.f32 %v6893_v18, %v1926_v15  ;;  %v2407_v18 = vadd.f32 %v6620_v61, %v6602_v20 }
 0x6a5   :  { %v2796_v29 = vadd.f32 %v2792_v42, %v2740_v13  ;;  %v2828_v13 = vmul.f32 %v2826_v59, %v8879_v58 }
 0x6a6   :  { %v2446_v21 = vpop.permute.xlu1 %2445  ;;  %v2753_v42 = vadd.f32 %v6618_v60, %v2697_v12 }
 0x6a7   :  { %v2839_v22 = vpack.c.bf16 %v2796_v29, %v2795_v19  ;;  %v2450_v54 = vadd.f32 %v2446_v21, %v2394_v53  ;;  %v2116_v53 = vmul.f32 %v2114_v16, %v8877_v35 }
 0x6a8   :  { %v2809_v29 = vadd.f32 %v6630_v37, %v2753_v42 }
 0x6a9   :  { %4127 = vmatmul.msk.bf16.vlgmr.msra.gmra.mxu1 %vm2858_vm0, %v2839_v22  ;;  %2583 = vrot.lane.b32.xlu2 %v2579_v14, %s8483_s0 }
 0x6aa   :  { %2585 = vrot.lane.b32.xlu0 %v2580_v49, %s8483_s0 }
 0x6ac   :  { %2663 = vrot.lane.b32.xlu1 %v2659_v51, %s8474_s4  ;;  %v2502_v46 = vpop.permute.xlu0 %2501  ;;  %v2694_v41 = vpop.permute.xlu2 %2693 }
 0x6ad   :  { %v2506_v10 = vadd.f32 %v2502_v46, %v2450_v54 }
 0x6ae   :  { %v2558_v43 = vpop.permute.xlu1 %2557 }
 0x6af   :  { %v2562_v50 = vadd.f32 %v2558_v43, %v2506_v10 }
 0x6b1   :  { %v2602_v38 = vadd.f32 %v2600_v11, %v2562_v50  ;;  %2665 = vrot.lane.b32.xlu2 %v2660_v62, %s8474_s4 }
 0x6b2   :  { %2719 = vrot.lane.b32.xlu0 %v2715_v36, %s8597_s6 }
 0x6b4   :  { %2721 = vrot.lane.b32.xlu1 %v2716_v33, %s8597_s6  ;;  %v2212_v30 = vpop.permute.xlu0 %2211  ;;  %v2404_v39 = vpop.permute.xlu2 %2403 }
 0x6b5   :  { %v2216_v45 = vadd.f32 %v2212_v30, %v2160_v32 }
 0x6b6   :  { %v2638_v47 = vpop.permute.xlu1 %2637 }
 0x6b7   :  { %v2272_v44 = vadd.f32 %v2268_v7, %v2216_v45  ;;  %v2642_v52 = vadd.f32 %v2638_v47, %v2602_v38 }
 0x6b9   :  { %2775 = vrot.lane.b32.xlu2 %v2771_v34, %s8602_s17  ;;  %v2698_v8 = vadd.f32 %v2694_v41, %v2642_v52 }
 0x6ba   :  { %2777 = vrot.lane.b32.xlu0 %v2772_v23, %s8602_s17  ;;  %s4090_s17 = sld [smem:[#allocation2 + $0x96]] }
 0x6bc   :  { %2831 = vrot.lane.b32.xlu1 %v2827_v57, %s8483_s0  ;;  %v2324_v63 = vpop.permute.xlu0 %2323  ;;  %v2460_v4 = vpop.permute.xlu2 %2459 }
 0x6bd   :  { %v2328_v5 = vadd.f32 %v2324_v63, %v2272_v44 }
 0x6be   :  { %v2750_v26 = vpop.permute.xlu1 %2749 }
 0x6bf   :  { %v2360_v0 = vadd.f32 %v2358_v28, %v2328_v5  ;;  %v2754_v19 = vadd.f32 %v2750_v26, %v2698_v8 }
 0x6c0   :  { %v2362_v34 = vstv %s4090_s17  ;;  %s7210_s17 = sld [smem:[#allocation9 + $0x17]] }
 0x6c1   :  { %2833 = vrot.lane.b32.xlu2 %v2828_v13, %s8483_s0  ;;  %s4109_s0 = sld [smem:[#allocation2 + $0x73]]  ;;  %v2408_v14 = vadd.f32 %v2404_v39, %v2360_v0  ;;  %v2363_v9 = vmul.f32 %v2362_v34, %v6167_v40 }
 0x6c3   :  { %v2464_v54 = vadd.f32 %v2460_v4, %v2408_v14  ;;  %v2364_v4 = vmul.f32 %v2362_v34, %v8876_v25 }
 0x6c4   :  { %v2034_v21 = vpop.permute.xlu0 %2033  ;;  %v2168_v2 = vpop.permute.xlu2 %2167 }
 0x6c5   :  { %v2038_v22 = vadd.f32 %v2034_v21, %v1982_v6  ;;  %v2173_v20 = vadd.f32 %v2168_v2, %v6720_v48 }
 0x6c6   :  { %v2806_v27 = vpop.permute.xlu1 %2805 }
 0x6c7   :  { %v2810_v7 = vadd.f32 %v2806_v27, %v2754_v19  ;;  %v2604_v10 = vstv %s4109_s0  ;;  %s7207_s0 = sld [smem:[#allocation9 + $0x19]] }
 0x6c8   :  { %v2606_v41 = vmul.f32 %v2604_v10, %v8879_v58  ;;  %v2605_v62 = vmul.f32 %v2604_v10, %v6227_v3 }
 0x6c9   :  { %v2840_v24 = vpack.c.bf16 %v2810_v7, %v2809_v29 }
 0x6cb   :  { %4128 = vmatmul.msk.bf16.gmra.mxu1 %vm2858_vm0, %v2840_v24 }
 0x6cc   :  { %v2090_v60 = vpop.permute.xlu0 %2089  ;;  %v2572_v51 = vpop.permute.xlu2 %2571 }
 0x6cd   :  { %v2094_v49 = vadd.f32 %v2090_v60, %v2038_v22 }
 0x6ce   :  { %v2458_v17 = vpop.permute.xlu1 %2457 }
 0x6cf   :  { %v2118_v37 = vadd.f32 %v2116_v53, %v2094_v49  ;;  %v2463_v50 = vadd.f32 %v2458_v17, %v2407_v18 }
 0x6d4   :  { %v2514_v46 = vpop.permute.xlu0 %2513  ;;  %v2280_v31 = vpop.permute.xlu2 %2279 }
 0x6d5   :  { %v2519_v36 = vadd.f32 %v2514_v46, %v2463_v50 }
 0x6d6   :  { %v2516_v43 = vpop.permute.xlu1 %2515 }
 0x6d7   :  { %v2520_v55 = vadd.f32 %v2516_v43, %v2464_v54 }
 0x6d9   :  { %v2576_v56 = vadd.f32 %v2572_v51, %v2520_v55 }
 0x6db   :  { %v2608_v11 = vadd.f32 %v2606_v41, %v2576_v56 }
 0x6dc   :  { %v2170_v16 = vpop.permute.xlu0 %2169  ;;  %v2652_v38 = vpop.permute.xlu2 %2651 }
 0x6dd   :  { %v2174_v1 = vadd.f32 %v2170_v16, %v2118_v37  ;;  %v2656_v21 = vadd.f32 %v2652_v38, %v2608_v11  ;;  %v2610_v37 = vstv %s4110_s15  ;;  %s7224_s15 = sld [smem:[#allocation9 + $0x1c]] }
 0x6de   :  { %v2570_v35 = vpop.permute.xlu1 %2569  ;;  %v2611_v55 = vmul.f32 %v2610_v37, %v6227_v3  ;;  %v2612_v11 = vmul.f32 %v2610_v37, %v8879_v58  ;;  %v2947_v37 = vstv %s7099_s13  ;;  %s4168_s13 = sld [smem:[#allocation9 + $0x2c]] }
 0x6df   :  { %v2575_v33 = vadd.f32 %v2570_v35, %v2519_v36 }
 0x6e1   :  { %v2607_v30 = vadd.f32 %v2605_v62, %v2575_v33 }
 0x6e4   :  { %v2224_v32 = vpop.permute.xlu0 %2223  ;;  %v2706_v39 = vpop.permute.xlu2 %2705 }
 0x6e5   :  { %v2229_v45 = vadd.f32 %v2224_v32, %v2173_v20 }
 0x6e6   :  { %v2226_v47 = vpop.permute.xlu1 %2225 }
 0x6e7   :  { %v2230_v23 = vadd.f32 %v2226_v47, %v2174_v1  ;;  %v2285_v44 = vadd.f32 %v2280_v31, %v2229_v45  ;;  %v2911_v45 = vstv %s7086_s7  ;;  %v2917_v1 = vstv %s7088_s16  ;;  %s7228_s7 = sld [smem:[#allocation9 + $0x26]] }
 0x6e8   :  { %s7231_s16 = sld [smem:[#allocation9 + $0x1a]] }
 0x6ec   :  { %v2282_v59 = vpop.permute.xlu0 %2281  ;;  %v2764_v57 = vpop.permute.xlu2 %2763 }
 0x6ed   :  { %v2286_v63 = vadd.f32 %v2282_v59, %v2230_v23 }
 0x6ee   :  { %v2650_v61 = vpop.permute.xlu1 %2649 }
 0x6ef   :  { %v2655_v42 = vadd.f32 %v2650_v61, %v2607_v30 }
 0x6f1   :  { %v2711_v7 = vadd.f32 %v2706_v39, %v2655_v42 }
 0x6f4   :  { %v2336_v26 = vpop.permute.xlu0 %2335  ;;  %v2818_v8 = vpop.permute.xlu2 %2817 }
 0x6f5   :  { %v2341_v5 = vadd.f32 %v2336_v26, %v2285_v44  ;;  %v2905_v26 = vstv %s7090_s8  ;;  %s7251_s8 = sld [smem:[#allocation9 + $0x29]] }
 0x6f6   :  { %v2338_v28 = vpop.permute.xlu1 %2337 }
 0x6f7   :  { %v2342_v52 = vadd.f32 %v2338_v28, %v2286_v63  ;;  %v2365_v0 = vadd.f32 %v2363_v9, %v2341_v5  ;;  %v2908_v28 = vstv %s7092_s25  ;;  %s7255_s25 = sld [smem:[#allocation9 + $0x1d]] }
 0x6f9   :  { %v2366_v12 = vadd.f32 %v2364_v4, %v2342_v52 }
 0x6fc   :  { %v2708_v48 = vpop.permute.xlu0 %2707  ;;  %v2474_v29 = vpop.permute.xlu2 %2473 }
 0x6fd   :  { %v2712_v2 = vadd.f32 %v2708_v48, %v2656_v21 }
 0x6fe   :  { %v2762_v13 = vpop.permute.xlu1 %2761 }
 0x6ff   :  { %v2767_v15 = vadd.f32 %v2762_v13, %v2711_v7  ;;  %v2768_v24 = vadd.f32 %v2764_v57, %v2712_v2 }
 0x701   :  { %v2823_v40 = vadd.f32 %v2818_v8, %v2767_v15 }
 0x704   :  { %v2416_v19 = vpop.permute.xlu0 %2415  ;;  %v2584_v17 = vpop.permute.xlu2 %2583 }
 0x705   :  { %v2421_v49 = vadd.f32 %v2416_v19, %v2365_v0  ;;  %v2923_v0 = vstv %s4133_s28  ;;  %s7258_s28 = sld [smem:[#allocation9 + $0x28]] }
 0x706   :  { %v2418_v27 = vpop.permute.xlu1 %2417 }
 0x707   :  { %v2422_v14 = vadd.f32 %v2418_v27, %v2366_v12  ;;  %v2929_v12 = vstv %s4134_s18  ;;  %v2935_v27 = vstv %s4135_s20  ;;  %s7281_s18 = sld [smem:[#allocation9 + $0x20]] }
 0x708   :  { %s7285_s20 = sld [smem:[#allocation9 + $0x2b]] }
 0x709   :  { %v2478_v31 = vadd.f32 %v2474_v29, %v2422_v14  ;;  %v2941_v29 = vstv %s4136_s12  ;;  %v2953_v14 = vstv %s7101_s1  ;;  %s7288_s12 = sld [smem:[#allocation9 + $0x1f]] }
 0x70a   :  { %s4182_s1 = sld [smem:[#allocation9 + $0x22]] }
 0x70c   :  { %v2820_v6 = vpop.permute.xlu0 %2819  ;;  %v2666_v18 = vpop.permute.xlu2 %2665 }
 0x70d   :  { %v2824_v60 = vadd.f32 %v2820_v6, %v2768_v24 }
 0x70e   :  { %v2472_v22 = vpop.permute.xlu1 %2471 }
 0x70f   :  { %v2841_v25 = vpack.c.bf16 %v2824_v60, %v2823_v40  ;;  %v2477_v53 = vadd.f32 %v2472_v22, %v2421_v49 }
 0x711   :  { %4129 = vmatmul.msk.bf16.gmra.mxu1 %vm2858_vm0, %v2841_v25 }
 0x714   :  { %v2528_v51 = vpop.permute.xlu0 %2527  ;;  %v2776_v35 = vpop.permute.xlu2 %2775 }
 0x715   :  { %v2533_v46 = vadd.f32 %v2528_v51, %v2477_v53 }
 0x716   :  { %v2530_v54 = vpop.permute.xlu1 %2529 }
 0x717   :  { %v2589_v43 = vadd.f32 %v2584_v17, %v2533_v46  ;;  %v2534_v56 = vadd.f32 %v2530_v54, %v2478_v31 }
 0x719   :  { %v2613_v10 = vadd.f32 %v2611_v55, %v2589_v43 }
 0x71c   :  { %v2586_v41 = vpop.permute.xlu0 %2585  ;;  %v2834_v61 = vpop.permute.xlu2 %2833 }
 0x71d   :  { %v2590_v36 = vadd.f32 %v2586_v41, %v2534_v56  ;;  %v3303_v56 = vstv %s7103_s26  ;;  %v3143_v41 = vstv %s7105_s14  ;;  %s7330_s26 = sld [smem:[#allocation9 + $0x2e]] }
 0x71e   :  { %v2664_v50 = vpop.permute.xlu1 %2663  ;;  %s7332_s14 = sld [smem:[#allocation9 + $0x23]] }
 0x71f   :  { %v2614_v16 = vadd.f32 %v2612_v11, %v2590_v36  ;;  %v2669_v3 = vadd.f32 %v2664_v50, %v2613_v10  ;;  %v3031_v50 = vstv %s7107_s9  ;;  %s7360_s9 = sld [smem:[#allocation9]] }
 0x721   :  { %v2670_v30 = vadd.f32 %v2666_v18, %v2614_v16 }
 0x724   :  { %v2720_v33 = vpop.permute.xlu0 %2719 }
 0x725   :  { %v2725_v58 = vadd.f32 %v2720_v33, %v2669_v3 }
 0x726   :  { %v2722_v38 = vpop.permute.xlu1 %2721  ;;  %v2884_v62 = vpop.f32.mrf.mxu1 }
 0x727   :  { %v2726_v32 = vadd.f32 %v2722_v38, %v2670_v30  ;;  %v2781_v59 = vadd.f32 %v2776_v35, %v2725_v58  ;;  %v2912_v40 = vmul.f32 %v2911_v45, %v2884_v62  ;;  %v2918_v22 = vmul.f32 %v2917_v1, %v2884_v62 }
 0x728   :  { %v3157_v30 = vstv %s7111_s5  ;;  %v3045_v58 = vstv %s7116_s19  ;;  %s7371_s5 = sld [smem:[#allocation10]] }
 0x729   :  { %v2914_v17 = vadd.f32 %v2912_v40, %v2905_v26  ;;  %v2920_v49 = vadd.f32 %v2918_v22, %v2908_v28  ;;  %v3199_v40 = vstv %s7231_s16  ;;  %s7373_s19 = sld [smem:[#allocation9 + $0x6]] }
 0x72a   :  { %s7597_s16 = sld [smem:[#allocation10 + $0x7]] }
 0x72c   :  { %v2778_v47 = vpop.permute.xlu0 %2777 }
 0x72d   :  { %v2782_v20 = vadd.f32 %v2778_v47, %v2726_v32 }
 0x72e   :  { %v2832_v39 = vpop.permute.xlu1 %2831  ;;  %v2886_v23 = vpop.f32.mrf.mxu1 }
 0x72f   :  { %v2837_v57 = vadd.f32 %v2832_v39, %v2781_v59  ;;  %v2838_v34 = vadd.f32 %v2834_v61, %v2782_v20  ;;  %v2913_v44 = vmul.f32 %v2911_v45, %v2886_v23  ;;  %v2919_v63 = vmul.f32 %v2917_v1, %v2886_v23 }
 0x730   :  { %v3415_v39 = vstv %s7122_s27  ;;  %v3059_v45 = vstv %s7136_s30  ;;  %v3429_v1 = vstv %s7140_s2  ;;  %v3317_v23 = vstv %s7147_s24  ;;  %s7379_s27 = sld [smem:[#allocation9 + $0x3]] }
 0x731   :  { %v2915_v5 = vadd.f32 %v2913_v44, %v2905_v26  ;;  %v2921_v9 = vadd.f32 %v2919_v63, %v2908_v28  ;;  %v2842_v52 = vpack.c.bf16 %v2838_v34, %v2837_v57  ;;  %v3443_v63 = vstv %s7161_s23  ;;  %s7381_s30 = sld [smem:[#allocation10 + $0x1]] }
 0x732   :  { %v3331_v26 = vstv %s7165_s21  ;;  %v3171_v28 = vstv %s7168_s10  ;;  %s7409_s2 = sld [smem:[#allocation9 + $0x9]] }
 0x733   :  { %4130 = vmatmul.msk.bf16.gmra.mxu1 %vm2858_vm0, %v2842_v52  ;;  %s7428_s24 = sld [smem:[#allocation9 + $0xc]] }
 0x734   :  { %s7434_s23 = sld [smem:[#allocation10 + $0x2]] }
 0x735   :  { %s7453_s21 = sld [smem:[#allocation9 + $0xf]] }
 0x736   :  { %s7457_s10 = sld [smem:[#allocation9 + $0x12]] }
 0x748   :  { %v2889_v4 = vpop.f32.mrf.mxu1 }
 0x749   :  { %v2924_v60 = vmul.f32 %v2923_v0, %v2889_v4  ;;  %v2930_v25 = vmul.f32 %v2929_v12, %v2889_v4  ;;  %v3345_v4 = vstv %s7182_s29  ;;  %s7474_s29 = sld [smem:[#allocation10 + $0x3]] }
 0x74b   :  { %v2926_v54 = vadd.f32 %v2924_v60, %v2914_v17  ;;  %v2932_v46 = vadd.f32 %v2930_v25, %v2920_v49 }
 0x750   :  { %v2891_v8 = vpop.f32.mrf.mxu1 }
 0x751   :  { %v2925_v48 = vmul.f32 %v2923_v0, %v2891_v8  ;;  %v2931_v13 = vmul.f32 %v2929_v12, %v2891_v8  ;;  %v3185_v0 = vstv %s7186_s3  ;;  %v3073_v12 = vstv %s7189_s11  ;;  %s7484_s3 = sld [smem:[#allocation9 + $0x24]] }
 0x752   :  { %s7487_s11 = sld [smem:[#allocation9 + $0x15]] }
 0x753   :  { %v2927_v42 = vadd.f32 %v2925_v48, %v2915_v5  ;;  %v2933_v19 = vadd.f32 %v2931_v13, %v2921_v9 }
 0x78e   :  { %v2894_v21 = vpop.f32.mrf.mxu1 }
 0x78f   :  { %v2936_v53 = vmul.f32 %v2935_v27, %v2894_v21  ;;  %v2942_v51 = vmul.f32 %v2941_v29, %v2894_v21  ;;  %v3457_v21 = vstv %s7210_s17  ;;  %s7517_s17 = sld [smem:[#allocation9 + $0x2f]] }
 0x791   :  { %v2938_v55 = vadd.f32 %v2936_v53, %v2926_v54  ;;  %v2944_v31 = vadd.f32 %v2942_v51, %v2932_v46  ;;  %v3499_v51 = vstv %s7251_s8 }
 0x796   :  { %v2896_v7 = vpop.f32.mrf.mxu1 }
 0x797   :  { %v2937_v2 = vmul.f32 %v2935_v27, %v2896_v7  ;;  %v2943_v15 = vmul.f32 %v2941_v29, %v2896_v7 }
 0x799   :  { %v2939_v24 = vadd.f32 %v2937_v2, %v2927_v42  ;;  %v2945_v6 = vadd.f32 %v2943_v15, %v2933_v19  ;;  %v3115_v42 = vstv %s7203_s22  ;;  %v3087_v19 = vstv %s7207_s0  ;;  %s7498_s22 = sld [smem:[#allocation10 + $0x6]] }
 0x79a   :  { %s7510_s0 = sld [smem:[#allocation9 + $0x18]] }
 0x7b0   :  { %v2899_v43 = vpop.f32.mrf.mxu1 }
 0x7b1   :  { %v2948_v10 = vmul.f32 %v2947_v37, %v2899_v43  ;;  %v2954_v18 = vmul.f32 %v2953_v14, %v2899_v43 }
 0x7b3   :  { %v7118_v11 = vadd.f32 %v2948_v10, %v2938_v55  ;;  %v7120_v36 = vadd.f32 %v2954_v18, %v2944_v31  ;;  %v3213_v18 = vstv %s7281_s18  ;;  %s7568_s18 = sld [smem:[#allocation9 + $0x1e]] }
 0x7b5   :  { %v3304_v16 = vmul.f32 %v3303_v56, %v7120_v36  ;;  %v3144_v35 = vmul.f32 %v3143_v41, %v7118_v11  ;;  %v3032_v33 = vmul.f32 %v3031_v50, %v7118_v11  ;;  %v3158_v59 = vmul.f32 %v3157_v30, %v7118_v11 }
 0x7b6   :  { %v3046_v20 = vmul.f32 %v3045_v58, %v7118_v11  ;;  %v3416_v61 = vmul.f32 %v3415_v39, %v7120_v36  ;;  %v3060_v57 = vmul.f32 %v3059_v45, %v7118_v11  ;;  %v3430_v34 = vmul.f32 %v3429_v1, %v7120_v36 }
 0x7b7   :  { %3308 = vrot.lane.b32.xlu1 %v3304_v16, %s8474_s4  ;;  %3148 = vrot.lane.b32.xlu2 %v3144_v35, %s8597_s6  ;;  %v3318_v44 = vmul.f32 %v3317_v23, %v7120_v36  ;;  %v3444_v5 = vmul.f32 %v3443_v63, %v7120_v36  ;;  %v3332_v9 = vmul.f32 %v3331_v26, %v7120_v36 }
 0x7b8   :  { %3036 = vrot.lane.b32.xlu0 %v3032_v33, %s8474_s4  ;;  %v2901_v38 = vpop.f32.mrf.mxu1  ;;  %v3172_v52 = vmul.f32 %v3171_v28, %v7118_v11  ;;  %v3346_v8 = vmul.f32 %v3345_v4, %v7120_v36  ;;  %v3186_v48 = vmul.f32 %v3185_v0, %v7118_v11  ;;  %v3074_v13 = vmul.f32 %v3073_v12, %v7118_v11 }
 0x7b9   :  { %v2949_v62 = vmul.f32 %v2947_v37, %v2901_v38  ;;  %v2955_v3 = vmul.f32 %v2953_v14, %v2901_v38  ;;  %v3116_v27 = vmul.f32 %v3115_v42, %v7118_v11  ;;  %v3088_v29 = vmul.f32 %v3087_v19, %v7118_v11 }
 0x7ba   :  { %v3458_v7 = vmul.f32 %v3457_v21, %v7120_v36  ;;  %v3200_v25 = vmul.f32 %v3199_v40, %v7118_v11  ;;  %v3471_v37 = vstv %s7255_s25  ;;  %v3387_v14 = vstv %s7258_s28  ;;  %s8882_s25 = sld [smem:[#allocation175_spill]] }
 0x7bb   :  { %v7142_v32 = vadd.f32 %v2949_v62, %v2939_v24  ;;  %v7144_v47 = vadd.f32 %v2955_v3, %v2945_v6  ;;  %v3359_v24 = vstv %s7224_s15  ;;  %v3227_v6 = vstv %s7228_s7  ;;  %s7519_s15 = sld [smem:[#allocation10 + $0x4]] }
 0x7bc   :  { %v3360_v22 = vmul.f32 %v3359_v24, %v7120_v36  ;;  %v3228_v60 = vmul.f32 %v3227_v6, %v7118_v11  ;;  %v3500_v54 = vmul.f32 %v3499_v51, %v7120_v36  ;;  %v3472_v46 = vmul.f32 %v3471_v37, %v7120_v36  ;;  %s7542_s7 = sld [smem:[#allocation9 + $0x1b]] }
 0x7bd   :  { %v3305_v2 = vmul.f32 %v3303_v56, %v7144_v47  ;;  %v3033_v15 = vmul.f32 %v3031_v50, %v7142_v32  ;;  %v3145_v17 = vmul.f32 %v3143_v41, %v7142_v32  ;;  %v3417_v49 = vmul.f32 %v3415_v39, %v7144_v47  ;;  %s7554_s28 = sld [smem:[#allocation9 + $0x27]] }
 0x7be   :  { %v3159_v53 = vmul.f32 %v3157_v30, %v7142_v32  ;;  %v3388_v43 = vmul.f32 %v3387_v14, %v7120_v36  ;;  %v3047_v55 = vmul.f32 %v3045_v58, %v7142_v32  ;;  %v3319_v31 = vmul.f32 %v3317_v23, %v7144_v47 }
 0x7bf   :  { %3162 = vrot.lane.b32.xlu1 %v3158_v59, %s8597_s6  ;;  %3050 = vrot.lane.b32.xlu2 %v3046_v20, %s8474_s4  ;;  %v3061_v10 = vmul.f32 %v3059_v45, %v7142_v32  ;;  %v3129_v56 = vstv %s7285_s20  ;;  %v3101_v41 = vstv %s7288_s12  ;;  %v3214_v50 = vmul.f32 %v3213_v18, %v7118_v11  ;;  %s7575_s20 = sld [smem:[#allocation10 + $0x5]] }
 0x7c0   :  { %3420 = vrot.lane.b32.xlu0 %v3416_v61, %s8597_s6  ;;  %v3130_v16 = vmul.f32 %v3129_v56, %v7118_v11  ;;  %v3102_v35 = vmul.f32 %v3101_v41, %v7118_v11  ;;  %v3241_v33 = vstv %s4168_s13  ;;  %v3373_v62 = vstv %s4182_s1  ;;  %s7586_s12 = sld [smem:[#allocation9 + $0x21]] }
 0x7c1   :  { %v3242_v38 = vmul.f32 %v3241_v33, %v7118_v11  ;;  %v3374_v3 = vmul.f32 %v3373_v62, %v7120_v36  ;;  %v3401_v58 = vstv %s7330_s26  ;;  %v3485_v39 = vstv %s7332_s14 }
 0x7c2   :  { %v7340_v59 = vmul.f32 %v3101_v41, %v7142_v32  ;;  %v7343_v20 = vmul.f32 %v3129_v56, %v7142_v32  ;;  %v7346_v61 = vmul.f32 %v3241_v33, %v7142_v32  ;;  %v7349_v45 = vmul.f32 %v3373_v62, %v7144_v47 }
 0x7c3   :  { %v3402_v23 = vmul.f32 %v3401_v58, %v7120_v36  ;;  %v3261_v56 = vstv %s7409_s2  ;;  %v3361_v41 = vmul.f32 %v3359_v24, %v7144_v47  ;;  %v2995_v24 = vstv %s7428_s24  ;;  %8883 = sst [smem:[#allocation43_spill]] %s7554_s28 }
 0x7c4   :  { %v2996_v62 = vmul.f32 %v2995_v24, %v7118_v11  ;;  %s8887_s24 = sld [smem:[#allocation177_spill]] }
 0x7c7   :  { %3064 = vrot.lane.b32.xlu1 %v3060_v57, %s8474_s4  ;;  %3434 = vrot.lane.b32.xlu2 %v3430_v34, %s8597_s6  ;;  %v3486_v57 = vmul.f32 %v3485_v39, %v7120_v36 }
 0x7c8   :  { %3322 = vrot.lane.b32.xlu0 %v3318_v44, %s8474_s4  ;;  %v3445_v44 = vmul.f32 %v3443_v63, %v7144_v47 }
 0x7cf   :  { %3448 = vrot.lane.b32.xlu1 %v3444_v5, %s8597_s6  ;;  %3336 = vrot.lane.b32.xlu2 %v3332_v9, %s8474_s4  ;;  %v3173_v5 = vmul.f32 %v3171_v28, %v7142_v32  ;;  %v3431_v9 = vmul.f32 %v3429_v1, %v7144_v47  ;;  %v3347_v1 = vmul.f32 %v3345_v4, %v7144_v47 }
 0x7d0   :  { %3176 = vrot.lane.b32.xlu0 %v3172_v52, %s8597_s6  ;;  %v2983_v52 = vstv %s7360_s9  ;;  %v3075_v28 = vmul.f32 %v3073_v12, %v7142_v32 }
 0x7d7   :  { %3350 = vrot.lane.b32.xlu1 %v3346_v8, %s8474_s4  ;;  %3190 = vrot.lane.b32.xlu2 %v3186_v48, %s8597_s6  ;;  %v2984_v8 = vmul.f32 %v2983_v52, %v7118_v11  ;;  %v3333_v48 = vmul.f32 %v3331_v26, %v7144_v47 }
 0x7d8   :  { %3078 = vrot.lane.b32.xlu0 %v3074_v13, %s8474_s4  ;;  %v2959_v13 = vstv %s7371_s5 }
 0x7df   :  { %3120 = vrot.lane.b32.xlu1 %v3116_v27, %s8474_s4  ;;  %3092 = vrot.lane.b32.xlu2 %v3088_v29, %s8474_s4  ;;  %v2989_v27 = vstv %s7373_s19  ;;  %v2986_v29 = vadd.f32 %v2984_v8, %v2959_v13 }
 0x7e0   :  { %3462 = vrot.lane.b32.xlu0 %v3458_v7, %s8597_s6  ;;  %v2990_v26 = vmul.f32 %v2989_v27, %v7118_v11 }
 0x7e7   :  { %3364 = vrot.lane.b32.xlu1 %v3360_v22, %s8474_s4  ;;  %3232 = vrot.lane.b32.xlu2 %v3228_v60, %s8597_s6 }
 0x7e8   :  { %3204 = vrot.lane.b32.xlu0 %v3200_v25, %s8597_s6  ;;  %v3117_v25 = vmul.f32 %v3115_v42, %v7142_v32 }
 0x7ef   :  { %3504 = vrot.lane.b32.xlu1 %v3500_v54, %s8597_s6  ;;  %3476 = vrot.lane.b32.xlu2 %v3472_v46, %s8597_s6  ;;  %v3187_v54 = vmul.f32 %v3185_v0, %v7142_v32 }
 0x7f0   :  { %3392 = vrot.lane.b32.xlu0 %v3388_v43, %s8474_s4 }
 0x7f7   :  { %3218 = vrot.lane.b32.xlu1 %v3214_v50, %s8597_s6  ;;  %3134 = vrot.lane.b32.xlu2 %v3130_v16, %s8474_s4  ;;  %v3201_v50 = vmul.f32 %v3199_v40, %v7142_v32  ;;  %v3089_v16 = vmul.f32 %v3087_v19, %v7142_v32 }
 0x7f8   :  { %3106 = vrot.lane.b32.xlu0 %v3102_v35, %s8474_s4  ;;  %v3262_v35 = vmul.f32 %v3261_v56, %v7120_v36 }
 0x7ff   :  { %3310 = vrot.lane.b32.xlu2 %v3305_v2, %s8474_s4  ;;  %3038 = vrot.lane.b32.xlu1 %v3033_v15, %s8474_s4  ;;  %v3255_v2 = vstv %s7379_s27  ;;  %v2962_v15 = vstv %s7381_s30  ;;  %s8885_s27 = sld [smem:[#allocation176_spill]] }
 0x800   :  { %3246 = vrot.lane.b32.xlu0 %v3242_v38, %s8597_s6 }
 0x807   :  { %3378 = vrot.lane.b32.xlu2 %v3374_v3, %s8474_s4  ;;  %3422 = vrot.lane.b32.xlu1 %v3417_v49, %s8597_s6  ;;  %v3256_v49 = vmul.f32 %v3255_v2, %v7120_v36 }
 0x808   :  { %3150 = vrot.lane.b32.xlu0 %v3145_v17, %s8597_s6  ;;  %v3459_v17 = vmul.f32 %v3457_v21, %v7144_v47 }
 0x80f   :  { %3164 = vrot.lane.b32.xlu2 %v3159_v53, %s8597_s6  ;;  %3324 = vrot.lane.b32.xlu1 %v3319_v31, %s8474_s4  ;;  %v2992_v53 = vadd.f32 %v2990_v26, %v2962_v15  ;;  %v3473_v26 = vmul.f32 %v3471_v37, %v7144_v47  ;;  %v3019_v37 = vstv %s7484_s3 }
 0x810   :  { %3052 = vrot.lane.b32.xlu0 %v3047_v55, %s8474_s4 }
 0x811   :  { %v3149_v30 = vpop.permute.xlu2 %3148 }
 0x817   :  { %3066 = vrot.lane.b32.xlu2 %v3061_v10, %s8474_s4  ;;  %3406 = vrot.lane.b32.xlu1 %v3402_v23, %s8474_s4 }
 0x818   :  { %3490 = vrot.lane.b32.xlu0 %v3486_v57, %s8597_s6  ;;  %v3501_v57 = vmul.f32 %v3499_v51, %v7144_v47  ;;  %v3267_v51 = vstv %s7453_s21 }
 0x819   :  { %v3051_v34 = vpop.permute.xlu2 %3050 }
 0x81a   :  { %v3056_v46 = vadd.f32 %v3051_v34, %v2992_v53  ;;  %v3389_v34 = vmul.f32 %v3387_v14, %v7144_v47 }
 0x81f   :  { %3450 = vrot.lane.b32.xlu2 %v3445_v44, %s8597_s6  ;;  %3178 = vrot.lane.b32.xlu1 %v3173_v5, %s8597_s6  ;;  %v3229_v44 = vmul.f32 %v3227_v6, %v7142_v32 }
 0x820   :  { %3436 = vrot.lane.b32.xlu0 %v3431_v9, %s8597_s6 }
 0x821   :  { %v3435_v63 = vpop.permute.xlu2 %3434 }
 0x827   :  { %3352 = vrot.lane.b32.xlu2 %v3347_v1, %s8474_s4  ;;  %3080 = vrot.lane.b32.xlu1 %v3075_v28, %s8474_s4  ;;  %v3268_v28 = vmul.f32 %v3267_v51, %v7120_v36 }
 0x828   :  { %3338 = vrot.lane.b32.xlu0 %v3333_v48, %s8474_s4 }
 0x829   :  { %v3309_v4 = vpop.permute.xlu1 %3308  ;;  %v7400_v12 = vpop.permute.xlu2 %3336 }
 0x82a   :  { %v3037_v7 = vpop.permute.xlu0 %3036 }
 0x82b   :  { %v3042_v22 = vadd.f32 %v3037_v7, %v2986_v29  ;;  %v2968_v7 = vstv %s7474_s29 }
 0x82d   :  { %v3154_v60 = vadd.f32 %v3149_v30, %v3042_v22  ;;  %v2965_v30 = vstv %s7434_s23 }
 0x82e   :  { %v2998_v5 = vadd.f32 %v2996_v62, %v2965_v30  ;;  %v3487_v62 = vmul.f32 %v3485_v39, %v7144_v47 }
 0x82f   :  { %3122 = vrot.lane.b32.xlu2 %v3117_v25, %s8474_s4  ;;  %3464 = vrot.lane.b32.xlu1 %v3459_v17, %s8597_s6  ;;  %v3258_v42 = vadd.f32 %v3256_v49, %v3154_v60 }
 0x830   :  { %3192 = vrot.lane.b32.xlu0 %v3187_v54, %s8597_s6  ;;  %v3403_v54 = vmul.f32 %v3401_v58, %v7144_v47 }
 0x831   :  { %v3163_v21 = vpop.permute.xlu1 %3162  ;;  %v7430_v43 = vpop.permute.xlu2 %3190  ;;  %v3314_v55 = vadd.f32 %v3309_v4, %v3258_v42  ;;  %v3215_v4 = vmul.f32 %v3213_v18, %v7142_v32  ;;  %v2977_v42 = vstv %s7498_s22 }
 0x832   :  { %v3168_v31 = vadd.f32 %v3163_v21, %v3056_v46  ;;  %v3421_v0 = vpop.permute.xlu0 %3420 }
 0x833   :  { %v7432_v10 = vadd.f32 %v3421_v0, %v3314_v55  ;;  %v3007_v55 = vstv %s7510_s0 }
 0x834   :  { %v3264_v19 = vadd.f32 %v3262_v35, %v3168_v31  ;;  %v2971_v35 = vstv %s7519_s15 }
 0x837   :  { %3366 = vrot.lane.b32.xlu2 %v3361_v41, %s8474_s4  ;;  %3206 = vrot.lane.b32.xlu1 %v3201_v50, %s8597_s6  ;;  %v3513_v50 = vstv %s7517_s17 }
 0x838   :  { %3094 = vrot.lane.b32.xlu0 %v3089_v16, %s8474_s4  ;;  %v3008_v16 = vmul.f32 %v3007_v55, %v7118_v11 }
 0x839   :  { %v3065_v40 = vpop.permute.xlu1 %3064  ;;  %v7455_v33 = vpop.permute.xlu2 %3092 }
 0x83a   :  { %v3323_v38 = vpop.permute.xlu0 %3322  ;;  %v3070_v9 = vadd.f32 %v3065_v40, %v2998_v5 }
 0x83b   :  { %v3328_v3 = vadd.f32 %v3323_v38, %v3264_v19  ;;  %v3514_v38 = vmul.f32 %v3513_v50, %v7120_v36 }
 0x83d   :  { %v7463_v23 = vadd.f32 %v3435_v63, %v3328_v3  ;;  %v3001_v63 = vstv %s7457_s10 }
 0x83e   :  { %v3002_v29 = vmul.f32 %v3001_v63, %v7118_v11 }
 0x83f   :  { %3506 = vrot.lane.b32.xlu2 %v3501_v57, %s8597_s6  ;;  %3394 = vrot.lane.b32.xlu1 %v3389_v34, %s8474_s4  ;;  %v3010_v57 = vadd.f32 %v3008_v16, %v2971_v35 }
 0x840   :  { %3234 = vrot.lane.b32.xlu0 %v3229_v44, %s8597_s6  ;;  %v3004_v60 = vadd.f32 %v3002_v29, %v2968_v7  ;;  %v3279_v44 = vstv %s7542_s7 }
 0x841   :  { %v7482_v14 = vpop.permute.xlu1 %3448  ;;  %v3233_v1 = vpop.permute.xlu2 %3232  ;;  %v3098_v5 = vadd.f32 %v7455_v33, %v3010_v57 }
 0x842   :  { %v3177_v6 = vpop.permute.xlu0 %3176 }
 0x843   :  { %v3182_v8 = vadd.f32 %v3177_v6, %v3070_v9  ;;  %v3280_v6 = vmul.f32 %v3279_v44, %v7120_v36 }
 0x845   :  { %v3270_v48 = vadd.f32 %v3268_v28, %v3182_v8  ;;  %v3291_v28 = vstv %s7554_s28 }
 0x846   :  { %v3292_v33 = vmul.f32 %v3291_v28, %v7120_v36 }
 0x847   :  { %v7505_v22 = vadd.f32 %v7400_v12, %v3270_v48  ;;  %3220 = vrot.lane.b32.xlu2 %v3215_v4, %s8597_s6  ;;  %3108 = vrot.lane.b32.xlu1 %v7340_v59, %s8474_s4  ;;  %v3273_v12 = vstv %s7487_s11  ;;  %v3020_v59 = vmul.f32 %v3019_v37, %v7118_v11  ;;  %v3515_v48 = vmul.f32 %v3513_v50, %v7144_v47 }
 0x848   :  { %3478 = vrot.lane.b32.xlu0 %v3473_v26, %s8597_s6  ;;  %v3274_v46 = vmul.f32 %v3273_v12, %v7120_v36 }
 0x849   :  { %v3351_v18 = vpop.permute.xlu1 %3350  ;;  %v7524_v49 = vpop.permute.xlu2 %3476 }
 0x84a   :  { %v3079_v25 = vpop.permute.xlu0 %3078 }
 0x84b   :  { %v3084_v17 = vadd.f32 %v3079_v25, %v3004_v60  ;;  %v3013_v60 = vstv %s7568_s18 }
 0x84d   :  { %v3196_v53 = vadd.f32 %v7430_v43, %v3084_v17  ;;  %v3022_v43 = vadd.f32 %v3020_v59, %v2977_v42  ;;  %v3536_v17 = vld [vmem:[%s8882_s25 + $0x10] sm:$0xff]  ;;  %v3537_v59 = vld [vmem:[%s8882_s25 + $0x18] sm:$0xff] }
 0x84f   :  { %3408 = vrot.lane.b32.xlu2 %v3403_v54, %s8474_s4  ;;  %3248 = vrot.lane.b32.xlu1 %v7346_v61, %s8597_s6  ;;  %v3276_v21 = vadd.f32 %v3274_v46, %v3196_v53  ;;  %v3534_v53 = vld [vmem:[%s8882_s25] sm:$0xff]  ;;  %v3540_v54 = vpack.c.bf16 %v3537_v59, %v3536_v17  ;;  %v3535_v46 = vld [vmem:[%s8882_s25 + $0x8] sm:$0xff]  ;;  %v3257_v17 = vmul.f32 %v3255_v2, %v7144_v47 }
 0x850   :  { %3136 = vrot.lane.b32.xlu0 %v7343_v20, %s8474_s4  ;;  %v3538_v20 = vld [vmem:[%s8882_s25 + $0x20] sm:$0xf]  ;;  %s7629_s25 = sld [smem:[#allocation9 + $0x2d]] }
 0x851   :  { %v3121_v58 = vpop.permute.xlu1 %3120  ;;  %v3356_v31 = vadd.f32 %v3351_v18, %v3276_v21  ;;  %v3541_v19 = vpack.c.bf16 %v3538_v20, %v3538_v20  ;;  %v3135_v34 = vpop.permute.xlu2 %3134  ;;  %v3285_v20 = vstv %s7586_s12 }
 0x852   :  { %v3126_v0 = vadd.f32 %v3121_v58, %v3022_v43  ;;  %v3463_v41 = vpop.permute.xlu0 %3462  ;;  %v3014_v43 = vmul.f32 %v3013_v60, %v7118_v11  ;;  %v2974_v58 = vstv %s7575_s20  ;;  %v3286_v57 = vmul.f32 %v3285_v20, %v7120_v36 }
 0x853   :  { %v7548_v61 = vadd.f32 %v3463_v41, %v3356_v31  ;;  %v3573_v3 = vsel %vm3571_vm1, %v3541_v19, 0  ;;  %v3539_v31 = vpack.c.bf16 %v3535_v46, %v3534_v53  ;;  %v2991_v53 = vmul.f32 %v2989_v27, %v7142_v32 }
 0x854   :  { %v3238_v40 = vadd.f32 %v3233_v1, %v3126_v0  ;;  %3580 = vmatpush.bf16.msra.mxu2 %v3573_v3  ;;  %4205 = vmatpush.bf16.msrb.mxu3 %v3573_v3  ;;  %v3016_v50 = vadd.f32 %v3014_v43, %v2974_v58 }
 0x856   :  { %v3294_v26 = vadd.f32 %v3292_v33, %v3238_v40 }
 0x857   :  { %3518 = vrot.lane.b32.xlu2 %v3514_v38, %s8597_s6  ;;  %3492 = vrot.lane.b32.xlu1 %v3487_v62, %s8597_s6  ;;  %v2980_v62 = vstv %s7597_s16 }
 0x858   :  { %3380 = vrot.lane.b32.xlu0 %v7349_v45, %s8474_s4  ;;  %s7582_s4 = sld [smem:[#allocation9 + $0x2a]]  ;;  %3581 = vmatpush.bf16.msra.mxu2 %v3540_v54 }
 0x859   :  { %v3365_v9 = vpop.permute.xlu1 %3364  ;;  %v3311_v4 = vpop.permute.xlu2 %3310  ;;  %4206 = vmatpush.bf16.msrb.mxu3 %v3540_v54 }
 0x85a   :  { %v3205_v39 = vpop.permute.xlu0 %3204 }
 0x85b   :  { %v3210_v1 = vadd.f32 %v3205_v39, %v3098_v5 }
 0x85c   :  { %3582 = vmatpush.bf16.msra.mxu2 %v3539_v31 }
 0x85d   :  { %v3282_v8 = vadd.f32 %v3280_v6, %v3210_v1  ;;  %4207 = vmatpush.bf16.msrb.mxu3 %v3539_v31 }
 0x85e   :  { %v3025_v0 = vstv %s7582_s4 }
 0x85f   :  { %v7577_v45 = vadd.f32 %v3365_v9, %v3282_v8  ;;  %v3026_v40 = vmul.f32 %v3025_v0, %v7118_v11  ;;  %v2985_v11 = vmul.f32 %v2983_v52, %v7142_v32 }
 0x860   :  { %3520 = vrot.lane.b32.xlu0 %v3515_v48, %s8597_s6 }
 0x861   :  { %v3505_v29 = vpop.permute.xlu1 %3504  ;;  %v3379_v19 = vpop.permute.xlu2 %3378  ;;  %v3028_v5 = vadd.f32 %v3026_v40, %v2980_v62  ;;  %v3263_v40 = vmul.f32 %v3261_v56, %v7144_v47 }
 0x862   :  { %v3393_v18 = vpop.permute.xlu0 %3392 }
 0x863   :  { %v3398_v25 = vadd.f32 %v3393_v18, %v3294_v26  ;;  %v3140_v39 = vadd.f32 %v3135_v34, %v3028_v5 }
 0x865   :  { %v7602_v21 = vadd.f32 %v3505_v29, %v3398_v25  ;;  %v2987_v29 = vadd.f32 %v2985_v11, %v2959_v13  ;;  %v2993_v13 = vadd.f32 %v2991_v53, %v2962_v15 }
 0x869   :  { %v3219_v41 = vpop.permute.xlu1 %3218  ;;  %v3165_v33 = vpop.permute.xlu2 %3164 }
 0x86a   :  { %v3107_v16 = vpop.permute.xlu0 %3106 }
 0x86b   :  { %v3112_v38 = vadd.f32 %v3107_v16, %v3016_v50  ;;  %v3297_v50 = vstv %s7629_s25 }
 0x86c   :  { %v3298_v27 = vmul.f32 %v3297_v50, %v7120_v36 }
 0x86d   :  { %v3224_v3 = vadd.f32 %v3219_v41, %v3112_v38 }
 0x86f   :  { %v3288_v9 = vadd.f32 %v3286_v57, %v3224_v3  ;;  %v2997_v3 = vmul.f32 %v2995_v24, %v7142_v32 }
 0x871   :  { %v3039_v6 = vpop.permute.xlu1 %3038  ;;  %v3384_v1 = vadd.f32 %v3379_v19, %v3288_v9  ;;  %v3067_v52 = vpop.permute.xlu2 %3066  ;;  %v2999_v56 = vadd.f32 %v2997_v3, %v2965_v30 }
 0x872   :  { %v3247_v8 = vpop.permute.xlu0 %3246  ;;  %v3043_v26 = vadd.f32 %v3039_v6, %v2987_v29 }
 0x873   :  { %v3252_v48 = vadd.f32 %v3247_v8, %v3140_v39  ;;  %v3071_v9 = vadd.f32 %v3067_v52, %v2999_v56 }
 0x875   :  { %v3300_v15 = vadd.f32 %v3298_v27, %v3252_v48  ;;  %v3269_v48 = vmul.f32 %v3267_v51, %v7144_v47  ;;  %v3454_v51 = vadd.f32 %v7482_v14, %v7505_v22 }
 0x879   :  { %v3423_v18 = vpop.permute.xlu1 %3422  ;;  %v3451_v19 = vpop.permute.xlu2 %3450 }
 0x87a   :  { %v3151_v25 = vpop.permute.xlu0 %3150 }
 0x87b   :  { %v3155_v59 = vadd.f32 %v3151_v25, %v3043_v26 }
 0x87d   :  { %v3259_v34 = vadd.f32 %v3257_v17, %v3155_v59 }
 0x87f   :  { %v3315_v54 = vadd.f32 %v3311_v4, %v3259_v34 }
 0x881   :  { %v3427_v46 = vadd.f32 %v3423_v18, %v3315_v54  ;;  %v3325_v43 = vpop.permute.xlu1 %3324  ;;  %v3353_v11 = vpop.permute.xlu2 %3352  ;;  %v3003_v18 = vmul.f32 %v3001_v63, %v7142_v32  ;;  %v3275_v54 = vmul.f32 %v3273_v12, %v7144_v47  ;;  %v3021_v12 = vmul.f32 %v3019_v37, %v7142_v32 }
 0x882   :  { %v3053_v31 = vpop.permute.xlu0 %3052  ;;  %v3015_v37 = vmul.f32 %v3013_v60, %v7142_v32  ;;  %v3482_v60 = vadd.f32 %v7524_v49, %v7577_v45  ;;  %v3299_v49 = vmul.f32 %v3297_v50, %v7144_v47 }
 0x883   :  { %v3526_v2 = vpack.c.bf16 %v3427_v46, %v7432_v10  ;;  %v3057_v41 = vadd.f32 %v3053_v31, %v2993_v13  ;;  %v3005_v59 = vadd.f32 %v3003_v18, %v2968_v7  ;;  %v3009_v13 = vmul.f32 %v3007_v55, %v7142_v32 }
 0x884   :  { %v3281_v55 = vmul.f32 %v3279_v44, %v7144_v47  ;;  %v3023_v27 = vadd.f32 %v3021_v12, %v2977_v42  ;;  %v3017_v42 = vadd.f32 %v3015_v37, %v2974_v58  ;;  %v3027_v58 = vmul.f32 %v3025_v0, %v7142_v32 }
 0x885   :  { %v3169_v16 = vadd.f32 %v3165_v33, %v3057_v41  ;;  %4193 = vmatmul.msk.bf16.vlgmr.msra.gmra.mxu2 %vm3546_vm2, %v3526_v2  ;;  %v3011_v7 = vadd.f32 %v3009_v13, %v2971_v35 }
 0x887   :  { %v3265_v4 = vadd.f32 %v3263_v40, %v3169_v16 }
 0x889   :  { %v3407_v38 = vpop.permute.xlu1 %3406  ;;  %v3329_v39 = vadd.f32 %v3325_v43, %v3265_v4  ;;  %v3123_v25 = vpop.permute.xlu2 %3122 }
 0x88a   :  { %v3491_v10 = vpop.permute.xlu0 %3490  ;;  %v7648_v57 = vadd.f32 %v3407_v38, %v3300_v15  ;;  %v3127_v15 = vadd.f32 %v3123_v25, %v3023_v27 }
 0x88b   :  { %v7650_v5 = vadd.f32 %v3491_v10, %v3384_v1  ;;  %v3293_v10 = vmul.f32 %v3291_v28, %v7144_v47 }
 0x891   :  { %v3179_v6 = vpop.permute.xlu1 %3178  ;;  %v3367_v43 = vpop.permute.xlu2 %3366 }
 0x892   :  { %v3437_v36 = vpop.permute.xlu0 %3436  ;;  %v3183_v8 = vadd.f32 %v3179_v6, %v3071_v9 }
 0x893   :  { %v3441_v33 = vadd.f32 %v3437_v36, %v3329_v39 }
 0x894   :  { %v3271_v24 = vadd.f32 %v3269_v48, %v3183_v8 }
 0x895   :  { %v3527_v29 = vpack.c.bf16 %v3441_v33, %v7463_v23  ;;  %v3287_v33 = vmul.f32 %v3285_v20, %v7144_v47  ;;  %v4223_v47 = vld [vmem:[%s8885_s27] ss:$0 sm:$0xff] }
 0x897   :  { %4194 = vmatmul.msk.bf16.gmra.mxu2 %vm3546_vm2, %v3527_v29 }
 0x899   :  { %v3081_v1 = vpop.permute.xlu1 %3080 }
 0x89a   :  { %v3339_v30 = vpop.permute.xlu0 %3338  ;;  %v3085_v23 = vadd.f32 %v3081_v1, %v3005_v59  ;;  %v3029_v1 = vadd.f32 %v3027_v58, %v2980_v62 }
 0x89b   :  { %v3343_v26 = vadd.f32 %v3339_v30, %v3271_v24 }
 0x89d   :  { %v3455_v17 = vadd.f32 %v3451_v19, %v3343_v26  ;;  %v3507_v19 = vpop.permute.xlu2 %3506 }
 0x89f   :  { %v3528_v34 = vpack.c.bf16 %v3455_v17, %v3454_v51 }
 0x8a1   :  { %v3465_v53 = vpop.permute.xlu1 %3464 }
 0x8a2   :  { %v3193_v52 = vpop.permute.xlu0 %3192 }
 0x8a3   :  { %v3197_v46 = vadd.f32 %v3193_v52, %v3085_v23 }
 0x8a5   :  { %v3277_v63 = vadd.f32 %v3275_v54, %v3197_v46  ;;  %v3221_v8 = vpop.permute.xlu2 %3220 }
 0x8a7   :  { %v3357_v31 = vadd.f32 %v3353_v11, %v3277_v63  ;;  %4195 = vmatmul.msk.bf16.gmra.mxu2 %vm3546_vm2, %v3528_v34 }
 0x8a9   :  { %v3469_v14 = vadd.f32 %v3465_v53, %v3357_v31  ;;  %v3207_v22 = vpop.permute.xlu1 %3206 }
 0x8aa   :  { %v3095_v2 = vpop.permute.xlu0 %3094 }
 0x8ab   :  { %v3529_v41 = vpack.c.bf16 %v3469_v14, %v7548_v61  ;;  %v3099_v16 = vadd.f32 %v3095_v2, %v3011_v7 }
 0x8ad   :  { %v3211_v40 = vadd.f32 %v3207_v22, %v3099_v16  ;;  %v3409_v18 = vpop.permute.xlu2 %3408 }
 0x8af   :  { %v3283_v4 = vadd.f32 %v3281_v55, %v3211_v40 }
 0x8b1   :  { %v3395_v35 = vpop.permute.xlu1 %3394  ;;  %v3371_v9 = vadd.f32 %v3367_v43, %v3283_v4 }
 0x8b2   :  { %v3235_v38 = vpop.permute.xlu0 %3234 }
 0x8b3   :  { %v3239_v3 = vadd.f32 %v3235_v38, %v3127_v15 }
 0x8b5   :  { %v3295_v61 = vadd.f32 %v3293_v10, %v3239_v3  ;;  %v3519_v0 = vpop.permute.xlu2 %3518 }
 0x8b6   :  { %v3524_v23 = vadd.f32 %v3519_v0, %v7648_v57 }
 0x8b7   :  { %v3399_v56 = vadd.f32 %v3395_v35, %v3295_v61  ;;  %4196 = vmatmul.msk.bf16.gmra.mxu2 %vm3546_vm2, %v3529_v41 }
 0x8b9   :  { %v3511_v44 = vadd.f32 %v3507_v19, %v3399_v56  ;;  %v3109_v39 = vpop.permute.xlu1 %3108 }
 0x8ba   :  { %v3479_v6 = vpop.permute.xlu0 %3478  ;;  %v3113_v36 = vadd.f32 %v3109_v39, %v3017_v42 }
 0x8bb   :  { %v3532_v28 = vpack.c.bf16 %v3511_v44, %v7602_v21  ;;  %v3483_v48 = vadd.f32 %v3479_v6, %v3371_v9  ;;  %v8886_v6 = vld [vmem:[#allocation16_spill] sm:$0xff] }
 0x8bc   :  { %v3225_v11 = vadd.f32 %v3221_v8, %v3113_v36 }
 0x8bd   :  { %v3530_v24 = vpack.c.bf16 %v3483_v48, %v3482_v60  ;;  %4199 = vmatmul.msk.bf16.vlgmr.msrb.gmra.mxu3 %vm3546_vm2, %v3532_v28 }
 0x8be   :  { %v3289_v29 = vadd.f32 %v3287_v33, %v3225_v11 }
 0x8c1   :  { %v3249_v26 = vpop.permute.xlu1 %3248 }
 0x8c2   :  { %v3137_v30 = vpop.permute.xlu0 %3136 }
 0x8c3   :  { %v3141_v21 = vadd.f32 %v3137_v30, %v3029_v1 }
 0x8c5   :  { %v3253_v45 = vadd.f32 %v3249_v26, %v3141_v21 }
 0x8c7   :  { %v3301_v25 = vadd.f32 %v3299_v49, %v3253_v45  ;;  %4197 = vmatmul.msk.bf16.gmra.mxu2 %vm3546_vm2, %v3530_v24 }
 0x8c9   :  { %v3493_v51 = vpop.permute.xlu1 %3492  ;;  %v3413_v34 = vadd.f32 %v3409_v18, %v3301_v25 }
 0x8ca   :  { %v3381_v20 = vpop.permute.xlu0 %3380 }
 0x8cb   :  { %v3385_v17 = vadd.f32 %v3381_v20, %v3289_v29 }
 0x8cd   :  { %v3497_v59 = vadd.f32 %v3493_v51, %v3385_v17 }
 0x8cf   :  { %v3531_v32 = vpack.c.bf16 %v3497_v59, %v7650_v5 }
 0x8d2   :  { %v3521_v62 = vpop.permute.xlu0 %3520 }
 0x8d3   :  { %v3525_v53 = vadd.f32 %v3521_v62, %v3413_v34 }
 0x8d5   :  { %v3533_v52 = vpack.c.bf16 %v3525_v53, %v3524_v23 }
 0x8d7   :  { %4198 = vmatmul.msk.bf16.gmra.mxu2 %vm3546_vm2, %v3531_v32  ;;  %4200 = vmatmul.msk.bf16.gmra.mxu3 %vm3546_vm2, %v3533_v52 }
 0x908   :  { %v3584_v50 = vpop.f32.mrf.mxu2 }
 0x909   :  { %v3585_v54 = vadd.f32 %v4223_v47, %v3584_v50 }
 0x90b   :  { %3624 = vmax.xlane.f32.xlu1 %v3585_v54 }
 0x910   :  { %v3586_v46 = vpop.f32.mrf.mxu2 }
 0x911   :  { %v3587_v5 = vadd.f32 %v4223_v47, %v3586_v46 }
 0x913   :  { %3626 = vmax.xlane.f32.xlu2 %v3587_v5 }
 0x91a   :  { %v3589_v63 = vpop.f32.mrf.mxu2 }
 0x91b   :  { %v3590_v13 = vadd.f32 %v4223_v47, %v3589_v63 }
 0x91d   :  { %3628 = vmax.xlane.f32.xlu0 %v3590_v13 }
 0x922   :  { %v3591_v57 = vpop.f32.mrf.mxu2 }
 0x923   :  { %v3592_v41 = vadd.f32 %v4223_v47, %v3591_v57 }
 0x92a   :  { %v3594_v43 = vpop.f32.mrf.mxu2 }
 0x92b   :  { %v3595_v40 = vadd.f32 %v4223_v47, %v3594_v43 }
 0x932   :  { %v3596_v31 = vpop.f32.mrf.mxu2 }
 0x933   :  { %v7730_v61 = vadd.f32 %v4223_v47, %v3596_v31 }
 0x93a   :  { %v3599_v14 = vpop.f32.mrf.mxu2 }
 0x93b   :  { %v3600_v27 = vadd.f32 %v4223_v47, %v3599_v14 }
 0x940   :  { %v3614_v7 = vpop.f32.mrf.mxu3 }
 0x941   :  { %v3615_v22 = vadd.f32 %v4223_v47, %v3614_v7 }
 0x942   :  { %v3601_v2 = vpop.f32.mrf.mxu2 }
 0x943   :  { %3648 = vmax.xlane.f32.xlu1 %v3615_v22  ;;  %v7719_v15 = vadd.f32 %v4223_v47, %v3601_v2 }
 0x948   :  { %v3616_v12 = vpop.f32.mrf.mxu3 }
 0x949   :  { %v7716_v16 = vadd.f32 %v4223_v47, %v3616_v12 }
 0x94a   :  { %v3604_v55 = vpop.f32.mrf.mxu2 }
 0x94b   :  { %3650 = vmax.xlane.f32.xlu2 %v7716_v16  ;;  %3630 = vmax.xlane.f32.xlu1 %v3592_v41  ;;  %v7737_v42 = vadd.f32 %v4223_v47, %v3604_v55 }
 0x952   :  { %v3606_v4 = vpop.f32.mrf.mxu2 }
 0x953   :  { %3632 = vmax.xlane.f32.xlu2 %v3595_v40  ;;  %3636 = vmax.xlane.f32.xlu1 %v3600_v27  ;;  %v7721_v19 = vadd.f32 %v4223_v47, %v3606_v4 }
 0x95a   :  { %v3619_v35 = vpop.f32.mrf.mxu3  ;;  %v3609_v3 = vpop.f32.mrf.mxu2 }
 0x95b   :  { %v7723_v38 = vadd.f32 %v4223_v47, %v3619_v35  ;;  %3638 = vmax.xlane.f32.xlu2 %v7719_v15  ;;  %3642 = vmax.xlane.f32.xlu1 %v7721_v19  ;;  %v7728_v10 = vadd.f32 %v4223_v47, %v3609_v3 }
 0x95d   :  { %3652 = vmax.xlane.f32.xlu0 %v7723_v38 }
 0x962   :  { %v3621_v37 = vpop.f32.mrf.mxu3  ;;  %v3611_v44 = vpop.f32.mrf.mxu2 }
 0x963   :  { %v7732_v56 = vadd.f32 %v4223_v47, %v3621_v37  ;;  %3644 = vmax.xlane.f32.xlu2 %v7728_v10  ;;  %v7740_v9 = vadd.f32 %v4223_v47, %v3611_v44 }
 0x965   :  { %3634 = vmax.xlane.f32.xlu0 %v7730_v61  ;;  %3654 = vmax.xlane.f32.xlu1 %v7732_v56 }
 0x96d   :  { %3640 = vmax.xlane.f32.xlu0 %v7737_v42 }
 0x975   :  { %3646 = vmax.xlane.f32.xlu0 %v7740_v9 }
 0x97e   :  { %v3625_v39 = vpop.xlane.xlu1 %3624 }
 0x97f   :  { %vm3656_vm3 = vcmp.ge.f32.partialorder %v3585_v54, %v3625_v39 }
 0x980   :  { %v7744_v36 = vsel %vm3656_vm3, %v8886_v6, 128 }
 0x981   :  { %v3689_v8 = vshra.s32 %v7744_v36, 16 }
 0x983   :  { %v7747_v28 = vcvt.s32.f32 %v3689_v8 }
 0x985   :  { %3692 = vmin.xlane.f32.xlu2 %v7747_v28 }
 0x986   :  { %v3627_v60 = vpop.xlane.xlu2 %3626 }
 0x987   :  { %vm3657_vm4 = vcmp.ge.f32.partialorder %v3587_v5, %v3627_v60  ;;  %v3688_v60 = vand.u32 65535, %v7744_v36 }
 0x988   :  { %v7751_v48 = vsel %vm3657_vm4, %v8886_v6, 128 }
 0x989   :  { %v3703_v11 = vshra.s32 %v7751_v48, 16 }
 0x98b   :  { %v7754_v33 = vcvt.s32.f32 %v3703_v11 }
 0x98d   :  { %3706 = vmin.xlane.f32.xlu1 %v7754_v33 }
 0x990   :  { %v3629_v24 = vpop.xlane.xlu0 %3628 }
 0x991   :  { %vm3658_vm5 = vcmp.ge.f32.partialorder %v3590_v13, %v3629_v24 }
 0x992   :  { %v7758_v58 = vsel %vm3658_vm5, %v8886_v6, 128 }
 0x993   :  { %v3717_v29 = vshra.s32 %v7758_v58, 16 }
 0x995   :  { %v7761_v1 = vcvt.s32.f32 %v3717_v29 }
 0x997   :  { %3720 = vmin.xlane.f32.xlu2 %v7761_v1 }
 0x9b6   :  { %v3649_v30 = vpop.xlane.xlu1 %3648 }
 0x9b7   :  { %vm3668_vm6 = vcmp.ge.f32.partialorder %v3615_v22, %v3649_v30 }
 0x9b8   :  { %v7765_v26 = vsel %vm3668_vm6, %v8886_v6, 128 }
 0x9b9   :  { %v3857_v21 = vshra.s32 %v7765_v26, 16 }
 0x9bb   :  { %v7768_v49 = vcvt.s32.f32 %v3857_v21  ;;  %v3716_v21 = vand.u32 65535, %v7758_v58 }
 0x9bd   :  { %3860 = vmin.xlane.f32.xlu0 %v7768_v49 }
 0x9be   :  { %v3651_v45 = vpop.xlane.xlu2 %3650  ;;  %v3631_v18 = vpop.xlane.xlu1 %3630 }
 0x9bf   :  { %vm3659_vm7 = vcmp.ge.f32.partialorder %v3592_v41, %v3631_v18  ;;  %vm3669_vm13 = vcmp.ge.f32.partialorder %v7716_v16, %v3651_v45  ;;  %v3718_v45 = vcvt.s32.f32 %v3716_v21 }
 0x9c0   :  { %v7772_v25 = vsel %vm3659_vm7, %v8886_v6, 128 }
 0x9c1   :  { %v3731_v20 = vshra.s32 %v7772_v25, 16  ;;  %v3730_v58 = vand.u32 65535, %v7772_v25 }
 0x9c3   :  { %v7775_v17 = vcvt.s32.f32 %v3731_v20 }
 0x9c5   :  { %3734 = vmin.xlane.f32.xlu0 %v7775_v17 }
 0x9c6   :  { %v3633_v51 = vpop.xlane.xlu2 %3632  ;;  %v3637_v59 = vpop.xlane.xlu1 %3636 }
 0x9c7   :  { %vm3660_vm8 = vcmp.ge.f32.partialorder %v3595_v40, %v3633_v51  ;;  %vm3662_vm9 = vcmp.ge.f32.partialorder %v3600_v27, %v3637_v59  ;;  %v7826_v40 = vsel %vm3669_vm13, %v8886_v6, 128  ;;  %v3732_v59 = vcvt.s32.f32 %v3730_v58 }
 0x9c8   :  { %v7779_v32 = vsel %vm3660_vm8, %v8886_v6, 128  ;;  %v7782_v0 = vsel %vm3662_vm9, %v8886_v6, 128 }
 0x9c9   :  { %v3745_v34 = vshra.s32 %v7779_v32, 16  ;;  %v3773_v62 = vshra.s32 %v7782_v0, 16 }
 0x9cb   :  { %v7786_v23 = vcvt.s32.f32 %v3745_v34  ;;  %v7788_v53 = vcvt.s32.f32 %v3773_v62  ;;  %v3772_v62 = vand.u32 65535, %v7782_v0 }
 0x9cd   :  { %3748 = vmin.xlane.f32.xlu1 %v7786_v23  ;;  %3776 = vmin.xlane.f32.xlu0 %v7788_v53 }
 0x9ce   :  { %v3639_v52 = vpop.xlane.xlu2 %3638  ;;  %v3643_v47 = vpop.xlane.xlu1 %3642 }
 0x9cf   :  { %vm3663_vm10 = vcmp.ge.f32.partialorder %v7719_v15, %v3639_v52  ;;  %vm3665_vm11 = vcmp.ge.f32.partialorder %v7721_v19, %v3643_v47  ;;  %v3871_v15 = vshra.s32 %v7826_v40, 16  ;;  %v3774_v47 = vcvt.s32.f32 %v3772_v62 }
 0x9d0   :  { %v7795_v50 = vsel %vm3663_vm10, %v8886_v6, 128  ;;  %v7798_v54 = vsel %vm3665_vm11, %v8886_v6, 128  ;;  %v3653_v46 = vpop.xlane.xlu0 %3652 }
 0x9d1   :  { %v3787_v5 = vshra.s32 %v7795_v50, 16  ;;  %v3815_v63 = vshra.s32 %v7798_v54, 16  ;;  %v7841_v3 = vcvt.s32.f32 %v3871_v15  ;;  %vm3670_vm2 = vcmp.ge.f32.partialorder %v7723_v38, %v3653_v46 }
 0x9d2   :  { %v7857_v39 = vsel %vm3670_vm2, %v8886_v6, 128  ;;  %v3814_v0 = vand.u32 65535, %v7798_v54 }
 0x9d3   :  { %v7802_v13 = vcvt.s32.f32 %v3787_v5  ;;  %v7804_v57 = vcvt.s32.f32 %v3815_v63  ;;  %v3885_v8 = vshra.s32 %v7857_v39, 16 }
 0x9d4   :  { %v3816_v63 = vcvt.s32.f32 %v3814_v0 }
 0x9d5   :  { %3790 = vmin.xlane.f32.xlu1 %v7802_v13  ;;  %3818 = vmin.xlane.f32.xlu0 %v7804_v57  ;;  %v7862_v11 = vcvt.s32.f32 %v3885_v8 }
 0x9d6   :  { %v3645_v43 = vpop.xlane.xlu2 %3644 }
 0x9d7   :  { %vm3666_vm12 = vcmp.ge.f32.partialorder %v7728_v10, %v3645_v43 }
 0x9d8   :  { %v7810_v31 = vsel %vm3666_vm12, %v8886_v6, 128  ;;  %v3635_v14 = vpop.xlane.xlu0 %3634  ;;  %v3655_v7 = vpop.xlane.xlu1 %3654 }
 0x9d9   :  { %v3829_v22 = vshra.s32 %v7810_v31, 16  ;;  %vm3661_vm14 = vcmp.ge.f32.partialorder %v7730_v61, %v3635_v14  ;;  %vm3671_vm15 = vcmp.ge.f32.partialorder %v7732_v56, %v3655_v7 }
 0x9da   :  { %v7817_v2 = vsel %vm3661_vm14, %v8886_v6, 128  ;;  %v7820_v12 = vsel %vm3671_vm15, %v8886_v6, 128 }
 0x9db   :  { %v7822_v41 = vcvt.s32.f32 %v3829_v22  ;;  %v3759_v55 = vshra.s32 %v7817_v2, 16  ;;  %v3899_v16 = vshra.s32 %v7820_v12, 16  ;;  %v3758_v54 = vand.u32 65535, %v7817_v2 }
 0x9dc   :  { %v3898_v7 = vand.u32 65535, %v7820_v12 }
 0x9dd   :  { %v7829_v27 = vcvt.s32.f32 %v3759_v55  ;;  %3832 = vmin.xlane.f32.xlu1 %v7822_v41  ;;  %v7832_v4 = vcvt.s32.f32 %v3899_v16 }
 0x9de   :  { %v3900_v15 = vcvt.s32.f32 %v3898_v7 }
 0x9df   :  { %3762 = vmin.xlane.f32.xlu2 %v7829_v27  ;;  %3902 = vmin.xlane.f32.xlu0 %v7832_v4 }
 0x9e0   :  { %v3641_v19 = vpop.xlane.xlu0 %3640 }
 0x9e1   :  { %vm3664_vm0 = vcmp.ge.f32.partialorder %v7737_v42, %v3641_v19 }
 0x9e2   :  { %v7839_v35 = vsel %vm3664_vm0, %v8886_v6, 128 }
 0x9e3   :  { %v3801_v10 = vshra.s32 %v7839_v35, 16 }
 0x9e5   :  { %v7844_v37 = vcvt.s32.f32 %v3801_v10  ;;  %3874 = vmin.xlane.f32.xlu1 %v7841_v3 }
 0x9e7   :  { %3804 = vmin.xlane.f32.xlu2 %v7844_v37 }
 0x9e8   :  { %v3647_v61 = vpop.xlane.xlu0 %3646 }
 0x9e9   :  { %vm3667_vm1 = vcmp.ge.f32.partialorder %v7740_v9, %v3647_v61  ;;  %v3690_v9 = vcvt.s32.f32 %v3688_v60 }
 0x9ea   :  { %v7850_v56 = vsel %vm3667_vm1, %v8886_v6, 128  ;;  %v3702_v6 = vand.u32 65535, %v7751_v48  ;;  %v3856_v48 = vand.u32 65535, %v7765_v26  ;;  %v3744_v26 = vand.u32 65535, %v7779_v32 }
 0x9eb   :  { %v3843_v42 = vshra.s32 %v7850_v56, 16  ;;  %v3786_v32 = vand.u32 65535, %v7795_v50  ;;  %v3828_v50 = vand.u32 65535, %v7810_v31  ;;  %v3870_v31 = vand.u32 65535, %v7826_v40 }
 0x9ec   :  { %v3704_v29 = vcvt.s32.f32 %v3702_v6  ;;  %v3858_v20 = vcvt.s32.f32 %v3856_v48  ;;  %v3746_v52 = vcvt.s32.f32 %v3744_v26 }
 0x9ed   :  { %v7854_v44 = vcvt.s32.f32 %v3843_v42  ;;  %v3788_v5 = vcvt.s32.f32 %v3786_v32  ;;  %v3830_v22 = vcvt.s32.f32 %v3828_v50  ;;  %v3872_v10 = vcvt.s32.f32 %v3870_v31 }
 0x9ef   :  { %3846 = vmin.xlane.f32.xlu2 %v7854_v44 }
 0x9f7   :  { %3888 = vmin.xlane.f32.xlu2 %v7862_v11 }
 0x9f8   :  { %v7865_v24 = vpop.xlane.xlu2 %3692 }
 0x9f9   :  { %vm3694_vm3 = vcmp.eq.f32.partialorder %v7747_v28, %v7865_v24 }
 0x9fa   :  { %v3695_v38 = vsel %vm3694_vm3, %v3690_v9, inf  ;;  %vm3928_vm3 = vcmask 7168  }
 0x9fb   :  { %3696 = vmin.xlane.f32.xlu0 %v3695_v38 }
 0xa00   :  { %v7870_v30 = vpop.xlane.xlu1 %3706 }
 0xa01   :  { %vm3708_vm4 = vcmp.eq.f32.partialorder %v7754_v33, %v7870_v30 }
 0xa02   :  { %v3709_v36 = vsel %vm3708_vm4, %v3704_v29, inf }
 0xa03   :  { %3710 = vmin.xlane.f32.xlu1 %v3709_v36 }
 0xa0a   :  { %v7875_v18 = vpop.xlane.xlu2 %3720 }
 0xa0b   :  { %vm3722_vm5 = vcmp.eq.f32.partialorder %v7761_v1, %v7875_v18 }
 0xa0c   :  { %v3723_v28 = vsel %vm3722_vm5, %v3718_v45, inf }
 0xa0d   :  { %3724 = vmin.xlane.f32.xlu2 %v3723_v28 }
 0xa30   :  { %v7880_v51 = vpop.xlane.xlu0 %3860 }
 0xa31   :  { %vm3862_vm6 = vcmp.eq.f32.partialorder %v7768_v49, %v7880_v51  ;;  %v3867_v62 = vcvt.f32.s32 %v7880_v51 }
 0xa32   :  { %v3863_v33 = vsel %vm3862_vm6, %v3858_v20, inf }
 0xa33   :  { %3864 = vmin.xlane.f32.xlu0 %v3863_v33  ;;  %v3727_v33 = vcvt.f32.s32 %v7875_v18 }
 0xa38   :  { %v7885_v34 = vpop.xlane.xlu0 %3734 }
 0xa39   :  { %vm3736_vm7 = vcmp.eq.f32.partialorder %v7775_v17, %v7885_v34 }
 0xa3a   :  { %v3737_v1 = vsel %vm3736_vm7, %v3732_v59, inf }
 0xa3b   :  { %3738 = vmin.xlane.f32.xlu0 %v3737_v1 }
 0xa40   :  { %v7891_v46 = vpop.xlane.xlu0 %3776  ;;  %v7893_v49 = vpop.xlane.xlu1 %3748 }
 0xa41   :  { %vm3778_vm8 = vcmp.eq.f32.partialorder %v7788_v53, %v7891_v46  ;;  %vm3750_vm9 = vcmp.eq.f32.partialorder %v7786_v23, %v7893_v49  ;;  %v3755_v51 = vcvt.f32.s32 %v7893_v49 }
 0xa42   :  { %v3779_v25 = vsel %vm3778_vm8, %v3774_v47, inf  ;;  %v3751_v17 = vsel %vm3750_vm9, %v3746_v52, inf  ;;  %v3868_v47 = vshll.u32 %v3867_v62, 16 }
 0xa43   :  { %3780 = vmin.xlane.f32.xlu0 %v3779_v25  ;;  %3752 = vmin.xlane.f32.xlu1 %v3751_v17  ;;  %v3741_v17 = vcvt.f32.s32 %v7885_v34 }
 0xa48   :  { %v7901_v43 = vpop.xlane.xlu0 %3818  ;;  %v7903_v14 = vpop.xlane.xlu1 %3790 }
 0xa49   :  { %vm3820_vm10 = vcmp.eq.f32.partialorder %v7804_v57, %v7901_v43  ;;  %vm3792_vm11 = vcmp.eq.f32.partialorder %v7802_v13, %v7903_v14  ;;  %v3760_v57 = vcvt.s32.f32 %v3758_v54 }
 0xa4a   :  { %v3821_v23 = vsel %vm3820_vm10, %v3816_v63, inf  ;;  %v3793_v53 = vsel %vm3792_vm11, %v3788_v5, inf  ;;  %v3742_v5 = vshll.u32 %v3741_v17, 16 }
 0xa4b   :  { %3822 = vmin.xlane.f32.xlu0 %v3821_v23  ;;  %3794 = vmin.xlane.f32.xlu1 %v3793_v53  ;;  %v3783_v53 = vcvt.f32.s32 %v7891_v46  ;;  %v3797_v46 = vcvt.f32.s32 %v7903_v14 }
 0xa4d   :  { %v3784_v7 = vshll.u32 %v3783_v53, 16 }
 0xa50   :  { %v7912_v55 = vpop.xlane.xlu1 %3832 }
 0xa51   :  { %vm3834_vm12 = vcmp.eq.f32.partialorder %v7822_v41, %v7912_v55  ;;  %v3800_v41 = vand.u32 65535, %v7839_v35 }
 0xa52   :  { %v7916_v16 = vpop.xlane.xlu2 %3762  ;;  %v3835_v13 = vsel %vm3834_vm12, %v3830_v22, inf  ;;  %v7920_v19 = vpop.xlane.xlu0 %3902  ;;  %v3756_v22 = vshll.u32 %v3755_v51, 16 }
 0xa53   :  { %vm3764_vm13 = vcmp.eq.f32.partialorder %v7829_v27, %v7916_v16  ;;  %3836 = vmin.xlane.f32.xlu1 %v3835_v13  ;;  %vm3904_vm14 = vcmp.eq.f32.partialorder %v7832_v4, %v7920_v19  ;;  %v3802_v27 = vcvt.s32.f32 %v3800_v41  ;;  %v3842_v4 = vand.u32 65535, %v7850_v56 }
 0xa54   :  { %v3765_v2 = vsel %vm3764_vm13, %v3760_v57, inf  ;;  %v3905_v12 = vsel %vm3904_vm14, %v3900_v15, inf }
 0xa55   :  { %3766 = vmin.xlane.f32.xlu2 %v3765_v2  ;;  %3906 = vmin.xlane.f32.xlu0 %v3905_v12  ;;  %v3844_v35 = vcvt.s32.f32 %v3842_v4  ;;  %v3825_v2 = vcvt.f32.s32 %v7901_v43 }
 0xa58   :  { %v7926_v61 = vpop.xlane.xlu1 %3874 }
 0xa59   :  { %vm3876_vm15 = vcmp.eq.f32.partialorder %v7841_v3, %v7926_v61  ;;  %v3884_v3 = vand.u32 65535, %v7857_v39 }
 0xa5a   :  { %v7930_v42 = vpop.xlane.xlu2 %3804  ;;  %v3877_v8 = vsel %vm3876_vm15, %v3872_v10, inf }
 0xa5b   :  { %vm3806_vm0 = vcmp.eq.f32.partialorder %v7844_v37, %v7930_v42  ;;  %3878 = vmin.xlane.f32.xlu1 %v3877_v8  ;;  %v3886_v38 = vcvt.s32.f32 %v3884_v3  ;;  %v3699_v37 = vcvt.f32.s32 %v7865_v24  ;;  %v3798_v8 = vshll.u32 %v3797_v46, 16 }
 0xa5c   :  { %v3807_v40 = vsel %vm3806_vm0, %v3802_v27, inf  ;;  %v3826_v27 = vshll.u32 %v3825_v2, 16 }
 0xa5d   :  { %3808 = vmin.xlane.f32.xlu2 %v3807_v40  ;;  %v3700_v36 = vshll.u32 %v3699_v37, 16  ;;  %v3909_v37 = vcvt.f32.s32 %v7920_v19 }
 0xa62   :  { %v7935_v60 = vpop.xlane.xlu2 %3846 }
 0xa63   :  { %vm3848_vm1 = vcmp.eq.f32.partialorder %v7854_v44, %v7935_v60  ;;  %v3713_v44 = vcvt.f32.s32 %v7870_v30  ;;  %v3728_v30 = vshll.u32 %v3727_v33, 16 }
 0xa64   :  { %v3849_v9 = vsel %vm3848_vm1, %v3844_v35, inf  ;;  %v3839_v35 = vcvt.f32.s32 %v7912_v55 }
 0xa65   :  { %3850 = vmin.xlane.f32.xlu2 %v3849_v9  ;;  %v3714_v24 = vshll.u32 %v3713_v44, 16 }
 0xa6a   :  { %v7940_v6 = vpop.xlane.xlu2 %3888 }
 0xa6b   :  { %vm3890_vm2 = vcmp.eq.f32.partialorder %v7862_v11, %v7940_v6 }
 0xa6c   :  { %v3891_v29 = vsel %vm3890_vm2, %v3886_v38, inf  ;;  %v3769_v38 = vcvt.f32.s32 %v7916_v16 }
 0xa6d   :  { %3892 = vmin.xlane.f32.xlu2 %v3891_v29 }
 0xa6e   :  { %v3697_v56 = vpop.xlane.xlu0 %3696 }
 0xa6f   :  { %v3698_v21 = vcvt.f32.s32 %v3697_v56  ;;  %v3840_v56 = vshll.u32 %v3839_v35, 16 }
 0xa71   :  { %v3701_v45 = vadd.s32 %v3700_v36, %v3698_v21  ;;  %v3770_v21 = vshll.u32 %v3769_v38, 16 }
 0xa73   :  { %v3912_v28 = vcvt.s32.f32 %v3701_v45 }
 0xa75   :  { %3929 = vst.msk [vmem:[%s8887_s24] sm:$0xff] %vm3928_vm3, %v3912_v28  ;;  %v3910_v28 = vshll.u32 %v3909_v37, 16 }
 0xa76   :  { %v3711_v39 = vpop.xlane.xlu1 %3710 }
 0xa77   :  { %v3712_v48 = vcvt.f32.s32 %v3711_v39 }
 0xa79   :  { %v3715_v20 = vadd.s32 %v3714_v24, %v3712_v48  ;;  %v3881_v24 = vcvt.f32.s32 %v7926_v61 }
 0xa7b   :  { %v3913_v11 = vcvt.s32.f32 %v3715_v20 }
 0xa7d   :  { %3930 = vst.msk [vmem:[%s8887_s24 + $0x8] sm:$0xff] %vm3928_vm3, %v3913_v11  ;;  %v3811_v11 = vcvt.f32.s32 %v7930_v42 }
 0xa80   :  { %v3725_v58 = vpop.xlane.xlu2 %3724 }
 0xa81   :  { %v3726_v59 = vcvt.f32.s32 %v3725_v58 }
 0xa83   :  { %v3729_v1 = vadd.s32 %v3728_v30, %v3726_v59  ;;  %v3882_v59 = vshll.u32 %v3881_v24, 16 }
 0xa85   :  { %v3914_v26 = vcvt.s32.f32 %v3729_v1  ;;  %v3812_v1 = vshll.u32 %v3811_v11, 16 }
 0xa87   :  { %3931 = vst.msk [vmem:[%s8887_s24 + $0x10] sm:$0xff] %vm3928_vm3, %v3914_v26 }
 0xaa6   :  { %v3865_v52 = vpop.xlane.xlu0 %3864 }
 0xaa7   :  { %v3866_v18 = vcvt.f32.s32 %v3865_v52 }
 0xaa9   :  { %v3869_v25 = vadd.s32 %v3868_v47, %v3866_v18  ;;  %v3853_v18 = vcvt.f32.s32 %v7935_v60 }
 0xaab   :  { %v3924_v32 = vcvt.s32.f32 %v3869_v25 }
 0xaad   :  { %3941 = vst.msk [vmem:[%s8887_s24 + $0x60] sm:$0xff] %vm3928_vm3, %v3924_v32  ;;  %v3854_v32 = vshll.u32 %v3853_v18, 16 }
 0xaae   :  { %v3739_v0 = vpop.xlane.xlu0 %3738 }
 0xaaf   :  { %v3740_v63 = vcvt.f32.s32 %v3739_v0 }
 0xab1   :  { %v3743_v23 = vadd.s32 %v3742_v5, %v3740_v63  ;;  %v3895_v63 = vcvt.f32.s32 %v7940_v6 }
 0xab3   :  { %v3915_v50 = vcvt.s32.f32 %v3743_v23  ;;  %v3896_v53 = vshll.u32 %v3895_v63, 16 }
 0xab5   :  { %3932 = vst.msk [vmem:[%s8887_s24 + $0x18] sm:$0xff] %vm3928_vm3, %v3915_v50 }
 0xab6   :  { %v3781_v34 = vpop.xlane.xlu0 %3780  ;;  %v3753_v54 = vpop.xlane.xlu1 %3752 }
 0xab7   :  { %v3782_v57 = vcvt.f32.s32 %v3781_v34  ;;  %v3754_v13 = vcvt.f32.s32 %v3753_v54 }
 0xab9   :  { %v3785_v15 = vadd.s32 %v3784_v7, %v3782_v57  ;;  %v3757_v31 = vadd.s32 %v3756_v22, %v3754_v13 }
 0xabb   :  { %v3918_v12 = vcvt.s32.f32 %v3785_v15  ;;  %v3916_v49 = vcvt.s32.f32 %v3757_v31 }
 0xabd   :  { %3935 = vst.msk [vmem:[%s8887_s24 + $0x30] sm:$0xff] %vm3928_vm3, %v3918_v12 }
 0xabe   :  { %3933 = vst.msk [vmem:[%s8887_s24 + $0x20] sm:$0xff] %vm3928_vm3, %v3916_v49  ;;  %v3823_v41 = vpop.xlane.xlu0 %3822  ;;  %v3795_v10 = vpop.xlane.xlu1 %3794 }
 0xabf   :  { %v3824_v40 = vcvt.f32.s32 %v3823_v41  ;;  %v3796_v43 = vcvt.f32.s32 %v3795_v10 }
 0xac1   :  { %v3827_v4 = vadd.s32 %v3826_v27, %v3824_v40  ;;  %v3799_v14 = vadd.s32 %v3798_v8, %v3796_v43 }
 0xac3   :  { %v3921_v9 = vcvt.s32.f32 %v3827_v4  ;;  %v3919_v3 = vcvt.s32.f32 %v3799_v14 }
 0xac5   :  { %3938 = vst.msk [vmem:[%s8887_s24 + $0x48] sm:$0xff] %vm3928_vm3, %v3921_v9 }
 0xac6   :  { %3936 = vst.msk [vmem:[%s8887_s24 + $0x38] sm:$0xff] %vm3928_vm3, %v3919_v3  ;;  %v3837_v29 = vpop.xlane.xlu1 %3836 }
 0xac7   :  { %v3838_v36 = vcvt.f32.s32 %v3837_v29 }
 0xac8   :  { %v3767_v55 = vpop.xlane.xlu2 %3766  ;;  %v3907_v16 = vpop.xlane.xlu0 %3906 }
 0xac9   :  { %v3841_v45 = vadd.s32 %v3840_v56, %v3838_v36  ;;  %v3768_v44 = vcvt.f32.s32 %v3767_v55  ;;  %v3908_v39 = vcvt.f32.s32 %v3907_v16 }
 0xacb   :  { %v3922_v48 = vcvt.s32.f32 %v3841_v45  ;;  %v3771_v20 = vadd.s32 %v3770_v21, %v3768_v44  ;;  %v3911_v19 = vadd.s32 %v3910_v28, %v3908_v39 }
 0xacd   :  { %3939 = vst.msk [vmem:[%s8887_s24 + $0x50] sm:$0xff] %vm3928_vm3, %v3922_v48  ;;  %v3917_v33 = vcvt.s32.f32 %v3771_v20  ;;  %v3927_v58 = vcvt.s32.f32 %v3911_v19 }
 0xace   :  { %v3879_v30 = vpop.xlane.xlu1 %3878 }
 0xacf   :  { %3934 = vst.msk [vmem:[%s8887_s24 + $0x28] sm:$0xff] %vm3928_vm3, %v3917_v33  ;;  %v3880_v61 = vcvt.f32.s32 %v3879_v30 }
 0xad0   :  { %3944 = vst.msk [vmem:[%s8887_s24 + $0x78] sm:$0xff] %vm3928_vm3, %v3927_v58  ;;  %v3809_v42 = vpop.xlane.xlu2 %3808 }
 0xad1   :  { %v3883_v26 = vadd.s32 %v3882_v59, %v3880_v61  ;;  %v3810_v62 = vcvt.f32.s32 %v3809_v42 }
 0xad3   :  { %v3925_v52 = vcvt.s32.f32 %v3883_v26  ;;  %v3813_v47 = vadd.s32 %v3812_v1, %v3810_v62 }
 0xad5   :  { %3942 = vst.msk [vmem:[%s8887_s24 + $0x68] sm:$0xff] %vm3928_vm3, %v3925_v52  ;;  %v3920_v25 = vcvt.s32.f32 %v3813_v47 }
 0xad7   :  { %3937 = vst.msk [vmem:[%s8887_s24 + $0x40] sm:$0xff] %vm3928_vm3, %v3920_v25 }
 0xad8   :  { %v3851_v17 = vpop.xlane.xlu2 %3850 }
 0xad9   :  { %v3852_v0 = vcvt.f32.s32 %v3851_v17 }
 0xadb   :  { %v3855_v5 = vadd.s32 %v3854_v32, %v3852_v0 }
 0xadd   :  { %v3923_v23 = vcvt.s32.f32 %v3855_v5 }
 0xadf   :  { %3940 = vst.msk [vmem:[%s8887_s24 + $0x58] sm:$0xff] %vm3928_vm3, %v3923_v23 }
 0xae0   :  { %v3893_v60 = vpop.xlane.xlu2 %3892 }
 0xae1   :  { %v3894_v51 = vcvt.f32.s32 %v3893_v60 }
 0xae3   :  { %v3897_v50 = vadd.s32 %v3896_v53, %v3894_v51 }
 0xae5   :  { %v3926_v34 = vcvt.s32.f32 %v3897_v50 }
 0xae7   :  { %3943 = vst.msk [vmem:[%s8887_s24 + $0x70] sm:$0xff] %vm3928_vm3, %v3926_v34 }
 0xae8   :  { %3949 = vsyncpa [#allocation3], 1 }
 0xae9   :  { %3950 = vsyncpa [#allocation5], 1 }
 0xaea   :  { %3951 = vsyncpa [#allocation8], 1 }
 0xaeb   :  { %3952 = vsyncpa [#allocation11], 1 }

</bundles_post_ra>
